<compile_context>
chip_gen: v5e
topology: v5e:2x2
jax: 0.10.0
libtpu: 0.0.40
codegen_flags: <defaults>
</compile_context>

<pallas_src>
import functools

import jax
import jax.numpy as jnp
from jax.experimental import pallas as pl
from jax.experimental.pallas import tpu as pltpu

NEG_SLOPE = 0.2   # LeakyReLU slope
IN_EPS = 1e-5     # nn.InstanceNorm2d default eps (affine=False, no running stats)
SN_EPS = 1e-12    # spectral-norm l2-normalize eps


def _round_up(x, m):
    return (x + m - 1) // m * m


# ----------------------------- Pallas kernel --------------------------------

def _conv_in_lrelu_kernel(x_ref, w_ref, o_ref, *, tap_groups, m, win, wo, ho, post):
    """Fused conv (sum of tap-group matmuls) + optional InstanceNorm + LeakyReLU.

    x_ref: (Min_p, Cin_eff) bf16  flattened, zero-padded activation rows (one sample)
    w_ref: (G, Kg, TC)      bf16  per-tap-group weight slices (one Cout tile)
    o_ref: (M, TC)                "wide" output rows (Ho rows of Win_p columns each)
    """
    tc = o_ref.shape[-1]
    acc = jnp.zeros((m, tc), jnp.float32)
    for g, offs in enumerate(tap_groups):
        if len(offs) == 1:
            xt = x_ref[pl.ds(offs[0], m), :]                    # (M, Cin_eff) bf16
        else:
            # Paired taps: lane-concat two aligned slices -> K doubled (fills MXU depth).
            xt = jnp.concatenate([x_ref[pl.ds(o, m), :] for o in offs], axis=-1)
        acc = acc + jnp.dot(xt, w_ref[g], preferred_element_type=jnp.float32)

    if post == "in_lrelu":
        # Mask out the wrap-around / alignment-padding columns of each wide row and
        # compute per-channel instance stats over the Ho*Wo valid positions in ONE pass.
        col = jax.lax.broadcasted_iota(jnp.int32, (m, 1), 0) % win
        valid = col < wo
        inv_cnt = 1.0 / float(ho * wo)
        masked = jnp.where(valid, acc, 0.0)
        s1 = jnp.sum(masked, axis=0, keepdims=True)
        s2 = jnp.sum(masked * masked, axis=0, keepdims=True)
        mean = s1 * inv_cnt
        var = s2 * inv_cnt - mean * mean                        # biased var (PyTorch IN)
        y = (acc - mean) * jax.lax.rsqrt(var + IN_EPS)
        y = jnp.where(y >= 0.0, y, NEG_SLOPE * y)               # LeakyReLU(0.2)
    else:
        y = acc
    o_ref[...] = y.astype(o_ref.dtype)


# ------------------------------- JAX glue ------------------------------------

def _spectral_normalize(w_pt, u, n_iter=1):
    """PyTorch-style spectral norm: one power iteration on w.view(Cout, -1)."""
    cout = w_pt.shape[0]
    wm = w_pt.reshape(cout, -1)
    v = None
    for _ in range(n_iter):
        v = wm.T @ u
        v = v / (jnp.linalg.norm(v) + SN_EPS)
        u = wm @ v
        u = u / (jnp.linalg.norm(u) + SN_EPS)
    sigma = jnp.dot(u, wm @ v)
    return w_pt / sigma


def conv_block(xp, w_pt, u, *, stride, post):
    """4x4 conv (stride 1 or 2, zero-pad 1 already applied to `xp`, no bias,
    spectral-normalized weight) fused with optional InstanceNorm + LeakyReLU.

    xp: (N, H+2, W+2, Cin) NHWC, f32 or bf16.
    Returns (out_wide, Wo, Cout) where out_wide is (N, Ho, Win_p, Cout_p).
    """
    w_sn = _spectral_normalize(w_pt, u)                  # (Cout, Cin, 4, 4)
    wk = jnp.transpose(w_sn, (2, 3, 1, 0))               # (kh, kw, Cin, Cout)
    N, Hp, Wp, Cin = xp.shape
    Cout = w_pt.shape[0]

    if stride == 2:
        # space-to-depth: stride-2 4x4 conv == stride-1 2x2 conv on (Hp/2, Wp/2, 4*Cin)
        assert Hp % 2 == 0 and Wp % 2 == 0, "stride-2 path needs even padded extents"
        Hin, Win = Hp // 2, Wp // 2
        x_in = (xp.reshape(N, Hin, 2, Win, 2, Cin)
                  .transpose(0, 1, 3, 2, 4, 5)
                  .reshape(N, Hin, Win, 4 * Cin))
        wt = (wk.reshape(2, 2, 2, 2, Cin, Cout)
                .transpose(0, 2, 1, 3, 4, 5)
                .reshape(2, 2, 4 * Cin, Cout))
        kh = kw = 2
        Cin_eff = 4 * Cin
    else:
        Hin, Win = Hp, Wp
        x_in = xp
        wt = wk                                           # (4, 4, Cin, Cout)
        kh = kw = 4
        Cin_eff = Cin

    Ho, Wo = Hin - kh + 1, Win - kw + 1
    Win_p = _round_up(Win, 8)            # sublane-aligned wide rows (tap row offsets % 8 == 0)
    M = Ho * Win_p                       # wide output rows (Wo valid + padding/garbage cols)
    Min_p = _round_up(Hin * Win_p + (kw - 1), 8)   # extra zero rows so tap slices stay in-bounds

    # Flatten, pad, and cast the activation to bf16 ONCE (wrapper-side).
    x_in = jnp.pad(x_in, ((0, 0), (0, 0), (0, Win_p - Win), (0, 0)))
    xf = x_in.reshape(N, Hin * Win_p, Cin_eff)
    xf = jnp.pad(xf, ((0, 0), (0, Min_p - Hin * Win_p), (0, 0)))
    xf = xf.astype(jnp.bfloat16)

    # Pair adjacent kw taps when it raises the matmul K to the 256-deep MXU (conv3: 128->256).
    pair = (kw % 2 == 0) and (Cin_eff % 128 == 0) and (2 * Cin_eff <= 256)
    groups = []
    if pair:
        for a in range(kh):
            for j in range(kw // 2):
                off = a * Win_p + 2 * j
                wg = jnp.concatenate([wt[a, 2 * j], wt[a, 2 * j + 1]], axis=0)
                groups.append(((off, off + 1), wg))
    else:
        for a in range(kh):
            for b in range(kw):
                groups.append(((a * Win_p + b,), wt[a, b]))
    tap_groups = tuple(offs for offs, _ in groups)
    w_stack = jnp.stack([w for _, w in groups], axis=0)   # (G, Kg, Cout)

    # Lane handling: keep Cout as-is when >= 64 (writeback savings dominate); for the
    # tiny conv4 head (Cout=1) pad to 128 so stores are lane-dense (no masked vst).
    Cout_p = Cout if Cout >= 64 else 128
    if Cout_p != Cout:
        w_stack = jnp.pad(w_stack, ((0, 0), (0, 0), (0, Cout_p - Cout)))
    w_stack = w_stack.astype(jnp.bfloat16)
    G, Kg = w_stack.shape[0], w_stack.shape[1]

    # Channel tile: 256 fills the full MXU output width on v6e/v7x (and is still correct,
    # merely split into two passes, on v5e's 128-wide MXU).
    if Cout_p % 256 == 0:
        TC = 256
    elif Cout_p % 128 == 0:
        TC = 128
    else:
        TC = Cout_p
    nct = Cout_p // TC

    out_dtype = jnp.bfloat16 if post == "in_lrelu" else jnp.float32
    kernel = functools.partial(_conv_in_lrelu_kernel, tap_groups=tap_groups,
                               m=M, win=Win_p, wo=Wo, ho=Ho, post=post)

    out = pl.pallas_call(
        kernel,
        out_shape=jax.ShapeDtypeStruct((N, M, Cout_p), out_dtype),
        grid=(N, nct),
        in_specs=[pl.BlockSpec((None, Min_p, Cin_eff), lambda n, c: (n, 0, 0)),
                  pl.BlockSpec((G, Kg, TC), lambda n, c: (0, 0, c))],
        out_specs=pl.BlockSpec((None, M, TC), lambda n, c: (n, 0, c)),
        compiler_params=pltpu.CompilerParams(
            dimension_semantics=("parallel", "parallel"),
            vmem_limit_bytes=64 * 1024 * 1024),
    )(xf, w_stack)

    out_wide = out.reshape(N, Ho, Win_p, Cout_p)
    return out_wide, Wo, Cout


def _crop(out_wide, wo, cout):
    """Drop alignment/garbage columns and padded channels; return f32 feature map."""
    return out_wide[:, :, :wo, :cout].astype(jnp.float32)


def _pad_next(out_wide, wo, cout):
    """Valid region of a wide output, zero-padded by 1 for the next conv (stays bf16)."""
    x = out_wide[:, :, :wo, :cout]
    return jnp.pad(x, ((0, 0), (1, 1), (1, 1), (0, 0)))


# ------------------------------ parameters -----------------------------------

def init_params(key, in_channels=3):
    """Conv weights in PyTorch layout (Cout, Cin, 4, 4), N(0, 0.02) init (init_weights
    'normal'), plus a fixed power-iteration vector u per layer for spectral norm."""
    keys = jax.random.split(key, 8)

    def conv_w(k, cout, cin):
        return 0.02 * jax.random.normal(k, (cout, cin, 4, 4), jnp.float32)

    def u_vec(k, cout):
        u = jax.random.normal(k, (cout,), jnp.float32)
        return u / (jnp.linalg.norm(u) + SN_EPS)

    return {
        'conv1': {'w': conv_w(keys[0], 64, in_channels), 'u': u_vec(keys[1], 64)},
        'conv2': {'w': conv_w(keys[2], 128, 64),         'u': u_vec(keys[3], 128)},
        'conv3': {'w': conv_w(keys[4], 256, 128),        'u': u_vec(keys[5], 256)},
        'conv4': {'w': conv_w(keys[6], 1, 256),          'u': u_vec(keys[7], 1)},
    }


# ------------------------------- forward -------------------------------------

def local_discriminator_forward(params, x_nchw, use_sigmoid=True):
    """Mirror of LocalDiscriminator.forward(x).  Input NCHW; returns
    (scalar mean score, [conv1, conv2, conv3, conv4] feature maps in NCHW)."""
    x = jnp.transpose(x_nchw, (0, 2, 3, 1)).astype(jnp.float32)   # NHWC
    xp = jnp.pad(x, ((0, 0), (1, 1), (1, 1), (0, 0)))

    o1, wo1, co1 = conv_block(xp, params['conv1']['w'], params['conv1']['u'],
                              stride=2, post='in_lrelu')
    o2, wo2, co2 = conv_block(_pad_next(o1, wo1, co1), params['conv2']['w'],
                              params['conv2']['u'], stride=2, post='in_lrelu')
    o3, wo3, co3 = conv_block(_pad_next(o2, wo2, co2), params['conv3']['w'],
                              params['conv3']['u'], stride=1, post='in_lrelu')
    o4, wo4, co4 = conv_block(_pad_next(o3, wo3, co3), params['conv4']['w'],
                              params['conv4']['u'], stride=1, post='none')

    c1 = _crop(o1, wo1, co1)
    c2 = _crop(o2, wo2, co2)
    c3 = _crop(o3, wo3, co3)
    c4 = _crop(o4, wo4, co4)

    out = jax.nn.sigmoid(c4) if use_sigmoid else c4   # tiny (N,2,2,1) tensor: XLA glue
    score = jnp.mean(out)

    feats = [jnp.transpose(f, (0, 3, 1, 2)) for f in (c1, c2, c3, c4)]
    return score, feats


# --------------------------------- main ---------------------------------------

if __name__ == "__main__":
    key = jax.random.PRNGKey(0)
    kp, kx = jax.random.split(key)

    N, C_IN, H, W = 2, 3, 16, 16
    params = init_params(kp, in_channels=C_IN)
    x = jax.random.uniform(kx, (N, C_IN, H, W), jnp.float32) * 2.0 - 1.0

    fwd = jax.jit(local_discriminator_forward)
    score, feats = jax.block_until_ready(fwd(params, x))

    assert score.shape == (), score.shape
    assert feats[0].shape == (N, 64, H // 2, W // 2), feats[0].shape
    assert feats[1].shape == (N, 128, H // 4, W // 4), feats[1].shape
    assert feats[2].shape == (N, 256, H // 4 - 1, W // 4 - 1), feats[2].shape
    assert feats[3].shape == (N, 1, H // 4 - 2, W // 4 - 2), feats[3].shape
    assert bool(jnp.isfinite(score))
    assert all(bool(jnp.all(jnp.isfinite(f))) for f in feats)
    print("KERNEL_OK")
</pallas_src>

<mosaic_0001>
module attributes {stable_mosaic.version = 11 : i64} {
  func.func @_conv_in_lrelu_kernel(%arg0: i32, %arg1: i32, %arg2: memref<1x152x12xbf16, #tpu.memory_space<vmem>>, %arg3: memref<4x12x64xbf16, #tpu.memory_space<vmem>>, %arg4: memref<1x128x64xbf16, #tpu.memory_space<vmem>>) attributes {dimension_semantics = [#tpu.dimension_semantics<parallel>, #tpu.dimension_semantics<parallel>], iteration_bounds = array<i64: 2, 1>, scalar_prefetch = 0 : i64, scratch_operands = 0 : i64, tpu.core_type = #tpu.core_type<tc>, window_params = [{transform_indices = @transform_0, window_bounds = array<i64: 1, 152, 12>}, {transform_indices = @transform_1, window_bounds = array<i64: 4, 12, 64>}, {transform_indices = @transform_2, window_bounds = array<i64: 1, 128, 64>}]} {
    %cst = arith.constant 0.000000e+00 : f32
    %0 = vector.broadcast %cst : f32 to vector<128x64xf32>
    %c0 = arith.constant 0 : index
    %c0_0 = arith.constant 0 : index
    %c0_1 = arith.constant 0 : index
    %1 = vector.load %arg2[%c0, %c0_0, %c0_1] : memref<1x152x12xbf16, #tpu.memory_space<vmem>>, vector<1x128x12xbf16>
    %2 = vector.shape_cast %1 : vector<1x128x12xbf16> to vector<128x12xbf16>
    %c0_2 = arith.constant 0 : index
    %c0_3 = arith.constant 0 : index
    %c0_4 = arith.constant 0 : index
    %3 = vector.load %arg3[%c0_2, %c0_3, %c0_4] : memref<4x12x64xbf16, #tpu.memory_space<vmem>>, vector<1x12x64xbf16>
    %4 = vector.shape_cast %3 : vector<1x12x64xbf16> to vector<12x64xbf16>
    %cst_5 = arith.constant dense<0.000000e+00> : vector<128x64xf32>
    %5 = tpu.matmul %2, %4, %cst_5 {dimension_numbers = #tpu.dot_dimension_numbers<[1], [0], [0], [1], [0, 0, 1, 1], [], []>} : vector<128x12xbf16>, vector<12x64xbf16>, vector<128x64xf32> -> vector<128x64xf32>
    %6 = arith.addf %0, %5 : vector<128x64xf32>
    %c0_6 = arith.constant 0 : index
    %c1 = arith.constant 1 : index
    %c0_7 = arith.constant 0 : index
    %7 = vector.load %arg2[%c0_6, %c1, %c0_7] : memref<1x152x12xbf16, #tpu.memory_space<vmem>>, vector<1x128x12xbf16>
    %8 = vector.shape_cast %7 : vector<1x128x12xbf16> to vector<128x12xbf16>
    %c1_8 = arith.constant 1 : index
    %c0_9 = arith.constant 0 : index
    %c0_10 = arith.constant 0 : index
    %9 = vector.load %arg3[%c1_8, %c0_9, %c0_10] : memref<4x12x64xbf16, #tpu.memory_space<vmem>>, vector<1x12x64xbf16>
    %10 = vector.shape_cast %9 : vector<1x12x64xbf16> to vector<12x64xbf16>
    %cst_11 = arith.constant dense<0.000000e+00> : vector<128x64xf32>
    %11 = tpu.matmul %8, %10, %cst_11 {dimension_numbers = #tpu.dot_dimension_numbers<[1], [0], [0], [1], [0, 0, 1, 1], [], []>} : vector<128x12xbf16>, vector<12x64xbf16>, vector<128x64xf32> -> vector<128x64xf32>
    %12 = arith.addf %6, %11 : vector<128x64xf32>
    %c0_12 = arith.constant 0 : index
    %c16 = arith.constant 16 : index
    %c0_13 = arith.constant 0 : index
    %13 = vector.load %arg2[%c0_12, %c16, %c0_13] : memref<1x152x12xbf16, #tpu.memory_space<vmem>>, vector<1x128x12xbf16>
    %14 = vector.shape_cast %13 : vector<1x128x12xbf16> to vector<128x12xbf16>
    %c2 = arith.constant 2 : index
    %c0_14 = arith.constant 0 : index
    %c0_15 = arith.constant 0 : index
    %15 = vector.load %arg3[%c2, %c0_14, %c0_15] : memref<4x12x64xbf16, #tpu.memory_space<vmem>>, vector<1x12x64xbf16>
    %16 = vector.shape_cast %15 : vector<1x12x64xbf16> to vector<12x64xbf16>
    %cst_16 = arith.constant dense<0.000000e+00> : vector<128x64xf32>
    %17 = tpu.matmul %14, %16, %cst_16 {dimension_numbers = #tpu.dot_dimension_numbers<[1], [0], [0], [1], [0, 0, 1, 1], [], []>} : vector<128x12xbf16>, vector<12x64xbf16>, vector<128x64xf32> -> vector<128x64xf32>
    %18 = arith.addf %12, %17 : vector<128x64xf32>
    %c0_17 = arith.constant 0 : index
    %c17 = arith.constant 17 : index
    %c0_18 = arith.constant 0 : index
    %19 = vector.load %arg2[%c0_17, %c17, %c0_18] : memref<1x152x12xbf16, #tpu.memory_space<vmem>>, vector<1x128x12xbf16>
    %20 = vector.shape_cast %19 : vector<1x128x12xbf16> to vector<128x12xbf16>
    %c3 = arith.constant 3 : index
    %c0_19 = arith.constant 0 : index
    %c0_20 = arith.constant 0 : index
    %21 = vector.load %arg3[%c3, %c0_19, %c0_20] : memref<4x12x64xbf16, #tpu.memory_space<vmem>>, vector<1x12x64xbf16>
    %22 = vector.shape_cast %21 : vector<1x12x64xbf16> to vector<12x64xbf16>
    %cst_21 = arith.constant dense<0.000000e+00> : vector<128x64xf32>
    %23 = tpu.matmul %20, %22, %cst_21 {dimension_numbers = #tpu.dot_dimension_numbers<[1], [0], [0], [1], [0, 0, 1, 1], [], []>} : vector<128x12xbf16>, vector<12x64xbf16>, vector<128x64xf32> -> vector<128x64xf32>
    %24 = arith.addf %18, %23 : vector<128x64xf32>
    %25 = tpu.iota {dimensions = array<i32: 0>} : vector<128x1xi32>
    %c16_i32 = arith.constant 16 : i32
    %c0_i32 = arith.constant 0 : i32
    %26 = arith.cmpi eq, %c16_i32, %c0_i32 : i32
    %c1_i32 = arith.constant 1 : i32
    %27 = arith.select %26, %c1_i32, %c16_i32 : i32
    %28 = vector.broadcast %27 : i32 to vector<128x1xi32>
    %29 = arith.remsi %25, %28 : vector<128x1xi32>
    %c0_i32_22 = arith.constant 0 : i32
    %30 = vector.broadcast %c0_i32_22 : i32 to vector<128x1xi32>
    %31 = arith.cmpi ne, %29, %30 : vector<128x1xi32>
    %c0_i32_23 = arith.constant 0 : i32
    %32 = vector.broadcast %c0_i32_23 : i32 to vector<128x1xi32>
    %33 = arith.cmpi slt, %29, %32 : vector<128x1xi32>
    %c0_i32_24 = arith.constant 0 : i32
    %34 = arith.cmpi slt, %27, %c0_i32_24 : i32
    %35 = vector.broadcast %34 : i1 to vector<128x1xi1>
    %36 = vector.broadcast %35 : vector<128x1xi1> to vector<128x1xi1>
    %37 = arith.xori %33, %36 : vector<128x1xi1>
    %38 = arith.andi %37, %31 : vector<128x1xi1>
    %39 = vector.broadcast %27 : i32 to vector<128x1xi32>
    %40 = arith.addi %29, %39 : vector<128x1xi32>
    %41 = arith.select %38, %40, %29 : vector<128x1xi1>, vector<128x1xi32>
    %c8_i32 = arith.constant 8 : i32
    %42 = vector.broadcast %c8_i32 : i32 to vector<128x1xi32>
    %43 = arith.cmpi slt, %41, %42 : vector<128x1xi32>
    %cst_25 = arith.constant 0.000000e+00 : f32
    %44 = vector.shape_cast %43 : vector<128x1xi1> to vector<128x1xi1>
    %45 = vector.broadcast %44 : vector<128x1xi1> to vector<128x64xi1>
    %46 = vector.broadcast %cst_25 : f32 to vector<128x64xf32>
    %47 = arith.select %45, %24, %46 : vector<128x64xi1>, vector<128x64xf32>
    %cst_26 = arith.constant dense<0.000000e+00> : vector<64xf32>
    %48 = vector.multi_reduction <add>, %47, %cst_26 [0] : vector<128x64xf32> to vector<64xf32>
    %49 = vector.shape_cast %48 : vector<64xf32> to vector<1x64xf32>
    %50 = arith.mulf %47, %47 : vector<128x64xf32>
    %cst_27 = arith.constant dense<0.000000e+00> : vector<64xf32>
    %51 = vector.multi_reduction <add>, %50, %cst_27 [0] : vector<128x64xf32> to vector<64xf32>
    %52 = vector.shape_cast %51 : vector<64xf32> to vector<1x64xf32>
    %cst_28 = arith.constant 1.562500e-02 : f32
    %53 = vector.broadcast %cst_28 : f32 to vector<1x64xf32>
    %54 = arith.mulf %49, %53 : vector<1x64xf32>
    %cst_29 = arith.constant 1.562500e-02 : f32
    %55 = vector.broadcast %cst_29 : f32 to vector<1x64xf32>
    %56 = arith.mulf %52, %55 : vector<1x64xf32>
    %57 = arith.mulf %54, %54 : vector<1x64xf32>
    %58 = arith.subf %56, %57 : vector<1x64xf32>
    %59 = vector.broadcast %54 : vector<1x64xf32> to vector<128x64xf32>
    %60 = arith.subf %24, %59 : vector<128x64xf32>
    %cst_30 = arith.constant 9.99999974E-6 : f32
    %61 = vector.broadcast %cst_30 : f32 to vector<1x64xf32>
    %62 = arith.addf %58, %61 : vector<1x64xf32>
    %63 = math.rsqrt %62 : vector<1x64xf32>
    %64 = vector.broadcast %63 : vector<1x64xf32> to vector<128x64xf32>
    %65 = arith.mulf %60, %64 : vector<128x64xf32>
    %cst_31 = arith.constant 0.000000e+00 : f32
    %66 = vector.broadcast %cst_31 : f32 to vector<128x64xf32>
    %67 = arith.cmpf oge, %65, %66 : vector<128x64xf32>
    %cst_32 = arith.constant 2.000000e-01 : f32
    %68 = vector.broadcast %cst_32 : f32 to vector<128x64xf32>
    %69 = arith.mulf %68, %65 : vector<128x64xf32>
    %70 = arith.select %67, %65, %69 : vector<128x64xi1>, vector<128x64xf32>
    %71 = arith.truncf %70 : vector<128x64xf32> to vector<128x64xbf16>
    %c0_33 = arith.constant 0 : index
    %c0_34 = arith.constant 0 : index
    %c0_35 = arith.constant 0 : index
    %72 = vector.load %arg4[%c0_33, %c0_34, %c0_35] : memref<1x128x64xbf16, #tpu.memory_space<vmem>>, vector<1x128x64xbf16>
    %73 = vector.shape_cast %72 : vector<1x128x64xbf16> to vector<128x64xbf16>
    %74 = vector.shape_cast %71 : vector<128x64xbf16> to vector<1x128x64xbf16>
    tpu.vector_store %arg4[%c0_33, %c0_34, %c0_35], %74 {strides = array<i32>} : memref<1x128x64xbf16, #tpu.memory_space<vmem>>, vector<1x128x64xbf16>,
    return
  }
  func.func @transform_0(%arg0: i32, %arg1: i32) -> (i32, i32, i32) {
    %c0_i32 = arith.constant 0 : i32
    %c0_i32_0 = arith.constant 0 : i32
    %c0_i32_1 = arith.constant 0 : i32
    return %arg0, %c0_i32, %c0_i32_0 : i32, i32, i32
  }
  func.func @transform_1(%arg0: i32, %arg1: i32) -> (i32, i32, i32) {
    %c0_i32 = arith.constant 0 : i32
    %c0_i32_0 = arith.constant 0 : i32
    %c0_i32_1 = arith.constant 0 : i32
    return %c0_i32, %c0_i32_0, %arg1 : i32, i32, i32
  }
  func.func @transform_2(%arg0: i32, %arg1: i32) -> (i32, i32, i32) {
    %c0_i32 = arith.constant 0 : i32
    %c0_i32_0 = arith.constant 0 : i32
    return %arg0, %c0_i32, %arg1 : i32, i32, i32
  }
}

module attributes {stable_mosaic.version = 11 : i64} {
  func.func @_conv_in_lrelu_kernel(%arg0: i32, %arg1: i32, %arg2: memref<1x48x256xbf16, #tpu.memory_space<vmem>>, %arg3: memref<4x256x128xbf16, #tpu.memory_space<vmem>>, %arg4: memref<1x32x128xbf16, #tpu.memory_space<vmem>>) attributes {dimension_semantics = [#tpu.dimension_semantics<parallel>, #tpu.dimension_semantics<parallel>], iteration_bounds = array<i64: 2, 1>, scalar_prefetch = 0 : i64, scratch_operands = 0 : i64, tpu.core_type = #tpu.core_type<tc>, window_params = [{transform_indices = @transform_0, window_bounds = array<i64: 1, 48, 256>}, {transform_indices = @transform_1, window_bounds = array<i64: 4, 256, 128>}, {transform_indices = @transform_2, window_bounds = array<i64: 1, 32, 128>}]} {
    %cst = arith.constant 0.000000e+00 : f32
    %0 = vector.broadcast %cst : f32 to vector<32x128xf32>
    %c0 = arith.constant 0 : index
    %c0_0 = arith.constant 0 : index
    %c0_1 = arith.constant 0 : index
    %1 = vector.load %arg2[%c0, %c0_0, %c0_1] : memref<1x48x256xbf16, #tpu.memory_space<vmem>>, vector<1x32x256xbf16>
    %2 = vector.shape_cast %1 : vector<1x32x256xbf16> to vector<32x256xbf16>
    %c0_2 = arith.constant 0 : index
    %c0_3 = arith.constant 0 : index
    %c0_4 = arith.constant 0 : index
    %3 = vector.load %arg3[%c0_2, %c0_3, %c0_4] : memref<4x256x128xbf16, #tpu.memory_space<vmem>>, vector<1x256x128xbf16>
    %4 = vector.shape_cast %3 : vector<1x256x128xbf16> to vector<256x128xbf16>
    %cst_5 = arith.constant dense<0.000000e+00> : vector<32x128xf32>
    %5 = tpu.matmul %2, %4, %cst_5 {dimension_numbers = #tpu.dot_dimension_numbers<[1], [0], [0], [1], [0, 0, 1, 1], [], []>} : vector<32x256xbf16>, vector<256x128xbf16>, vector<32x128xf32> -> vector<32x128xf32>
    %6 = arith.addf %0, %5 : vector<32x128xf32>
    %c0_6 = arith.constant 0 : index
    %c1 = arith.constant 1 : index
    %c0_7 = arith.constant 0 : index
    %7 = vector.load %arg2[%c0_6, %c1, %c0_7] : memref<1x48x256xbf16, #tpu.memory_space<vmem>>, vector<1x32x256xbf16>
    %8 = vector.shape_cast %7 : vector<1x32x256xbf16> to vector<32x256xbf16>
    %c1_8 = arith.constant 1 : index
    %c0_9 = arith.constant 0 : index
    %c0_10 = arith.constant 0 : index
    %9 = vector.load %arg3[%c1_8, %c0_9, %c0_10] : memref<4x256x128xbf16, #tpu.memory_space<vmem>>, vector<1x256x128xbf16>
    %10 = vector.shape_cast %9 : vector<1x256x128xbf16> to vector<256x128xbf16>
    %cst_11 = arith.constant dense<0.000000e+00> : vector<32x128xf32>
    %11 = tpu.matmul %8, %10, %cst_11 {dimension_numbers = #tpu.dot_dimension_numbers<[1], [0], [0], [1], [0, 0, 1, 1], [], []>} : vector<32x256xbf16>, vector<256x128xbf16>, vector<32x128xf32> -> vector<32x128xf32>
    %12 = arith.addf %6, %11 : vector<32x128xf32>
    %c0_12 = arith.constant 0 : index
    %c8 = arith.constant 8 : index
    %c0_13 = arith.constant 0 : index
    %13 = vector.load %arg2[%c0_12, %c8, %c0_13] : memref<1x48x256xbf16, #tpu.memory_space<vmem>>, vector<1x32x256xbf16>
    %14 = vector.shape_cast %13 : vector<1x32x256xbf16> to vector<32x256xbf16>
    %c2 = arith.constant 2 : index
    %c0_14 = arith.constant 0 : index
    %c0_15 = arith.constant 0 : index
    %15 = vector.load %arg3[%c2, %c0_14, %c0_15] : memref<4x256x128xbf16, #tpu.memory_space<vmem>>, vector<1x256x128xbf16>
    %16 = vector.shape_cast %15 : vector<1x256x128xbf16> to vector<256x128xbf16>
    %cst_16 = arith.constant dense<0.000000e+00> : vector<32x128xf32>
    %17 = tpu.matmul %14, %16, %cst_16 {dimension_numbers = #tpu.dot_dimension_numbers<[1], [0], [0], [1], [0, 0, 1, 1], [], []>} : vector<32x256xbf16>, vector<256x128xbf16>, vector<32x128xf32> -> vector<32x128xf32>
    %18 = arith.addf %12, %17 : vector<32x128xf32>
    %c0_17 = arith.constant 0 : index
    %c9 = arith.constant 9 : index
    %c0_18 = arith.constant 0 : index
    %19 = vector.load %arg2[%c0_17, %c9, %c0_18] : memref<1x48x256xbf16, #tpu.memory_space<vmem>>, vector<1x32x256xbf16>
    %20 = vector.shape_cast %19 : vector<1x32x256xbf16> to vector<32x256xbf16>
    %c3 = arith.constant 3 : index
    %c0_19 = arith.constant 0 : index
    %c0_20 = arith.constant 0 : index
    %21 = vector.load %arg3[%c3, %c0_19, %c0_20] : memref<4x256x128xbf16, #tpu.memory_space<vmem>>, vector<1x256x128xbf16>
    %22 = vector.shape_cast %21 : vector<1x256x128xbf16> to vector<256x128xbf16>
    %cst_21 = arith.constant dense<0.000000e+00> : vector<32x128xf32>
    %23 = tpu.matmul %20, %22, %cst_21 {dimension_numbers = #tpu.dot_dimension_numbers<[1], [0], [0], [1], [0, 0, 1, 1], [], []>} : vector<32x256xbf16>, vector<256x128xbf16>, vector<32x128xf32> -> vector<32x128xf32>
    %24 = arith.addf %18, %23 : vector<32x128xf32>
    %25 = tpu.iota {dimensions = array<i32: 0>} : vector<32x1xi32>
    %c8_i32 = arith.constant 8 : i32
    %c0_i32 = arith.constant 0 : i32
    %26 = arith.cmpi eq, %c8_i32, %c0_i32 : i32
    %c1_i32 = arith.constant 1 : i32
    %27 = arith.select %26, %c1_i32, %c8_i32 : i32
    %28 = vector.broadcast %27 : i32 to vector<32x1xi32>
    %29 = arith.remsi %25, %28 : vector<32x1xi32>
    %c0_i32_22 = arith.constant 0 : i32
    %30 = vector.broadcast %c0_i32_22 : i32 to vector<32x1xi32>
    %31 = arith.cmpi ne, %29, %30 : vector<32x1xi32>
    %c0_i32_23 = arith.constant 0 : i32
    %32 = vector.broadcast %c0_i32_23 : i32 to vector<32x1xi32>
    %33 = arith.cmpi slt, %29, %32 : vector<32x1xi32>
    %c0_i32_24 = arith.constant 0 : i32
    %34 = arith.cmpi slt, %27, %c0_i32_24 : i32
    %35 = vector.broadcast %34 : i1 to vector<32x1xi1>
    %36 = vector.broadcast %35 : vector<32x1xi1> to vector<32x1xi1>
    %37 = arith.xori %33, %36 : vector<32x1xi1>
    %38 = arith.andi %37, %31 : vector<32x1xi1>
    %39 = vector.broadcast %27 : i32 to vector<32x1xi32>
    %40 = arith.addi %29, %39 : vector<32x1xi32>
    %41 = arith.select %38, %40, %29 : vector<32x1xi1>, vector<32x1xi32>
    %c4_i32 = arith.constant 4 : i32
    %42 = vector.broadcast %c4_i32 : i32 to vector<32x1xi32>
    %43 = arith.cmpi slt, %41, %42 : vector<32x1xi32>
    %cst_25 = arith.constant 0.000000e+00 : f32
    %44 = vector.shape_cast %43 : vector<32x1xi1> to vector<32x1xi1>
    %45 = vector.broadcast %44 : vector<32x1xi1> to vector<32x128xi1>
    %46 = vector.broadcast %cst_25 : f32 to vector<32x128xf32>
    %47 = arith.select %45, %24, %46 : vector<32x128xi1>, vector<32x128xf32>
    %cst_26 = arith.constant dense<0.000000e+00> : vector<128xf32>
    %48 = vector.multi_reduction <add>, %47, %cst_26 [0] : vector<32x128xf32> to vector<128xf32>
    %49 = vector.shape_cast %48 : vector<128xf32> to vector<1x128xf32>
    %50 = arith.mulf %47, %47 : vector<32x128xf32>
    %cst_27 = arith.constant dense<0.000000e+00> : vector<128xf32>
    %51 = vector.multi_reduction <add>, %50, %cst_27 [0] : vector<32x128xf32> to vector<128xf32>
    %52 = vector.shape_cast %51 : vector<128xf32> to vector<1x128xf32>
    %cst_28 = arith.constant 6.250000e-02 : f32
    %53 = vector.broadcast %cst_28 : f32 to vector<1x128xf32>
    %54 = arith.mulf %49, %53 : vector<1x128xf32>
    %cst_29 = arith.constant 6.250000e-02 : f32
    %55 = vector.broadcast %cst_29 : f32 to vector<1x128xf32>
    %56 = arith.mulf %52, %55 : vector<1x128xf32>
    %57 = arith.mulf %54, %54 : vector<1x128xf32>
    %58 = arith.subf %56, %57 : vector<1x128xf32>
    %59 = vector.broadcast %54 : vector<1x128xf32> to vector<32x128xf32>
    %60 = arith.subf %24, %59 : vector<32x128xf32>
    %cst_30 = arith.constant 9.99999974E-6 : f32
    %61 = vector.broadcast %cst_30 : f32 to vector<1x128xf32>
    %62 = arith.addf %58, %61 : vector<1x128xf32>
    %63 = math.rsqrt %62 : vector<1x128xf32>
    %64 = vector.broadcast %63 : vector<1x128xf32> to vector<32x128xf32>
    %65 = arith.mulf %60, %64 : vector<32x128xf32>
    %cst_31 = arith.constant 0.000000e+00 : f32
    %66 = vector.broadcast %cst_31 : f32 to vector<32x128xf32>
    %67 = arith.cmpf oge, %65, %66 : vector<32x128xf32>
    %cst_32 = arith.constant 2.000000e-01 : f32
    %68 = vector.broadcast %cst_32 : f32 to vector<32x128xf32>
    %69 = arith.mulf %68, %65 : vector<32x128xf32>
    %70 = arith.select %67, %65, %69 : vector<32x128xi1>, vector<32x128xf32>
    %71 = arith.truncf %70 : vector<32x128xf32> to vector<32x128xbf16>
    %c0_33 = arith.constant 0 : index
    %c0_34 = arith.constant 0 : index
    %c0_35 = arith.constant 0 : index
    %72 = vector.load %arg4[%c0_33, %c0_34, %c0_35] : memref<1x32x128xbf16, #tpu.memory_space<vmem>>, vector<1x32x128xbf16>
    %73 = vector.shape_cast %72 : vector<1x32x128xbf16> to vector<32x128xbf16>
    %74 = vector.shape_cast %71 : vector<32x128xbf16> to vector<1x32x128xbf16>
    tpu.vector_store %arg4[%c0_33, %c0_34, %c0_35], %74 {strides = array<i32>} : memref<1x32x128xbf16, #tpu.memory_space<vmem>>, vector<1x32x128xbf16>,
    return
  }
  func.func @transform_0(%arg0: i32, %arg1: i32) -> (i32, i32, i32) {
    %c0_i32 = arith.constant 0 : i32
    %c0_i32_0 = arith.constant 0 : i32
    %c0_i32_1 = arith.constant 0 : i32
    return %arg0, %c0_i32, %c0_i32_0 : i32, i32, i32
  }
  func.func @transform_1(%arg0: i32, %arg1: i32) -> (i32, i32, i32) {
    %c0_i32 = arith.constant 0 : i32
    %c0_i32_0 = arith.constant 0 : i32
    %c0_i32_1 = arith.constant 0 : i32
    return %c0_i32, %c0_i32_0, %arg1 : i32, i32, i32
  }
  func.func @transform_2(%arg0: i32, %arg1: i32) -> (i32, i32, i32) {
    %c0_i32 = arith.constant 0 : i32
    %c0_i32_0 = arith.constant 0 : i32
    return %arg0, %c0_i32, %arg1 : i32, i32, i32
  }
}

module attributes {stable_mosaic.version = 11 : i64} {
  func.func @_conv_in_lrelu_kernel(%arg0: i32, %arg1: i32, %arg2: memref<1x56x128xbf16, #tpu.memory_space<vmem>>, %arg3: memref<8x256x256xbf16, #tpu.memory_space<vmem>>, %arg4: memref<1x24x256xbf16, #tpu.memory_space<vmem>>) attributes {dimension_semantics = [#tpu.dimension_semantics<parallel>, #tpu.dimension_semantics<parallel>], iteration_bounds = array<i64: 2, 1>, scalar_prefetch = 0 : i64, scratch_operands = 0 : i64, tpu.core_type = #tpu.core_type<tc>, window_params = [{transform_indices = @transform_0, window_bounds = array<i64: 1, 56, 128>}, {transform_indices = @transform_1, window_bounds = array<i64: 8, 256, 256>}, {transform_indices = @transform_2, window_bounds = array<i64: 1, 24, 256>}]} {
    %cst = arith.constant 0.000000e+00 : f32
    %0 = vector.broadcast %cst : f32 to vector<24x256xf32>
    %c0 = arith.constant 0 : index
    %c0_0 = arith.constant 0 : index
    %c0_1 = arith.constant 0 : index
    %1 = vector.load %arg2[%c0, %c0_0, %c0_1] : memref<1x56x128xbf16, #tpu.memory_space<vmem>>, vector<1x24x128xbf16>
    %2 = vector.shape_cast %1 : vector<1x24x128xbf16> to vector<24x128xbf16>
    %c0_2 = arith.constant 0 : index
    %c1 = arith.constant 1 : index
    %c0_3 = arith.constant 0 : index
    %3 = vector.load %arg2[%c0_2, %c1, %c0_3] : memref<1x56x128xbf16, #tpu.memory_space<vmem>>, vector<1x24x128xbf16>
    %4 = vector.shape_cast %3 : vector<1x24x128xbf16> to vector<24x128xbf16>
    %5 = tpu.concatenate %2, %4 in 1 : vector<24x128xbf16>, vector<24x128xbf16> -> vector<24x256xbf16>
    %c0_4 = arith.constant 0 : index
    %c0_5 = arith.constant 0 : index
    %c0_6 = arith.constant 0 : index
    %6 = vector.load %arg3[%c0_4, %c0_5, %c0_6] : memref<8x256x256xbf16, #tpu.memory_space<vmem>>, vector<1x256x256xbf16>
    %7 = vector.shape_cast %6 : vector<1x256x256xbf16> to vector<256x256xbf16>
    %cst_7 = arith.constant dense<0.000000e+00> : vector<24x256xf32>
    %8 = tpu.matmul %5, %7, %cst_7 {dimension_numbers = #tpu.dot_dimension_numbers<[1], [0], [0], [1], [0, 0, 1, 1], [], []>} : vector<24x256xbf16>, vector<256x256xbf16>, vector<24x256xf32> -> vector<24x256xf32>
    %9 = arith.addf %0, %8 : vector<24x256xf32>
    %c0_8 = arith.constant 0 : index
    %c2 = arith.constant 2 : index
    %c0_9 = arith.constant 0 : index
    %10 = vector.load %arg2[%c0_8, %c2, %c0_9] : memref<1x56x128xbf16, #tpu.memory_space<vmem>>, vector<1x24x128xbf16>
    %11 = vector.shape_cast %10 : vector<1x24x128xbf16> to vector<24x128xbf16>
    %c0_10 = arith.constant 0 : index
    %c3 = arith.constant 3 : index
    %c0_11 = arith.constant 0 : index
    %12 = vector.load %arg2[%c0_10, %c3, %c0_11] : memref<1x56x128xbf16, #tpu.memory_space<vmem>>, vector<1x24x128xbf16>
    %13 = vector.shape_cast %12 : vector<1x24x128xbf16> to vector<24x128xbf16>
    %14 = tpu.concatenate %11, %13 in 1 : vector<24x128xbf16>, vector<24x128xbf16> -> vector<24x256xbf16>
    %c1_12 = arith.constant 1 : index
    %c0_13 = arith.constant 0 : index
    %c0_14 = arith.constant 0 : index
    %15 = vector.load %arg3[%c1_12, %c0_13, %c0_14] : memref<8x256x256xbf16, #tpu.memory_space<vmem>>, vector<1x256x256xbf16>
    %16 = vector.shape_cast %15 : vector<1x256x256xbf16> to vector<256x256xbf16>
    %cst_15 = arith.constant dense<0.000000e+00> : vector<24x256xf32>
    %17 = tpu.matmul %14, %16, %cst_15 {dimension_numbers = #tpu.dot_dimension_numbers<[1], [0], [0], [1], [0, 0, 1, 1], [], []>} : vector<24x256xbf16>, vector<256x256xbf16>, vector<24x256xf32> -> vector<24x256xf32>
    %18 = arith.addf %9, %17 : vector<24x256xf32>
    %c0_16 = arith.constant 0 : index
    %c8 = arith.constant 8 : index
    %c0_17 = arith.constant 0 : index
    %19 = vector.load %arg2[%c0_16, %c8, %c0_17] : memref<1x56x128xbf16, #tpu.memory_space<vmem>>, vector<1x24x128xbf16>
    %20 = vector.shape_cast %19 : vector<1x24x128xbf16> to vector<24x128xbf16>
    %c0_18 = arith.constant 0 : index
    %c9 = arith.constant 9 : index
    %c0_19 = arith.constant 0 : index
    %21 = vector.load %arg2[%c0_18, %c9, %c0_19] : memref<1x56x128xbf16, #tpu.memory_space<vmem>>, vector<1x24x128xbf16>
    %22 = vector.shape_cast %21 : vector<1x24x128xbf16> to vector<24x128xbf16>
    %23 = tpu.concatenate %20, %22 in 1 : vector<24x128xbf16>, vector<24x128xbf16> -> vector<24x256xbf16>
    %c2_20 = arith.constant 2 : index
    %c0_21 = arith.constant 0 : index
    %c0_22 = arith.constant 0 : index
    %24 = vector.load %arg3[%c2_20, %c0_21, %c0_22] : memref<8x256x256xbf16, #tpu.memory_space<vmem>>, vector<1x256x256xbf16>
    %25 = vector.shape_cast %24 : vector<1x256x256xbf16> to vector<256x256xbf16>
    %cst_23 = arith.constant dense<0.000000e+00> : vector<24x256xf32>
    %26 = tpu.matmul %23, %25, %cst_23 {dimension_numbers = #tpu.dot_dimension_numbers<[1], [0], [0], [1], [0, 0, 1, 1], [], []>} : vector<24x256xbf16>, vector<256x256xbf16>, vector<24x256xf32> -> vector<24x256xf32>
    %27 = arith.addf %18, %26 : vector<24x256xf32>
    %c0_24 = arith.constant 0 : index
    %c10 = arith.constant 10 : index
    %c0_25 = arith.constant 0 : index
    %28 = vector.load %arg2[%c0_24, %c10, %c0_25] : memref<1x56x128xbf16, #tpu.memory_space<vmem>>, vector<1x24x128xbf16>
    %29 = vector.shape_cast %28 : vector<1x24x128xbf16> to vector<24x128xbf16>
    %c0_26 = arith.constant 0 : index
    %c11 = arith.constant 11 : index
    %c0_27 = arith.constant 0 : index
    %30 = vector.load %arg2[%c0_26, %c11, %c0_27] : memref<1x56x128xbf16, #tpu.memory_space<vmem>>, vector<1x24x128xbf16>
    %31 = vector.shape_cast %30 : vector<1x24x128xbf16> to vector<24x128xbf16>
    %32 = tpu.concatenate %29, %31 in 1 : vector<24x128xbf16>, vector<24x128xbf16> -> vector<24x256xbf16>
    %c3_28 = arith.constant 3 : index
    %c0_29 = arith.constant 0 : index
    %c0_30 = arith.constant 0 : index
    %33 = vector.load %arg3[%c3_28, %c0_29, %c0_30] : memref<8x256x256xbf16, #tpu.memory_space<vmem>>, vector<1x256x256xbf16>
    %34 = vector.shape_cast %33 : vector<1x256x256xbf16> to vector<256x256xbf16>
    %cst_31 = arith.constant dense<0.000000e+00> : vector<24x256xf32>
    %35 = tpu.matmul %32, %34, %cst_31 {dimension_numbers = #tpu.dot_dimension_numbers<[1], [0], [0], [1], [0, 0, 1, 1], [], []>} : vector<24x256xbf16>, vector<256x256xbf16>, vector<24x256xf32> -> vector<24x256xf32>
    %36 = arith.addf %27, %35 : vector<24x256xf32>
    %c0_32 = arith.constant 0 : index
    %c16 = arith.constant 16 : index
    %c0_33 = arith.constant 0 : index
    %37 = vector.load %arg2[%c0_32, %c16, %c0_33] : memref<1x56x128xbf16, #tpu.memory_space<vmem>>, vector<1x24x128xbf16>
    %38 = vector.shape_cast %37 : vector<1x24x128xbf16> to vector<24x128xbf16>
    %c0_34 = arith.constant 0 : index
    %c17 = arith.constant 17 : index
    %c0_35 = arith.constant 0 : index
    %39 = vector.load %arg2[%c0_34, %c17, %c0_35] : memref<1x56x128xbf16, #tpu.memory_space<vmem>>, vector<1x24x128xbf16>
    %40 = vector.shape_cast %39 : vector<1x24x128xbf16> to vector<24x128xbf16>
    %41 = tpu.concatenate %38, %40 in 1 : vector<24x128xbf16>, vector<24x128xbf16> -> vector<24x256xbf16>
    %c4 = arith.constant 4 : index
    %c0_36 = arith.constant 0 : index
    %c0_37 = arith.constant 0 : index
    %42 = vector.load %arg3[%c4, %c0_36, %c0_37] : memref<8x256x256xbf16, #tpu.memory_space<vmem>>, vector<1x256x256xbf16>
    %43 = vector.shape_cast %42 : vector<1x256x256xbf16> to vector<256x256xbf16>
    %cst_38 = arith.constant dense<0.000000e+00> : vector<24x256xf32>
    %44 = tpu.matmul %41, %43, %cst_38 {dimension_numbers = #tpu.dot_dimension_numbers<[1], [0], [0], [1], [0, 0, 1, 1], [], []>} : vector<24x256xbf16>, vector<256x256xbf16>, vector<24x256xf32> -> vector<24x256xf32>
    %45 = arith.addf %36, %44 : vector<24x256xf32>
    %c0_39 = arith.constant 0 : index
    %c18 = arith.constant 18 : index
    %c0_40 = arith.constant 0 : index
    %46 = vector.load %arg2[%c0_39, %c18, %c0_40] : memref<1x56x128xbf16, #tpu.memory_space<vmem>>, vector<1x24x128xbf16>
    %47 = vector.shape_cast %46 : vector<1x24x128xbf16> to vector<24x128xbf16>
    %c0_41 = arith.constant 0 : index
    %c19 = arith.constant 19 : index
    %c0_42 = arith.constant 0 : index
    %48 = vector.load %arg2[%c0_41, %c19, %c0_42] : memref<1x56x128xbf16, #tpu.memory_space<vmem>>, vector<1x24x128xbf16>
    %49 = vector.shape_cast %48 : vector<1x24x128xbf16> to vector<24x128xbf16>
    %50 = tpu.concatenate %47, %49 in 1 : vector<24x128xbf16>, vector<24x128xbf16> -> vector<24x256xbf16>
    %c5 = arith.constant 5 : index
    %c0_43 = arith.constant 0 : index
    %c0_44 = arith.constant 0 : index
    %51 = vector.load %arg3[%c5, %c0_43, %c0_44] : memref<8x256x256xbf16, #tpu.memory_space<vmem>>, vector<1x256x256xbf16>
    %52 = vector.shape_cast %51 : vector<1x256x256xbf16> to vector<256x256xbf16>
    %cst_45 = arith.constant dense<0.000000e+00> : vector<24x256xf32>
    %53 = tpu.matmul %50, %52, %cst_45 {dimension_numbers = #tpu.dot_dimension_numbers<[1], [0], [0], [1], [0, 0, 1, 1], [], []>} : vector<24x256xbf16>, vector<256x256xbf16>, vector<24x256xf32> -> vector<24x256xf32>
    %54 = arith.addf %45, %53 : vector<24x256xf32>
    %c0_46 = arith.constant 0 : index
    %c24 = arith.constant 24 : index
    %c0_47 = arith.constant 0 : index
    %55 = vector.load %arg2[%c0_46, %c24, %c0_47] : memref<1x56x128xbf16, #tpu.memory_space<vmem>>, vector<1x24x128xbf16>
    %56 = vector.shape_cast %55 : vector<1x24x128xbf16> to vector<24x128xbf16>
    %c0_48 = arith.constant 0 : index
    %c25 = arith.constant 25 : index
    %c0_49 = arith.constant 0 : index
    %57 = vector.load %arg2[%c0_48, %c25, %c0_49] : memref<1x56x128xbf16, #tpu.memory_space<vmem>>, vector<1x24x128xbf16>
    %58 = vector.shape_cast %57 : vector<1x24x128xbf16> to vector<24x128xbf16>
    %59 = tpu.concatenate %56, %58 in 1 : vector<24x128xbf16>, vector<24x128xbf16> -> vector<24x256xbf16>
    %c6 = arith.constant 6 : index
    %c0_50 = arith.constant 0 : index
    %c0_51 = arith.constant 0 : index
    %60 = vector.load %arg3[%c6, %c0_50, %c0_51] : memref<8x256x256xbf16, #tpu.memory_space<vmem>>, vector<1x256x256xbf16>
    %61 = vector.shape_cast %60 : vector<1x256x256xbf16> to vector<256x256xbf16>
    %cst_52 = arith.constant dense<0.000000e+00> : vector<24x256xf32>
    %62 = tpu.matmul %59, %61, %cst_52 {dimension_numbers = #tpu.dot_dimension_numbers<[1], [0], [0], [1], [0, 0, 1, 1], [], []>} : vector<24x256xbf16>, vector<256x256xbf16>, vector<24x256xf32> -> vector<24x256xf32>
    %63 = arith.addf %54, %62 : vector<24x256xf32>
    %c0_53 = arith.constant 0 : index
    %c26 = arith.constant 26 : index
    %c0_54 = arith.constant 0 : index
    %64 = vector.load %arg2[%c0_53, %c26, %c0_54] : memref<1x56x128xbf16, #tpu.memory_space<vmem>>, vector<1x24x128xbf16>
    %65 = vector.shape_cast %64 : vector<1x24x128xbf16> to vector<24x128xbf16>
    %c0_55 = arith.constant 0 : index
    %c27 = arith.constant 27 : index
    %c0_56 = arith.constant 0 : index
    %66 = vector.load %arg2[%c0_55, %c27, %c0_56] : memref<1x56x128xbf16, #tpu.memory_space<vmem>>, vector<1x24x128xbf16>
    %67 = vector.shape_cast %66 : vector<1x24x128xbf16> to vector<24x128xbf16>
    %68 = tpu.concatenate %65, %67 in 1 : vector<24x128xbf16>, vector<24x128xbf16> -> vector<24x256xbf16>
    %c7 = arith.constant 7 : index
    %c0_57 = arith.constant 0 : index
    %c0_58 = arith.constant 0 : index
    %69 = vector.load %arg3[%c7, %c0_57, %c0_58] : memref<8x256x256xbf16, #tpu.memory_space<vmem>>, vector<1x256x256xbf16>
    %70 = vector.shape_cast %69 : vector<1x256x256xbf16> to vector<256x256xbf16>
    %cst_59 = arith.constant dense<0.000000e+00> : vector<24x256xf32>
    %71 = tpu.matmul %68, %70, %cst_59 {dimension_numbers = #tpu.dot_dimension_numbers<[1], [0], [0], [1], [0, 0, 1, 1], [], []>} : vector<24x256xbf16>, vector<256x256xbf16>, vector<24x256xf32> -> vector<24x256xf32>
    %72 = arith.addf %63, %71 : vector<24x256xf32>
    %73 = tpu.iota {dimensions = array<i32: 0>} : vector<24x1xi32>
    %c8_i32 = arith.constant 8 : i32
    %c0_i32 = arith.constant 0 : i32
    %74 = arith.cmpi eq, %c8_i32, %c0_i32 : i32
    %c1_i32 = arith.constant 1 : i32
    %75 = arith.select %74, %c1_i32, %c8_i32 : i32
    %76 = vector.broadcast %75 : i32 to vector<24x1xi32>
    %77 = arith.remsi %73, %76 : vector<24x1xi32>
    %c0_i32_60 = arith.constant 0 : i32
    %78 = vector.broadcast %c0_i32_60 : i32 to vector<24x1xi32>
    %79 = arith.cmpi ne, %77, %78 : vector<24x1xi32>
    %c0_i32_61 = arith.constant 0 : i32
    %80 = vector.broadcast %c0_i32_61 : i32 to vector<24x1xi32>
    %81 = arith.cmpi slt, %77, %80 : vector<24x1xi32>
    %c0_i32_62 = arith.constant 0 : i32
    %82 = arith.cmpi slt, %75, %c0_i32_62 : i32
    %83 = vector.broadcast %82 : i1 to vector<24x1xi1>
    %84 = vector.broadcast %83 : vector<24x1xi1> to vector<24x1xi1>
    %85 = arith.xori %81, %84 : vector<24x1xi1>
    %86 = arith.andi %85, %79 : vector<24x1xi1>
    %87 = vector.broadcast %75 : i32 to vector<24x1xi32>
    %88 = arith.addi %77, %87 : vector<24x1xi32>
    %89 = arith.select %86, %88, %77 : vector<24x1xi1>, vector<24x1xi32>
    %c3_i32 = arith.constant 3 : i32
    %90 = vector.broadcast %c3_i32 : i32 to vector<24x1xi32>
    %91 = arith.cmpi slt, %89, %90 : vector<24x1xi32>
    %cst_63 = arith.constant 0.000000e+00 : f32
    %92 = vector.shape_cast %91 : vector<24x1xi1> to vector<24x1xi1>
    %93 = vector.broadcast %92 : vector<24x1xi1> to vector<24x256xi1>
    %94 = vector.broadcast %cst_63 : f32 to vector<24x256xf32>
    %95 = arith.select %93, %72, %94 : vector<24x256xi1>, vector<24x256xf32>
    %cst_64 = arith.constant dense<0.000000e+00> : vector<256xf32>
    %96 = vector.multi_reduction <add>, %95, %cst_64 [0] : vector<24x256xf32> to vector<256xf32>
    %97 = vector.shape_cast %96 : vector<256xf32> to vector<1x256xf32>
    %98 = arith.mulf %95, %95 : vector<24x256xf32>
    %cst_65 = arith.constant dense<0.000000e+00> : vector<256xf32>
    %99 = vector.multi_reduction <add>, %98, %cst_65 [0] : vector<24x256xf32> to vector<256xf32>
    %100 = vector.shape_cast %99 : vector<256xf32> to vector<1x256xf32>
    %cst_66 = arith.constant 0.111111112 : f32
    %101 = vector.broadcast %cst_66 : f32 to vector<1x256xf32>
    %102 = arith.mulf %97, %101 : vector<1x256xf32>
    %cst_67 = arith.constant 0.111111112 : f32
    %103 = vector.broadcast %cst_67 : f32 to vector<1x256xf32>
    %104 = arith.mulf %100, %103 : vector<1x256xf32>
    %105 = arith.mulf %102, %102 : vector<1x256xf32>
    %106 = arith.subf %104, %105 : vector<1x256xf32>
    %107 = vector.broadcast %102 : vector<1x256xf32> to vector<24x256xf32>
    %108 = arith.subf %72, %107 : vector<24x256xf32>
    %cst_68 = arith.constant 9.99999974E-6 : f32
    %109 = vector.broadcast %cst_68 : f32 to vector<1x256xf32>
    %110 = arith.addf %106, %109 : vector<1x256xf32>
    %111 = math.rsqrt %110 : vector<1x256xf32>
    %112 = vector.broadcast %111 : vector<1x256xf32> to vector<24x256xf32>
    %113 = arith.mulf %108, %112 : vector<24x256xf32>
    %cst_69 = arith.constant 0.000000e+00 : f32
    %114 = vector.broadcast %cst_69 : f32 to vector<24x256xf32>
    %115 = arith.cmpf oge, %113, %114 : vector<24x256xf32>
    %cst_70 = arith.constant 2.000000e-01 : f32
    %116 = vector.broadcast %cst_70 : f32 to vector<24x256xf32>
    %117 = arith.mulf %116, %113 : vector<24x256xf32>
    %118 = arith.select %115, %113, %117 : vector<24x256xi1>, vector<24x256xf32>
    %119 = arith.truncf %118 : vector<24x256xf32> to vector<24x256xbf16>
    %c0_71 = arith.constant 0 : index
    %c0_72 = arith.constant 0 : index
    %c0_73 = arith.constant 0 : index
    %120 = vector.load %arg4[%c0_71, %c0_72, %c0_73] : memref<1x24x256xbf16, #tpu.memory_space<vmem>>, vector<1x24x256xbf16>
    %121 = vector.shape_cast %120 : vector<1x24x256xbf16> to vector<24x256xbf16>
    %122 = vector.shape_cast %119 : vector<24x256xbf16> to vector<1x24x256xbf16>
    tpu.vector_store %arg4[%c0_71, %c0_72, %c0_73], %122 {strides = array<i32>} : memref<1x24x256xbf16, #tpu.memory_space<vmem>>, vector<1x24x256xbf16>,
    return
  }
  func.func @transform_0(%arg0: i32, %arg1: i32) -> (i32, i32, i32) {
    %c0_i32 = arith.constant 0 : i32
    %c0_i32_0 = arith.constant 0 : i32
    %c0_i32_1 = arith.constant 0 : i32
    return %arg0, %c0_i32, %c0_i32_0 : i32, i32, i32
  }
  func.func @transform_1(%arg0: i32, %arg1: i32) -> (i32, i32, i32) {
    %c0_i32 = arith.constant 0 : i32
    %c0_i32_0 = arith.constant 0 : i32
    %c0_i32_1 = arith.constant 0 : i32
    return %c0_i32, %c0_i32_0, %arg1 : i32, i32, i32
  }
  func.func @transform_2(%arg0: i32, %arg1: i32) -> (i32, i32, i32) {
    %c0_i32 = arith.constant 0 : i32
    %c0_i32_0 = arith.constant 0 : i32
    return %arg0, %c0_i32, %arg1 : i32, i32, i32
  }
}

module attributes {stable_mosaic.version = 11 : i64} {
  func.func @_conv_in_lrelu_kernel(%arg0: i32, %arg1: i32, %arg2: memref<1x48x256xbf16, #tpu.memory_space<vmem>>, %arg3: memref<16x256x128xbf16, #tpu.memory_space<vmem>>, %arg4: memref<1x16x128xf32, #tpu.memory_space<vmem>>) attributes {dimension_semantics = [#tpu.dimension_semantics<parallel>, #tpu.dimension_semantics<parallel>], iteration_bounds = array<i64: 2, 1>, scalar_prefetch = 0 : i64, scratch_operands = 0 : i64, tpu.core_type = #tpu.core_type<tc>, window_params = [{transform_indices = @transform_0, window_bounds = array<i64: 1, 48, 256>}, {transform_indices = @transform_1, window_bounds = array<i64: 16, 256, 128>}, {transform_indices = @transform_2, window_bounds = array<i64: 1, 16, 128>}]} {
    %cst = arith.constant 0.000000e+00 : f32
    %0 = vector.broadcast %cst : f32 to vector<16x128xf32>
    %c0 = arith.constant 0 : index
    %c0_0 = arith.constant 0 : index
    %c0_1 = arith.constant 0 : index
    %1 = vector.load %arg2[%c0, %c0_0, %c0_1] : memref<1x48x256xbf16, #tpu.memory_space<vmem>>, vector<1x16x256xbf16>
    %2 = vector.shape_cast %1 : vector<1x16x256xbf16> to vector<16x256xbf16>
    %c0_2 = arith.constant 0 : index
    %c0_3 = arith.constant 0 : index
    %c0_4 = arith.constant 0 : index
    %3 = vector.load %arg3[%c0_2, %c0_3, %c0_4] : memref<16x256x128xbf16, #tpu.memory_space<vmem>>, vector<1x256x128xbf16>
    %4 = vector.shape_cast %3 : vector<1x256x128xbf16> to vector<256x128xbf16>
    %cst_5 = arith.constant dense<0.000000e+00> : vector<16x128xf32>
    %5 = tpu.matmul %2, %4, %cst_5 {dimension_numbers = #tpu.dot_dimension_numbers<[1], [0], [0], [1], [0, 0, 1, 1], [], []>} : vector<16x256xbf16>, vector<256x128xbf16>, vector<16x128xf32> -> vector<16x128xf32>
    %6 = arith.addf %0, %5 : vector<16x128xf32>
    %c0_6 = arith.constant 0 : index
    %c1 = arith.constant 1 : index
    %c0_7 = arith.constant 0 : index
    %7 = vector.load %arg2[%c0_6, %c1, %c0_7] : memref<1x48x256xbf16, #tpu.memory_space<vmem>>, vector<1x16x256xbf16>
    %8 = vector.shape_cast %7 : vector<1x16x256xbf16> to vector<16x256xbf16>
    %c1_8 = arith.constant 1 : index
    %c0_9 = arith.constant 0 : index
    %c0_10 = arith.constant 0 : index
    %9 = vector.load %arg3[%c1_8, %c0_9, %c0_10] : memref<16x256x128xbf16, #tpu.memory_space<vmem>>, vector<1x256x128xbf16>
    %10 = vector.shape_cast %9 : vector<1x256x128xbf16> to vector<256x128xbf16>
    %cst_11 = arith.constant dense<0.000000e+00> : vector<16x128xf32>
    %11 = tpu.matmul %8, %10, %cst_11 {dimension_numbers = #tpu.dot_dimension_numbers<[1], [0], [0], [1], [0, 0, 1, 1], [], []>} : vector<16x256xbf16>, vector<256x128xbf16>, vector<16x128xf32> -> vector<16x128xf32>
    %12 = arith.addf %6, %11 : vector<16x128xf32>
    %c0_12 = arith.constant 0 : index
    %c2 = arith.constant 2 : index
    %c0_13 = arith.constant 0 : index
    %13 = vector.load %arg2[%c0_12, %c2, %c0_13] : memref<1x48x256xbf16, #tpu.memory_space<vmem>>, vector<1x16x256xbf16>
    %14 = vector.shape_cast %13 : vector<1x16x256xbf16> to vector<16x256xbf16>
    %c2_14 = arith.constant 2 : index
    %c0_15 = arith.constant 0 : index
    %c0_16 = arith.constant 0 : index
    %15 = vector.load %arg3[%c2_14, %c0_15, %c0_16] : memref<16x256x128xbf16, #tpu.memory_space<vmem>>, vector<1x256x128xbf16>
    %16 = vector.shape_cast %15 : vector<1x256x128xbf16> to vector<256x128xbf16>
    %cst_17 = arith.constant dense<0.000000e+00> : vector<16x128xf32>
    %17 = tpu.matmul %14, %16, %cst_17 {dimension_numbers = #tpu.dot_dimension_numbers<[1], [0], [0], [1], [0, 0, 1, 1], [], []>} : vector<16x256xbf16>, vector<256x128xbf16>, vector<16x128xf32> -> vector<16x128xf32>
    %18 = arith.addf %12, %17 : vector<16x128xf32>
    %c0_18 = arith.constant 0 : index
    %c3 = arith.constant 3 : index
    %c0_19 = arith.constant 0 : index
    %19 = vector.load %arg2[%c0_18, %c3, %c0_19] : memref<1x48x256xbf16, #tpu.memory_space<vmem>>, vector<1x16x256xbf16>
    %20 = vector.shape_cast %19 : vector<1x16x256xbf16> to vector<16x256xbf16>
    %c3_20 = arith.constant 3 : index
    %c0_21 = arith.constant 0 : index
    %c0_22 = arith.constant 0 : index
    %21 = vector.load %arg3[%c3_20, %c0_21, %c0_22] : memref<16x256x128xbf16, #tpu.memory_space<vmem>>, vector<1x256x128xbf16>
    %22 = vector.shape_cast %21 : vector<1x256x128xbf16> to vector<256x128xbf16>
    %cst_23 = arith.constant dense<0.000000e+00> : vector<16x128xf32>
    %23 = tpu.matmul %20, %22, %cst_23 {dimension_numbers = #tpu.dot_dimension_numbers<[1], [0], [0], [1], [0, 0, 1, 1], [], []>} : vector<16x256xbf16>, vector<256x128xbf16>, vector<16x128xf32> -> vector<16x128xf32>
    %24 = arith.addf %18, %23 : vector<16x128xf32>
    %c0_24 = arith.constant 0 : index
    %c8 = arith.constant 8 : index
    %c0_25 = arith.constant 0 : index
    %25 = vector.load %arg2[%c0_24, %c8, %c0_25] : memref<1x48x256xbf16, #tpu.memory_space<vmem>>, vector<1x16x256xbf16>
    %26 = vector.shape_cast %25 : vector<1x16x256xbf16> to vector<16x256xbf16>
    %c4 = arith.constant 4 : index
    %c0_26 = arith.constant 0 : index
    %c0_27 = arith.constant 0 : index
    %27 = vector.load %arg3[%c4, %c0_26, %c0_27] : memref<16x256x128xbf16, #tpu.memory_space<vmem>>, vector<1x256x128xbf16>
    %28 = vector.shape_cast %27 : vector<1x256x128xbf16> to vector<256x128xbf16>
    %cst_28 = arith.constant dense<0.000000e+00> : vector<16x128xf32>
    %29 = tpu.matmul %26, %28, %cst_28 {dimension_numbers = #tpu.dot_dimension_numbers<[1], [0], [0], [1], [0, 0, 1, 1], [], []>} : vector<16x256xbf16>, vector<256x128xbf16>, vector<16x128xf32> -> vector<16x128xf32>
    %30 = arith.addf %24, %29 : vector<16x128xf32>
    %c0_29 = arith.constant 0 : index
    %c9 = arith.constant 9 : index
    %c0_30 = arith.constant 0 : index
    %31 = vector.load %arg2[%c0_29, %c9, %c0_30] : memref<1x48x256xbf16, #tpu.memory_space<vmem>>, vector<1x16x256xbf16>
    %32 = vector.shape_cast %31 : vector<1x16x256xbf16> to vector<16x256xbf16>
    %c5 = arith.constant 5 : index
    %c0_31 = arith.constant 0 : index
    %c0_32 = arith.constant 0 : index
    %33 = vector.load %arg3[%c5, %c0_31, %c0_32] : memref<16x256x128xbf16, #tpu.memory_space<vmem>>, vector<1x256x128xbf16>
    %34 = vector.shape_cast %33 : vector<1x256x128xbf16> to vector<256x128xbf16>
    %cst_33 = arith.constant dense<0.000000e+00> : vector<16x128xf32>
    %35 = tpu.matmul %32, %34, %cst_33 {dimension_numbers = #tpu.dot_dimension_numbers<[1], [0], [0], [1], [0, 0, 1, 1], [], []>} : vector<16x256xbf16>, vector<256x128xbf16>, vector<16x128xf32> -> vector<16x128xf32>
    %36 = arith.addf %30, %35 : vector<16x128xf32>
    %c0_34 = arith.constant 0 : index
    %c10 = arith.constant 10 : index
    %c0_35 = arith.constant 0 : index
    %37 = vector.load %arg2[%c0_34, %c10, %c0_35] : memref<1x48x256xbf16, #tpu.memory_space<vmem>>, vector<1x16x256xbf16>
    %38 = vector.shape_cast %37 : vector<1x16x256xbf16> to vector<16x256xbf16>
    %c6 = arith.constant 6 : index
    %c0_36 = arith.constant 0 : index
    %c0_37 = arith.constant 0 : index
    %39 = vector.load %arg3[%c6, %c0_36, %c0_37] : memref<16x256x128xbf16, #tpu.memory_space<vmem>>, vector<1x256x128xbf16>
    %40 = vector.shape_cast %39 : vector<1x256x128xbf16> to vector<256x128xbf16>
    %cst_38 = arith.constant dense<0.000000e+00> : vector<16x128xf32>
    %41 = tpu.matmul %38, %40, %cst_38 {dimension_numbers = #tpu.dot_dimension_numbers<[1], [0], [0], [1], [0, 0, 1, 1], [], []>} : vector<16x256xbf16>, vector<256x128xbf16>, vector<16x128xf32> -> vector<16x128xf32>
    %42 = arith.addf %36, %41 : vector<16x128xf32>
    %c0_39 = arith.constant 0 : index
    %c11 = arith.constant 11 : index
    %c0_40 = arith.constant 0 : index
    %43 = vector.load %arg2[%c0_39, %c11, %c0_40] : memref<1x48x256xbf16, #tpu.memory_space<vmem>>, vector<1x16x256xbf16>
    %44 = vector.shape_cast %43 : vector<1x16x256xbf16> to vector<16x256xbf16>
    %c7 = arith.constant 7 : index
    %c0_41 = arith.constant 0 : index
    %c0_42 = arith.constant 0 : index
    %45 = vector.load %arg3[%c7, %c0_41, %c0_42] : memref<16x256x128xbf16, #tpu.memory_space<vmem>>, vector<1x256x128xbf16>
    %46 = vector.shape_cast %45 : vector<1x256x128xbf16> to vector<256x128xbf16>
    %cst_43 = arith.constant dense<0.000000e+00> : vector<16x128xf32>
    %47 = tpu.matmul %44, %46, %cst_43 {dimension_numbers = #tpu.dot_dimension_numbers<[1], [0], [0], [1], [0, 0, 1, 1], [], []>} : vector<16x256xbf16>, vector<256x128xbf16>, vector<16x128xf32> -> vector<16x128xf32>
    %48 = arith.addf %42, %47 : vector<16x128xf32>
    %c0_44 = arith.constant 0 : index
    %c16 = arith.constant 16 : index
    %c0_45 = arith.constant 0 : index
    %49 = vector.load %arg2[%c0_44, %c16, %c0_45] : memref<1x48x256xbf16, #tpu.memory_space<vmem>>, vector<1x16x256xbf16>
    %50 = vector.shape_cast %49 : vector<1x16x256xbf16> to vector<16x256xbf16>
    %c8_46 = arith.constant 8 : index
    %c0_47 = arith.constant 0 : index
    %c0_48 = arith.constant 0 : index
    %51 = vector.load %arg3[%c8_46, %c0_47, %c0_48] : memref<16x256x128xbf16, #tpu.memory_space<vmem>>, vector<1x256x128xbf16>
    %52 = vector.shape_cast %51 : vector<1x256x128xbf16> to vector<256x128xbf16>
    %cst_49 = arith.constant dense<0.000000e+00> : vector<16x128xf32>
    %53 = tpu.matmul %50, %52, %cst_49 {dimension_numbers = #tpu.dot_dimension_numbers<[1], [0], [0], [1], [0, 0, 1, 1], [], []>} : vector<16x256xbf16>, vector<256x128xbf16>, vector<16x128xf32> -> vector<16x128xf32>
    %54 = arith.addf %48, %53 : vector<16x128xf32>
    %c0_50 = arith.constant 0 : index
    %c17 = arith.constant 17 : index
    %c0_51 = arith.constant 0 : index
    %55 = vector.load %arg2[%c0_50, %c17, %c0_51] : memref<1x48x256xbf16, #tpu.memory_space<vmem>>, vector<1x16x256xbf16>
    %56 = vector.shape_cast %55 : vector<1x16x256xbf16> to vector<16x256xbf16>
    %c9_52 = arith.constant 9 : index
    %c0_53 = arith.constant 0 : index
    %c0_54 = arith.constant 0 : index
    %57 = vector.load %arg3[%c9_52, %c0_53, %c0_54] : memref<16x256x128xbf16, #tpu.memory_space<vmem>>, vector<1x256x128xbf16>
    %58 = vector.shape_cast %57 : vector<1x256x128xbf16> to vector<256x128xbf16>
    %cst_55 = arith.constant dense<0.000000e+00> : vector<16x128xf32>
    %59 = tpu.matmul %56, %58, %cst_55 {dimension_numbers = #tpu.dot_dimension_numbers<[1], [0], [0], [1], [0, 0, 1, 1], [], []>} : vector<16x256xbf16>, vector<256x128xbf16>, vector<16x128xf32> -> vector<16x128xf32>
    %60 = arith.addf %54, %59 : vector<16x128xf32>
    %c0_56 = arith.constant 0 : index
    %c18 = arith.constant 18 : index
    %c0_57 = arith.constant 0 : index
    %61 = vector.load %arg2[%c0_56, %c18, %c0_57] : memref<1x48x256xbf16, #tpu.memory_space<vmem>>, vector<1x16x256xbf16>
    %62 = vector.shape_cast %61 : vector<1x16x256xbf16> to vector<16x256xbf16>
    %c10_58 = arith.constant 10 : index
    %c0_59 = arith.constant 0 : index
    %c0_60 = arith.constant 0 : index
    %63 = vector.load %arg3[%c10_58, %c0_59, %c0_60] : memref<16x256x128xbf16, #tpu.memory_space<vmem>>, vector<1x256x128xbf16>
    %64 = vector.shape_cast %63 : vector<1x256x128xbf16> to vector<256x128xbf16>
    %cst_61 = arith.constant dense<0.000000e+00> : vector<16x128xf32>
    %65 = tpu.matmul %62, %64, %cst_61 {dimension_numbers = #tpu.dot_dimension_numbers<[1], [0], [0], [1], [0, 0, 1, 1], [], []>} : vector<16x256xbf16>, vector<256x128xbf16>, vector<16x128xf32> -> vector<16x128xf32>
    %66 = arith.addf %60, %65 : vector<16x128xf32>
    %c0_62 = arith.constant 0 : index
    %c19 = arith.constant 19 : index
    %c0_63 = arith.constant 0 : index
    %67 = vector.load %arg2[%c0_62, %c19, %c0_63] : memref<1x48x256xbf16, #tpu.memory_space<vmem>>, vector<1x16x256xbf16>
    %68 = vector.shape_cast %67 : vector<1x16x256xbf16> to vector<16x256xbf16>
    %c11_64 = arith.constant 11 : index
    %c0_65 = arith.constant 0 : index
    %c0_66 = arith.constant 0 : index
    %69 = vector.load %arg3[%c11_64, %c0_65, %c0_66] : memref<16x256x128xbf16, #tpu.memory_space<vmem>>, vector<1x256x128xbf16>
    %70 = vector.shape_cast %69 : vector<1x256x128xbf16> to vector<256x128xbf16>
    %cst_67 = arith.constant dense<0.000000e+00> : vector<16x128xf32>
    %71 = tpu.matmul %68, %70, %cst_67 {dimension_numbers = #tpu.dot_dimension_numbers<[1], [0], [0], [1], [0, 0, 1, 1], [], []>} : vector<16x256xbf16>, vector<256x128xbf16>, vector<16x128xf32> -> vector<16x128xf32>
    %72 = arith.addf %66, %71 : vector<16x128xf32>
    %c0_68 = arith.constant 0 : index
    %c24 = arith.constant 24 : index
    %c0_69 = arith.constant 0 : index
    %73 = vector.load %arg2[%c0_68, %c24, %c0_69] : memref<1x48x256xbf16, #tpu.memory_space<vmem>>, vector<1x16x256xbf16>
    %74 = vector.shape_cast %73 : vector<1x16x256xbf16> to vector<16x256xbf16>
    %c12 = arith.constant 12 : index
    %c0_70 = arith.constant 0 : index
    %c0_71 = arith.constant 0 : index
    %75 = vector.load %arg3[%c12, %c0_70, %c0_71] : memref<16x256x128xbf16, #tpu.memory_space<vmem>>, vector<1x256x128xbf16>
    %76 = vector.shape_cast %75 : vector<1x256x128xbf16> to vector<256x128xbf16>
    %cst_72 = arith.constant dense<0.000000e+00> : vector<16x128xf32>
    %77 = tpu.matmul %74, %76, %cst_72 {dimension_numbers = #tpu.dot_dimension_numbers<[1], [0], [0], [1], [0, 0, 1, 1], [], []>} : vector<16x256xbf16>, vector<256x128xbf16>, vector<16x128xf32> -> vector<16x128xf32>
    %78 = arith.addf %72, %77 : vector<16x128xf32>
    %c0_73 = arith.constant 0 : index
    %c25 = arith.constant 25 : index
    %c0_74 = arith.constant 0 : index
    %79 = vector.load %arg2[%c0_73, %c25, %c0_74] : memref<1x48x256xbf16, #tpu.memory_space<vmem>>, vector<1x16x256xbf16>
    %80 = vector.shape_cast %79 : vector<1x16x256xbf16> to vector<16x256xbf16>
    %c13 = arith.constant 13 : index
    %c0_75 = arith.constant 0 : index
    %c0_76 = arith.constant 0 : index
    %81 = vector.load %arg3[%c13, %c0_75, %c0_76] : memref<16x256x128xbf16, #tpu.memory_space<vmem>>, vector<1x256x128xbf16>
    %82 = vector.shape_cast %81 : vector<1x256x128xbf16> to vector<256x128xbf16>
    %cst_77 = arith.constant dense<0.000000e+00> : vector<16x128xf32>
    %83 = tpu.matmul %80, %82, %cst_77 {dimension_numbers = #tpu.dot_dimension_numbers<[1], [0], [0], [1], [0, 0, 1, 1], [], []>} : vector<16x256xbf16>, vector<256x128xbf16>, vector<16x128xf32> -> vector<16x128xf32>
    %84 = arith.addf %78, %83 : vector<16x128xf32>
    %c0_78 = arith.constant 0 : index
    %c26 = arith.constant 26 : index
    %c0_79 = arith.constant 0 : index
    %85 = vector.load %arg2[%c0_78, %c26, %c0_79] : memref<1x48x256xbf16, #tpu.memory_space<vmem>>, vector<1x16x256xbf16>
    %86 = vector.shape_cast %85 : vector<1x16x256xbf16> to vector<16x256xbf16>
    %c14 = arith.constant 14 : index
    %c0_80 = arith.constant 0 : index
    %c0_81 = arith.constant 0 : index
    %87 = vector.load %arg3[%c14, %c0_80, %c0_81] : memref<16x256x128xbf16, #tpu.memory_space<vmem>>, vector<1x256x128xbf16>
    %88 = vector.shape_cast %87 : vector<1x256x128xbf16> to vector<256x128xbf16>
    %cst_82 = arith.constant dense<0.000000e+00> : vector<16x128xf32>
    %89 = tpu.matmul %86, %88, %cst_82 {dimension_numbers = #tpu.dot_dimension_numbers<[1], [0], [0], [1], [0, 0, 1, 1], [], []>} : vector<16x256xbf16>, vector<256x128xbf16>, vector<16x128xf32> -> vector<16x128xf32>
    %90 = arith.addf %84, %89 : vector<16x128xf32>
    %c0_83 = arith.constant 0 : index
    %c27 = arith.constant 27 : index
    %c0_84 = arith.constant 0 : index
    %91 = vector.load %arg2[%c0_83, %c27, %c0_84] : memref<1x48x256xbf16, #tpu.memory_space<vmem>>, vector<1x16x256xbf16>
    %92 = vector.shape_cast %91 : vector<1x16x256xbf16> to vector<16x256xbf16>
    %c15 = arith.constant 15 : index
    %c0_85 = arith.constant 0 : index
    %c0_86 = arith.constant 0 : index
    %93 = vector.load %arg3[%c15, %c0_85, %c0_86] : memref<16x256x128xbf16, #tpu.memory_space<vmem>>, vector<1x256x128xbf16>
    %94 = vector.shape_cast %93 : vector<1x256x128xbf16> to vector<256x128xbf16>
    %cst_87 = arith.constant dense<0.000000e+00> : vector<16x128xf32>
    %95 = tpu.matmul %92, %94, %cst_87 {dimension_numbers = #tpu.dot_dimension_numbers<[1], [0], [0], [1], [0, 0, 1, 1], [], []>} : vector<16x256xbf16>, vector<256x128xbf16>, vector<16x128xf32> -> vector<16x128xf32>
    %96 = arith.addf %90, %95 : vector<16x128xf32>
    %c0_88 = arith.constant 0 : index
    %c0_89 = arith.constant 0 : index
    %c0_90 = arith.constant 0 : index
    %97 = vector.load %arg4[%c0_88, %c0_89, %c0_90] : memref<1x16x128xf32, #tpu.memory_space<vmem>>, vector<1x16x128xf32>
    %98 = vector.shape_cast %97 : vector<1x16x128xf32> to vector<16x128xf32>
    %99 = vector.shape_cast %96 : vector<16x128xf32> to vector<1x16x128xf32>
    tpu.vector_store %arg4[%c0_88, %c0_89, %c0_90], %99 {strides = array<i32>} : memref<1x16x128xf32, #tpu.memory_space<vmem>>, vector<1x16x128xf32>,
    return
  }
  func.func @transform_0(%arg0: i32, %arg1: i32) -> (i32, i32, i32) {
    %c0_i32 = arith.constant 0 : i32
    %c0_i32_0 = arith.constant 0 : i32
    %c0_i32_1 = arith.constant 0 : i32
    return %arg0, %c0_i32, %c0_i32_0 : i32, i32, i32
  }
  func.func @transform_1(%arg0: i32, %arg1: i32) -> (i32, i32, i32) {
    %c0_i32 = arith.constant 0 : i32
    %c0_i32_0 = arith.constant 0 : i32
    %c0_i32_1 = arith.constant 0 : i32
    return %c0_i32, %c0_i32_0, %arg1 : i32, i32, i32
  }
  func.func @transform_2(%arg0: i32, %arg1: i32) -> (i32, i32, i32) {
    %c0_i32 = arith.constant 0 : i32
    %c0_i32_0 = arith.constant 0 : i32
    return %arg0, %c0_i32, %arg1 : i32, i32, i32
  }
}

</mosaic_0001>

<bundles_post_ra>
// kernel: local_discriminator_forward.4
= control target key start
LH: loop header
LB: loop body
LE: loop exit
PB: predicated region body
PF: predicated region fallthrough
CT: control target
= control target key end

     0   :  { %s1697_s9 = smov 0   ;;  %s1699_s10 = smov 0   ;;  %s2005_s0 = inlined_call_operand.vmem [shape: bf16[2,152,12], index: 0, kind: input, shape index: {}]   ;;  %s2006_s1 = inlined_call_operand.vmem [shape: bf16[4,12,64], index: 1, kind: input, shape index: {}]   ;;  %s2007_s2 = inlined_call_operand.vmem [shape: bf16[2,128,64], index: 2, kind: output, shape index: {}]  }
   0x1   :  { %s1701_s11 = smov 0  }
   0x2 LB: > { %s24_s12 = sadd.s32 1, %s1676_s10  ;;  %p1446_p0 = scmp.ge.s32.totalorder %s1680_s11, 1  ;;  %s1680_s11 = sphi %s1701_s11, %s12_s11   ;;  %s1676_s10 = sphi %s1699_s10, %s2009_s10   ;;  %s1672_s9 = sphi %s1697_s9, %s2008_s9  }
   0x3   : > { %p26_p1 = scmp.ge.s32.totalorder %s24_s12, 2  ;;  %p135_p2 = scmp.lt.s32.totalorder %s1680_s11, 3 }
   0x5   : > { %s2011_s12 = smov (%p26_p1, %s24_s12), 0  ;;  %p136_p3 = pnand %p1446_p0, %p135_p2 }
   0x6   : > { %p164_p4 = scmp.lt.s32.totalorder (!%p136_p3), %s1672_s9, 1 }
   0x7   : > { %139 = sbr.rel (%p136_p3) target bundleno = 343 (0x157), region = 28 }
   0xc   : > { %vm346_vm0 = vcmask 1045504   ;;  %v1544_v0 = vld [vmem:[%s2006_s1 + $0x10] sm:$0xf]  ;;  %v1621_v1 = vld [vmem:[%s2006_s1 + $0x10] sm:$0x30]  ;;  %s2013_s9 = smov (!%p164_p4, %s1672_s9), 1 }
   0xd   : > { %v1545_v2 = vor.u32 %v1621_v1, %v1544_v0  ;;  %v1498_v3 = vld [vmem:[%s2006_s1] sm:$0xf]  ;;  %v1611_v4 = vld [vmem:[%s2006_s1] sm:$0x30]  ;;  %v1486_v6 = vld [vmem:[%s2006_s1 + $0x8] sm:$0xf] }
   0xe   : > { %v1499_v5 = vor.u32 %v1611_v4, %v1498_v3  ;;  %v1612_v7 = vld [vmem:[%s2006_s1 + $0x8] sm:$0x30]  ;;  %v1590_v10 = vld [vmem:[%s2006_s1 + $0x18] sm:$0xf]  ;;  %v1630_v11 = vld [vmem:[%s2006_s1 + $0x18] sm:$0x30] }
   0xf   : > { %v561_v8 = vsel %vm346_vm0, %v1545_v2, 0  ;;  %v1487_v9 = vor.u32 %v1612_v7, %v1486_v6  ;;  %s1631_s29 = smul.u32 76, %s2013_s9  ;;  %v1591_v13 = vor.u32 %v1630_v11, %v1590_v10  ;;  %vm321_vm1 = vcmask 97280   ;;  %s1602_s5 = sshll.u32 %s2013_s9, 6 }
  0x10   : > { %570 = vmatpush.bf16.msra.mxu2 %v561_v8  ;;  %v421_v12 = vsel %vm346_vm0, %v1499_v5, 0  ;;  %vm247_vm2 = vsmask.f32 7424  ;;  %vm1129_vm3 = vcmask 523264   ;;  %vm1331_vm13 = vcmask 519168   ;;  %s1939_s8 = scalar_lea.vmem %s2007_s2, %s1602_s5 }
  0x11   : > { %430 = vmatpush.bf16.msra.mxu1 %v421_v12  ;;  %v348_v14 = vsel %vm346_vm0, %v1487_v9, 0  ;;  %s1748_s4 = scalar_lea.vmem %s2005_s0, %s1631_s29  ;;  %v789_v15 = vsel %vm346_vm0, %v1591_v13, 0 }
  0x12   : > { %357 = vmatpush.bf16.msra.mxu0 %v348_v14  ;;  %v1613_v16 = vld [vmem:[%s1748_s4 + $0x8] sm:$0xff]  ;;  %v1603_v17 = vld [vmem:[%s1748_s4] sm:$0xff]  ;;  %798 = vmatpush.bf16.msra.mxu3 %v789_v15  ;;  %v1623_v20 = vld [vmem:[%s1748_s4 + $0x10] sm:$0xff] }
  0x13   : > { %v1604_v18 = vld [vmem:[%s1748_s4 + $0x8] sm:$0xff]  ;;  %1546 = vmatmul.msk.bf16.vlgmr.msra.gmra.mxu2 %vm321_vm1, %v1613_v16  ;;  %v251_v21 = vshll.u32 %v1603_v17, 16  ;;  %v249_v22 = vshrl.u32 %v1603_v17, 16  ;;  %v699_v26 = vshll.u32 %v1623_v20, 16  ;;  %v1605_v35 = vld [vmem:[%s1748_s4 + $0x10] sm:$0xff]  ;;  %v1624_v36 = vld [vmem:[%s1748_s4 + $0x18] sm:$0xff] }
  0x14   : > { %v1622_v19 = vld [vmem:[%s1748_s4 + $0x8] sm:$0xff]  ;;  %1500 = vmatmul.msk.bf16.vlgmr.msra.gmra.mxu1 %vm321_vm1, %v1603_v17  ;;  %v256_v23 = vshll.u32 %v1604_v18, 16  ;;  %v1614_v37 = vld [vmem:[%s1748_s4 + $0x10] sm:$0xff]  ;;  %v260_v38 = vshrl.u32 %v1604_v18, 16  ;;  %v264_v39 = vshll.u32 %v1605_v35, 16  ;;  %v703_v40 = vshrl.u32 %v1623_v20, 16 }
  0x15   : > { %v692_v24 = vshrl.u32 %v1622_v19, 16  ;;  %v694_v25 = vshll.u32 %v1622_v19, 16  ;;  %v253_v27 = vrot.slane %v251_v21, 1  ;;  %v701_v30 = vrot.slane %v699_v26, 1  ;;  %v1606_v48 = vld [vmem:[%s1748_s4 + $0x18] sm:$0xff]  ;;  %v1625_v49 = vld [vmem:[%s1748_s4 + $0x20] sm:$0xff] }
  0x16   : > { %v258_v28 = vrot.slane %v256_v23, 1  ;;  %v707_v41 = vshll.u32 %v1624_v36, 16  ;;  %v266_v43 = vrot.slane %v264_v39, 1  ;;  %v1615_v50 = vld [vmem:[%s1748_s4 + $0x18] sm:$0xff]  ;;  %v268_v51 = vshrl.u32 %v1605_v35, 16  ;;  %v1607_v61 = vld [vmem:[%s1748_s4 + $0x20] sm:$0xff] }
  0x17   : > { %v696_v29 = vrot.slane %v694_v25, 1  ;;  %v254_v31 = vor.u32 %v253_v27, %v249_v22  ;;  %v705_v44 = vor.u32 %v703_v40, %v701_v30  ;;  %v272_v52 = vshll.u32 %v1606_v48, 16  ;;  %v1626_v62 = vld [vmem:[%s1748_s4 + $0x28] sm:$0xff]  ;;  %v1616_v63 = vld [vmem:[%s1748_s4 + $0x20] sm:$0xff]  ;;  %v1627_v11 = vld [vmem:[%s1748_s4 + $0x30] sm:$0xff] }
  0x18   : > { %v262_v42 = vor.u32 %v260_v38, %v258_v28  ;;  %v709_v45 = vrot.slane %v707_v41, 1  ;;  %v711_v53 = vshrl.u32 %v1624_v36, 16  ;;  %v715_v54 = vshll.u32 %v1625_v49, 16  ;;  %v1608_v10 = vld [vmem:[%s1748_s4 + $0x28] sm:$0xff]  ;;  %v1609_v23 = vld [vmem:[%s1748_s4 + $0x30] sm:$0xff]  ;;  %v1610_v36 = vld [vmem:[%s1748_s4 + $0x38] sm:$0xff] }
  0x19   : > { %v697_v32 = vor.u32 %v696_v29, %v692_v24  ;;  %v259_v33 = vsel %vm247_vm2, %v254_v31, %v258_v28  ;;  %v270_v55 = vor.u32 %v268_v51, %v266_v43  ;;  %v274_v56 = vrot.slane %v272_v52, 1  ;;  %v1617_v12 = vld [vmem:[%s1748_s4 + $0x28] sm:$0xff]  ;;  %v1628_v24 = vld [vmem:[%s1748_s4 + $0x38] sm:$0xff]  ;;  %v1618_v25 = vld [vmem:[%s1748_s4 + $0x30] sm:$0xff] }
  0x1a   : > { %1488 = vmatmul.msk.bf16.vlgmr.msra.gmra.mxu0 %vm321_vm1, %v259_v33  ;;  %v267_v46 = vsel %vm247_vm2, %v262_v42, %v266_v43  ;;  %v710_v47 = vsel %vm247_vm2, %v705_v44, %v709_v45  ;;  %v713_v57 = vor.u32 %v711_v53, %v709_v45  ;;  %v717_v58 = vrot.slane %v715_v54, 1  ;;  %v1619_v38 = vld [vmem:[%s1748_s4 + $0x38] sm:$0xff] }
  0x1b   : > { %v702_v34 = vsel %vm247_vm2, %v697_v32, %v701_v30  ;;  %v275_v59 = vsel %vm247_vm2, %v270_v55, %v274_v56  ;;  %v276_v0 = vshrl.u32 %v1606_v48, 16  ;;  %v280_v1 = vshll.u32 %v1607_v61, 16  ;;  %v1620_v55 = vld [vmem:[%s1748_s4 + $0x40] sm:$0xff] }
  0x1c   : > { %1592 = vmatmul.msk.bf16.vlgmr.msra.gmra.mxu3 %vm321_vm1, %v702_v34  ;;  %v718_v60 = vsel %vm247_vm2, %v713_v57, %v717_v58  ;;  %v719_v2 = vshrl.u32 %v1625_v49, 16  ;;  %v723_v3 = vshll.u32 %v1626_v62, 16  ;;  %v284_v13 = vshrl.u32 %v1607_v61, 16 }
  0x1d   : > { %v278_v4 = vor.u32 %v276_v0, %v274_v56  ;;  %v282_v5 = vrot.slane %v280_v1, 1  ;;  %v288_v14 = vshll.u32 %v1608_v10, 16  ;;  %v727_v15 = vshrl.u32 %v1626_v62, 16 }
  0x1e   : > { %v721_v6 = vor.u32 %v719_v2, %v717_v58  ;;  %v725_v7 = vrot.slane %v723_v3, 1  ;;  %v731_v16 = vshll.u32 %v1627_v11, 16  ;;  %v292_v26 = vshrl.u32 %v1608_v10, 16 }
  0x1f   : > { %v283_v8 = vsel %vm247_vm2, %v278_v4, %v282_v5  ;;  %v286_v17 = vor.u32 %v284_v13, %v282_v5  ;;  %v296_v27 = vshll.u32 %v1609_v23, 16  ;;  %v735_v28 = vshrl.u32 %v1627_v11, 16 }
  0x20   : > { %v726_v9 = vsel %vm247_vm2, %v721_v6, %v725_v7  ;;  %v729_v19 = vor.u32 %v727_v15, %v725_v7  ;;  %v733_v20 = vrot.slane %v731_v16, 1  ;;  %v739_v29 = vshll.u32 %v1628_v24, 16 }
  0x21   : > { %v298_v31 = vrot.slane %v296_v27, 1  ;;  %v300_v39 = vshrl.u32 %v1609_v23, 16  ;;  %v304_v40 = vshll.u32 %v1610_v36, 16  ;;  %v743_v41 = vshrl.u32 %v1628_v24, 16 }
  0x22   : > { %v734_v22 = vsel %vm247_vm2, %v729_v19, %v733_v20  ;;  %v737_v32 = vor.u32 %v735_v28, %v733_v20  ;;  %v741_v33 = vrot.slane %v739_v29, 1  ;;  %v308_v56 = vshrl.u32 %v1610_v36, 16 }
  0x23   : > { %1547 = vmatmul.msk.bf16.gmra.mxu2 %vm321_vm1, %v1614_v37  ;;  %v1629_v37 = vld [vmem:[%s1748_s4 + $0x40] sm:$0xff]  ;;  %v302_v43 = vor.u32 %v300_v39, %v298_v31  ;;  %v306_v44 = vrot.slane %v304_v40, 1 }
  0x24   : > { %1501 = vmatmul.msk.bf16.gmra.mxu1 %vm321_vm1, %v1604_v18  ;;  %v290_v18 = vrot.slane %v288_v14, 1  ;;  %v747_v42 = vshll.u32 %v1629_v37, 16  ;;  %v745_v45 = vor.u32 %v743_v41, %v741_v33  ;;  %v751_v58 = vshrl.u32 %v1629_v37, 16 }
  0x25   : > { %v307_v49 = vsel %vm247_vm2, %v302_v43, %v306_v44 }
  0x26   : > { %v291_v21 = vsel %vm247_vm2, %v286_v17, %v290_v18  ;;  %v294_v30 = vor.u32 %v292_v26, %v290_v18 }
  0x28   : > { %v299_v34 = vsel %vm247_vm2, %v294_v30, %v298_v31 }
  0x2a   : > { %1489 = vmatmul.msk.bf16.gmra.mxu0 %vm321_vm1, %v267_v46  ;;  %v749_v46 = vrot.slane %v747_v42, 1 }
  0x2c   : > { %1593 = vmatmul.msk.bf16.gmra.mxu3 %vm321_vm1, %v710_v47  ;;  %v200_v47 = vld [vmem:[%s1748_s4 + $0x40] sm:$0x1]  ;;  %v750_v51 = vsel %vm247_vm2, %v745_v45, %v749_v46  ;;  %v753_v62 = vor.u32 %v751_v58, %v749_v46 }
  0x33   : > { %1548 = vmatmul.msk.bf16.gmra.mxu2 %vm321_vm1, %v1615_v50  ;;  %v237_v50 = vunpack.c.l.b16 %v200_v47 }
  0x34   : > { %1502 = vmatmul.msk.bf16.gmra.mxu1 %vm321_vm1, %v1605_v35  ;;  %v742_v35 = vsel %vm247_vm2, %v737_v32, %v741_v33 }
  0x35   : > { %v246_v53 = vpack.c.b16 %v237_v50, %v237_v50 }
  0x37   : > { %v312_v57 = vshll.u32 %v246_v53, 16 }
  0x3a   : > { %1490 = vmatmul.msk.bf16.gmra.mxu0 %vm321_vm1, %v275_v59 }
  0x3c   : > { %1594 = vmatmul.msk.bf16.gmra.mxu3 %vm321_vm1, %v718_v60  ;;  %v310_v60 = vor.u32 %v308_v56, %v306_v44 }
  0x43   : > { %1549 = vmatmul.msk.bf16.gmra.mxu2 %vm321_vm1, %v1616_v63 }
  0x44   : > { %1503 = vmatmul.msk.bf16.gmra.mxu1 %vm321_vm1, %v1606_v48  ;;  %v644_v48 = vld [vmem:[%s1748_s4 + $0x48] sm:$0x1] }
  0x45   : > { %v681_v52 = vunpack.c.l.b16 %v644_v48 }
  0x47   : > { %v690_v54 = vpack.c.b16 %v681_v52, %v681_v52 }
  0x49   : > { %v755_v59 = vshll.u32 %v690_v54, 16 }
  0x4a   : > { %1491 = vmatmul.msk.bf16.gmra.mxu0 %vm321_vm1, %v283_v8 }
  0x4b   : > { %v757_v63 = vrot.slane %v755_v59, 1 }
  0x4c   : > { %1595 = vmatmul.msk.bf16.gmra.mxu3 %vm321_vm1, %v726_v9 }
  0x4d   : > { %v758_v1 = vsel %vm247_vm2, %v753_v62, %v757_v63 }
  0x53   : > { %1550 = vmatmul.msk.bf16.gmra.mxu2 %vm321_vm1, %v1617_v12 }
  0x54   : > { %1504 = vmatmul.msk.bf16.gmra.mxu1 %vm321_vm1, %v1607_v61  ;;  %v314_v61 = vrot.slane %v312_v57, 1 }
  0x56   : > { %v315_v0 = vsel %vm247_vm2, %v310_v60, %v314_v61 }
  0x5a   : > { %1492 = vmatmul.msk.bf16.gmra.mxu0 %vm321_vm1, %v291_v21 }
  0x5c   : > { %1596 = vmatmul.msk.bf16.gmra.mxu3 %vm321_vm1, %v734_v22 }
  0x63   : > { %1551 = vmatmul.msk.bf16.gmra.mxu2 %vm321_vm1, %v1618_v25 }
  0x64   : > { %1505 = vmatmul.msk.bf16.gmra.mxu1 %vm321_vm1, %v1608_v10 }
  0x6a   : > { %1493 = vmatmul.msk.bf16.gmra.mxu0 %vm321_vm1, %v299_v34 }
  0x6c   : > { %1597 = vmatmul.msk.bf16.gmra.mxu3 %vm321_vm1, %v742_v35 }
  0x73   : > { %1552 = vmatmul.msk.bf16.gmra.mxu2 %vm321_vm1, %v1619_v38 }
  0x74   : > { %1506 = vmatmul.msk.bf16.gmra.mxu1 %vm321_vm1, %v1609_v23 }
  0x7a   : > { %1494 = vmatmul.msk.bf16.gmra.mxu0 %vm321_vm1, %v307_v49 }
  0x7c   : > { %1598 = vmatmul.msk.bf16.gmra.mxu3 %vm321_vm1, %v750_v51 }
  0x83   : > { %1553 = vmatmul.msk.bf16.gmra.mxu2 %vm321_vm1, %v1620_v55 }
  0x84   : > { %1507 = vmatmul.msk.bf16.gmra.mxu1 %vm321_vm1, %v1610_v36 }
  0x8a   : > { %1495 = vmatmul.msk.bf16.gmra.mxu0 %vm321_vm1, %v315_v0 }
  0x8c   : > { %1599 = vmatmul.msk.bf16.gmra.mxu3 %vm321_vm1, %v758_v1 }
  0x91   : > { %v432_v2 = vpop.f32.mrf.mxu1 }
  0x96   : > { %v572_v3 = vpop.f32.mrf.mxu2 }
  0x97   : > { %v359_v4 = vpop.f32.mrf.mxu0 }
  0x98   : > { %v433_v5 = vadd.f32 %v432_v2, %v359_v4 }
  0x99   : > { %v434_v6 = vpop.f32.mrf.mxu1 }
  0x9a   : > { %v612_v7 = vadd.f32 %v572_v3, %v433_v5 }
  0x9e   : > { %v574_v9 = vpop.f32.mrf.mxu2 }
  0x9f   : > { %v800_v8 = vpop.f32.mrf.mxu3  ;;  %v361_v11 = vpop.f32.mrf.mxu0 }
  0xa0   : > { %v1825_v10 = vadd.f32 %v800_v8, %v612_v7  ;;  %v435_v12 = vadd.f32 %v434_v6, %v361_v11 }
  0xa1   : > { %v437_v13 = vpop.f32.mrf.mxu1 }
  0xa2   : > { %v613_v14 = vadd.f32 %v574_v9, %v435_v12  ;;  %v1167_v24 = vmul.f32 %v1825_v10, %v1825_v10  ;;  %v1130_v29 = vsel %vm1129_vm3, %v1825_v10, 0.0 }
  0xa4   : > { %v1183_v34 = vsel %vm1129_vm3, %v1167_v24, 0.0 }
  0xa6   : > { %v577_v16 = vpop.f32.mrf.mxu2 }
  0xa7   : > { %v802_v15 = vpop.f32.mrf.mxu3  ;;  %v364_v18 = vpop.f32.mrf.mxu0 }
  0xa8   : > { %v1827_v17 = vadd.f32 %v802_v15, %v613_v14  ;;  %v438_v19 = vadd.f32 %v437_v13, %v364_v18 }
  0xa9   : > { %v439_v20 = vpop.f32.mrf.mxu1 }
  0xaa   : > { %v614_v21 = vadd.f32 %v577_v16, %v438_v19 }
  0xae   : > { %v579_v23 = vpop.f32.mrf.mxu2 }
  0xaf   : > { %v805_v22 = vpop.f32.mrf.mxu3  ;;  %v366_v26 = vpop.f32.mrf.mxu0 }
  0xb0   : > { %v1831_v25 = vadd.f32 %v805_v22, %v614_v21  ;;  %v440_v27 = vadd.f32 %v439_v20, %v366_v26 }
  0xb1   : > { %v442_v28 = vpop.f32.mrf.mxu1 }
  0xb2   : > { %v1133_v30 = vsel %vm1129_vm3, %v1831_v25, 0.0  ;;  %v1169_v31 = vmul.f32 %v1831_v25, %v1831_v25  ;;  %v615_v33 = vadd.f32 %v579_v23, %v440_v27 }
  0xb3   : > { %v1134_v32 = vadd.f32 %v1133_v30, %v1130_v29 }
  0xb4   : > { %v1186_v35 = vsel %vm1129_vm3, %v1169_v31, 0.0 }
  0xb5   : > { %v1187_v36 = vadd.f32 %v1186_v35, %v1183_v34 }
  0xb6   : > { %v582_v38 = vpop.f32.mrf.mxu2 }
  0xb7   : > { %v807_v37 = vpop.f32.mrf.mxu3  ;;  %v369_v40 = vpop.f32.mrf.mxu0 }
  0xb8   : > { %v1841_v39 = vadd.f32 %v807_v37, %v615_v33  ;;  %v443_v41 = vadd.f32 %v442_v28, %v369_v40 }
  0xb9   : > { %v444_v42 = vpop.f32.mrf.mxu1 }
  0xba   : > { %v616_v43 = vadd.f32 %v582_v38, %v443_v41 }
  0xbe   : > { %v584_v45 = vpop.f32.mrf.mxu2 }
  0xbf   : > { %v810_v44 = vpop.f32.mrf.mxu3  ;;  %v371_v47 = vpop.f32.mrf.mxu0 }
  0xc0   : > { %v1843_v46 = vadd.f32 %v810_v44, %v616_v43  ;;  %v445_v48 = vadd.f32 %v444_v42, %v371_v47 }
  0xc1   : > { %v447_v49 = vpop.f32.mrf.mxu1 }
  0xc2   : > { %v1137_v50 = vsel %vm1129_vm3, %v1843_v46, 0.0  ;;  %v1171_v51 = vmul.f32 %v1843_v46, %v1843_v46  ;;  %v617_v53 = vadd.f32 %v584_v45, %v445_v48 }
  0xc3   : > { %v1849_v52 = vadd.f32 %v1137_v50, %v1134_v32 }
  0xc4   : > { %v1190_v54 = vsel %vm1129_vm3, %v1171_v51, 0.0 }
  0xc5   : > { %v1852_v55 = vadd.f32 %v1190_v54, %v1187_v36 }
  0xc6   : > { %v587_v57 = vpop.f32.mrf.mxu2 }
  0xc7   : > { %v812_v56 = vpop.f32.mrf.mxu3  ;;  %v374_v59 = vpop.f32.mrf.mxu0 }
  0xc8   : > { %v1854_v58 = vadd.f32 %v812_v56, %v617_v53  ;;  %v448_v32 = vadd.f32 %v447_v49, %v374_v59 }
  0xc9   : > { %v449_v60 = vpop.f32.mrf.mxu1 }
  0xca   : > { %v618_v34 = vadd.f32 %v587_v57, %v448_v32 }
  0xce   : > { %v589_v62 = vpop.f32.mrf.mxu2 }
  0xcf   : > { %v815_v61 = vpop.f32.mrf.mxu3  ;;  %v376_v63 = vpop.f32.mrf.mxu0 }
  0xd0   : > { %v450_v0 = vadd.f32 %v449_v60, %v376_v63  ;;  %v1868_v43 = vadd.f32 %v815_v61, %v618_v34 }
  0xd1   : > { %v452_v1 = vpop.f32.mrf.mxu1 }
  0xd2   : > { %v619_v2 = vadd.f32 %v589_v62, %v450_v0  ;;  %v1173_v48 = vmul.f32 %v1868_v43, %v1868_v43  ;;  %v1141_v51 = vsel %vm1129_vm3, %v1868_v43, 0.0 }
  0xd3   : > { %v1142_v63 = vadd.f32 %v1141_v51, %v1849_v52 }
  0xd4   : > { %v1194_v60 = vsel %vm1129_vm3, %v1173_v48, 0.0 }
  0xd6   : > { %v592_v4 = vpop.f32.mrf.mxu2 }
  0xd7   : > { %v817_v3 = vpop.f32.mrf.mxu3  ;;  %v379_v6 = vpop.f32.mrf.mxu0 }
  0xd8   : > { %v1856_v5 = vadd.f32 %v817_v3, %v619_v2  ;;  %v453_v33 = vadd.f32 %v452_v1, %v379_v6  ;;  %v1195_v6 = vadd.f32 %v1194_v60, %v1852_v55 }
  0xd9   : > { %v454_v7 = vpop.f32.mrf.mxu1 }
  0xda   : > { %v620_v38 = vadd.f32 %v592_v4, %v453_v33 }
  0xde   : > { %v594_v9 = vpop.f32.mrf.mxu2 }
  0xdf   : > { %v820_v8 = vpop.f32.mrf.mxu3  ;;  %v381_v11 = vpop.f32.mrf.mxu0 }
  0xe0   : > { %v455_v12 = vadd.f32 %v454_v7, %v381_v11  ;;  %v1870_v45 = vadd.f32 %v820_v8, %v620_v38 }
  0xe1   : > { %v457_v13 = vpop.f32.mrf.mxu1 }
  0xe2   : > { %v621_v14 = vadd.f32 %v594_v9, %v455_v12  ;;  %v1175_v53 = vmul.f32 %v1870_v45, %v1870_v45  ;;  %v1145_v61 = vsel %vm1129_vm3, %v1870_v45, 0.0 }
  0xe3   : > { %v1146_v7 = vadd.f32 %v1145_v61, %v1142_v63 }
  0xe4   : > { %v1198_v1 = vsel %vm1129_vm3, %v1175_v53, 0.0 }
  0xe5   : > { %v1199_v11 = vadd.f32 %v1198_v1, %v1195_v6 }
  0xe6   : > { %v597_v16 = vpop.f32.mrf.mxu2 }
  0xe7   : > { %v822_v15 = vpop.f32.mrf.mxu3  ;;  %v384_v19 = vpop.f32.mrf.mxu0 }
  0xe8   : > { %v1858_v18 = vadd.f32 %v822_v15, %v621_v14  ;;  %v458_v35 = vadd.f32 %v457_v13, %v384_v19 }
  0xe9   : > { %v459_v20 = vpop.f32.mrf.mxu1 }
  0xea   : > { %v622_v44 = vadd.f32 %v597_v16, %v458_v35 }
  0xee   : > { %v599_v22 = vpop.f32.mrf.mxu2 }
  0xef   : > { %v825_v21 = vpop.f32.mrf.mxu3  ;;  %v386_v23 = vpop.f32.mrf.mxu0 }
  0xf0   : > { %v460_v24 = vadd.f32 %v459_v20, %v386_v23  ;;  %v1874_v49 = vadd.f32 %v825_v21, %v622_v44 }
  0xf1   : > { %v462_v27 = vpop.f32.mrf.mxu1 }
  0xf2   : > { %v623_v26 = vadd.f32 %v599_v22, %v460_v24  ;;  %v1177_v62 = vmul.f32 %v1874_v49, %v1874_v49  ;;  %v1149_v2 = vsel %vm1129_vm3, %v1874_v49, 0.0 }
  0xf3   : > { %v1150_v52 = vadd.f32 %v1149_v2, %v1146_v7 }
  0xf4   : > { %v1202_v8 = vsel %vm1129_vm3, %v1177_v62, 0.0 }
  0xf5   : > { %v1203_v15 = vadd.f32 %v1202_v8, %v1199_v11 }
  0xf6   : > { %v602_v29 = vpop.f32.mrf.mxu2 }
  0xf7   : > { %v827_v28 = vpop.f32.mrf.mxu3  ;;  %v389_v31 = vpop.f32.mrf.mxu0 }
  0xf8   : > { %v1860_v30 = vadd.f32 %v827_v28, %v623_v26  ;;  %v463_v40 = vadd.f32 %v462_v27, %v389_v31 }
  0xf9   : > { %v1862_v36 = vpop.f32.mrf.mxu1 }
  0xfa   : > { %v624_v47 = vadd.f32 %v602_v29, %v463_v40 }
  0xfe   : > { %v1866_v42 = vpop.f32.mrf.mxu2 }
  0xff   : > { %v830_v37 = vpop.f32.mrf.mxu3  ;;  %v1864_v41 = vpop.f32.mrf.mxu0 }
 0x100   : > { %v1882_v54 = vadd.f32 %v830_v37, %v624_v47 }
 0x101   : > { %v467_v56 = vpop.f32.mrf.mxu1 }
 0x102   : > { %v1179_v3 = vmul.f32 %v1882_v54, %v1882_v54  ;;  %v1153_v9 = vsel %vm1129_vm3, %v1882_v54, 0.0 }
 0x103   : > { %v1154_v16 = vadd.f32 %v1153_v9, %v1150_v52 }
 0x104   : > { %v1206_v13 = vsel %vm1129_vm3, %v1179_v3, 0.0 }
 0x105   : > { %v1207_v20 = vadd.f32 %v1206_v13, %v1203_v15 }
 0x106   : > { %v607_v0 = vpop.f32.mrf.mxu2 }
 0x107   : > { %v1876_v50 = vpop.f32.mrf.mxu3  ;;  %v394_v57 = vpop.f32.mrf.mxu0 }
 0x108   : > { %v468_v59 = vadd.f32 %v467_v56, %v394_v57 }
 0x109   : > { %v469_v2 = vpop.f32.mrf.mxu1 }
 0x10a   : > { %v626_v4 = vadd.f32 %v607_v0, %v468_v59 }
 0x10f   : > { %v835_v12 = vpop.f32.mrf.mxu3 }
 0x110   : > { %v1900_v14 = vadd.f32 %v835_v12, %v626_v4 }
 0x112   : > { %v1157_v19 = vsel %vm1129_vm3, %v1900_v14, 0.0  ;;  %v1181_v55 = vmul.f32 %v1900_v14, %v1900_v14 }
 0x113   : > { %v1158_v21 = vadd.f32 %v1157_v19, %v1154_v16 }
 0x114   : > { %v1210_v22 = vsel %vm1129_vm3, %v1181_v55, 0.0 }
 0x115   : > { %v1161_v23 = vrot.slane %v1158_v21, 4  ;;  %v1211_v24 = vadd.f32 %v1210_v22, %v1207_v20 }
 0x117   : > { %v1162_v26 = vadd.f32 %v1161_v23, %v1158_v21  ;;  %v1214_v27 = vrot.slane %v1211_v24, 4  ;;  %v837_v55 = vpop.f32.mrf.mxu3 }
 0x119   : > { %v1163_v28 = vrot.slane %v1162_v26, 2  ;;  %v1215_v29 = vadd.f32 %v1214_v27, %v1211_v24 }
 0x11b   : > { %v1164_v31 = vadd.f32 %v1163_v28, %v1162_v26  ;;  %v1216_v32 = vrot.slane %v1215_v29, 2 }
 0x11d   : > { %v1165_v33 = vrot.slane %v1164_v31, 1  ;;  %v1217_v34 = vadd.f32 %v1216_v32, %v1215_v29 }
 0x11f   : > { %v1166_v35 = vadd.f32 %v1165_v33, %v1164_v31  ;;  %v1218_v37 = vrot.slane %v1217_v34, 1 }
 0x121   : > { %v1219_v38 = vadd.f32 %v1218_v37, %v1217_v34  ;;  %v1220_v40 = vmul.f32 0.015625, %v1166_v35 }
 0x123   : > { %v1221_v44 = vmul.f32 0.015625, %v1219_v38  ;;  %v1222_v47 = vmul.f32 %v1220_v40, %v1220_v40  ;;  %v1224_v48 = vsub.f32 %v1825_v10, %v1220_v40  ;;  %v1225_v51 = vsub.f32 %v1827_v17, %v1220_v40 }
 0x124   : > { %v1226_v53 = vsub.f32 %v1831_v25, %v1220_v40  ;;  %v1227_v56 = vsub.f32 %v1841_v39, %v1220_v40  ;;  %v1228_v57 = vsub.f32 %v1843_v46, %v1220_v40  ;;  %v1229_v59 = vsub.f32 %v1854_v58, %v1220_v40  ;;  %v396_v39 = vpop.f32.mrf.mxu0 }
 0x125   : > { %v1223_v60 = vsub.f32 %v1221_v44, %v1222_v47  ;;  %v1231_v61 = vsub.f32 %v1856_v5, %v1220_v40  ;;  %v1233_v62 = vsub.f32 %v1858_v18, %v1220_v40  ;;  %v1235_v63 = vsub.f32 %v1860_v30, %v1220_v40  ;;  %v609_v30 = vpop.f32.mrf.mxu2 }
 0x126   : > { %v465_v17 = vadd.f32 %v1862_v36, %v1864_v41  ;;  %v470_v3 = vadd.f32 %v469_v2, %v396_v39  ;;  %v1230_v6 = vsub.f32 %v1868_v43, %v1220_v40  ;;  %v1232_v7 = vsub.f32 %v1870_v45, %v1220_v40 }
 0x127   : > { %v1240_v0 = vadd.f32 1e-05, %v1223_v60  ;;  %v1234_v36 = vsub.f32 %v1874_v49, %v1220_v40  ;;  %v1236_v8 = vsub.f32 %v1882_v54, %v1220_v40 }
 0x128   : > { %v625_v58 = vadd.f32 %v1866_v42, %v465_v17  ;;  %v627_v41 = vadd.f32 %v609_v30, %v470_v3  ;;  %v1238_v42 = vsub.f32 %v1900_v14, %v1220_v40 }
 0x129   : > { %1656 = vrsqrt.f32 %v1240_v0  ;;  %vm1247_vm5 = vweird.f32 %v1240_v0 }
 0x12a   : > { %v853_v5 = vadd.f32 %v1876_v50, %v625_v58  ;;  %v855_v23 = vadd.f32 %v837_v55, %v627_v41 }
 0x12c   : > { %v1237_v9 = vsub.f32 %v853_v5, %v1220_v40  ;;  %v1239_v24 = vsub.f32 %v855_v23, %v1220_v40 }
 0x12f   : > { %v1657_v10 = vpop.eup %1656 }
 0x130   : > { %v1242_v1 = vmul.f32 %v1657_v10, %v1240_v0  ;;  %vm1248_vm4 = vweird.f32 %v1657_v10 }
 0x131   : > { %vm1249_vm6 = vmor %vm1247_vm5, %vm1248_vm4 }
 0x132   : > { %v1243_v25 = vmul.f32 %v1657_v10, %v1242_v1 }
 0x134   : > { %v1244_v46 = vmul.f32 0.5, %v1243_v25 }
 0x136   : > { %v1245_v4 = vsub.f32 1.5, %v1244_v46 }
 0x138   : > { %v1246_v18 = vmul.f32 %v1657_v10, %v1245_v4 }
 0x13a   : > { %v1250_v11 = vsel %vm1249_vm6, %v1657_v10, %v1246_v18 }
 0x13b   : > { %v1251_v52 = vmul.f32 %v1250_v11, %v1224_v48  ;;  %v1252_v12 = vmul.f32 %v1250_v11, %v1225_v51  ;;  %v1253_v50 = vmul.f32 %v1250_v11, %v1226_v53  ;;  %v1254_v13 = vmul.f32 %v1250_v11, %v1227_v56 }
 0x13c   : > { %v1255_v15 = vmul.f32 %v1250_v11, %v1228_v57  ;;  %v1256_v16 = vmul.f32 %v1250_v11, %v1229_v59  ;;  %v1257_v19 = vmul.f32 %v1250_v11, %v1230_v6  ;;  %v1258_v43 = vmul.f32 %v1250_v11, %v1231_v61 }
 0x13d   : > { %v1259_v45 = vmul.f32 %v1250_v11, %v1232_v7  ;;  %v1260_v20 = vmul.f32 %v1250_v11, %v1233_v62  ;;  %v1261_v49 = vmul.f32 %v1250_v11, %v1234_v36  ;;  %v1925_v21 = vmul.f32 %v1250_v11, %v1235_v63 }
 0x13e   : > { %v1927_v54 = vmul.f32 %v1250_v11, %v1236_v8  ;;  %v1929_v22 = vmul.f32 %v1250_v11, %v1237_v9  ;;  %v1931_v14 = vmul.f32 %v1250_v11, %v1238_v42  ;;  %v1283_v26 = vmul.f32 0.2, %v1251_v52 }
 0x13f   : > { %v1284_v27 = vmul.f32 0.2, %v1252_v12  ;;  %v1285_v28 = vmul.f32 0.2, %v1253_v50  ;;  %v1933_v29 = vmul.f32 %v1250_v11, %v1239_v24  ;;  %vm1267_vm7 = vcmp.ge.f32.partialorder %v1251_v52, 0.0 }
 0x140   : > { %vm1268_vm8 = vcmp.ge.f32.partialorder %v1252_v12, 0.0  ;;  %vm1269_vm9 = vcmp.ge.f32.partialorder %v1253_v50, 0.0  ;;  %v1286_v31 = vmul.f32 0.2, %v1254_v13  ;;  %vm1270_vm10 = vcmp.ge.f32.partialorder %v1254_v13, 0.0 }
 0x141   : > { %v1287_v32 = vmul.f32 0.2, %v1255_v15  ;;  %vm1271_vm11 = vcmp.ge.f32.partialorder %v1255_v15, 0.0  ;;  %vm1272_vm12 = vcmp.ge.f32.partialorder %v1256_v16, 0.0  ;;  %v1288_v33 = vmul.f32 0.2, %v1256_v16 }
 0x142   : > { %v1289_v34 = vmul.f32 0.2, %v1257_v19  ;;  %v1299_v35 = vsel %vm1267_vm7, %v1251_v52, %v1283_v26  ;;  %v1300_v37 = vsel %vm1268_vm8, %v1252_v12, %v1284_v27  ;;  %v1301_v38 = vsel %vm1269_vm9, %v1253_v50, %v1285_v28 }
 0x143   : > { %vm1273_vm14 = vcmp.ge.f32.partialorder %v1257_v19, 0.0  ;;  %vm1274_vm15 = vcmp.ge.f32.partialorder %v1258_v43, 0.0  ;;  %v1290_v40 = vmul.f32 0.2, %v1258_v43  ;;  %v1302_v44 = vsel %vm1270_vm10, %v1254_v13, %v1286_v31 }
 0x144   : > { %vm1275_vm0 = vcmp.ge.f32.partialorder %v1259_v45, 0.0  ;;  %v1291_v47 = vmul.f32 0.2, %v1259_v45  ;;  %v1292_v48 = vmul.f32 0.2, %v1260_v20  ;;  %v1303_v51 = vsel %vm1271_vm11, %v1255_v15, %v1287_v32 }
 0x145   : > { %v1304_v53 = vsel %vm1272_vm12, %v1256_v16, %v1288_v33  ;;  %v1315_v56 = vpack.c.bf16 %v1299_v35, %v1299_v35  ;;  %v1316_v57 = vpack.c.bf16 %v1300_v37, %v1300_v37  ;;  %v1317_v59 = vpack.c.bf16 %v1301_v38, %v1301_v38 }
 0x146   : > { %vm1276_vm1 = vcmp.ge.f32.partialorder %v1260_v20, 0.0  ;;  %v1293_v60 = vmul.f32 0.2, %v1261_v49  ;;  %v1305_v61 = vsel %vm1273_vm14, %v1257_v19, %v1289_v34  ;;  %v1318_v62 = vpack.c.bf16 %v1302_v44, %v1302_v44 }
 0x147   : > { %vm1277_vm2 = vcmp.ge.f32.partialorder %v1261_v49, 0.0  ;;  %v1294_v63 = vmul.f32 0.2, %v1925_v21  ;;  %v1306_v0 = vsel %vm1274_vm15, %v1258_v43, %v1290_v40  ;;  %v1319_v10 = vpack.c.bf16 %v1303_v51, %v1303_v51  ;;  %1332 = vst.msk [vmem:[%s1939_s8] sm:$0xf] %vm1331_vm13, %v1315_v56 }
 0x148   : > { %vm1278_vm3 = vcmp.ge.f32.partialorder %v1925_v21, 0.0  ;;  %v1295_v1 = vmul.f32 0.2, %v1927_v54  ;;  %v1307_v17 = vsel %vm1275_vm0, %v1259_v45, %v1291_v47  ;;  %v1320_v25 = vpack.c.bf16 %v1304_v53, %v1304_v53  ;;  %1333 = vst.msk [vmem:[%s1939_s8 + $0x4] sm:$0xf] %vm1331_vm13, %v1316_v57 }
 0x149   : > { %vm1279_vm4 = vcmp.ge.f32.partialorder %v1927_v54, 0.0  ;;  %v1296_v39 = vmul.f32 0.2, %v1929_v22  ;;  %v1308_v2 = vsel %vm1276_vm1, %v1260_v20, %v1292_v48  ;;  %v1321_v46 = vpack.c.bf16 %v1305_v61, %v1305_v61  ;;  %1334 = vst.msk [vmem:[%s1939_s8 + $0x8] sm:$0xf] %vm1331_vm13, %v1317_v59 }
 0x14a   : > { %vm1280_vm5 = vcmp.ge.f32.partialorder %v1929_v22, 0.0  ;;  %v1297_v3 = vmul.f32 0.2, %v1931_v14  ;;  %v1309_v58 = vsel %vm1277_vm2, %v1261_v49, %v1293_v60  ;;  %v1322_v4 = vpack.c.bf16 %v1306_v0, %v1306_v0  ;;  %1335 = vst.msk [vmem:[%s1939_s8 + $0xc] sm:$0xf] %vm1331_vm13, %v1318_v62 }
 0x14b   : > { %vm1281_vm6 = vcmp.ge.f32.partialorder %v1931_v14, 0.0  ;;  %v1310_v5 = vsel %vm1278_vm3, %v1925_v21, %v1294_v63  ;;  %v1323_v18 = vpack.c.bf16 %v1307_v17, %v1307_v17  ;;  %1336 = vst.msk [vmem:[%s1939_s8 + $0x10] sm:$0xf] %vm1331_vm13, %v1319_v10  ;;  %v1298_v30 = vmul.f32 0.2, %v1933_v29 }
 0x14c   : > { %v1311_v6 = vsel %vm1279_vm4, %v1927_v54, %v1295_v1  ;;  %v1324_v7 = vpack.c.bf16 %v1308_v2, %v1308_v2  ;;  %1337 = vst.msk [vmem:[%s1939_s8 + $0x14] sm:$0xf] %vm1331_vm13, %v1320_v25  ;;  %vm1282_vm7 = vcmp.ge.f32.partialorder %v1933_v29, 0.0  ;;  %v1312_v36 = vsel %vm1280_vm5, %v1929_v22, %v1296_v39 }
 0x14d   : > { %v1325_v41 = vpack.c.bf16 %v1309_v58, %v1309_v58  ;;  %1338 = vst.msk [vmem:[%s1939_s8 + $0x18] sm:$0xf] %vm1331_vm13, %v1321_v46  ;;  %v1313_v8 = vsel %vm1281_vm6, %v1931_v14, %v1297_v3  ;;  %v1326_v9 = vpack.c.bf16 %v1310_v5, %v1310_v5  ;;  %v1327_v42 = vpack.c.bf16 %v1311_v6, %v1311_v6 }
 0x14e   : > { %1339 = vst.msk [vmem:[%s1939_s8 + $0x1c] sm:$0xf] %vm1331_vm13, %v1322_v4  ;;  %v1314_v11 = vsel %vm1282_vm7, %v1933_v29, %v1298_v30  ;;  %v1328_v52 = vpack.c.bf16 %v1312_v36, %v1312_v36  ;;  %v1329_v12 = vpack.c.bf16 %v1313_v8, %v1313_v8 }
 0x14f   : > { %1340 = vst.msk [vmem:[%s1939_s8 + $0x20] sm:$0xf] %vm1331_vm13, %v1323_v18  ;;  %v1330_v50 = vpack.c.bf16 %v1314_v11, %v1314_v11 }
 0x150   : > { %1341 = vst.msk [vmem:[%s1939_s8 + $0x24] sm:$0xf] %vm1331_vm13, %v1324_v7 }
 0x151   : > { %1342 = vst.msk [vmem:[%s1939_s8 + $0x28] sm:$0xf] %vm1331_vm13, %v1325_v41 }
 0x152   : > { %1343 = vst.msk [vmem:[%s1939_s8 + $0x2c] sm:$0xf] %vm1331_vm13, %v1326_v9 }
 0x153   : > { %1344 = vst.msk [vmem:[%s1939_s8 + $0x30] sm:$0xf] %vm1331_vm13, %v1327_v42 }
 0x154   : > { %1345 = vst.msk [vmem:[%s1939_s8 + $0x34] sm:$0xf] %vm1331_vm13, %v1328_v52 }
 0x155   : > { %1346 = vst.msk [vmem:[%s1939_s8 + $0x38] sm:$0xf] %vm1331_vm13, %v1329_v12 }
 0x156   : > { %1347 = vst.msk [vmem:[%s1939_s8 + $0x3c] sm:$0xf] %vm1331_vm13, %v1330_v50 }
 0x157 PF: > { %s12_s11 = sadd.s32 1, %s1680_s11   ;;  %s2008_s9 = smov %s1676_s10 }
 0x158   : > { %p9_p5 = scmp.ge.s32.totalorder %s12_s11, 4   ;;  %s2009_s10 = smov %s2011_s12 }
 0x15a   :  { %11 = sbr.rel (!%p9_p5) target bundleno = 2 (0x2), region = 64 }

// kernel: local_discriminator_forward.5
= control target key start
LH: loop header
LB: loop body
LE: loop exit
PB: predicated region body
PF: predicated region fallthrough
CT: control target
= control target key end

     0   :  { %s1765_s9 = smov 0   ;;  %s1767_s10 = smov 0   ;;  %s2079_s0 = inlined_call_operand.vmem [shape: bf16[2,48,256], index: 0, kind: input, shape index: {}]   ;;  %s2080_s1 = inlined_call_operand.vmem [shape: bf16[4,256,128], index: 1, kind: input, shape index: {}]   ;;  %s2081_s2 = inlined_call_operand.vmem [shape: bf16[2,32,128], index: 2, kind: output, shape index: {}]  }
   0x1   :  { %s1769_s11 = smov 0  }
   0x2 LB: > { %s24_s12 = sadd.s32 1, %s1744_s10  ;;  %p1245_p0 = scmp.ge.s32.totalorder %s1748_s11, 1  ;;  %s1748_s11 = sphi %s1769_s11, %s12_s11   ;;  %s1744_s10 = sphi %s1767_s10, %s2083_s10   ;;  %s1740_s9 = sphi %s1765_s9, %s2082_s9  }
   0x3   : > { %p26_p1 = scmp.ge.s32.totalorder %s24_s12, 2  ;;  %p135_p2 = scmp.lt.s32.totalorder %s1748_s11, 3 }
   0x5   : > { %s2085_s12 = smov (%p26_p1, %s24_s12), 0  ;;  %p136_p3 = pnand %p1245_p0, %p135_p2 }
   0x6   : > { %p164_p4 = scmp.lt.s32.totalorder (!%p136_p3), %s1740_s9, 1 }
   0x7   : > { %139 = sbr.rel (%p136_p3) target bundleno = 290 (0x122), region = 28 }
   0xc   : > { %v1643_v0 = vld [vmem:[%s2080_s1 + $0xb8] sm:$0xff]  ;;  %v1642_v4 = vld [vmem:[%s2080_s1 + $0xb0] sm:$0xff]  ;;  %s2087_s9 = smov (!%p164_p4, %s1740_s9), 1  ;;  %v1641_v8 = vld [vmem:[%s2080_s1 + $0xa8] sm:$0xff]  ;;  %vm272_vm0 = vsmask.f32 7424 }
   0xd   : > { %v1651_v1 = vld [vmem:[%s2080_s1 + $0xf8] sm:$0xff]  ;;  %413 = vmatpush.bf16.msra.mxu0 %v1643_v0  ;;  %v1650_v5 = vld [vmem:[%s2080_s1 + $0xf0] sm:$0xff]  ;;  %s1699_s29 = smul.u32 48, %s2087_s9  ;;  %v1649_v9 = vld [vmem:[%s2080_s1 + $0xe8] sm:$0xff] }
   0xe   : > { %v1627_v2 = vld [vmem:[%s2080_s1 + $0x38] sm:$0xff]  ;;  %432 = vmatpush.bf16.msra.mxu1 %v1651_v1  ;;  %v1626_v6 = vld [vmem:[%s2080_s1 + $0x30] sm:$0xff]  ;;  %v1625_v10 = vld [vmem:[%s2080_s1 + $0x28] sm:$0xff] }
   0xf   : > { %v1635_v3 = vld [vmem:[%s2080_s1 + $0x78] sm:$0xff]  ;;  %551 = vmatpush.bf16.msra.mxu2 %v1627_v2  ;;  %v1634_v7 = vld [vmem:[%s2080_s1 + $0x70] sm:$0xff]  ;;  %v1633_v11 = vld [vmem:[%s2080_s1 + $0x68] sm:$0xff]  ;;  %s1825_s16 = scalar_lea.vmem %s2079_s0, %s1699_s29 }
  0x10   : > { %570 = vmatpush.bf16.msra.mxu3 %v1635_v3  ;;  %v1640_v12 = vld [vmem:[%s2080_s1 + $0xa0] sm:$0xff]  ;;  %v1841_v17 = vld [vmem:[%s1825_s16 + $0x8] sm:$0xff]  ;;  %v1844_v18 = vld [vmem:[%s1825_s16 + $0x10] sm:$0xff] }
  0x11   : > { %414 = vmatpush.bf16.msra.mxu0 %v1642_v4  ;;  %v1648_v13 = vld [vmem:[%s2080_s1 + $0xe0] sm:$0xff]  ;;  %v1847_v19 = vld [vmem:[%s1825_s16 + $0x18] sm:$0xff]  ;;  %v258_v22 = vunpack.c.l.b16 %v1841_v17  ;;  %v259_v23 = vunpack.c.h.b16 %v1841_v17  ;;  %v260_v24 = vunpack.c.l.b16 %v1844_v18  ;;  %v261_v29 = vunpack.c.h.b16 %v1844_v18  ;;  %v1638_v35 = vld [vmem:[%s2080_s1 + $0x90] sm:$0xff] }
  0x12   : > { %433 = vmatpush.bf16.msra.mxu1 %v1650_v5  ;;  %v1624_v14 = vld [vmem:[%s2080_s1 + $0x20] sm:$0xff]  ;;  %v262_v25 = vunpack.c.l.b16 %v1847_v19  ;;  %v1639_v26 = vld [vmem:[%s2080_s1 + $0x98] sm:$0xff]  ;;  %v263_v30 = vunpack.c.h.b16 %v1847_v19  ;;  %v1646_v36 = vld [vmem:[%s2080_s1 + $0xd0] sm:$0xff] }
  0x13   : > { %552 = vmatpush.bf16.msra.mxu2 %v1626_v6  ;;  %v1632_v15 = vld [vmem:[%s2080_s1 + $0x60] sm:$0xff]  ;;  %v1647_v27 = vld [vmem:[%s2080_s1 + $0xd8] sm:$0xff]  ;;  %v1622_v40 = vld [vmem:[%s2080_s1 + $0x10] sm:$0xff] }
  0x14   : > { %571 = vmatpush.bf16.msra.mxu3 %v1634_v7  ;;  %v181_v16 = vld [vmem:[%s1825_s16] sm:$0xff]  ;;  %v1623_v32 = vld [vmem:[%s2080_s1 + $0x18] sm:$0xff]  ;;  %v1879_v34 = vpack.c.b16 %v262_v25, %v260_v24  ;;  %v1892_v38 = vpack.c.b16 %v263_v30, %v261_v29  ;;  %v1630_v41 = vld [vmem:[%s2080_s1 + $0x50] sm:$0xff] }
  0x15   : > { %415 = vmatpush.bf16.msra.mxu0 %v1641_v8  ;;  %v256_v20 = vunpack.c.l.b16 %v181_v16  ;;  %v257_v21 = vunpack.c.h.b16 %v181_v16  ;;  %v1631_v33 = vld [vmem:[%s2080_s1 + $0x58] sm:$0xff]  ;;  %v1637_v44 = vld [vmem:[%s2080_s1 + $0x88] sm:$0xff]  ;;  %v1636_v52 = vld [vmem:[%s2080_s1 + $0x80] sm:$0xff] }
  0x16   : > { %434 = vmatpush.bf16.msra.mxu1 %v1649_v9  ;;  %v281_v43 = vshll.u32 %v1879_v34, 16  ;;  %v1645_v45 = vld [vmem:[%s2080_s1 + $0xc8] sm:$0xff]  ;;  %v293_v49 = vshll.u32 %v1892_v38, 16  ;;  %v1644_v53 = vld [vmem:[%s2080_s1 + $0xc0] sm:$0xff]  ;;  %v1679_v61 = vld [vmem:[%s2080_s1 + $0x1b8] sm:$0xff] }
  0x17   : > { %553 = vmatpush.bf16.msra.mxu2 %v1625_v10  ;;  %v1861_v28 = vpack.c.b16 %v258_v22, %v256_v20  ;;  %v1867_v31 = vpack.c.b16 %v259_v23, %v257_v21  ;;  %v1621_v50 = vld [vmem:[%s2080_s1 + $0x8] sm:$0xff]  ;;  %v1620_v58 = vld [vmem:[%s2080_s1] sm:$0xff]  ;;  %v1687_v62 = vld [vmem:[%s2080_s1 + $0x1f8] sm:$0xff] }
  0x18   : > { %572 = vmatpush.bf16.msra.mxu3 %v1633_v11  ;;  %v1629_v51 = vld [vmem:[%s2080_s1 + $0x48] sm:$0xff]  ;;  %v283_v55 = vrot.slane %v281_v43, 1  ;;  %v295_v57 = vrot.slane %v293_v49, 1  ;;  %v1628_v59 = vld [vmem:[%s2080_s1 + $0x40] sm:$0xff]  ;;  %v1659_v3 = vld [vmem:[%s2080_s1 + $0x138] sm:$0xff] }
  0x19   : > { %416 = vmatpush.bf16.msra.mxu0 %v1640_v12  ;;  %v276_v37 = vshll.u32 %v1861_v28, 16  ;;  %v288_v39 = vshll.u32 %v1867_v31, 16  ;;  %v274_v42 = vshrl.u32 %v1861_v28, 16  ;;  %v286_v47 = vshrl.u32 %v1867_v31, 16  ;;  %v217_v60 = vld [vmem:[%s1825_s16 + $0x20] sm:$0x11] }
  0x1a   : > { %435 = vmatpush.bf16.msra.mxu1 %v1648_v13  ;;  %v264_v1 = vunpack.c.l.b16 %v217_v60  ;;  %v265_v2 = vunpack.c.h.b16 %v217_v60  ;;  %v1667_v4 = vld [vmem:[%s2080_s1 + $0x178] sm:$0xff]  ;;  %v1678_v5 = vld [vmem:[%s2080_s1 + $0x1b0] sm:$0xff]  ;;  %v1677_v11 = vld [vmem:[%s2080_s1 + $0x1a8] sm:$0xff]  ;;  %v297_v13 = vshrl.u32 %v1879_v34, 16 }
  0x1b   : > { %554 = vmatpush.bf16.msra.mxu2 %v1624_v14  ;;  %v278_v46 = vrot.slane %v276_v37, 1  ;;  %v290_v48 = vrot.slane %v288_v39, 1  ;;  %v1686_v6 = vld [vmem:[%s2080_s1 + $0x1f0] sm:$0xff]  ;;  %v1685_v12 = vld [vmem:[%s2080_s1 + $0x1e8] sm:$0xff]  ;;  %v1675_v37 = vld [vmem:[%s2080_s1 + $0x198] sm:$0xff] }
  0x1c   : > { %573 = vmatpush.bf16.msra.mxu3 %v1632_v15  ;;  %v270_v7 = vpack.c.b16 %v264_v1, %v264_v1  ;;  %v271_v8 = vpack.c.b16 %v265_v2, %v265_v2  ;;  %v1658_v9 = vld [vmem:[%s2080_s1 + $0x130] sm:$0xff]  ;;  %v305_v15 = vshrl.u32 %v1892_v38, 16  ;;  %v1657_v20 = vld [vmem:[%s2080_s1 + $0x128] sm:$0xff]  ;;  %v1683_v39 = vld [vmem:[%s2080_s1 + $0x1d8] sm:$0xff] }
  0x1d   : > { %417 = vmatpush.bf16.msra.mxu0 %v1639_v26  ;;  %v279_v54 = vor.u32 %v278_v46, %v274_v42  ;;  %v291_v56 = vor.u32 %v290_v48, %v286_v47  ;;  %v1666_v10 = vld [vmem:[%s2080_s1 + $0x170] sm:$0xff]  ;;  %v1665_v21 = vld [vmem:[%s2080_s1 + $0x168] sm:$0xff]  ;;  %v1676_v26 = vld [vmem:[%s2080_s1 + $0x1a0] sm:$0xff] }
  0x1e   : > { %436 = vmatpush.bf16.msra.mxu1 %v1647_v27  ;;  %v301_v14 = vshll.u32 %v270_v7, 16  ;;  %v309_v16 = vshll.u32 %v271_v8, 16  ;;  %v1684_v27 = vld [vmem:[%s2080_s1 + $0x1e0] sm:$0xff]  ;;  %v1668_v42 = vld [vmem:[%s1825_s16 + $0xc] sm:$0xf]  ;;  %v1655_v46 = vld [vmem:[%s2080_s1 + $0x118] sm:$0xff] }
  0x1f   : > { %555 = vmatpush.bf16.msra.mxu2 %v1623_v32  ;;  %v284_v63 = vsel %vm272_vm0, %v279_v54, %v283_v55  ;;  %v296_v0 = vsel %vm272_vm0, %v291_v56, %v295_v57  ;;  %v307_v32 = vor.u32 %v305_v15, %v295_v57  ;;  %v1541_v43 = vld [vmem:[%s1825_s16 + $0x10] sm:$0xf0]  ;;  %v1663_v47 = vld [vmem:[%s2080_s1 + $0x158] sm:$0xff]  ;;  %v1672_v2 = vld [vmem:[%s2080_s1 + $0x180] sm:$0xff]  ;;  %v626_v15 = vpack.c.b16 %v260_v24, %v258_v22 }
  0x20   : > { %574 = vmatpush.bf16.msra.mxu3 %v1631_v33  ;;  %v311_v33 = vrot.slane %v309_v16, 1  ;;  %v1674_v48 = vld [vmem:[%s2080_s1 + $0x190] sm:$0xff]  ;;  %v1670_v54 = vld [vmem:[%s1825_s16 + $0x1c] sm:$0xf]  ;;  %v1652_v8 = vld [vmem:[%s2080_s1 + $0x100] sm:$0xff]  ;;  %v627_v16 = vpack.c.b16 %v261_v29, %v259_v23 }
  0x21   : > { %418 = vmatpush.bf16.msra.mxu0 %v1638_v35  ;;  %v1656_v35 = vld [vmem:[%s2080_s1 + $0x120] sm:$0xff]  ;;  %v1682_v49 = vld [vmem:[%s2080_s1 + $0x1d0] sm:$0xff] }
  0x22   : > { %437 = vmatpush.bf16.msra.mxu1 %v1646_v36  ;;  %v1664_v36 = vld [vmem:[%s2080_s1 + $0x160] sm:$0xff]  ;;  %v1654_v56 = vld [vmem:[%s2080_s1 + $0x110] sm:$0xff] }
  0x23   : > { %556 = vmatpush.bf16.msra.mxu2 %v1622_v40  ;;  %v1539_v40 = vld [vmem:[%s1825_s16 + $0x8] sm:$0xf]  ;;  %v1662_v57 = vld [vmem:[%s2080_s1 + $0x150] sm:$0xff]  ;;  %v589_v22 = vld [vmem:[%s1825_s16 + $0x20] sm:$0xff] }
  0x24   : > { %575 = vmatpush.bf16.msra.mxu3 %v1630_v41  ;;  %v1669_v41 = vld [vmem:[%s1825_s16 + $0xc] sm:$0xf0]  ;;  %v624_v23 = vunpack.c.l.b16 %v589_v22  ;;  %v625_v29 = vunpack.c.h.b16 %v589_v22 }
  0x25   : > { %419 = vmatpush.bf16.msra.mxu0 %v1637_v44 }
  0x26   : > { %438 = vmatpush.bf16.msra.mxu1 %v1645_v45  ;;  %v312_v45 = vsel %vm272_vm0, %v307_v32, %v311_v33 }
  0x27   : > { %557 = vmatpush.bf16.msra.mxu2 %v1621_v50  ;;  %v1547_v50 = vld [vmem:[%s1825_s16 + $0x18] sm:$0xf] }
  0x28   : > { %576 = vmatpush.bf16.msra.mxu3 %v1629_v51  ;;  %v1671_v51 = vld [vmem:[%s1825_s16 + $0x1c] sm:$0xf0] }
  0x29   : > { %420 = vmatpush.bf16.msra.mxu0 %v1636_v52  ;;  %v1540_v52 = vor.u32 %v1669_v41, %v1539_v40  ;;  %v629_v40 = vpack.c.b16 %v625_v29, %v263_v30 }
  0x2a   : > { %439 = vmatpush.bf16.msra.mxu1 %v1644_v53  ;;  %v1544_v53 = vor.u32 %v1668_v42, %v1541_v43 }
  0x2b   : > { %558 = vmatpush.bf16.msra.mxu2 %v1620_v58  ;;  %v1548_v58 = vor.u32 %v1671_v51, %v1547_v50 }
  0x2c   : > { %577 = vmatpush.bf16.msra.mxu3 %v1628_v59  ;;  %421 = vmatmul.bf16.vlgmr.msra.gmra.mxu0 %v284_v63  ;;  %v1673_v59 = vld [vmem:[%s2080_s1 + $0x188] sm:$0xff] }
  0x2d   : > { %440 = vmatmul.bf16.vlgmr.msra.gmra.mxu1 %v296_v0  ;;  %730 = vmatpush.bf16.msrb.mxu0 %v1659_v3  ;;  %v1661_v63 = vld [vmem:[%s2080_s1 + $0x148] sm:$0xff]  ;;  %v832_v0 = vshrl.u32 %v1540_v52, 16  ;;  %v839_v1 = vshll.u32 %v1548_v58, 16  ;;  %v1680_v3 = vld [vmem:[%s2080_s1 + $0x1c0] sm:$0xff]  ;;  %v855_v24 = vshrl.u32 %v1548_v58, 16 }
  0x2e   : > { %559 = vmatmul.bf16.vlgmr.msra.gmra.mxu2 %v1861_v28  ;;  %749 = vmatpush.bf16.msrb.mxu1 %v1667_v4  ;;  %v299_v28 = vor.u32 %v297_v13, %v283_v55  ;;  %v1549_v55 = vld [vmem:[%s1825_s16 + $0x20] sm:$0xf0] }
  0x2f   : > { %971 = vmatpush.bf16.msrb.mxu2 %v1679_v61  ;;  %578 = vmatmul.bf16.vlgmr.msra.gmra.mxu3 %v1867_v31  ;;  %v303_v31 = vrot.slane %v301_v14, 1  ;;  %v1552_v60 = vor.u32 %v1670_v54, %v1549_v55  ;;  %v846_v61 = vshll.u32 %v1544_v53, 16  ;;  %v776_v14 = vld [vmem:[%s1825_s16 + $0x28] sm:$0x11]  ;;  %s1619_s16 = sshll.u32 %s2087_s9, 4 }
  0x30   : > { %990 = vmatpush.bf16.msrb.mxu3 %v1687_v62  ;;  %v1653_v62 = vld [vmem:[%s2080_s1 + $0x108] sm:$0xff]  ;;  %s180_s3 = scalar_lea.vmem %s2081_s2, %s1619_s16 }
  0x31   : > { %731 = vmatpush.bf16.msrb.mxu0 %v1658_v9  ;;  %v304_v44 = vsel %vm272_vm0, %v299_v28, %v303_v31  ;;  %v851_v7 = vshll.u32 %v1552_v60, 16  ;;  %v1660_v9 = vld [vmem:[%s2080_s1 + $0x140] sm:$0xff]  ;;  %v863_v32 = vshrl.u32 %v1552_v60, 16  ;;  %v1013_v60 = vlaneseq }
  0x32   : > { %750 = vmatpush.bf16.msrb.mxu1 %v1666_v10 }
  0x33   : > { %972 = vmatpush.bf16.msrb.mxu2 %v1678_v5  ;;  %v844_v5 = vshrl.u32 %v1544_v53, 16  ;;  %v853_v13 = vrot.slane %v851_v7, 1 }
  0x34   : > { %991 = vmatpush.bf16.msrb.mxu3 %v1686_v6  ;;  %v848_v6 = vrot.slane %v846_v61, 1 }
  0x35   : > { %732 = vmatpush.bf16.msrb.mxu0 %v1657_v20 }
  0x36   : > { %751 = vmatpush.bf16.msrb.mxu1 %v1665_v21 }
  0x37   : > { %973 = vmatpush.bf16.msrb.mxu2 %v1677_v11  ;;  %v841_v11 = vrot.slane %v839_v1, 1 }
  0x38   : > { %992 = vmatpush.bf16.msrb.mxu3 %v1685_v12  ;;  %v849_v12 = vor.u32 %v848_v6, %v844_v5 }
  0x39   : > { %733 = vmatpush.bf16.msrb.mxu0 %v1656_v35  ;;  %v857_v33 = vor.u32 %v855_v24, %v841_v11 }
  0x3a   : > { %752 = vmatpush.bf16.msrb.mxu1 %v1664_v36  ;;  %v854_v21 = vsel %vm272_vm0, %v849_v12, %v853_v13  ;;  %v865_v36 = vor.u32 %v863_v32, %v853_v13 }
  0x3b   : > { %974 = vmatpush.bf16.msrb.mxu2 %v1676_v26  ;;  %v823_v26 = vunpack.c.l.b16 %v776_v14 }
  0x3c   : > { %993 = vmatpush.bf16.msrb.mxu3 %v1684_v27  ;;  %426 = vmatmul.bf16.gmra.mxu0 %v304_v44  ;;  %v824_v27 = vunpack.c.h.b16 %v776_v14 }
  0x3d   : > { %445 = vmatmul.bf16.gmra.mxu1 %v312_v45  ;;  %734 = vmatpush.bf16.msrb.mxu0 %v1655_v46  ;;  %v829_v28 = vpack.c.b16 %v823_v26, %v823_v26 }
  0x3e   : > { %564 = vmatmul.bf16.gmra.mxu2 %v1879_v34  ;;  %753 = vmatpush.bf16.msrb.mxu1 %v1663_v47  ;;  %v1681_v34 = vld [vmem:[%s2080_s1 + $0x1c8] sm:$0xff]  ;;  %v830_v31 = vpack.c.b16 %v824_v27, %v824_v27 }
  0x3f   : > { %975 = vmatpush.bf16.msrb.mxu2 %v1675_v37  ;;  %583 = vmatmul.bf16.gmra.mxu3 %v1892_v38  ;;  %v834_v38 = vshll.u32 %v1540_v52, 16  ;;  %v859_v17 = vshll.u32 %v829_v28, 16 }
  0x40   : > { %994 = vmatpush.bf16.msrb.mxu3 %v1683_v39  ;;  %v867_v18 = vshll.u32 %v830_v31, 16  ;;  %v628_v39 = vpack.c.b16 %v624_v23, %v262_v25 }
  0x41   : > { %735 = vmatpush.bf16.msrb.mxu0 %v1654_v56  ;;  %v836_v4 = vrot.slane %v834_v38, 1  ;;  %v861_v35 = vrot.slane %v859_v17, 1 }
  0x42   : > { %754 = vmatpush.bf16.msrb.mxu1 %v1662_v57  ;;  %v869_v37 = vrot.slane %v867_v18, 1 }
  0x43   : > { %976 = vmatpush.bf16.msrb.mxu2 %v1674_v48  ;;  %v837_v10 = vor.u32 %v836_v4, %v832_v0  ;;  %v862_v41 = vsel %vm272_vm0, %v857_v33, %v861_v35  ;;  %v1014_v0 = vshrl.u32 %v1013_v60, 7 }
  0x44   : > { %995 = vmatpush.bf16.msrb.mxu3 %v1682_v49  ;;  %v870_v42 = vsel %vm272_vm0, %v865_v36, %v869_v37 }
  0x45   : > { %736 = vmatpush.bf16.msrb.mxu0 %v1653_v62  ;;  %v842_v20 = vsel %vm272_vm0, %v837_v10, %v841_v11  ;;  %v1015_v6 = vadd.s32 8, %v1014_v0  ;;  %v1016_v10 = vadd.s32 16, %v1014_v0  ;;  %v1022_v28 = vand.u32 7, %v1014_v0 }
  0x46   : > { %755 = vmatpush.bf16.msrb.mxu1 %v1661_v63  ;;  %v1017_v35 = vadd.s32 24, %v1014_v0 }
  0x47   : > { %977 = vmatpush.bf16.msrb.mxu2 %v1673_v59  ;;  %v1036_v24 = vand.u32 7, %v1016_v10  ;;  %vm1066_vm2 = vcmp.lt.s32.totalorder %v1022_v28, 4 }
  0x48   : > { %996 = vmatpush.bf16.msrb.mxu3 %v1681_v34 }
  0x49   : > { %737 = vmatpush.bf16.msrb.mxu0 %v1652_v8  ;;  %vm1068_vm3 = vcmp.lt.s32.totalorder %v1036_v24, 4 }
  0x4a   : > { %756 = vmatpush.bf16.msrb.mxu1 %v1660_v9 }
  0x4b   : > { %978 = vmatpush.bf16.msrb.mxu2 %v1672_v2 }
  0x4c   : > { %997 = vmatpush.bf16.msrb.mxu3 %v1680_v3  ;;  %738 = vmatmul.bf16.vlgmr.msrb.gmra.mxu0 %v626_v15  ;;  %v1029_v15 = vand.u32 7, %v1015_v6 }
  0x4d   : > { %757 = vmatmul.bf16.vlgmr.msrb.gmra.mxu1 %v627_v16 }
  0x4e   : > { %979 = vmatmul.bf16.vlgmr.msrb.gmra.mxu2 %v842_v20  ;;  %vm1067_vm1 = vcmp.lt.s32.totalorder %v1029_v15, 4 }
  0x4f   : > { %998 = vmatmul.bf16.vlgmr.msrb.gmra.mxu3 %v854_v21 }
  0x5c   : > { %743 = vmatmul.bf16.gmra.mxu0 %v628_v39 }
  0x5d   : > { %762 = vmatmul.bf16.gmra.mxu1 %v629_v40 }
  0x5e   : > { %984 = vmatmul.bf16.gmra.mxu2 %v862_v41 }
  0x5f   : > { %1003 = vmatmul.bf16.gmra.mxu3 %v870_v42  ;;  %v1043_v42 = vand.u32 7, %v1017_v35 }
  0x61   : > { %vm1069_vm4 = vcmp.lt.s32.totalorder %v1043_v42, 4 }
  0xa9   : > { %v422_v43 = vpop.f32.mrf.mxu0 }
  0xaa   : > { %v441_v44 = vpop.f32.mrf.mxu1 }
  0xab   : > { %v442_v61 = vadd.f32 %v441_v44, %v422_v43 }
  0xb1   : > { %v560_v45 = vpop.f32.mrf.mxu2  ;;  %v424_v47 = vpop.f32.mrf.mxu0 }
  0xb2   : > { %v579_v46 = vpop.f32.mrf.mxu3  ;;  %v443_v48 = vpop.f32.mrf.mxu1  ;;  %v561_v7 = vadd.f32 %v560_v45, %v442_v61 }
  0xb3   : > { %v444_v62 = vadd.f32 %v443_v48, %v424_v47 }
  0xb4   : > { %v580_v16 = vadd.f32 %v579_v46, %v561_v7 }
  0xb9   : > { %v562_v49 = vpop.f32.mrf.mxu2  ;;  %v427_v25 = vpop.f32.mrf.mxu0 }
  0xba   : > { %v581_v50 = vpop.f32.mrf.mxu3  ;;  %v446_v51 = vpop.f32.mrf.mxu1  ;;  %v563_v3 = vadd.f32 %v562_v49, %v444_v62 }
  0xbb   : > { %v447_v63 = vadd.f32 %v446_v51, %v427_v25 }
  0xbc   : > { %v582_v11 = vadd.f32 %v581_v50, %v563_v3 }
  0xc1   : > { %v565_v19 = vpop.f32.mrf.mxu2  ;;  %v429_v52 = vpop.f32.mrf.mxu0 }
  0xc2   : > { %v584_v30 = vpop.f32.mrf.mxu3  ;;  %v448_v53 = vpop.f32.mrf.mxu1  ;;  %v566_v8 = vadd.f32 %v565_v19, %v447_v63 }
  0xc3   : > { %v449_v27 = vadd.f32 %v448_v53, %v429_v52 }
  0xc4   : > { %v585_v20 = vadd.f32 %v584_v30, %v566_v8 }
  0xc9   : > { %v567_v54 = vpop.f32.mrf.mxu2  ;;  %v739_v56 = vpop.f32.mrf.mxu0 }
  0xca   : > { %v586_v55 = vpop.f32.mrf.mxu3  ;;  %v758_v57 = vpop.f32.mrf.mxu1  ;;  %v568_v36 = vadd.f32 %v567_v54, %v449_v27 }
  0xcb   : > { %v759_v12 = vadd.f32 %v758_v57, %v739_v56 }
  0xcc   : > { %v587_v43 = vadd.f32 %v586_v55, %v568_v36 }
  0xcd   : > { %v768_v17 = vadd.f32 %v759_v12, %v580_v16 }
  0xd1   : > { %v980_v58 = vpop.f32.mrf.mxu2  ;;  %v741_v34 = vpop.f32.mrf.mxu0 }
  0xd2   : > { %v999_v59 = vpop.f32.mrf.mxu3  ;;  %v760_v38 = vpop.f32.mrf.mxu1 }
  0xd3   : > { %v761_v9 = vadd.f32 %v760_v38, %v741_v34  ;;  %v1000_v21 = vadd.f32 %v999_v59, %v980_v58 }
  0xd5   : > { %v769_v26 = vadd.f32 %v761_v9, %v582_v11  ;;  %v1009_v37 = vadd.f32 %v1000_v21, %v768_v17 }
  0xd7   : > { %v1078_v44 = vsel %vm1066_vm2, %v1009_v37, 0.0 }
  0xd8   : > { %v1091_v25 = vmul.f32 %v1078_v44, %v1078_v44 }
  0xd9   : > { %v982_v1 = vpop.f32.mrf.mxu2  ;;  %v744_v4 = vpop.f32.mrf.mxu0 }
  0xda   : > { %v1001_v2 = vpop.f32.mrf.mxu3  ;;  %v763_v5 = vpop.f32.mrf.mxu1 }
  0xdb   : > { %v1002_v13 = vadd.f32 %v1001_v2, %v982_v1  ;;  %v764_v14 = vadd.f32 %v763_v5, %v744_v4 }
  0xdd   : > { %v2062_v32 = vadd.f32 %v1002_v13, %v769_v26  ;;  %v770_v18 = vadd.f32 %v764_v14, %v585_v20 }
  0xdf   : > { %v1079_v40 = vsel %vm1067_vm1, %v2062_v32, 0.0 }
  0xe0   : > { %v1092_v46 = vmul.f32 %v1079_v40, %v1079_v40  ;;  %v1082_v51 = vadd.f32 %v1079_v40, %v1078_v44 }
  0xe1   : > { %v985_v31 = vpop.f32.mrf.mxu2  ;;  %v746_v29 = vpop.f32.mrf.mxu0 }
  0xe2   : > { %v1004_v22 = vpop.f32.mrf.mxu3  ;;  %v765_v33 = vpop.f32.mrf.mxu1  ;;  %v1095_v52 = vadd.f32 %v1092_v46, %v1091_v25 }
  0xe3   : > { %v1005_v23 = vadd.f32 %v1004_v22, %v985_v31  ;;  %v766_v41 = vadd.f32 %v765_v33, %v746_v29 }
  0xe5   : > { %v1011_v39 = vadd.f32 %v1005_v23, %v770_v18  ;;  %v771_v49 = vadd.f32 %v766_v41, %v587_v43 }
  0xe7   : > { %v1080_v45 = vsel %vm1068_vm3, %v1011_v39, 0.0 }
  0xe8   : > { %v1093_v19 = vmul.f32 %v1080_v45, %v1080_v45  ;;  %v1083_v53 = vadd.f32 %v1082_v51, %v1080_v45 }
  0xe9   : > { %v987_v47 = vpop.f32.mrf.mxu2 }
  0xea   : > { %v1006_v48 = vpop.f32.mrf.mxu3  ;;  %v1096_v56 = vadd.f32 %v1095_v52, %v1093_v19 }
  0xeb   : > { %v1007_v50 = vadd.f32 %v1006_v48, %v987_v47 }
  0xed   : > { %v1012_v30 = vadd.f32 %v1007_v50, %v771_v49 }
  0xef   : > { %v1081_v54 = vsel %vm1069_vm4, %v1012_v30, 0.0 }
  0xf0   : > { %v1084_v57 = vadd.f32 %v1083_v53, %v1081_v54  ;;  %v1094_v58 = vmul.f32 %v1081_v54, %v1081_v54 }
  0xf2   : > { %v1085_v59 = vrot.slane %v1084_v57, 4  ;;  %v1097_v55 = vadd.f32 %v1096_v56, %v1094_v58 }
  0xf4   : > { %v1086_v34 = vadd.f32 %v1085_v59, %v1084_v57  ;;  %v1098_v38 = vrot.slane %v1097_v55, 4 }
  0xf6   : > { %v1087_v60 = vrot.slane %v1086_v34, 2  ;;  %v1099_v61 = vadd.f32 %v1098_v38, %v1097_v55 }
  0xf8   : > { %v1088_v62 = vadd.f32 %v1087_v60, %v1086_v34  ;;  %v1100_v63 = vrot.slane %v1099_v61, 2 }
  0xfa   : > { %v1089_v0 = vrot.slane %v1088_v62, 1  ;;  %v1101_v1 = vadd.f32 %v1100_v63, %v1099_v61 }
  0xfc   : > { %v1090_v2 = vadd.f32 %v1089_v0, %v1088_v62  ;;  %v1102_v3 = vrot.slane %v1101_v1, 1 }
  0xfe   : > { %v1103_v4 = vadd.f32 %v1102_v3, %v1101_v1  ;;  %v1104_v5 = vmul.f32 0.0625, %v1090_v2 }
 0x100   : > { %v1105_v6 = vmul.f32 0.0625, %v1103_v4  ;;  %v1106_v7 = vmul.f32 %v1104_v5, %v1104_v5  ;;  %v1108_v16 = vsub.f32 %v1009_v37, %v1104_v5  ;;  %v1109_v20 = vsub.f32 %v2062_v32, %v1104_v5 }
 0x101   : > { %v1110_v21 = vsub.f32 %v1011_v39, %v1104_v5  ;;  %v1111_v26 = vsub.f32 %v1012_v30, %v1104_v5 }
 0x102   : > { %v1107_v8 = vsub.f32 %v1105_v6, %v1106_v7 }
 0x104   : > { %v1112_v9 = vadd.f32 1e-05, %v1107_v8 }
 0x106   : > { %1724 = vrsqrt.f32 %v1112_v9  ;;  %vm1119_vm6 = vweird.f32 %v1112_v9 }
 0x10c   : > { %v1725_v10 = vpop.eup %1724 }
 0x10d   : > { %v1114_v11 = vmul.f32 %v1725_v10, %v1112_v9  ;;  %vm1120_vm5 = vweird.f32 %v1725_v10 }
 0x10e   : > { %vm1121_vm7 = vmor %vm1119_vm6, %vm1120_vm5 }
 0x10f   : > { %v1115_v12 = vmul.f32 %v1725_v10, %v1114_v11 }
 0x111   : > { %v1116_v13 = vmul.f32 0.5, %v1115_v12 }
 0x113   : > { %v1117_v14 = vsub.f32 1.5, %v1116_v13 }
 0x115   : > { %v1118_v15 = vmul.f32 %v1725_v10, %v1117_v14 }
 0x117   : > { %v1122_v27 = vsel %vm1121_vm7, %v1725_v10, %v1118_v15 }
 0x118   : > { %v1123_v28 = vmul.f32 %v1122_v27, %v1108_v16  ;;  %v1124_v31 = vmul.f32 %v1122_v27, %v1109_v20  ;;  %v1125_v22 = vmul.f32 %v1122_v27, %v1110_v21  ;;  %v1126_v24 = vmul.f32 %v1122_v27, %v1111_v26 }
 0x11a   : > { %vm1127_vm8 = vcmp.ge.f32.partialorder %v1123_v28, 0.0  ;;  %vm1128_vm9 = vcmp.ge.f32.partialorder %v1124_v31, 0.0  ;;  %vm1129_vm10 = vcmp.ge.f32.partialorder %v1125_v22, 0.0  ;;  %vm1130_vm11 = vcmp.ge.f32.partialorder %v1126_v24, 0.0 }
 0x11b   : > { %v1131_v17 = vmul.f32 0.2, %v1123_v28  ;;  %v1132_v18 = vmul.f32 0.2, %v1124_v31  ;;  %v1133_v23 = vmul.f32 0.2, %v1125_v22 }
 0x11c   : > { %v1134_v29 = vmul.f32 0.2, %v1126_v24 }
 0x11d   : > { %v1135_v32 = vsel %vm1127_vm8, %v1123_v28, %v1131_v17  ;;  %v1136_v33 = vsel %vm1128_vm9, %v1124_v31, %v1132_v18  ;;  %v1137_v35 = vsel %vm1129_vm10, %v1125_v22, %v1133_v23 }
 0x11e   : > { %v1138_v36 = vsel %vm1130_vm11, %v1126_v24, %v1134_v29  ;;  %v1691_v37 = vpack.c.bf16 %v1136_v33, %v1135_v32 }
 0x11f   : > { %v1696_v39 = vpack.c.bf16 %v1138_v36, %v1137_v35 }
 0x120   : > { %1692 = vst [vmem:[%s180_s3] sm:$0xff] %v1691_v37  }
 0x121   : > { %1698 = vst [vmem:[%s180_s3 + $0x8] sm:$0xff] %v1696_v39  }
 0x122 PF: > { %s12_s11 = sadd.s32 1, %s1748_s11   ;;  %s2082_s9 = smov %s1744_s10 }
 0x123   : > { %p9_p5 = scmp.ge.s32.totalorder %s12_s11, 4   ;;  %s2083_s10 = smov %s2085_s12 }
 0x125   :  { %11 = sbr.rel (!%p9_p5) target bundleno = 2 (0x2), region = 64 }

// kernel: local_discriminator_forward.6
= control target key start
LH: loop header
LB: loop body
LE: loop exit
PB: predicated region body
PF: predicated region fallthrough
CT: control target
= control target key end

     0   :  { %s4477_s9 = smov 0   ;;  %s4479_s10 = smov 0   ;;  %s6351_s0 = inlined_call_operand.vmem [shape: bf16[2,56,128], index: 0, kind: input, shape index: {}]   ;;  %s6352_s1 = inlined_call_operand.vmem [shape: bf16[8,256,256], index: 1, kind: input, shape index: {}]   ;;  %s6353_s2 = inlined_call_operand.vmem [shape: bf16[2,24,256], index: 2, kind: output, shape index: {}]  }
   0x1   :  { %s4481_s11 = smov 0  }
   0x2 LB: > { %s24_s12 = sadd.s32 1, %s4456_s10  ;;  %p2880_p0 = scmp.ge.s32.totalorder %s4460_s11, 1  ;;  %s4460_s11 = sphi %s4481_s11, %s12_s11   ;;  %s4456_s10 = sphi %s4479_s10, %s6361_s10   ;;  %s4452_s9 = sphi %s4477_s9, %s6360_s9  }
   0x3   : > { %p26_p1 = scmp.ge.s32.totalorder %s24_s12, 2  ;;  %p137_p2 = scmp.lt.s32.totalorder %s4460_s11, 3 }
   0x5   : > { %s6363_s12 = smov (%p26_p1, %s24_s12), 0  ;;  %p138_p3 = pnand %p2880_p0, %p137_p2 }
   0x6   : > { %p168_p4 = scmp.lt.s32.totalorder (!%p138_p3), %s4452_s9, 1 }
   0x7   : > { %141 = sbr.rel (%p138_p3) target bundleno = 481 (0x1e1), region = 28 }
   0xc   : > { %v2973_v0 = vld [vmem:[%s6352_s1 + $0x170] sm:$0xf]  ;;  %v4180_v1 = vld [vmem:[%s6352_s1 + $0x174] sm:$0xf0]  ;;  %v4179_v5 = vld [vmem:[%s6352_s1 + $0x174] sm:$0xf] }
   0xd   : > { %v3037_v2 = vld [vmem:[%s6352_s1 + $0x1f0] sm:$0xf]  ;;  %v2974_v3 = vor.u32 %v4180_v1, %v2973_v0  ;;  %v4196_v4 = vld [vmem:[%s6352_s1 + $0x1f4] sm:$0xf0]  ;;  %v2975_v6 = vld [vmem:[%s6352_s1 + $0x178] sm:$0xf0] }
   0xe   : > { %v3038_v7 = vor.u32 %v4196_v4, %v3037_v2  ;;  %v2978_v8 = vor.u32 %v4179_v5, %v2975_v6  ;;  %v4195_v9 = vld [vmem:[%s6352_s1 + $0x1f4] sm:$0xf]  ;;  %v3039_v10 = vld [vmem:[%s6352_s1 + $0x1f8] sm:$0xf0]  ;;  %v2965_v11 = vld [vmem:[%s6352_s1 + $0x160] sm:$0xf] }
   0xf   : > { %483 = vmatpush.bf16.msra.mxu0 %v2974_v3  ;;  %v3042_v12 = vor.u32 %v4195_v9, %v3039_v10  ;;  %v4178_v13 = vld [vmem:[%s6352_s1 + $0x164] sm:$0xf0]  ;;  %v3029_v14 = vld [vmem:[%s6352_s1 + $0x1e0] sm:$0xf]  ;;  %v4177_v18 = vld [vmem:[%s6352_s1 + $0x164] sm:$0xf] }
  0x10   : > { %v4194_v15 = vld [vmem:[%s6352_s1 + $0x1e4] sm:$0xf0]  ;;  %501 = vmatpush.bf16.msra.mxu1 %v3038_v7  ;;  %519 = vmatpush.bf16.msra.mxu2 %v2978_v8  ;;  %v2966_v16 = vor.u32 %v4178_v13, %v2965_v11  ;;  %v2967_v19 = vld [vmem:[%s6352_s1 + $0x168] sm:$0xf0]  ;;  %v4193_v20 = vld [vmem:[%s6352_s1 + $0x1e4] sm:$0xf] }
  0x11   : > { %v3030_v17 = vor.u32 %v4194_v15, %v3029_v14  ;;  %537 = vmatpush.bf16.msra.mxu3 %v3042_v12  ;;  %v2970_v21 = vor.u32 %v4177_v18, %v2967_v19  ;;  %v3031_v22 = vld [vmem:[%s6352_s1 + $0x1e8] sm:$0xf0]  ;;  %v2957_v23 = vld [vmem:[%s6352_s1 + $0x150] sm:$0xf]  ;;  %v4176_v24 = vld [vmem:[%s6352_s1 + $0x154] sm:$0xf0] }
  0x12   : > { %v3034_v25 = vor.u32 %v4193_v20, %v3031_v22  ;;  %v3021_v26 = vld [vmem:[%s6352_s1 + $0x1d0] sm:$0xf]  ;;  %v4192_v27 = vld [vmem:[%s6352_s1 + $0x1d4] sm:$0xf0]  ;;  %v4175_v28 = vld [vmem:[%s6352_s1 + $0x154] sm:$0xf]  ;;  %v2958_v29 = vor.u32 %v4176_v24, %v2957_v23 }
  0x13   : > { %484 = vmatpush.bf16.msra.mxu0 %v2966_v16  ;;  %v2959_v30 = vld [vmem:[%s6352_s1 + $0x158] sm:$0xf0]  ;;  %v4191_v31 = vld [vmem:[%s6352_s1 + $0x1d4] sm:$0xf]  ;;  %v3022_v33 = vor.u32 %v4192_v27, %v3021_v26  ;;  %v2949_v35 = vld [vmem:[%s6352_s1 + $0x140] sm:$0xf] }
  0x14   : > { %v3023_v32 = vld [vmem:[%s6352_s1 + $0x1d8] sm:$0xf0]  ;;  %502 = vmatpush.bf16.msra.mxu1 %v3030_v17  ;;  %520 = vmatpush.bf16.msra.mxu2 %v2970_v21  ;;  %v2962_v34 = vor.u32 %v4175_v28, %v2959_v30  ;;  %v4174_v36 = vld [vmem:[%s6352_s1 + $0x144] sm:$0xf0]  ;;  %v3013_v37 = vld [vmem:[%s6352_s1 + $0x1c0] sm:$0xf] }
  0x15   : > { %538 = vmatpush.bf16.msra.mxu3 %v3034_v25  ;;  %v3026_v38 = vor.u32 %v4191_v31, %v3023_v32  ;;  %v4190_v39 = vld [vmem:[%s6352_s1 + $0x1c4] sm:$0xf0]  ;;  %v4173_v40 = vld [vmem:[%s6352_s1 + $0x144] sm:$0xf]  ;;  %v2951_v41 = vld [vmem:[%s6352_s1 + $0x148] sm:$0xf0]  ;;  %v2950_v44 = vor.u32 %v4174_v36, %v2949_v35 }
  0x16   : > { %v4189_v42 = vld [vmem:[%s6352_s1 + $0x1c4] sm:$0xf]  ;;  %v3015_v43 = vld [vmem:[%s6352_s1 + $0x1c8] sm:$0xf0]  ;;  %v3014_v45 = vor.u32 %v4190_v39, %v3013_v37  ;;  %v2954_v46 = vor.u32 %v4173_v40, %v2951_v41  ;;  %v2941_v47 = vld [vmem:[%s6352_s1 + $0x130] sm:$0xf] }
  0x17   : > { %485 = vmatpush.bf16.msra.mxu0 %v2958_v29  ;;  %v4172_v48 = vld [vmem:[%s6352_s1 + $0x134] sm:$0xf0]  ;;  %v3005_v49 = vld [vmem:[%s6352_s1 + $0x1b0] sm:$0xf]  ;;  %v3018_v50 = vor.u32 %v4189_v42, %v3015_v43  ;;  %v4171_v52 = vld [vmem:[%s6352_s1 + $0x134] sm:$0xf] }
  0x18   : > { %503 = vmatpush.bf16.msra.mxu1 %v3022_v33  ;;  %521 = vmatpush.bf16.msra.mxu2 %v2962_v34  ;;  %v4188_v51 = vld [vmem:[%s6352_s1 + $0x1b4] sm:$0xf0]  ;;  %v2943_v53 = vld [vmem:[%s6352_s1 + $0x138] sm:$0xf0]  ;;  %v4187_v54 = vld [vmem:[%s6352_s1 + $0x1b4] sm:$0xf]  ;;  %v2942_v56 = vor.u32 %v4172_v48, %v2941_v47 }
  0x19   : > { %539 = vmatpush.bf16.msra.mxu3 %v3026_v38  ;;  %v3007_v55 = vld [vmem:[%s6352_s1 + $0x1b8] sm:$0xf0]  ;;  %v3006_v57 = vor.u32 %v4188_v51, %v3005_v49  ;;  %v2946_v58 = vor.u32 %v4171_v52, %v2943_v53  ;;  %v2933_v59 = vld [vmem:[%s6352_s1 + $0x120] sm:$0xf]  ;;  %v4170_v60 = vld [vmem:[%s6352_s1 + $0x124] sm:$0xf0] }
  0x1a   : > { %v2997_v61 = vld [vmem:[%s6352_s1 + $0x1a0] sm:$0xf]  ;;  %v3010_v62 = vor.u32 %v4187_v54, %v3007_v55  ;;  %v4186_v63 = vld [vmem:[%s6352_s1 + $0x1a4] sm:$0xf0]  ;;  %v4169_v0 = vld [vmem:[%s6352_s1 + $0x124] sm:$0xf]  ;;  %v2934_v4 = vor.u32 %v4170_v60, %v2933_v59 }
  0x1b   : > { %486 = vmatpush.bf16.msra.mxu0 %v2950_v44  ;;  %v2935_v1 = vld [vmem:[%s6352_s1 + $0x128] sm:$0xf0]  ;;  %v4185_v2 = vld [vmem:[%s6352_s1 + $0x1a4] sm:$0xf]  ;;  %v2925_v5 = vld [vmem:[%s6352_s1 + $0x110] sm:$0xf]  ;;  %v2998_v7 = vor.u32 %v4186_v63, %v2997_v61 }
  0x1c   : > { %504 = vmatpush.bf16.msra.mxu1 %v3014_v45  ;;  %522 = vmatpush.bf16.msra.mxu2 %v2954_v46  ;;  %v2999_v3 = vld [vmem:[%s6352_s1 + $0x1a8] sm:$0xf0]  ;;  %v4168_v6 = vld [vmem:[%s6352_s1 + $0x114] sm:$0xf0]  ;;  %v2938_v8 = vor.u32 %v4169_v0, %v2935_v1  ;;  %v2989_v9 = vld [vmem:[%s6352_s1 + $0x190] sm:$0xf] }
  0x1d   : > { %540 = vmatpush.bf16.msra.mxu3 %v3018_v50  ;;  %v4184_v10 = vld [vmem:[%s6352_s1 + $0x194] sm:$0xf0]  ;;  %v4167_v11 = vld [vmem:[%s6352_s1 + $0x114] sm:$0xf]  ;;  %v3002_v12 = vor.u32 %v4185_v2, %v2999_v3  ;;  %v2927_v13 = vld [vmem:[%s6352_s1 + $0x118] sm:$0xf0]  ;;  %v2926_v18 = vor.u32 %v4168_v6, %v2925_v5 }
  0x1e   : > { %v4183_v14 = vld [vmem:[%s6352_s1 + $0x194] sm:$0xf]  ;;  %v2991_v15 = vld [vmem:[%s6352_s1 + $0x198] sm:$0xf0]  ;;  %v2917_v16 = vld [vmem:[%s6352_s1 + $0x100] sm:$0xf]  ;;  %v2990_v22 = vor.u32 %v4184_v10, %v2989_v9  ;;  %v2930_v23 = vor.u32 %v4167_v11, %v2927_v13 }
  0x1f   : > { %487 = vmatpush.bf16.msra.mxu0 %v2942_v56  ;;  %v4166_v17 = vld [vmem:[%s6352_s1 + $0x104] sm:$0xf0]  ;;  %v2981_v19 = vld [vmem:[%s6352_s1 + $0x180] sm:$0xf]  ;;  %v4165_v21 = vld [vmem:[%s6352_s1 + $0x104] sm:$0xf]  ;;  %v2994_v27 = vor.u32 %v4183_v14, %v2991_v15 }
  0x20   : > { %505 = vmatpush.bf16.msra.mxu1 %v3006_v57  ;;  %523 = vmatpush.bf16.msra.mxu2 %v2946_v58  ;;  %v4182_v20 = vld [vmem:[%s6352_s1 + $0x184] sm:$0xf0]  ;;  %s6365_s9 = smov (!%p168_p4, %s4452_s9), 1  ;;  %v2919_v24 = vld [vmem:[%s6352_s1 + $0x108] sm:$0xf0]  ;;  %v2918_v33 = vor.u32 %v4166_v17, %v2917_v16  ;;  %vm312_vm0 = vcmask 1046528  }
  0x21   : > { %541 = vmatpush.bf16.msra.mxu3 %v3010_v62  ;;  %v4181_v25 = vld [vmem:[%s6352_s1 + $0x184] sm:$0xf]  ;;  %v2983_v26 = vld [vmem:[%s6352_s1 + $0x188] sm:$0xf0]  ;;  %s4408_s21 = smul.u32 28, %s6365_s9  ;;  %v2982_v37 = vor.u32 %v4182_v20, %v2981_v19  ;;  %v2922_v38 = vor.u32 %v4165_v21, %v2919_v24 }
  0x22   : > { %v4147_v28 = vld [vmem:[%s6352_s1 + $0x74] sm:$0xf]  ;;  %v3103_v29 = vld [vmem:[%s6352_s1 + $0x78] sm:$0xf0]  ;;  %v3101_v32 = vld [vmem:[%s6352_s1 + $0x70] sm:$0xf]  ;;  %v2986_v39 = vor.u32 %v4181_v25, %v2983_v26 }
  0x23   : > { %488 = vmatpush.bf16.msra.mxu0 %v2934_v4  ;;  %v4163_v30 = vld [vmem:[%s6352_s1 + $0xf4] sm:$0xf]  ;;  %v3167_v31 = vld [vmem:[%s6352_s1 + $0xf8] sm:$0xf0]  ;;  %s4712_s6 = scalar_lea.vmem %s6351_s0, %s4408_s21  ;;  %v4148_v34 = vld [vmem:[%s6352_s1 + $0x74] sm:$0xf0]  ;;  %v3106_v48 = vor.u32 %v4147_v28, %v3103_v29 }
  0x24   : > { %506 = vmatpush.bf16.msra.mxu1 %v2998_v7  ;;  %524 = vmatpush.bf16.msra.mxu2 %v2938_v8  ;;  %v3165_v35 = vld [vmem:[%s6352_s1 + $0xf0] sm:$0xf]  ;;  %v4164_v36 = vld [vmem:[%s6352_s1 + $0xf4] sm:$0xf0]  ;;  %v4724_v40 = vld [vmem:[%s4712_s6] sm:$0xff]   ;;  %v3170_v52 = vor.u32 %v4163_v30, %v3167_v31  ;;  %v3102_v53 = vor.u32 %v4148_v34, %v3101_v32  ;;  %s4409_s21 = smul.u32 24, %s6365_s9 }
  0x25   : > { %542 = vmatpush.bf16.msra.mxu3 %v3002_v12  ;;  %v191_v41 = vld [vmem:[%s4712_s6 + $0x8] sm:$0xf]  ;;  %v192_v42 = vld [vmem:[%s4712_s6 + $0xc] sm:$0x1]  ;;  %v4392_v43 = vunpack.c.h.b16 %v4724_v40  ;;  %v256_v46 = vld [vmem:[%s4712_s6] sm:$0xe]  ;;  %v3166_v58 = vor.u32 %v4164_v36, %v3165_v35 }
  0x26   : > { %v4729_v44 = vunpack.c.l.b16 %v191_v41  ;;  %v204_v45 = vunpack.c.l.b16 %v192_v42  ;;  %v257_v47 = vld [vmem:[%s4712_s6 + $0xc] sm:$0x3]  ;;  %v4145_v49 = vld [vmem:[%s6352_s1 + $0x64] sm:$0xf]  ;;  %v259_v50 = vunpack.c.l.b16 %v256_v46  ;;  %v3093_v59 = vld [vmem:[%s6352_s1 + $0x60] sm:$0xf]  ;;  %s187_s24 = scalar_lea.vmem %s6353_s2, %s4409_s21 }
  0x27   : > { %489 = vmatpush.bf16.msra.mxu0 %v2926_v18  ;;  %v262_v51 = vunpack.c.l.b16 %v257_v47  ;;  %v3095_v54 = vld [vmem:[%s6352_s1 + $0x68] sm:$0xf0]  ;;  %v4161_v55 = vld [vmem:[%s6352_s1 + $0xe4] sm:$0xf]  ;;  %v4146_v60 = vld [vmem:[%s6352_s1 + $0x64] sm:$0xf0] }
  0x28   : > { %507 = vmatpush.bf16.msra.mxu1 %v2990_v22  ;;  %525 = vmatpush.bf16.msra.mxu2 %v2930_v23  ;;  %v3159_v56 = vld [vmem:[%s6352_s1 + $0xe8] sm:$0xf0]  ;;  %v4746_v57 = vpack.c.b16 %v204_v45, %v4729_v44  ;;  %v260_v61 = vpack.c.b16 %v4392_v43, %v259_v50  ;;  %v3157_v63 = vld [vmem:[%s6352_s1 + $0xe0] sm:$0xf]  ;;  %v4162_v0 = vld [vmem:[%s6352_s1 + $0xe4] sm:$0xf0]  ;;  %v3098_v3 = vor.u32 %v4145_v49, %v3095_v54 }
  0x29   : > { %543 = vmatpush.bf16.msra.mxu3 %v2994_v27  ;;  %v263_v62 = vpack.c.b16 %v262_v51, %v4729_v44  ;;  %v4143_v1 = vld [vmem:[%s6352_s1 + $0x54] sm:$0xf]  ;;  %v3162_v4 = vor.u32 %v4161_v55, %v3159_v56  ;;  %v3087_v5 = vld [vmem:[%s6352_s1 + $0x58] sm:$0xf0]  ;;  %v3094_v13 = vor.u32 %v4146_v60, %v3093_v59  ;;  %v3158_v14 = vor.u32 %v4162_v0, %v3157_v63  ;;  %v3085_v15 = vld [vmem:[%s6352_s1 + $0x50] sm:$0xf] }
  0x2a   : > { %v4767_v2 = vrot.slane %v4746_v57, 1  ;;  %v4159_v6 = vld [vmem:[%s6352_s1 + $0xd4] sm:$0xf]  ;;  %v313_v7 = vrot.slane %v260_v61, 1  ;;  %v265_v8 = vshrl.u32 %v260_v61, 16  ;;  %v267_v9 = vshll.u32 %v260_v61, 16 }
  0x2b   : > { %490 = vmatpush.bf16.msra.mxu0 %v2918_v33  ;;  %v272_v10 = vshll.u32 %v263_v62, 16  ;;  %v3151_v11 = vld [vmem:[%s6352_s1 + $0xd8] sm:$0xf0]  ;;  %v276_v12 = vshrl.u32 %v263_v62, 16  ;;  %v4144_v16 = vld [vmem:[%s6352_s1 + $0x54] sm:$0xf0]  ;;  %v3090_v22 = vor.u32 %v4143_v1, %v3087_v5 }
  0x2c   : > { %508 = vmatpush.bf16.msra.mxu1 %v2982_v37  ;;  %526 = vmatpush.bf16.msra.mxu2 %v2922_v38  ;;  %v315_v17 = vsel %vm312_vm0, %v313_v7, %v4767_v2  ;;  %v269_v18 = vrot.slane %v267_v9, 1  ;;  %v3149_v20 = vld [vmem:[%s6352_s1 + $0xd0] sm:$0xf]  ;;  %v4160_v21 = vld [vmem:[%s6352_s1 + $0xd4] sm:$0xf0]  ;;  %v3154_v25 = vor.u32 %v4159_v6, %v3151_v11  ;;  %v3086_v29 = vor.u32 %v4144_v16, %v3085_v15 }
  0x2d   : > { %544 = vmatpush.bf16.msra.mxu3 %v2986_v39  ;;  %v274_v19 = vrot.slane %v272_v10, 1  ;;  %vm206_vm1 = vsmask.f32 7424  ;;  %v4141_v26 = vld [vmem:[%s6352_s1 + $0x44] sm:$0xf]  ;;  %v3150_v30 = vor.u32 %v4160_v21, %v3149_v20 }
  0x2e   : > { %491 = vmatmul.bf16.vlgmr.msra.gmra.mxu0 %v315_v17  ;;  %v270_v23 = vor.u32 %v269_v18, %v265_v8  ;;  %v3079_v27 = vld [vmem:[%s6352_s1 + $0x48] sm:$0xf0]  ;;  %v4157_v28 = vld [vmem:[%s6352_s1 + $0xc4] sm:$0xf]  ;;  %v3077_v32 = vld [vmem:[%s6352_s1 + $0x40] sm:$0xf] }
  0x2f   : > { %715 = vmatpush.bf16.msrb.mxu0 %v3102_v53  ;;  %527 = vmatmul.bf16.vlgmr.msra.gmra.mxu2 %v315_v17  ;;  %v278_v24 = vor.u32 %v276_v12, %v274_v19  ;;  %v3143_v31 = vld [vmem:[%s6352_s1 + $0xc8] sm:$0xf0]  ;;  %v4142_v33 = vld [vmem:[%s6352_s1 + $0x44] sm:$0xf0]  ;;  %v3141_v36 = vld [vmem:[%s6352_s1 + $0xc0] sm:$0xf]  ;;  %v3082_v39 = vor.u32 %v4141_v26, %v3079_v27 }
  0x30   : > { %751 = vmatpush.bf16.msrb.mxu2 %v3106_v48  ;;  %733 = vmatpush.bf16.msrb.mxu1 %v3166_v58  ;;  %v275_v34 = vsel %vm206_vm1, %v270_v23, %v274_v19  ;;  %v4158_v37 = vld [vmem:[%s6352_s1 + $0xc4] sm:$0xf0]  ;;  %v3146_v41 = vor.u32 %v4157_v28, %v3143_v31  ;;  %v4139_v42 = vld [vmem:[%s6352_s1 + $0x34] sm:$0xf]  ;;  %v3071_v45 = vld [vmem:[%s6352_s1 + $0x38] sm:$0xf0]  ;;  %v3078_v47 = vor.u32 %v4142_v33, %v3077_v32 }
  0x31   : > { %769 = vmatpush.bf16.msrb.mxu3 %v3170_v52  ;;  %v4811_v35 = vrot.slane %v278_v24, 1  ;;  %v316_v38 = vrot.slane %v275_v34, 1  ;;  %v3142_v48 = vor.u32 %v4158_v37, %v3141_v36  ;;  %v4155_v49 = vld [vmem:[%s6352_s1 + $0xb4] sm:$0xf]  ;;  %v3135_v50 = vld [vmem:[%s6352_s1 + $0xb8] sm:$0xf0]  ;;  %v3074_v55 = vor.u32 %v4139_v42, %v3071_v45 }
  0x32   : > { %v3069_v51 = vld [vmem:[%s6352_s1 + $0x30] sm:$0xf]  ;;  %v4140_v52 = vld [vmem:[%s6352_s1 + $0x34] sm:$0xf0]  ;;  %v3138_v56 = vor.u32 %v4155_v49, %v3135_v50  ;;  %v4137_v58 = vld [vmem:[%s6352_s1 + $0x24] sm:$0xf] }
  0x33   : > { %716 = vmatpush.bf16.msrb.mxu0 %v3094_v13  ;;  %v318_v46 = vsel %vm312_vm0, %v316_v38, %v4811_v35  ;;  %v3133_v53 = vld [vmem:[%s6352_s1 + $0xb0] sm:$0xf]  ;;  %v4156_v54 = vld [vmem:[%s6352_s1 + $0xb4] sm:$0xf0]  ;;  %v3063_v59 = vld [vmem:[%s6352_s1 + $0x28] sm:$0xf0]  ;;  %v3070_v60 = vor.u32 %v4140_v52, %v3069_v51 }
  0x34   : > { %752 = vmatpush.bf16.msrb.mxu2 %v3098_v3  ;;  %734 = vmatpush.bf16.msrb.mxu1 %v3158_v14  ;;  %v3134_v61 = vor.u32 %v4156_v54, %v3133_v53  ;;  %v4153_v62 = vld [vmem:[%s6352_s1 + $0xa4] sm:$0xf]  ;;  %v3127_v63 = vld [vmem:[%s6352_s1 + $0xa8] sm:$0xf0]  ;;  %v3061_v0 = vld [vmem:[%s6352_s1 + $0x20] sm:$0xf]  ;;  %v3066_v5 = vor.u32 %v4137_v58, %v3063_v59  ;;  %v4974_v58 = vpack.c.b16 %v4729_v44, %v4392_v43 }
  0x35   : > { %770 = vmatpush.bf16.msrb.mxu3 %v3162_v4  ;;  %509 = vmatmul.bf16.vlgmr.msra.gmra.mxu1 %v318_v46  ;;  %v4138_v1 = vld [vmem:[%s6352_s1 + $0x24] sm:$0xf0]  ;;  %v3125_v3 = vld [vmem:[%s6352_s1 + $0xa0] sm:$0xf]  ;;  %v3130_v6 = vor.u32 %v4153_v62, %v3127_v63  ;;  %v4135_v7 = vld [vmem:[%s6352_s1 + $0x14] sm:$0xf] }
  0x36   : > { %545 = vmatmul.bf16.vlgmr.msra.gmra.mxu3 %v318_v46  ;;  %v4154_v4 = vld [vmem:[%s6352_s1 + $0xa4] sm:$0xf0]  ;;  %v3055_v8 = vld [vmem:[%s6352_s1 + $0x18] sm:$0xf0]  ;;  %v3062_v9 = vor.u32 %v4138_v1, %v3061_v0  ;;  %v4151_v11 = vld [vmem:[%s6352_s1 + $0x94] sm:$0xf] }
  0x37   : > { %717 = vmatpush.bf16.msrb.mxu0 %v3086_v29  ;;  %v3126_v10 = vor.u32 %v4154_v4, %v3125_v3  ;;  %v3119_v12 = vld [vmem:[%s6352_s1 + $0x98] sm:$0xf0]  ;;  %v3053_v13 = vld [vmem:[%s6352_s1 + $0x10] sm:$0xf]  ;;  %v4136_v14 = vld [vmem:[%s6352_s1 + $0x14] sm:$0xf0]  ;;  %v3058_v18 = vor.u32 %v4135_v7, %v3055_v8 }
  0x38   : > { %753 = vmatpush.bf16.msrb.mxu2 %v3090_v22  ;;  %735 = vmatpush.bf16.msrb.mxu1 %v3150_v30  ;;  %v3117_v15 = vld [vmem:[%s6352_s1 + $0x90] sm:$0xf]  ;;  %v4152_v16 = vld [vmem:[%s6352_s1 + $0x94] sm:$0xf0]  ;;  %v4133_v17 = vld [vmem:[%s6352_s1 + $0x4] sm:$0xf]  ;;  %v3122_v19 = vor.u32 %v4151_v11, %v3119_v12  ;;  %v3054_v22 = vor.u32 %v4136_v14, %v3053_v13 }
  0x39   : > { %771 = vmatpush.bf16.msrb.mxu3 %v3154_v25  ;;  %v3047_v20 = vld [vmem:[%s6352_s1 + $0x8] sm:$0xf0]  ;;  %v4149_v21 = vld [vmem:[%s6352_s1 + $0x84] sm:$0xf]  ;;  %v3118_v23 = vor.u32 %v4152_v16, %v3117_v15  ;;  %v3045_v24 = vld [vmem:[%s6352_s1] sm:$0xf] }
  0x3a   : > { %v4134_v25 = vld [vmem:[%s6352_s1 + $0x4] sm:$0xf0]  ;;  %v3109_v26 = vld [vmem:[%s6352_s1 + $0x80] sm:$0xf]  ;;  %v4211_v28 = vld [vmem:[%s6352_s1 + $0x274] sm:$0xf]  ;;  %v3050_v33 = vor.u32 %v4133_v17, %v3047_v20 }
  0x3b   : > { %718 = vmatpush.bf16.msrb.mxu0 %v3078_v47  ;;  %v4150_v27 = vld [vmem:[%s6352_s1 + $0x84] sm:$0xf0]  ;;  %v3263_v29 = vld [vmem:[%s6352_s1 + $0x278] sm:$0xf0]  ;;  %v4227_v30 = vld [vmem:[%s6352_s1 + $0x2f4] sm:$0xf] }
  0x3c   : > { %754 = vmatpush.bf16.msrb.mxu2 %v3082_v39  ;;  %736 = vmatpush.bf16.msrb.mxu1 %v3142_v48  ;;  %v3327_v31 = vld [vmem:[%s6352_s1 + $0x2f8] sm:$0xf0]  ;;  %v3261_v32 = vld [vmem:[%s6352_s1 + $0x270] sm:$0xf]  ;;  %v4212_v36 = vld [vmem:[%s6352_s1 + $0x274] sm:$0xf0]  ;;  %v3046_v39 = vor.u32 %v4134_v25, %v3045_v24  ;;  %v3266_v45 = vor.u32 %v4211_v28, %v3263_v29 }
  0x3d   : > { %772 = vmatpush.bf16.msrb.mxu3 %v3146_v41  ;;  %v3325_v37 = vld [vmem:[%s6352_s1 + $0x2f0] sm:$0xf]  ;;  %v4228_v38 = vld [vmem:[%s6352_s1 + $0x2f4] sm:$0xf0]  ;;  %v3110_v41 = vor.u32 %v4150_v27, %v3109_v26  ;;  %v210_v42 = vshll.u32 %v4724_v40, 16  ;;  %v3330_v46 = vor.u32 %v4227_v30, %v3327_v31  ;;  %v3262_v48 = vor.u32 %v4212_v36, %v3261_v32 }
  0x3e   : > { %496 = vmatmul.bf16.gmra.mxu0 %v4767_v2  ;;  %v4209_v47 = vld [vmem:[%s6352_s1 + $0x264] sm:$0xf]  ;;  %v3326_v49 = vor.u32 %v4228_v38, %v3325_v37  ;;  %v3255_v50 = vld [vmem:[%s6352_s1 + $0x268] sm:$0xf0]  ;;  %v208_v52 = vshrl.u32 %v4724_v40, 16 }
  0x3f   : > { %719 = vmatpush.bf16.msrb.mxu0 %v3070_v60  ;;  %532 = vmatmul.bf16.gmra.mxu2 %v4767_v2  ;;  %v3111_v2 = vld [vmem:[%s6352_s1 + $0x88] sm:$0xf0]  ;;  %v4225_v51 = vld [vmem:[%s6352_s1 + $0x2e4] sm:$0xf]  ;;  %v3253_v53 = vld [vmem:[%s6352_s1 + $0x260] sm:$0xf] }
  0x40   : > { %755 = vmatpush.bf16.msrb.mxu2 %v3074_v55  ;;  %737 = vmatpush.bf16.msrb.mxu1 %v3134_v61  ;;  %v3114_v34 = vor.u32 %v4149_v21, %v3111_v2  ;;  %v4210_v54 = vld [vmem:[%s6352_s1 + $0x264] sm:$0xf0]  ;;  %v3317_v55 = vld [vmem:[%s6352_s1 + $0x2e0] sm:$0xf]  ;;  %v212_v59 = vrot.slane %v210_v42, 1  ;;  %v215_v60 = vshll.u32 %v4746_v57, 16  ;;  %v3258_v61 = vor.u32 %v4209_v47, %v3255_v50 }
  0x41   : > { %773 = vmatpush.bf16.msrb.mxu3 %v3138_v56  ;;  %v4226_v56 = vld [vmem:[%s6352_s1 + $0x2e4] sm:$0xf0]  ;;  %v4207_v63 = vld [vmem:[%s6352_s1 + $0x254] sm:$0xf]  ;;  %v3247_v0 = vld [vmem:[%s6352_s1 + $0x258] sm:$0xf0]  ;;  %v3254_v3 = vor.u32 %v4210_v54, %v3253_v53  ;;  %v200_v50 = vpack.c.b16 %v4729_v44, %v4729_v44 }
  0x42   : > { %v4223_v43 = vld [vmem:[%s6352_s1 + $0x2d4] sm:$0xf]  ;;  %v3311_v1 = vld [vmem:[%s6352_s1 + $0x2d8] sm:$0xf0]  ;;  %v3318_v4 = vor.u32 %v4226_v56, %v3317_v55  ;;  %v3309_v7 = vld [vmem:[%s6352_s1 + $0x2d0] sm:$0xf]  ;;  %v213_v11 = vor.u32 %v212_v59, %v208_v52 }
  0x43   : > { %720 = vmatpush.bf16.msrb.mxu0 %v3062_v9  ;;  %v4224_v8 = vld [vmem:[%s6352_s1 + $0x2d4] sm:$0xf0]  ;;  %v3250_v9 = vor.u32 %v4207_v63, %v3247_v0  ;;  %v5002_v12 = vrot.slane %v215_v60, 1  ;;  %v4205_v13 = vld [vmem:[%s6352_s1 + $0x244] sm:$0xf]  ;;  %v219_v52 = vshrl.u32 %v4746_v57, 16 }
  0x44   : > { %756 = vmatpush.bf16.msrb.mxu2 %v3066_v5  ;;  %738 = vmatpush.bf16.msrb.mxu1 %v3126_v10  ;;  %v3245_v5 = vld [vmem:[%s6352_s1 + $0x250] sm:$0xf]  ;;  %v3314_v10 = vor.u32 %v4223_v43, %v3311_v1  ;;  %v3239_v14 = vld [vmem:[%s6352_s1 + $0x248] sm:$0xf0]  ;;  %v3310_v16 = vor.u32 %v4224_v8, %v3309_v7  ;;  %v4221_v17 = vld [vmem:[%s6352_s1 + $0x2c4] sm:$0xf] }
  0x45   : > { %774 = vmatpush.bf16.msrb.mxu3 %v3130_v6  ;;  %514 = vmatmul.bf16.gmra.mxu1 %v4811_v35  ;;  %v4208_v6 = vld [vmem:[%s6352_s1 + $0x254] sm:$0xf0]  ;;  %v3301_v20 = vld [vmem:[%s6352_s1 + $0x2c0] sm:$0xf]  ;;  %v4222_v21 = vld [vmem:[%s6352_s1 + $0x2c4] sm:$0xf0]  ;;  %v218_v2 = vsel %vm206_vm1, %v213_v11, %v5002_v12 }
  0x46   : > { %550 = vmatmul.bf16.gmra.mxu3 %v4811_v35  ;;  %v3319_v35 = vld [vmem:[%s6352_s1 + $0x2e8] sm:$0xf0]  ;;  %v3246_v15 = vor.u32 %v4208_v6, %v3245_v5  ;;  %v4203_v24 = vld [vmem:[%s6352_s1 + $0x234] sm:$0xf]  ;;  %v3231_v25 = vld [vmem:[%s6352_s1 + $0x238] sm:$0xf0]  ;;  %v3302_v27 = vor.u32 %v4222_v21, %v3301_v20 }
  0x47   : > { %721 = vmatpush.bf16.msrb.mxu0 %v3054_v22  ;;  %v3322_v62 = vor.u32 %v4225_v51, %v3319_v35  ;;  %v3242_v22 = vor.u32 %v4205_v13, %v3239_v14  ;;  %v4219_v28 = vld [vmem:[%s6352_s1 + $0x2b4] sm:$0xf]  ;;  %v3295_v29 = vld [vmem:[%s6352_s1 + $0x2b8] sm:$0xf0]  ;;  %v3229_v30 = vld [vmem:[%s6352_s1 + $0x230] sm:$0xf] }
  0x48   : > { %757 = vmatpush.bf16.msrb.mxu2 %v3058_v18  ;;  %739 = vmatpush.bf16.msrb.mxu1 %v3118_v23  ;;  %v3237_v18 = vld [vmem:[%s6352_s1 + $0x240] sm:$0xf]  ;;  %v4204_v31 = vld [vmem:[%s6352_s1 + $0x234] sm:$0xf0]  ;;  %v3293_v32 = vld [vmem:[%s6352_s1 + $0x2b0] sm:$0xf]  ;;  %v3298_v36 = vor.u32 %v4219_v28, %v3295_v29 }
  0x49   : > { %775 = vmatpush.bf16.msrb.mxu3 %v3122_v19  ;;  %v4206_v19 = vld [vmem:[%s6352_s1 + $0x244] sm:$0xf0]  ;;  %v3230_v37 = vor.u32 %v4204_v31, %v3229_v30  ;;  %v4217_v42 = vld [vmem:[%s6352_s1 + $0x2a4] sm:$0xf]  ;;  %v4199_v55 = vld [vmem:[%s6352_s1 + $0x214] sm:$0xf] }
  0x4a   : > { %v3238_v26 = vor.u32 %v4206_v19, %v3237_v18  ;;  %v4202_v47 = vld [vmem:[%s6352_s1 + $0x224] sm:$0xf0]  ;;  %v788_v35 = vld [vmem:[%s4712_s6 + $0x4] sm:$0xf]  ;;  %v3215_v44 = vld [vmem:[%s6352_s1 + $0x218] sm:$0xf0] }
  0x4b   : > { %722 = vmatpush.bf16.msrb.mxu0 %v3046_v39  ;;  %v4201_v39 = vld [vmem:[%s6352_s1 + $0x224] sm:$0xf]  ;;  %v5082_v51 = vld [vmem:[%s4712_s6 + $0x8] sm:$0xff]   ;;  %v4215_v60 = vld [vmem:[%s6352_s1 + $0x294] sm:$0xf]  ;;  %v800_v1 = vunpack.c.l.b16 %v788_v35  ;;  %v3218_v5 = vor.u32 %v4199_v55, %v3215_v44 }
  0x4c   : > { %758 = vmatpush.bf16.msrb.mxu2 %v3050_v33  ;;  %740 = vmatpush.bf16.msrb.mxu1 %v3110_v41  ;;  %v4220_v33 = vld [vmem:[%s6352_s1 + $0x2b4] sm:$0xf0]  ;;  %v3223_v41 = vld [vmem:[%s6352_s1 + $0x228] sm:$0xf0]  ;;  %v3279_v57 = vld [vmem:[%s6352_s1 + $0x298] sm:$0xf0]  ;;  %v4395_v43 = vunpack.c.l.b16 %v5082_v51 }
  0x4d   : > { %776 = vmatpush.bf16.msrb.mxu3 %v3114_v34  ;;  %v3234_v34 = vor.u32 %v4203_v24, %v3231_v25  ;;  %v3294_v38 = vor.u32 %v4220_v33, %v3293_v32  ;;  %v3226_v53 = vor.u32 %v4201_v39, %v3223_v41  ;;  %v3277_v63 = vld [vmem:[%s6352_s1 + $0x290] sm:$0xf]  ;;  %v4216_v0 = vld [vmem:[%s6352_s1 + $0x294] sm:$0xf0]  ;;  %v3282_v6 = vor.u32 %v4215_v60, %v3279_v57  ;;  %v3207_v7 = vld [vmem:[%s6352_s1 + $0x208] sm:$0xf0] }
  0x4e   : > { %723 = vmatmul.bf16.vlgmr.msrb.gmra.mxu0 %v4724_v40  ;;  %v4213_v8 = vld [vmem:[%s6352_s1 + $0x284] sm:$0xf]  ;;  %v3278_v11 = vor.u32 %v4216_v0, %v3277_v63  ;;  %v3205_v13 = vld [vmem:[%s6352_s1 + $0x200] sm:$0xf]  ;;  %v4198_v14 = vld [vmem:[%s6352_s1 + $0x204] sm:$0xf0]  ;;  %v803_v19 = vpack.c.b16 %v4395_v43, %v800_v1 }
  0x4f   : > { %1015 = vmatpush.bf16.msra.mxu0 %v3262_v48  ;;  %759 = vmatmul.bf16.vlgmr.msrb.gmra.mxu2 %v4724_v40  ;;  %v3303_v40 = vld [vmem:[%s6352_s1 + $0x2c8] sm:$0xf0]  ;;  %v3285_v48 = vld [vmem:[%s6352_s1 + $0x2a0] sm:$0xf]  ;;  %v4243_v20 = vld [vmem:[%s6352_s1 + $0x374] sm:$0xf]  ;;  %v3206_v28 = vor.u32 %v4198_v14, %v3205_v13 }
  0x50   : > { %1051 = vmatpush.bf16.msra.mxu2 %v3266_v45  ;;  %1033 = vmatpush.bf16.msra.mxu1 %v3326_v49  ;;  %v3306_v23 = vor.u32 %v4221_v17, %v3303_v40  ;;  %v3287_v45 = vld [vmem:[%s6352_s1 + $0x2a8] sm:$0xf0]  ;;  %v4218_v49 = vld [vmem:[%s6352_s1 + $0x2a4] sm:$0xf0]  ;;  %v5138_v40 = vunpack.c.h.b16 %v5082_v51  ;;  %v3423_v21 = vld [vmem:[%s6352_s1 + $0x378] sm:$0xf0] }
  0x51   : > { %1069 = vmatpush.bf16.msra.mxu3 %v3330_v46  ;;  %v3221_v46 = vld [vmem:[%s6352_s1 + $0x220] sm:$0xf]  ;;  %v3290_v54 = vor.u32 %v4217_v42, %v3287_v45  ;;  %v3286_v59 = vor.u32 %v4218_v49, %v3285_v48  ;;  %v4214_v17 = vld [vmem:[%s6352_s1 + $0x284] sm:$0xf0]  ;;  %v4244_v25 = vld [vmem:[%s6352_s1 + $0x374] sm:$0xf0]  ;;  %v3426_v32 = vor.u32 %v4243_v20, %v3423_v21 }
  0x52   : > { %v3222_v56 = vor.u32 %v4202_v47, %v3221_v46  ;;  %v808_v31 = vshll.u32 %v803_v19, 16  ;;  %v4257_v39 = vld [vmem:[%s6352_s1 + $0x3e4] sm:$0xf]  ;;  %v3479_v41 = vld [vmem:[%s6352_s1 + $0x3e8] sm:$0xf0]  ;;  %v806_v42 = vshrl.u32 %v803_v19, 16 }
  0x53   : > { %1016 = vmatpush.bf16.msra.mxu0 %v3254_v3  ;;  %v4197_v3 = vld [vmem:[%s6352_s1 + $0x204] sm:$0xf]  ;;  %v3413_v45 = vld [vmem:[%s6352_s1 + $0x360] sm:$0xf]  ;;  %v4242_v46 = vld [vmem:[%s6352_s1 + $0x364] sm:$0xf0] }
  0x54   : > { %1052 = vmatpush.bf16.msra.mxu2 %v3258_v61  ;;  %1034 = vmatpush.bf16.msra.mxu1 %v3318_v4  ;;  %v3213_v61 = vld [vmem:[%s6352_s1 + $0x210] sm:$0xf]  ;;  %v3477_v47 = vld [vmem:[%s6352_s1 + $0x3e0] sm:$0xf]  ;;  %v4258_v48 = vld [vmem:[%s6352_s1 + $0x3e4] sm:$0xf0] }
  0x55   : > { %1070 = vmatpush.bf16.msra.mxu3 %v3322_v62  ;;  %741 = vmatmul.bf16.vlgmr.msrb.gmra.mxu1 %v218_v2  ;;  %v4200_v62 = vld [vmem:[%s6352_s1 + $0x214] sm:$0xf0]  ;;  %v790_v4 = vld [vmem:[%s4712_s6 + $0x10] sm:$0x1]  ;;  %v810_v49 = vrot.slane %v808_v31, 1 }
  0x56   : > { %777 = vmatmul.bf16.vlgmr.msrb.gmra.mxu3 %v218_v2  ;;  %v802_v18 = vunpack.c.l.b16 %v790_v4  ;;  %v3487_v2 = vld [vmem:[%s6352_s1 + $0x3f8] sm:$0xf0]  ;;  %v4255_v55 = vld [vmem:[%s6352_s1 + $0x3d4] sm:$0xf]  ;;  %v3405_v60 = vld [vmem:[%s6352_s1 + $0x350] sm:$0xf] }
  0x57   : > { %1017 = vmatpush.bf16.msra.mxu0 %v3246_v15  ;;  %v3269_v15 = vld [vmem:[%s6352_s1 + $0x280] sm:$0xf]  ;;  %v3471_v44 = vld [vmem:[%s6352_s1 + $0x3d8] sm:$0xf0]  ;;  %v4240_v57 = vld [vmem:[%s6352_s1 + $0x354] sm:$0xf0]  ;;  %v811_v1 = vor.u32 %v810_v49, %v806_v42 }
  0x58   : > { %1053 = vmatpush.bf16.msra.mxu2 %v3250_v9  ;;  %1035 = vmatpush.bf16.msra.mxu1 %v3310_v16  ;;  %v3271_v9 = vld [vmem:[%s6352_s1 + $0x288] sm:$0xf0]  ;;  %v221_v16 = vor.u32 %v219_v52, %v5002_v12  ;;  %v4259_v12 = vld [vmem:[%s6352_s1 + $0x3f4] sm:$0xf]  ;;  %v3270_v29 = vor.u32 %v4214_v17, %v3269_v15  ;;  %v5167_v30 = vpack.c.b16 %v802_v18, %v5138_v40  ;;  %v4237_v4 = vld [vmem:[%s6352_s1 + $0x344] sm:$0xf] }
  0x59   : > { %1071 = vmatpush.bf16.msra.mxu3 %v3314_v10  ;;  %v3214_v10 = vor.u32 %v4200_v62, %v3213_v61  ;;  %v3274_v24 = vor.u32 %v4213_v8, %v3271_v9  ;;  %v3490_v33 = vor.u32 %v4259_v12, %v3487_v2  ;;  %v3482_v52 = vor.u32 %v4257_v39, %v3479_v41  ;;  %v3469_v61 = vld [vmem:[%s6352_s1 + $0x3d0] sm:$0xf]  ;;  %v4256_v62 = vld [vmem:[%s6352_s1 + $0x3d4] sm:$0xf0]  ;;  %v4253_v8 = vld [vmem:[%s6352_s1 + $0x3c4] sm:$0xf] }
  0x5a   : > { %v3474_v0 = vor.u32 %v4255_v55, %v3471_v44  ;;  %v3397_v9 = vld [vmem:[%s6352_s1 + $0x340] sm:$0xf]  ;;  %v4254_v13 = vld [vmem:[%s6352_s1 + $0x3c4] sm:$0xf0]  ;;  %v4235_v17 = vld [vmem:[%s6352_s1 + $0x334] sm:$0xf] }
  0x5b   : > { %1018 = vmatpush.bf16.msra.mxu0 %v3238_v26  ;;  %v3485_v26 = vld [vmem:[%s6352_s1 + $0x3f0] sm:$0xf]  ;;  %v3391_v18 = vld [vmem:[%s6352_s1 + $0x338] sm:$0xf0]  ;;  %v1093_v19 = vld [vmem:[%s4712_s6 + $0x4] sm:$0xe] }
  0x5c   : > { %1054 = vmatpush.bf16.msra.mxu2 %v3242_v22  ;;  %1036 = vmatpush.bf16.msra.mxu1 %v3302_v27  ;;  %v3421_v22 = vld [vmem:[%s6352_s1 + $0x370] sm:$0xf]  ;;  %v4260_v27 = vld [vmem:[%s6352_s1 + $0x3f4] sm:$0xf0]  ;;  %v4251_v12 = vld [vmem:[%s6352_s1 + $0x3b4] sm:$0xf] }
  0x5d   : > { %1072 = vmatpush.bf16.msra.mxu3 %v3306_v23  ;;  %v3210_v23 = vor.u32 %v4197_v3, %v3207_v7  ;;  %v3470_v7 = vor.u32 %v4256_v62, %v3469_v61  ;;  %v3455_v2 = vld [vmem:[%s6352_s1 + $0x3b8] sm:$0xf0]  ;;  %v4234_v39 = vld [vmem:[%s6352_s1 + $0x324] sm:$0xf0]  ;;  %v3445_v41 = vld [vmem:[%s6352_s1 + $0x3a0] sm:$0xf] }
  0x5e   : > { %728 = vmatmul.bf16.gmra.mxu0 %v200_v50  ;;  %v4250_v42 = vld [vmem:[%s6352_s1 + $0x3a4] sm:$0xf0]  ;;  %v3373_v55 = vld [vmem:[%s6352_s1 + $0x310] sm:$0xf]  ;;  %v4232_v44 = vld [vmem:[%s6352_s1 + $0x314] sm:$0xf0] }
  0x5f   : > { %1019 = vmatpush.bf16.msra.mxu0 %v3230_v37  ;;  %764 = vmatmul.bf16.gmra.mxu2 %v200_v50  ;;  %v3486_v37 = vor.u32 %v4260_v27, %v3485_v26  ;;  %v813_v50 = vshll.u32 %v5167_v30, 16  ;;  %v1096_v26 = vunpack.c.l.b16 %v1093_v19  ;;  %v3394_v27 = vor.u32 %v4235_v17, %v3391_v18  ;;  %v4229_v62 = vld [vmem:[%s6352_s1 + $0x304] sm:$0xf]  ;;  %v3583_v17 = vld [vmem:[%s6352_s1 + $0x478] sm:$0xf0] }
  0x60   : > { %1055 = vmatpush.bf16.msra.mxu2 %v3234_v34  ;;  %1037 = vmatpush.bf16.msra.mxu1 %v3294_v38  ;;  %v4241_v34 = vld [vmem:[%s6352_s1 + $0x364] sm:$0xf]  ;;  %v3415_v38 = vld [vmem:[%s6352_s1 + $0x368] sm:$0xf0]  ;;  %v4291_v18 = vld [vmem:[%s6352_s1 + $0x4f4] sm:$0xf] }
  0x61   : > { %1073 = vmatpush.bf16.msra.mxu3 %v3298_v36  ;;  %v3422_v36 = vor.u32 %v4244_v25, %v3421_v22  ;;  %v3418_v35 = vor.u32 %v4241_v34, %v3415_v38  ;;  %v5219_v3 = vrot.slane %v813_v50, 1  ;;  %v3389_v22 = vld [vmem:[%s6352_s1 + $0x330] sm:$0xf]  ;;  %v4252_v25 = vld [vmem:[%s6352_s1 + $0x3b4] sm:$0xf0] }
  0x62   : > { %v3383_v34 = vld [vmem:[%s6352_s1 + $0x328] sm:$0xf0]  ;;  %v3381_v38 = vld [vmem:[%s6352_s1 + $0x320] sm:$0xf]  ;;  %v4231_v50 = vld [vmem:[%s6352_s1 + $0x314] sm:$0xf] }
  0x63   : > { %1020 = vmatpush.bf16.msra.mxu0 %v3222_v56  ;;  %v3414_v56 = vor.u32 %v4242_v46, %v3413_v45  ;;  %v816_v14 = vsel %vm206_vm1, %v811_v1, %v5219_v3  ;;  %v5300_v45 = vpack.c.b16 %v4395_v43, %v1096_v26  ;;  %v4247_v43 = vld [vmem:[%s6352_s1 + $0x394] sm:$0xf]  ;;  %v3647_v19 = vld [vmem:[%s6352_s1 + $0x4f8] sm:$0xf0] }
  0x64   : > { %1056 = vmatpush.bf16.msra.mxu2 %v3226_v53  ;;  %1038 = vmatpush.bf16.msra.mxu1 %v3286_v59  ;;  %v4239_v53 = vld [vmem:[%s6352_s1 + $0x354] sm:$0xf]  ;;  %v3478_v59 = vor.u32 %v4258_v48, %v3477_v47  ;;  %v794_v47 = vpack.c.b16 %v5138_v40, %v5138_v40 }
  0x65   : > { %1074 = vmatpush.bf16.msra.mxu3 %v3290_v54  ;;  %746 = vmatmul.bf16.gmra.mxu1 %v221_v16  ;;  %v3407_v54 = vld [vmem:[%s6352_s1 + $0x358] sm:$0xf0]  ;;  %v1104_v61 = vshll.u32 %v5300_v45, 16 }
  0x66   : > { %782 = vmatmul.bf16.gmra.mxu3 %v221_v16  ;;  %v3410_v63 = vor.u32 %v4239_v53, %v3407_v54  ;;  %v3446_v53 = vor.u32 %v4250_v42, %v3445_v41  ;;  %v3439_v54 = vld [vmem:[%s6352_s1 + $0x398] sm:$0xf0]  ;;  %v3573_v41 = vld [vmem:[%s6352_s1 + $0x460] sm:$0xf]  ;;  %v4274_v42 = vld [vmem:[%s6352_s1 + $0x464] sm:$0xf0] }
  0x67   : > { %1021 = vmatpush.bf16.msra.mxu0 %v3214_v10  ;;  %v4238_v10 = vld [vmem:[%s6352_s1 + $0x344] sm:$0xf0] }
  0x68   : > { %1057 = vmatpush.bf16.msra.mxu2 %v3218_v5  ;;  %1039 = vmatpush.bf16.msra.mxu1 %v3278_v11  ;;  %v3399_v5 = vld [vmem:[%s6352_s1 + $0x348] sm:$0xf0]  ;;  %v3461_v11 = vld [vmem:[%s6352_s1 + $0x3c0] sm:$0xf]  ;;  %v3398_v20 = vor.u32 %v4238_v10, %v3397_v9  ;;  %v4246_v10 = vld [vmem:[%s6352_s1 + $0x384] sm:$0xf0] }
  0x69   : > { %1075 = vmatpush.bf16.msra.mxu3 %v3282_v6  ;;  %v3406_v6 = vor.u32 %v4240_v57, %v3405_v60  ;;  %v3402_v15 = vor.u32 %v4237_v4, %v3399_v5  ;;  %v3462_v21 = vor.u32 %v4254_v13, %v3461_v11  ;;  %v4248_v60 = vld [vmem:[%s6352_s1 + $0x394] sm:$0xf0]  ;;  %v3442_v4 = vor.u32 %v4247_v43, %v3439_v54  ;;  %v3431_v5 = vld [vmem:[%s6352_s1 + $0x388] sm:$0xf0]  ;;  %v3429_v9 = vld [vmem:[%s6352_s1 + $0x380] sm:$0xf] }
  0x6a   : > { %v1102_v11 = vshrl.u32 %v5300_v45, 16  ;;  %v3631_v43 = vld [vmem:[%s6352_s1 + $0x4d8] sm:$0xf0]  ;;  %v3574_v54 = vor.u32 %v4274_v42, %v3573_v41 }
  0x6b   : > { %1022 = vmatpush.bf16.msra.mxu0 %v3206_v28  ;;  %v3458_v28 = vor.u32 %v4251_v12, %v3455_v2  ;;  %v4276_v12 = vld [vmem:[%s6352_s1 + $0x474] sm:$0xf0]  ;;  %v3645_v2 = vld [vmem:[%s6352_s1 + $0x4f0] sm:$0xf]  ;;  %v3535_v41 = vld [vmem:[%s6352_s1 + $0x418] sm:$0xf0] }
  0x6c   : > { %1058 = vmatpush.bf16.msra.mxu2 %v3210_v23  ;;  %1040 = vmatpush.bf16.msra.mxu1 %v3270_v29  ;;  %v4236_v23 = vld [vmem:[%s6352_s1 + $0x334] sm:$0xf0]  ;;  %v1094_v29 = vld [vmem:[%s4712_s6 + $0x10] sm:$0x3] }
  0x6d   : > { %1076 = vmatpush.bf16.msra.mxu3 %v3274_v24  ;;  %v3453_v24 = vld [vmem:[%s6352_s1 + $0x3b0] sm:$0xf]  ;;  %v3390_v31 = vor.u32 %v4236_v23, %v3389_v22  ;;  %v1099_v46 = vunpack.c.l.b16 %v1094_v29  ;;  %v4292_v22 = vld [vmem:[%s6352_s1 + $0x4f4] sm:$0xf0]  ;;  %v4273_v29 = vld [vmem:[%s6352_s1 + $0x464] sm:$0xf] }
  0x6e   : > { %1023 = vmatmul.bf16.vlgmr.msra.gmra.mxu0 %v4974_v58 }
  0x6f   : > { %1319 = vmatpush.bf16.msrb.mxu0 %v3422_v36  ;;  %1059 = vmatmul.bf16.vlgmr.msra.gmra.mxu2 %v4974_v58  ;;  %v3463_v58 = vld [vmem:[%s6352_s1 + $0x3c8] sm:$0xf0]  ;;  %v4249_v36 = vld [vmem:[%s6352_s1 + $0x3a4] sm:$0xf]  ;;  %v5330_v57 = vpack.c.b16 %v1099_v46, %v5138_v40  ;;  %v3637_v46 = vld [vmem:[%s6352_s1 + $0x4e0] sm:$0xf] }
  0x70   : > { %1355 = vmatpush.bf16.msrb.mxu2 %v3426_v32  ;;  %1337 = vmatpush.bf16.msrb.mxu1 %v3486_v37  ;;  %v3466_v16 = vor.u32 %v4253_v8, %v3463_v58  ;;  %v3454_v32 = vor.u32 %v4252_v25, %v3453_v24  ;;  %v3447_v37 = vld [vmem:[%s6352_s1 + $0x3a8] sm:$0xf0]  ;;  %v3374_v8 = vor.u32 %v4232_v44, %v3373_v55  ;;  %v3565_v44 = vld [vmem:[%s6352_s1 + $0x450] sm:$0xf] }
  0x71   : > { %1373 = vmatpush.bf16.msrb.mxu3 %v3490_v33  ;;  %v4233_v33 = vld [vmem:[%s6352_s1 + $0x324] sm:$0xf]  ;;  %v3450_v49 = vor.u32 %v4249_v36, %v3447_v37  ;;  %v3430_v24 = vor.u32 %v4246_v10, %v3429_v9  ;;  %v1113_v26 = vshrl.u32 %v5330_v57, 16  ;;  %v3639_v36 = vld [vmem:[%s6352_s1 + $0x4e8] sm:$0xf0]  ;;  %v1149_v37 = vrot.slane %v5300_v45, 1 }
  0x72   : > { %v3386_v48 = vor.u32 %v4233_v33, %v3383_v34  ;;  %v3575_v33 = vld [vmem:[%s6352_s1 + $0x468] sm:$0xf0]  ;;  %v4289_v34 = vld [vmem:[%s6352_s1 + $0x4e4] sm:$0xf]  ;;  %v3621_v9 = vld [vmem:[%s6352_s1 + $0x4c0] sm:$0xf] }
  0x73   : > { %1320 = vmatpush.bf16.msrb.mxu0 %v3414_v56  ;;  %v817_v56 = vshrl.u32 %v5167_v30, 16  ;;  %v3578_v45 = vor.u32 %v4273_v29, %v3575_v33  ;;  %v4286_v10 = vld [vmem:[%s6352_s1 + $0x4c4] sm:$0xf0]  ;;  %v3607_v29 = vld [vmem:[%s6352_s1 + $0x4a8] sm:$0xf0] }
  0x74   : > { %1356 = vmatpush.bf16.msrb.mxu2 %v3418_v35  ;;  %1338 = vmatpush.bf16.msrb.mxu1 %v3478_v59  ;;  %v3375_v35 = vld [vmem:[%s6352_s1 + $0x318] sm:$0xf0]  ;;  %v3437_v59 = vld [vmem:[%s6352_s1 + $0x390] sm:$0xf]  ;;  %v3605_v33 = vld [vmem:[%s6352_s1 + $0x4a0] sm:$0xf] }
  0x75   : > { %1374 = vmatpush.bf16.msrb.mxu3 %v3482_v52  ;;  %1041 = vmatmul.bf16.vlgmr.msra.gmra.mxu1 %v816_v14  ;;  %v3382_v52 = vor.u32 %v4234_v39, %v3381_v38  ;;  %v3378_v1 = vor.u32 %v4231_v50, %v3375_v35  ;;  %v3438_v58 = vor.u32 %v4248_v60, %v3437_v59  ;;  %v5399_v38 = vrot.slane %v5167_v30, 1  ;;  %v4290_v30 = vld [vmem:[%s6352_s1 + $0x4e4] sm:$0xf0]  ;;  %v3567_v50 = vld [vmem:[%s6352_s1 + $0x458] sm:$0xf0] }
  0x76   : > { %1077 = vmatmul.bf16.vlgmr.msra.gmra.mxu3 %v816_v14  ;;  %v819_v13 = vor.u32 %v817_v56, %v5219_v3  ;;  %v1106_v14 = vrot.slane %v1104_v61, 1  ;;  %v3581_v3 = vld [vmem:[%s6352_s1 + $0x470] sm:$0xf]  ;;  %v4287_v35 = vld [vmem:[%s6352_s1 + $0x4d4] sm:$0xf]  ;;  %v3638_v55 = vor.u32 %v4290_v30, %v3637_v46 }
  0x77   : > { %1321 = vmatpush.bf16.msrb.mxu0 %v3406_v6  ;;  %v3365_v6 = vld [vmem:[%s6352_s1 + $0x300] sm:$0xf]  ;;  %v4272_v56 = vld [vmem:[%s6352_s1 + $0x454] sm:$0xf0]  ;;  %v3629_v59 = vld [vmem:[%s6352_s1 + $0x4d0] sm:$0xf]  ;;  %v3634_v61 = vor.u32 %v4287_v35, %v3631_v43 }
  0x78   : > { %1357 = vmatpush.bf16.msrb.mxu2 %v3410_v63  ;;  %1339 = vmatpush.bf16.msrb.mxu1 %v3470_v7  ;;  %v3367_v63 = vld [vmem:[%s6352_s1 + $0x308] sm:$0xf0]  ;;  %v4230_v7 = vld [vmem:[%s6352_s1 + $0x304] sm:$0xf0]  ;;  %v1107_v39 = vor.u32 %v1106_v14, %v1102_v11  ;;  %v4288_v60 = vld [vmem:[%s6352_s1 + $0x4d4] sm:$0xf0] }
  0x79   : > { %1375 = vmatpush.bf16.msrb.mxu3 %v3474_v0  ;;  %v4245_v0 = vld [vmem:[%s6352_s1 + $0x384] sm:$0xf]  ;;  %v3366_v23 = vor.u32 %v4230_v7, %v3365_v6  ;;  %v3623_v7 = vld [vmem:[%s6352_s1 + $0x4c8] sm:$0xf0]  ;;  %v4279_v30 = vld [vmem:[%s6352_s1 + $0x494] sm:$0xf] }
  0x7a   : > { %v4285_v6 = vld [vmem:[%s6352_s1 + $0x4c4] sm:$0xf]  ;;  %v1397_v43 = vld [vmem:[%s4712_s6 + $0x10] sm:$0xf] }
  0x7b   : > { %1322 = vmatpush.bf16.msrb.mxu0 %v3398_v20  ;;  %v3370_v20 = vor.u32 %v4229_v62, %v3367_v63  ;;  %v3626_v14 = vor.u32 %v4285_v6, %v3623_v7  ;;  %v4261_v35 = vld [vmem:[%s6352_s1 + $0x404] sm:$0xf]  ;;  %v4323_v6 = vld [vmem:[%s6352_s1 + $0x5f4] sm:$0xf]  ;;  %v3807_v7 = vld [vmem:[%s6352_s1 + $0x5f8] sm:$0xf0] }
  0x7c   : > { %1358 = vmatpush.bf16.msrb.mxu2 %v3402_v15  ;;  %1340 = vmatpush.bf16.msrb.mxu1 %v3462_v21  ;;  %v1109_v15 = vshll.u32 %v5330_v57, 16  ;;  %v3434_v21 = vor.u32 %v4245_v0, %v3431_v5  ;;  %v4269_v0 = vld [vmem:[%s6352_s1 + $0x444] sm:$0xf]  ;;  %v3630_v5 = vor.u32 %v4288_v60, %v3629_v59  ;;  %v3525_v60 = vld [vmem:[%s6352_s1 + $0x400] sm:$0xf] }
  0x7d   : > { %1376 = vmatpush.bf16.msrb.mxu3 %v3466_v16  ;;  %v4275_v16 = vld [vmem:[%s6352_s1 + $0x474] sm:$0xf] }
  0x7e   : > { %1028 = vmatmul.bf16.gmra.mxu0 %v794_v47  ;;  %v1111_v25 = vrot.slane %v1109_v15, 1  ;;  %v4267_v15 = vld [vmem:[%s6352_s1 + $0x434] sm:$0xf] }
  0x7f   : > { %1323 = vmatpush.bf16.msrb.mxu0 %v3390_v31  ;;  %1064 = vmatmul.bf16.gmra.mxu2 %v794_v47  ;;  %v3582_v31 = vor.u32 %v4276_v12, %v3581_v3  ;;  %v3642_v47 = vor.u32 %v4289_v34, %v3639_v36  ;;  %v3615_v3 = vld [vmem:[%s6352_s1 + $0x4b8] sm:$0xf0]  ;;  %v3613_v12 = vld [vmem:[%s6352_s1 + $0x4b0] sm:$0xf]  ;;  %v4282_v34 = vld [vmem:[%s6352_s1 + $0x4a4] sm:$0xf0] }
  0x80   : > { %1359 = vmatpush.bf16.msrb.mxu2 %v3394_v27  ;;  %1341 = vmatpush.bf16.msrb.mxu1 %v3454_v32  ;;  %v3586_v27 = vor.u32 %v4275_v16, %v3583_v17  ;;  %v3646_v32 = vor.u32 %v4292_v22, %v3645_v2  ;;  %v3551_v16 = vld [vmem:[%s6352_s1 + $0x438] sm:$0xf0]  ;;  %v4284_v2 = vld [vmem:[%s6352_s1 + $0x4b4] sm:$0xf0]  ;;  %v3606_v46 = vor.u32 %v4282_v34, %v3605_v33  ;;  %v4319_v34 = vld [vmem:[%s6352_s1 + $0x5d4] sm:$0xf] }
  0x81   : > { %1377 = vmatpush.bf16.msrb.mxu3 %v3458_v28  ;;  %v3650_v28 = vor.u32 %v4291_v18, %v3647_v19  ;;  %v3622_v18 = vor.u32 %v4286_v10, %v3621_v9  ;;  %v4283_v19 = vld [vmem:[%s6352_s1 + $0x4b4] sm:$0xf]  ;;  %v3554_v22 = vor.u32 %v4267_v15, %v3551_v16  ;;  %v4308_v10 = vld [vmem:[%s6352_s1 + $0x574] sm:$0xf0]  ;;  %v3727_v33 = vld [vmem:[%s6352_s1 + $0x558] sm:$0xf0] }
  0x83   : > { %1324 = vmatpush.bf16.msrb.mxu0 %v3382_v52  ;;  %v1151_v52 = vsel %vm312_vm0, %v1149_v37, %v5399_v38 }
  0x84   : > { %1360 = vmatpush.bf16.msrb.mxu2 %v3386_v48  ;;  %1342 = vmatpush.bf16.msrb.mxu1 %v3446_v53  ;;  %v4271_v48 = vld [vmem:[%s6352_s1 + $0x454] sm:$0xf]  ;;  %v1112_v53 = vsel %vm206_vm1, %v1107_v39, %v1111_v25 }
  0x85   : > { %1378 = vmatpush.bf16.msrb.mxu3 %v3450_v49  ;;  %1046 = vmatmul.bf16.gmra.mxu1 %v819_v13  ;;  %v1115_v49 = vor.u32 %v1113_v26, %v1111_v25  ;;  %v3570_v57 = vor.u32 %v4271_v48, %v3567_v50  ;;  %v1152_v62 = vrot.slane %v1112_v53, 1  ;;  %v3614_v25 = vor.u32 %v4284_v2, %v3613_v12  ;;  %v4265_v26 = vld [vmem:[%s6352_s1 + $0x424] sm:$0xf]  ;;  %v4263_v39 = vld [vmem:[%s6352_s1 + $0x414] sm:$0xf] }
  0x86   : > { %1082 = vmatmul.bf16.gmra.mxu3 %v819_v13  ;;  %v4264_v48 = vld [vmem:[%s6352_s1 + $0x414] sm:$0xf0]  ;;  %v3538_v53 = vor.u32 %v4263_v39, %v3535_v41  ;;  %v3735_v12 = vld [vmem:[%s6352_s1 + $0x568] sm:$0xf0] }
  0x87   : > { %1325 = vmatpush.bf16.msrb.mxu0 %v3374_v8  ;;  %v5440_v63 = vrot.slane %v1115_v49, 1  ;;  %v3557_v8 = vld [vmem:[%s6352_s1 + $0x440] sm:$0xf]  ;;  %v3597_v49 = vld [vmem:[%s6352_s1 + $0x490] sm:$0xf] }
  0x88   : > { %1361 = vmatpush.bf16.msrb.mxu2 %v3378_v1  ;;  %1343 = vmatpush.bf16.msrb.mxu1 %v3438_v58  ;;  %v3559_v1 = vld [vmem:[%s6352_s1 + $0x448] sm:$0xf0]  ;;  %v4270_v58 = vld [vmem:[%s6352_s1 + $0x444] sm:$0xf0]  ;;  %v4280_v50 = vld [vmem:[%s6352_s1 + $0x494] sm:$0xf0] }
  0x89   : > { %1379 = vmatpush.bf16.msrb.mxu3 %v3442_v4  ;;  %v3566_v4 = vor.u32 %v4272_v56, %v3565_v44  ;;  %v1154_v11 = vsel %vm312_vm0, %v1152_v62, %v5440_v63  ;;  %v3562_v13 = vor.u32 %v4269_v0, %v3559_v1  ;;  %v3558_v17 = vor.u32 %v4270_v58, %v3557_v8  ;;  %v4277_v44 = vld [vmem:[%s6352_s1 + $0x484] sm:$0xf]  ;;  %v4278_v62 = vld [vmem:[%s6352_s1 + $0x484] sm:$0xf0]  ;;  %v3741_v8 = vld [vmem:[%s6352_s1 + $0x570] sm:$0xf] }
  0x8a   : > { %v3598_v59 = vor.u32 %v4280_v50, %v3597_v49  ;;  %v5568_v0 = vunpack.c.l.b16 %v1397_v43  ;;  %v3799_v2 = vld [vmem:[%s6352_s1 + $0x5e8] sm:$0xf0] }
  0x8b   : > { %1326 = vmatpush.bf16.msrb.mxu0 %v3366_v23  ;;  %v3618_v23 = vor.u32 %v4283_v19, %v3615_v3  ;;  %v3810_v19 = vor.u32 %v4323_v6, %v3807_v7  ;;  %v4305_v3 = vld [vmem:[%s6352_s1 + $0x564] sm:$0xf]  ;;  %v3719_v43 = vld [vmem:[%s6352_s1 + $0x548] sm:$0xf0]  ;;  %v4315_v6 = vld [vmem:[%s6352_s1 + $0x5b4] sm:$0xf] }
  0x8c   : > { %1362 = vmatpush.bf16.msrb.mxu2 %v3370_v20  ;;  %1344 = vmatpush.bf16.msrb.mxu1 %v3430_v24  ;;  %v3549_v20 = vld [vmem:[%s6352_s1 + $0x430] sm:$0xf] }
  0x8d   : > { %1380 = vmatpush.bf16.msrb.mxu3 %v3434_v21  ;;  %v4268_v21 = vld [vmem:[%s6352_s1 + $0x434] sm:$0xf0] }
  0x8e   : > { %1327 = vmatmul.bf16.vlgmr.msrb.gmra.mxu0 %v1151_v52  ;;  %v3550_v24 = vor.u32 %v4268_v21, %v3549_v20  ;;  %v3742_v20 = vor.u32 %v4308_v10, %v3741_v8 }
  0x8f   : > { %1625 = vmatpush.bf16.msra.mxu0 %v3582_v31  ;;  %1363 = vmatmul.bf16.vlgmr.msrb.gmra.mxu2 %v1151_v52  ;;  %v3541_v31 = vld [vmem:[%s6352_s1 + $0x420] sm:$0xf]  ;;  %v1400_v52 = vld [vmem:[%s4712_s6 + $0x14] sm:$0x1] }
  0x90   : > { %1661 = vmatpush.bf16.msra.mxu2 %v3586_v27  ;;  %1643 = vmatpush.bf16.msra.mxu1 %v3646_v32  ;;  %v3543_v27 = vld [vmem:[%s6352_s1 + $0x428] sm:$0xf0]  ;;  %v4266_v32 = vld [vmem:[%s6352_s1 + $0x424] sm:$0xf0]  ;;  %v1412_v1 = vunpack.c.l.b16 %v1400_v52  ;;  %v4317_v52 = vld [vmem:[%s6352_s1 + $0x5c4] sm:$0xf] }
  0x91   : > { %1679 = vmatpush.bf16.msra.mxu3 %v3650_v28  ;;  %v4281_v28 = vld [vmem:[%s6352_s1 + $0x4a4] sm:$0xf]  ;;  %v3546_v36 = vor.u32 %v4265_v26, %v3543_v27  ;;  %v3542_v42 = vor.u32 %v4266_v32, %v3541_v31  ;;  %v4322_v26 = vld [vmem:[%s6352_s1 + $0x5e4] sm:$0xf0]  ;;  %v4303_v32 = vld [vmem:[%s6352_s1 + $0x554] sm:$0xf] }
  0x92   : > { %v3610_v37 = vor.u32 %v4281_v28, %v3607_v29  ;;  %v5597_v16 = vpack.c.b16 %v1412_v1, %v5568_v0  ;;  %v3738_v29 = vor.u32 %v4305_v3, %v3735_v12 }
  0x93   : > { %1626 = vmatpush.bf16.msra.mxu0 %v3574_v54 }
  0x94   : > { %1662 = vmatpush.bf16.msra.mxu2 %v3578_v45  ;;  %1644 = vmatpush.bf16.msra.mxu1 %v3638_v55  ;;  %v3599_v45 = vld [vmem:[%s6352_s1 + $0x498] sm:$0xf0]  ;;  %v3527_v55 = vld [vmem:[%s6352_s1 + $0x408] sm:$0xf0]  ;;  %v1423_v28 = vshll.u32 %v5597_v16, 16 }
  0x95   : > { %1680 = vmatpush.bf16.msra.mxu3 %v3642_v47  ;;  %1345 = vmatmul.bf16.vlgmr.msrb.gmra.mxu1 %v1154_v11  ;;  %v3533_v47 = vld [vmem:[%s6352_s1 + $0x410] sm:$0xf]  ;;  %v3602_v54 = vor.u32 %v4279_v30, %v3599_v45  ;;  %v3530_v58 = vor.u32 %v4261_v35, %v3527_v55  ;;  %v4320_v45 = vld [vmem:[%s6352_s1 + $0x5d4] sm:$0xf0]  ;;  %v4301_v35 = vld [vmem:[%s6352_s1 + $0x544] sm:$0xf] }
  0x96   : > { %1381 = vmatmul.bf16.vlgmr.msrb.gmra.mxu3 %v1154_v11  ;;  %v3534_v56 = vor.u32 %v4264_v48, %v3533_v47  ;;  %v3805_v11 = vld [vmem:[%s6352_s1 + $0x5f0] sm:$0xf]  ;;  %v5650_v47 = vrot.slane %v1423_v28, 1  ;;  %v3730_v48 = vor.u32 %v4303_v32, %v3727_v33  ;;  %v3717_v55 = vld [vmem:[%s6352_s1 + $0x540] sm:$0xf] }
  0x97   : > { %1627 = vmatpush.bf16.msra.mxu0 %v3566_v4  ;;  %v4307_v4 = vld [vmem:[%s6352_s1 + $0x574] sm:$0xf]  ;;  %v3789_v30 = vld [vmem:[%s6352_s1 + $0x5d0] sm:$0xf]  ;;  %v4314_v32 = vld [vmem:[%s6352_s1 + $0x5a4] sm:$0xf0] }
  0x98   : > { %1663 = vmatpush.bf16.msra.mxu2 %v3570_v57  ;;  %1645 = vmatpush.bf16.msra.mxu1 %v3630_v5  ;;  %v4262_v57 = vld [vmem:[%s6352_s1 + $0x404] sm:$0xf0]  ;;  %v3743_v5 = vld [vmem:[%s6352_s1 + $0x578] sm:$0xf0] }
  0x99   : > { %1681 = vmatpush.bf16.msra.mxu3 %v3634_v61  ;;  %v3589_v61 = vld [vmem:[%s6352_s1 + $0x480] sm:$0xf] }
  0x9a   : > { %v3590_v15 = vor.u32 %v4278_v62, %v3589_v61  ;;  %v3722_v62 = vor.u32 %v4301_v35, %v3719_v43  ;;  %v4311_v35 = vld [vmem:[%s6352_s1 + $0x594] sm:$0xf]  ;;  %v3759_v43 = vld [vmem:[%s6352_s1 + $0x598] sm:$0xf0] }
  0x9b   : > { %1628 = vmatpush.bf16.msra.mxu0 %v3558_v17  ;;  %v1418_v17 = vshll.u32 %v5082_v51, 16 }
  0x9c   : > { %1664 = vmatpush.bf16.msra.mxu2 %v3562_v13  ;;  %1646 = vmatpush.bf16.msra.mxu1 %v3622_v18  ;;  %v4324_v13 = vld [vmem:[%s6352_s1 + $0x5f4] sm:$0xf0]  ;;  %v3746_v18 = vor.u32 %v4307_v4, %v3743_v5  ;;  %v4299_v4 = vld [vmem:[%s6352_s1 + $0x534] sm:$0xf]  ;;  %v3711_v5 = vld [vmem:[%s6352_s1 + $0x538] sm:$0xf0] }
  0x9d   : > { %1682 = vmatpush.bf16.msra.mxu3 %v3626_v14  ;;  %v3526_v14 = vor.u32 %v4262_v57, %v3525_v60  ;;  %v3806_v21 = vor.u32 %v4324_v13, %v3805_v11  ;;  %v1420_v27 = vrot.slane %v1418_v17, 1  ;;  %v3775_v11 = vld [vmem:[%s6352_s1 + $0x5b8] sm:$0xf0]  ;;  %v3709_v13 = vld [vmem:[%s6352_s1 + $0x530] sm:$0xf] }
  0x9e   : > { %1332 = vmatmul.bf16.gmra.mxu0 %v5399_v38  ;;  %v3773_v17 = vld [vmem:[%s6352_s1 + $0x5b0] sm:$0xf]  ;;  %v3778_v3 = vor.u32 %v4315_v6, %v3775_v11  ;;  %v3685_v6 = vld [vmem:[%s6352_s1 + $0x500] sm:$0xf] }
  0x9f   : > { %1629 = vmatpush.bf16.msra.mxu0 %v3550_v24  ;;  %1368 = vmatmul.bf16.gmra.mxu2 %v5399_v38  ;;  %v3591_v38 = vld [vmem:[%s6352_s1 + $0x488] sm:$0xf0]  ;;  %v4306_v24 = vld [vmem:[%s6352_s1 + $0x564] sm:$0xf0] }
  0xa0   : > { %1665 = vmatpush.bf16.msra.mxu2 %v3554_v22  ;;  %1647 = vmatpush.bf16.msra.mxu1 %v3614_v25  ;;  %v3594_v9 = vor.u32 %v4277_v44, %v3591_v38  ;;  %v1416_v22 = vshrl.u32 %v5082_v51, 16  ;;  %v3797_v25 = vld [vmem:[%s6352_s1 + $0x5e0] sm:$0xf]  ;;  %v1703_v44 = vld [vmem:[%s4712_s6 + $0x8] sm:$0xe] }
  0xa1   : > { %1683 = vmatpush.bf16.msra.mxu3 %v3618_v23  ;;  %v3733_v23 = vld [vmem:[%s6352_s1 + $0x560] sm:$0xf]  ;;  %v3798_v41 = vor.u32 %v4322_v26, %v3797_v25  ;;  %v4302_v38 = vld [vmem:[%s6352_s1 + $0x544] sm:$0xf0]  ;;  %v1706_v7 = vunpack.c.l.b16 %v1703_v44  ;;  %v3767_v25 = vld [vmem:[%s6352_s1 + $0x5a8] sm:$0xf0] }
  0xa2   : > { %v3734_v39 = vor.u32 %v4306_v24, %v3733_v23  ;;  %v1421_v50 = vor.u32 %v1420_v27, %v1416_v22  ;;  %v3703_v22 = vld [vmem:[%s6352_s1 + $0x528] sm:$0xf0]  ;;  %v4313_v24 = vld [vmem:[%s6352_s1 + $0x5a4] sm:$0xf]  ;;  %v3701_v26 = vld [vmem:[%s6352_s1 + $0x520] sm:$0xf] }
  0xa3   : > { %1630 = vmatpush.bf16.msra.mxu0 %v3542_v42  ;;  %v3725_v42 = vld [vmem:[%s6352_s1 + $0x550] sm:$0xf] }
  0xa4   : > { %1666 = vmatpush.bf16.msra.mxu2 %v3546_v36  ;;  %1648 = vmatpush.bf16.msra.mxu1 %v3606_v46  ;;  %v3791_v36 = vld [vmem:[%s6352_s1 + $0x5d8] sm:$0xf0]  ;;  %v4304_v46 = vld [vmem:[%s6352_s1 + $0x554] sm:$0xf0]  ;;  %v1426_v61 = vsel %vm206_vm1, %v1421_v50, %v5650_v47 }
  0xa5   : > { %1684 = vmatpush.bf16.msra.mxu3 %v3610_v37  ;;  %1350 = vmatmul.bf16.gmra.mxu1 %v5440_v63  ;;  %v3794_v49 = vor.u32 %v4319_v34, %v3791_v36  ;;  %v1404_v34 = vpack.c.b16 %v5568_v0, %v5568_v0 }
  0xa6   : > { %1386 = vmatmul.bf16.gmra.mxu3 %v5440_v63  ;;  %v4321_v63 = vld [vmem:[%s6352_s1 + $0x5e4] sm:$0xf] }
  0xa7   : > { %1631 = vmatpush.bf16.msra.mxu0 %v3534_v56  ;;  %v3802_v31 = vor.u32 %v4321_v63, %v3799_v2  ;;  %v3781_v56 = vld [vmem:[%s6352_s1 + $0x5c0] sm:$0xf]  ;;  %v4297_v2 = vld [vmem:[%s6352_s1 + $0x524] sm:$0xf] }
  0xa8   : > { %1667 = vmatpush.bf16.msra.mxu2 %v3538_v53  ;;  %1649 = vmatpush.bf16.msra.mxu1 %v3598_v59  ;;  %v3726_v53 = vor.u32 %v4304_v46, %v3725_v42  ;;  %v4318_v59 = vld [vmem:[%s6352_s1 + $0x5c4] sm:$0xf0]  ;;  %v1427_v42 = vshrl.u32 %v5597_v16, 16  ;;  %v3706_v46 = vor.u32 %v4297_v2, %v3703_v22  ;;  %v4340_v2 = vld [vmem:[%s6352_s1 + $0x674] sm:$0xf0] }
  0xa9   : > { %1685 = vmatpush.bf16.msra.mxu3 %v3602_v54  ;;  %v3790_v54 = vor.u32 %v4320_v45, %v3789_v30  ;;  %v3782_v10 = vor.u32 %v4318_v59, %v3781_v56  ;;  %v3770_v30 = vor.u32 %v4313_v24, %v3767_v25  ;;  %v4295_v45 = vld [vmem:[%s6352_s1 + $0x514] sm:$0xf]  ;;  %v3965_v22 = vld [vmem:[%s6352_s1 + $0x6f0] sm:$0xf] }
  0xab   : > { %1632 = vmatpush.bf16.msra.mxu0 %v3526_v14  ;;  %v492_v37 = vpop.f32.mrf.mxu0  ;;  %v1704_v14 = vld [vmem:[%s4712_s6 + $0x14] sm:$0x3] }
  0xac   : > { %1668 = vmatpush.bf16.msra.mxu2 %v3530_v58  ;;  %1650 = vmatpush.bf16.msra.mxu1 %v3590_v15  ;;  %v4300_v15 = vld [vmem:[%s6352_s1 + $0x534] sm:$0xf0] }
  0xad   : > { %1686 = vmatpush.bf16.msra.mxu3 %v3594_v9  ;;  %v3718_v9 = vor.u32 %v4302_v38, %v3717_v55  ;;  %v3710_v12 = vor.u32 %v4300_v15, %v3709_v13  ;;  %v4293_v55 = vld [vmem:[%s6352_s1 + $0x504] sm:$0xf]  ;;  %v4310_v13 = vld [vmem:[%s6352_s1 + $0x584] sm:$0xf0]  ;;  %v3903_v15 = vld [vmem:[%s6352_s1 + $0x678] sm:$0xf0] }
  0xae   : > { %1633 = vmatmul.bf16.vlgmr.msra.gmra.mxu0 %v5082_v51 }
  0xaf   : > { %1929 = vmatpush.bf16.msrb.mxu0 %v3742_v20  ;;  %1669 = vmatmul.bf16.vlgmr.msra.gmra.mxu2 %v5082_v51  ;;  %v3783_v51 = vld [vmem:[%s6352_s1 + $0x5c8] sm:$0xf0]  ;;  %v5709_v20 = vpack.c.b16 %v5138_v40, %v1706_v7  ;;  %v4294_v7 = vld [vmem:[%s6352_s1 + $0x504] sm:$0xf0] }
  0xb0   : > { %1965 = vmatpush.bf16.msrb.mxu2 %v3746_v18  ;;  %1947 = vmatpush.bf16.msrb.mxu1 %v3806_v21  ;;  %v3786_v1 = vor.u32 %v4317_v52, %v3783_v51  ;;  %v4316_v18 = vld [vmem:[%s6352_s1 + $0x5b4] sm:$0xf0]  ;;  %v1709_v21 = vunpack.c.l.b16 %v1704_v14  ;;  %v3693_v52 = vld [vmem:[%s6352_s1 + $0x510] sm:$0xf]  ;;  %v4339_v14 = vld [vmem:[%s6352_s1 + $0x674] sm:$0xf]  ;;  %v3686_v24 = vor.u32 %v4294_v7, %v3685_v6 }
  0xb1   : > { %1983 = vmatpush.bf16.msrb.mxu3 %v3810_v19  ;;  %v3714_v19 = vor.u32 %v4299_v4, %v3711_v5  ;;  %v3774_v63 = vor.u32 %v4316_v18, %v3773_v17  ;;  %v4312_v51 = vld [vmem:[%s6352_s1 + $0x594] sm:$0xf0]  ;;  %v1712_v44 = vshrl.u32 %v5709_v20, 16  ;;  %v4355_v18 = vld [vmem:[%s6352_s1 + $0x6f4] sm:$0xf] }
  0xb2   : > { %v528_v60 = vpop.f32.mrf.mxu2  ;;  %v510_v57 = vpop.f32.mrf.mxu1  ;;  %v5740_v36 = vpack.c.b16 %v1709_v21, %v5568_v0  ;;  %v4352_v6 = vld [vmem:[%s6352_s1 + $0x6d4] sm:$0xf0] }
  0xb3   : > { %1930 = vmatpush.bf16.msrb.mxu0 %v3734_v39  ;;  %v5690_v8 = vadd.f32 %v510_v57, %v492_v37  ;;  %v494_v58 = vpop.f32.mrf.mxu0  ;;  %v1714_v37 = vshll.u32 %v5709_v20, 16  ;;  %v3687_v57 = vld [vmem:[%s6352_s1 + $0x508] sm:$0xf0] }
  0xb4   : > { %1966 = vmatpush.bf16.msrb.mxu2 %v3738_v29  ;;  %1948 = vmatpush.bf16.msrb.mxu1 %v3798_v41  ;;  %v4298_v29 = vld [vmem:[%s6352_s1 + $0x524] sm:$0xf0]  ;;  %v1719_v56 = vshll.u32 %v5740_v36, 16 }
  0xb5   : > { %1984 = vmatpush.bf16.msrb.mxu3 %v3802_v31  ;;  %1651 = vmatmul.bf16.vlgmr.msra.gmra.mxu1 %v1426_v61  ;;  %v3765_v31 = vld [vmem:[%s6352_s1 + $0x5a0] sm:$0xf]  ;;  %v1716_v38 = vrot.slane %v1714_v37, 1  ;;  %v3895_v37 = vld [vmem:[%s6352_s1 + $0x668] sm:$0xf0] }
  0xb6   : > { %1687 = vmatmul.bf16.vlgmr.msra.gmra.mxu3 %v1426_v61  ;;  %v3766_v50 = vor.u32 %v4314_v32, %v3765_v31  ;;  %v4309_v61 = vld [vmem:[%s6352_s1 + $0x584] sm:$0xf] }
  0xb7   : > { %1931 = vmatpush.bf16.msrb.mxu0 %v3726_v53  ;;  %v4296_v53 = vld [vmem:[%s6352_s1 + $0x514] sm:$0xf0]  ;;  %v4337_v32 = vld [vmem:[%s6352_s1 + $0x664] sm:$0xf] }
  0xb8   : > { %1967 = vmatpush.bf16.msrb.mxu2 %v3730_v48  ;;  %1949 = vmatpush.bf16.msrb.mxu1 %v3790_v54  ;;  %v3695_v48 = vld [vmem:[%s6352_s1 + $0x518] sm:$0xf0]  ;;  %v3757_v54 = vld [vmem:[%s6352_s1 + $0x590] sm:$0xf]  ;;  %v3694_v4 = vor.u32 %v4296_v53, %v3693_v52  ;;  %v4335_v53 = vld [vmem:[%s6352_s1 + $0x654] sm:$0xf] }
  0xb9   : > { %1985 = vmatpush.bf16.msrb.mxu3 %v3794_v49  ;;  %v546_v23 = vpop.f32.mrf.mxu3  ;;  %v3702_v49 = vor.u32 %v4298_v29, %v3701_v26  ;;  %v3698_v59 = vor.u32 %v4295_v45, %v3695_v48  ;;  %v3758_v5 = vor.u32 %v4312_v51, %v3757_v54  ;;  %v1721_v26 = vrot.slane %v1719_v56, 1  ;;  %v3893_v45 = vld [vmem:[%s6352_s1 + $0x660] sm:$0xf] }
  0xba   : > { %v5726_v27 = vadd.f32 %v546_v23, %v528_v60  ;;  %v530_v28 = vpop.f32.mrf.mxu2  ;;  %v512_v33 = vpop.f32.mrf.mxu1  ;;  %v3762_v60 = vor.u32 %v4311_v35, %v3759_v43  ;;  %v4356_v23 = vld [vmem:[%s6352_s1 + $0x6f4] sm:$0xf0]  ;;  %v3906_v29 = vor.u32 %v4339_v14, %v3903_v15  ;;  %v3898_v43 = vor.u32 %v4337_v32, %v3895_v37  ;;  %v3935_v37 = vld [vmem:[%s6352_s1 + $0x6b8] sm:$0xf0] }
  0xbb   : > { %1932 = vmatpush.bf16.msrb.mxu0 %v3718_v9  ;;  %v5743_v39 = vadd.f32 %v512_v33, %v494_v58  ;;  %v497_v41 = vpop.f32.mrf.mxu0  ;;  %v3749_v58 = vld [vmem:[%s6352_s1 + $0x580] sm:$0xf] }
  0xbc   : > { %1968 = vmatpush.bf16.msrb.mxu2 %v3722_v62  ;;  %1950 = vmatpush.bf16.msrb.mxu1 %v3782_v10  ;;  %v3751_v62 = vld [vmem:[%s6352_s1 + $0x588] sm:$0xf0]  ;;  %v1429_v10 = vor.u32 %v1427_v42, %v5650_v47  ;;  %v3967_v47 = vld [vmem:[%s6352_s1 + $0x6f8] sm:$0xf0]  ;;  %v3750_v25 = vor.u32 %v4310_v13, %v3749_v58  ;;  %v1759_v42 = vrot.slane %v5709_v20, 1 }
  0xbd   : > { %1986 = vmatpush.bf16.msrb.mxu3 %v3786_v1  ;;  %v3970_v31 = vor.u32 %v4355_v18, %v3967_v47  ;;  %v3879_v13 = vld [vmem:[%s6352_s1 + $0x648] sm:$0xf0]  ;;  %v3877_v47 = vld [vmem:[%s6352_s1 + $0x640] sm:$0xf] }
  0xbe   : > { %1638 = vmatmul.bf16.gmra.mxu0 %v1404_v34  ;;  %v3943_v18 = vld [vmem:[%s6352_s1 + $0x6c8] sm:$0xf0] }
  0xbf   : > { %1933 = vmatpush.bf16.msrb.mxu0 %v3710_v12  ;;  %1674 = vmatmul.bf16.gmra.mxu2 %v1404_v34  ;;  %v3690_v12 = vor.u32 %v4293_v55, %v3687_v57  ;;  %v3966_v34 = vor.u32 %v4356_v23, %v3965_v22  ;;  %v3887_v55 = vld [vmem:[%s6352_s1 + $0x658] sm:$0xf0] }
  0xc0   : > { %1969 = vmatpush.bf16.msrb.mxu2 %v3714_v19  ;;  %1951 = vmatpush.bf16.msrb.mxu1 %v3774_v63  ;;  %v3901_v19 = vld [vmem:[%s6352_s1 + $0x670] sm:$0xf]  ;;  %v3754_v63 = vor.u32 %v4309_v61, %v3751_v62  ;;  %v3890_v7 = vor.u32 %v4335_v53, %v3887_v55  ;;  %v3927_v53 = vld [vmem:[%s6352_s1 + $0x6a8] sm:$0xf0] }
  0xc1   : > { %1987 = vmatpush.bf16.msrb.mxu3 %v3778_v3  ;;  %v548_v1 = vpop.f32.mrf.mxu3  ;;  %v3902_v33 = vor.u32 %v4340_v2, %v3901_v19  ;;  %v3885_v62 = vld [vmem:[%s6352_s1 + $0x650] sm:$0xf] }
  0xc2   : > { %v5793_v9 = vadd.f32 %v548_v1, %v530_v28  ;;  %v533_v11 = vpop.f32.mrf.mxu2  ;;  %v515_v17 = vpop.f32.mrf.mxu1  ;;  %v1723_v28 = vshrl.u32 %v5740_v36, 16  ;;  %v3959_v36 = vld [vmem:[%s6352_s1 + $0x6e8] sm:$0xf0] }
  0xc3   : > { %1934 = vmatpush.bf16.msrb.mxu0 %v3702_v49  ;;  %v5814_v3 = vadd.f32 %v515_v17, %v497_v41  ;;  %v499_v21 = vpop.f32.mrf.mxu0  ;;  %v4353_v41 = vld [vmem:[%s6352_s1 + $0x6e4] sm:$0xf]  ;;  %v4338_v49 = vld [vmem:[%s6352_s1 + $0x664] sm:$0xf0] }
  0xc4   : > { %1970 = vmatpush.bf16.msrb.mxu2 %v3706_v46  ;;  %1952 = vmatpush.bf16.msrb.mxu1 %v3766_v50  ;;  %v5840_v46 = vrot.slane %v5597_v16, 1  ;;  %v3957_v50 = vld [vmem:[%s6352_s1 + $0x6e0] sm:$0xf]  ;;  %v4354_v16 = vld [vmem:[%s6352_s1 + $0x6e4] sm:$0xf0]  ;;  %v3962_v52 = vor.u32 %v4353_v41, %v3959_v36  ;;  %v1725_v51 = vor.u32 %v1723_v28, %v1721_v26  ;;  %v3894_v57 = vor.u32 %v4338_v49, %v3893_v45 }
  0xc5   : > { %1988 = vmatpush.bf16.msrb.mxu3 %v3770_v30  ;;  %1656 = vmatmul.bf16.gmra.mxu1 %v1429_v10  ;;  %v1717_v30 = vor.u32 %v1716_v38, %v1712_v44  ;;  %v4351_v44 = vld [vmem:[%s6352_s1 + $0x6d4] sm:$0xf]  ;;  %v3951_v38 = vld [vmem:[%s6352_s1 + $0x6d8] sm:$0xf0]  ;;  %v3958_v61 = vor.u32 %v4354_v16, %v3957_v50  ;;  %v4349_v17 = vld [vmem:[%s6352_s1 + $0x6c4] sm:$0xf] }
  0xc6   : > { %1692 = vmatmul.bf16.gmra.mxu3 %v1429_v10  ;;  %v3954_v58 = vor.u32 %v4351_v44, %v3951_v38  ;;  %v4334_v21 = vld [vmem:[%s6352_s1 + $0x644] sm:$0xf0]  ;;  %v4331_v28 = vld [vmem:[%s6352_s1 + $0x634] sm:$0xf]  ;;  %v3869_v41 = vld [vmem:[%s6352_s1 + $0x630] sm:$0xf] }
  0xc7   : > { %1935 = vmatpush.bf16.msrb.mxu0 %v3694_v4  ;;  %v4336_v4 = vld [vmem:[%s6352_s1 + $0x654] sm:$0xf0]  ;;  %v4329_v16 = vld [vmem:[%s6352_s1 + $0x624] sm:$0xf]  ;;  %v4330_v44 = vld [vmem:[%s6352_s1 + $0x624] sm:$0xf0] }
  0xc8   : > { %1971 = vmatpush.bf16.msrb.mxu2 %v3698_v59  ;;  %1953 = vmatpush.bf16.msrb.mxu1 %v3758_v5  ;;  %v1761_v59 = vsel %vm312_vm0, %v1759_v42, %v5840_v46  ;;  %v3949_v5 = vld [vmem:[%s6352_s1 + $0x6d0] sm:$0xf]  ;;  %v3886_v14 = vor.u32 %v4336_v4, %v3885_v62  ;;  %v4332_v42 = vld [vmem:[%s6352_s1 + $0x634] sm:$0xf0]  ;;  %v3925_v38 = vld [vmem:[%s6352_s1 + $0x6a0] sm:$0xf] }
  0xc9   : > { %1989 = vmatpush.bf16.msrb.mxu3 %v3762_v60  ;;  %v551_v48 = vpop.f32.mrf.mxu3  ;;  %v1722_v60 = vsel %vm206_vm1, %v1717_v30, %v1721_v26  ;;  %v3950_v15 = vor.u32 %v4352_v6, %v3949_v5  ;;  %v3946_v26 = vor.u32 %v4349_v17, %v3943_v18  ;;  %v3933_v30 = vld [vmem:[%s6352_s1 + $0x6b0] sm:$0xf]  ;;  %v4348_v45 = vld [vmem:[%s6352_s1 + $0x6b4] sm:$0xf0]  ;;  %v2008_v62 = vld [vmem:[%s4712_s6 + $0xc] sm:$0xf] }
  0xca   : > { %v5854_v20 = vadd.f32 %v551_v48, %v533_v11  ;;  %v535_v35 = vpop.f32.mrf.mxu2  ;;  %v517_v54 = vpop.f32.mrf.mxu1  ;;  %v1762_v10 = vrot.slane %v1722_v60, 1  ;;  %v5884_v11 = vrot.slane %v1725_v51, 1  ;;  %v3934_v50 = vor.u32 %v4348_v45, %v3933_v30  ;;  %v2011_v17 = vld [vmem:[%s4712_s6 + $0x18] sm:$0x1]  ;;  %v4063_v30 = vld [vmem:[%s6352_s1 + $0x778] sm:$0xf0] }
  0xcb   : > { %1936 = vmatpush.bf16.msrb.mxu0 %v3686_v24  ;;  %v724_v56 = vpop.f32.mrf.mxu0  ;;  %v3863_v35 = vld [vmem:[%s6352_s1 + $0x628] sm:$0xf0]  ;;  %v3861_v54 = vld [vmem:[%s6352_s1 + $0x620] sm:$0xf]  ;;  %v4328_v18 = vld [vmem:[%s6352_s1 + $0x614] sm:$0xf0] }
  0xcc   : > { %1972 = vmatpush.bf16.msrb.mxu2 %v3690_v12  ;;  %1954 = vmatpush.bf16.msrb.mxu1 %v3750_v25  ;;  %v725_v1 = vadd.f32 %v724_v56, %v5690_v8  ;;  %v4333_v8 = vld [vmem:[%s6352_s1 + $0x644] sm:$0xf]  ;;  %v3941_v12 = vld [vmem:[%s6352_s1 + $0x6c0] sm:$0xf]  ;;  %v1764_v23 = vsel %vm312_vm0, %v1762_v10, %v5884_v11  ;;  %v4346_v56 = vld [vmem:[%s6352_s1 + $0x6a4] sm:$0xf0]  ;;  %v3866_v5 = vor.u32 %v4329_v16, %v3863_v35 }
  0xcd   : > { %1990 = vmatpush.bf16.msrb.mxu3 %v3754_v63  ;;  %v4350_v63 = vld [vmem:[%s6352_s1 + $0x6c4] sm:$0xf0]  ;;  %v3882_v25 = vor.u32 %v4333_v8, %v3879_v13  ;;  %v3862_v8 = vor.u32 %v4330_v44, %v3861_v54  ;;  %v3926_v13 = vor.u32 %v4346_v56, %v3925_v38  ;;  %v4061_v16 = vld [vmem:[%s6352_s1 + $0x770] sm:$0xf] }
  0xce   : > { %1937 = vmatmul.bf16.vlgmr.msrb.gmra.mxu0 %v1761_v59  ;;  %v4125_v54 = vld [vmem:[%s6352_s1 + $0x7f0] sm:$0xf] }
  0xcf   : > { %2238 = vmatpush.bf16.msra.mxu0 %v3902_v33  ;;  %1973 = vmatmul.bf16.vlgmr.msrb.gmra.mxu2 %v1761_v59  ;;  %v3878_v33 = vor.u32 %v4334_v21, %v3877_v47  ;;  %v3917_v47 = vld [vmem:[%s6352_s1 + $0x690] sm:$0xf]  ;;  %v2022_v21 = vunpack.c.l.b16 %v2008_v62 }
  0xd0   : > { %2274 = vmatpush.bf16.msra.mxu2 %v3906_v29  ;;  %2256 = vmatpush.bf16.msra.mxu1 %v3966_v34  ;;  %v3871_v29 = vld [vmem:[%s6352_s1 + $0x638] sm:$0xf0]  ;;  %v3942_v34 = vor.u32 %v4350_v63, %v3941_v12  ;;  %v4325_v12 = vld [vmem:[%s6352_s1 + $0x604] sm:$0xf] }
  0xd1   : > { %2292 = vmatpush.bf16.msra.mxu3 %v3970_v31  ;;  %v553_v19 = vpop.f32.mrf.mxu3  ;;  %v3874_v48 = vor.u32 %v4331_v28, %v3871_v29 }
  0xd2   : > { %v760_v2 = vpop.f32.mrf.mxu2  ;;  %v742_v22 = vpop.f32.mrf.mxu1 }
  0xd3   : > { %2239 = vmatpush.bf16.msra.mxu0 %v3894_v57  ;;  %v761_v24 = vadd.f32 %v760_v2, %v5726_v27  ;;  %v5919_v31 = vadd.f32 %v742_v22, %v725_v1  ;;  %v726_v32 = vpop.f32.mrf.mxu0  ;;  %v4347_v27 = vld [vmem:[%s6352_s1 + $0x6b4] sm:$0xf]  ;;  %v3847_v22 = vld [vmem:[%s6352_s1 + $0x608] sm:$0xf0] }
  0xd4   : > { %2275 = vmatpush.bf16.msra.mxu2 %v3898_v43  ;;  %2257 = vmatpush.bf16.msra.mxu1 %v3958_v61  ;;  %v727_v36 = vadd.f32 %v726_v32, %v5743_v39  ;;  %v3938_v49 = vor.u32 %v4347_v27, %v3935_v37  ;;  %v3870_v39 = vor.u32 %v4332_v42, %v3869_v41  ;;  %v4327_v57 = vld [vmem:[%s6352_s1 + $0x614] sm:$0xf]  ;;  %v3845_v32 = vld [vmem:[%s6352_s1 + $0x600] sm:$0xf]  ;;  %v4342_v41 = vld [vmem:[%s6352_s1 + $0x684] sm:$0xf0] }
  0xd5   : > { %2293 = vmatpush.bf16.msra.mxu3 %v3962_v52  ;;  %1955 = vmatmul.bf16.vlgmr.msrb.gmra.mxu1 %v1764_v23  ;;  %v4345_v52 = vld [vmem:[%s6352_s1 + $0x6a4] sm:$0xf]  ;;  %v5971_v61 = vld [vmem:[%s4712_s6 + $0x10] sm:$0xff]  }
  0xd6   : > { %1991 = vmatmul.bf16.vlgmr.msrb.gmra.mxu3 %v1764_v23  ;;  %v3930_v6 = vor.u32 %v4345_v52, %v3927_v53  ;;  %v4403_v19 = vunpack.c.l.b16 %v5971_v61  ;;  %v4341_v23 = vld [vmem:[%s6352_s1 + $0x684] sm:$0xf]  ;;  %v4371_v42 = vld [vmem:[%s6352_s1 + $0x774] sm:$0xf]  ;;  %v4372_v53 = vld [vmem:[%s6352_s1 + $0x774] sm:$0xf0] }
  0xd7   : > { %2240 = vmatpush.bf16.msra.mxu0 %v3886_v14  ;;  %v3853_v14 = vld [vmem:[%s6352_s1 + $0x610] sm:$0xf]  ;;  %v4062_v62 = vor.u32 %v4372_v53, %v4061_v16  ;;  %v4366_v16 = vld [vmem:[%s6352_s1 + $0x744] sm:$0xf0] }
  0xd8   : > { %2276 = vmatpush.bf16.msra.mxu2 %v3890_v7  ;;  %2258 = vmatpush.bf16.msra.mxu1 %v3950_v15  ;;  %v4343_v7 = vld [vmem:[%s6352_s1 + $0x694] sm:$0xf]  ;;  %v3854_v28 = vor.u32 %v4328_v18, %v3853_v14  ;;  %v4386_v14 = vld [vmem:[%s6352_s1 + $0x7e4] sm:$0xf0] }
  0xd9   : > { %2294 = vmatpush.bf16.msra.mxu3 %v3954_v58  ;;  %v778_v43 = vpop.f32.mrf.mxu3  ;;  %v3919_v58 = vld [vmem:[%s6352_s1 + $0x698] sm:$0xf0]  ;;  %v5990_v15 = vld [vmem:[%s4712_s6 + $0x14] sm:$0xf] }
  0xda   : > { %v5955_v51 = vadd.f32 %v778_v43, %v761_v24  ;;  %v762_v55 = vpop.f32.mrf.mxu2  ;;  %v744_v59 = vpop.f32.mrf.mxu1  ;;  %v3922_v2 = vor.u32 %v4343_v7, %v3919_v58  ;;  %v2024_v24 = vunpack.c.l.b16 %v5990_v15  ;;  %v4053_v58 = vld [vmem:[%s6352_s1 + $0x760] sm:$0xf] }
  0xdb   : > { %2241 = vmatpush.bf16.msra.mxu0 %v3878_v33  ;;  %v763_v60 = vadd.f32 %v762_v55, %v5793_v9  ;;  %v5974_v1 = vadd.f32 %v744_v59, %v727_v36  ;;  %v729_v4 = vpop.f32.mrf.mxu0  ;;  %v3855_v9 = vld [vmem:[%s6352_s1 + $0x618] sm:$0xf0]  ;;  %v4326_v33 = vld [vmem:[%s6352_s1 + $0x604] sm:$0xf0]  ;;  %v6034_v36 = vpack.c.b16 %v4403_v19, %v2022_v21  ;;  %v4388_v55 = vld [vmem:[%s6352_s1 + $0x7f4] sm:$0xf0]  ;;  %v4066_v59 = vor.u32 %v4371_v42, %v4063_v30 }
  0xdc   : > { %2277 = vmatpush.bf16.msra.mxu2 %v3882_v25  ;;  %2259 = vmatpush.bf16.msra.mxu1 %v3942_v34  ;;  %v730_v10 = vadd.f32 %v729_v4, %v5814_v3  ;;  %v4344_v3 = vld [vmem:[%s6352_s1 + $0x694] sm:$0xf0]  ;;  %v3858_v63 = vor.u32 %v4327_v57, %v3855_v9  ;;  %v2025_v25 = vunpack.c.l.b16 %v2011_v17  ;;  %v3909_v34 = vld [vmem:[%s6352_s1 + $0x680] sm:$0xf]  ;;  %v3846_v44 = vor.u32 %v4326_v33, %v3845_v32  ;;  %v4369_v57 = vld [vmem:[%s6352_s1 + $0x764] sm:$0xf] }
  0xdd   : > { %2295 = vmatpush.bf16.msra.mxu3 %v3946_v26  ;;  %v3918_v29 = vor.u32 %v4344_v3, %v3917_v47  ;;  %v3910_v38 = vor.u32 %v4342_v41, %v3909_v34  ;;  %v2031_v56 = vshll.u32 %v6034_v36, 16  ;;  %v4126_v4 = vor.u32 %v4388_v55, %v4125_v54  ;;  %v4384_v32 = vld [vmem:[%s6352_s1 + $0x7d4] sm:$0xf0]  ;;  %v4039_v42 = vld [vmem:[%s6352_s1 + $0x748] sm:$0xf0] }
  0xde   : > { %1942 = vmatmul.bf16.gmra.mxu0 %v5840_v46  ;;  %v2029_v9 = vshrl.u32 %v6034_v36, 16  ;;  %v4365_v36 = vld [vmem:[%s6352_s1 + $0x744] sm:$0xf] }
  0xdf   : > { %2242 = vmatpush.bf16.msra.mxu0 %v3870_v39  ;;  %1978 = vmatmul.bf16.gmra.mxu2 %v5840_v46  ;;  %v3911_v46 = vld [vmem:[%s6352_s1 + $0x688] sm:$0xf0]  ;;  %v4387_v39 = vld [vmem:[%s6352_s1 + $0x7f4] sm:$0xf]  ;;  %v2033_v47 = vrot.slane %v2031_v56, 1 }
  0xe0   : > { %2278 = vmatpush.bf16.msra.mxu2 %v3874_v48  ;;  %2260 = vmatpush.bf16.msra.mxu1 %v3934_v50  ;;  %v4127_v50 = vld [vmem:[%s6352_s1 + $0x7f8] sm:$0xf0]  ;;  %v3914_v52 = vor.u32 %v4341_v23, %v3911_v46  ;;  %v4383_v23 = vld [vmem:[%s6352_s1 + $0x7d4] sm:$0xf] }
  0xe1   : > { %2296 = vmatpush.bf16.msra.mxu3 %v3938_v49  ;;  %v780_v26 = vpop.f32.mrf.mxu3  ;;  %v3850_v49 = vor.u32 %v4325_v12, %v3847_v22  ;;  %v4367_v12 = vld [vmem:[%s6352_s1 + $0x754] sm:$0xf]  ;;  %v4047_v22 = vld [vmem:[%s6352_s1 + $0x758] sm:$0xf0] }
  0xe2   : > { %v6027_v27 = vadd.f32 %v780_v26, %v763_v60  ;;  %v765_v37 = vpop.f32.mrf.mxu2  ;;  %v747_v45 = vpop.f32.mrf.mxu1  ;;  %v4130_v60 = vor.u32 %v4387_v39, %v4127_v50  ;;  %v4111_v46 = vld [vmem:[%s6352_s1 + $0x7d8] sm:$0xf0]  ;;  %v4050_v33 = vor.u32 %v4367_v12, %v4047_v22  ;;  %v4037_v39 = vld [vmem:[%s6352_s1 + $0x740] sm:$0xf]  ;;  %v4363_v56 = vld [vmem:[%s6352_s1 + $0x734] sm:$0xf] }
  0xe3   : > { %2243 = vmatpush.bf16.msra.mxu0 %v3862_v8  ;;  %v766_v48 = vadd.f32 %v765_v37, %v5854_v20  ;;  %v6052_v35 = vadd.f32 %v747_v45, %v730_v10  ;;  %v731_v43 = vpop.f32.mrf.mxu0  ;;  %v6056_v20 = vpack.c.b16 %v2025_v25, %v2024_v24  ;;  %v4370_v8 = vld [vmem:[%s6352_s1 + $0x764] sm:$0xf0]  ;;  %v4114_v34 = vor.u32 %v4383_v23, %v4111_v46  ;;  %v4377_v12 = vld [vmem:[%s6352_s1 + $0x7a4] sm:$0xf]  ;;  %v2317_v22 = vld [vmem:[%s4712_s6 + $0x18] sm:$0x3] }
  0xe4   : > { %2279 = vmatpush.bf16.msra.mxu2 %v3866_v5  ;;  %2261 = vmatpush.bf16.msra.mxu1 %v3926_v13  ;;  %v4055_v5 = vld [vmem:[%s6352_s1 + $0x768] sm:$0xf0]  ;;  %v4117_v13 = vld [vmem:[%s6352_s1 + $0x7e0] sm:$0xf]  ;;  %v4054_v26 = vor.u32 %v4370_v8, %v4053_v58  ;;  %v2034_v37 = vor.u32 %v2033_v47, %v2029_v9  ;;  %v4364_v9 = vld [vmem:[%s6352_s1 + $0x734] sm:$0xf0] }
  0xe5   : > { %2297 = vmatpush.bf16.msra.mxu3 %v3930_v6  ;;  %1960 = vmatmul.bf16.gmra.mxu1 %v5884_v11  ;;  %v4385_v6 = vld [vmem:[%s6352_s1 + $0x7e4] sm:$0xf]  ;;  %v2036_v7 = vshll.u32 %v6056_v20, 16  ;;  %v4058_v3 = vor.u32 %v4369_v57, %v4055_v5  ;;  %v4101_v43 = vld [vmem:[%s6352_s1 + $0x7c0] sm:$0xf] }
  0xe6   : > { %1996 = vmatmul.bf16.gmra.mxu3 %v5884_v11  ;;  %v4119_v11 = vld [vmem:[%s6352_s1 + $0x7e8] sm:$0xf0]  ;;  %v4380_v58 = vld [vmem:[%s6352_s1 + $0x7b4] sm:$0xf0]  ;;  %v4361_v47 = vld [vmem:[%s6352_s1 + $0x724] sm:$0xf] }
  0xe7   : > { %2244 = vmatpush.bf16.msra.mxu0 %v3854_v28  ;;  %v4122_v21 = vor.u32 %v4385_v6, %v4119_v11  ;;  %v4118_v28 = vor.u32 %v4386_v14, %v4117_v13  ;;  %v6124_v41 = vrot.slane %v2036_v7, 1  ;;  %v4095_v6 = vld [vmem:[%s6352_s1 + $0x7b8] sm:$0xf0]  ;;  %v4029_v11 = vld [vmem:[%s6352_s1 + $0x730] sm:$0xf]  ;;  %v4404_v13 = vunpack.c.h.b16 %v5971_v61 }
  0xe8   : > { %2280 = vmatpush.bf16.msra.mxu2 %v3858_v63  ;;  %2262 = vmatpush.bf16.msra.mxu1 %v3918_v29  ;;  %v4109_v29 = vld [vmem:[%s6352_s1 + $0x7d0] sm:$0xf]  ;;  %v4021_v46 = vld [vmem:[%s6352_s1 + $0x720] sm:$0xf]  ;;  %v4360_v61 = vld [vmem:[%s6352_s1 + $0x714] sm:$0xf0] }
  0xe9   : > { %2298 = vmatpush.bf16.msra.mxu3 %v3922_v2  ;;  %v783_v10 = vpop.f32.mrf.mxu3  ;;  %v2014_v2 = vpack.c.b16 %v5568_v0, %v5138_v40  ;;  %v4045_v40 = vld [vmem:[%s6352_s1 + $0x750] sm:$0xf]  ;;  %v4368_v0 = vld [vmem:[%s6352_s1 + $0x754] sm:$0xf0]  ;;  %v4110_v45 = vor.u32 %v4384_v32, %v4109_v29  ;;  %v2039_v55 = vsel %vm206_vm1, %v2034_v37, %v6124_v41  ;;  %v2015_v32 = vpack.c.b16 %v4404_v13, %v4404_v13 }
  0xea   : > { %v6096_v17 = vadd.f32 %v783_v10, %v766_v48  ;;  %v767_v18 = vpop.f32.mrf.mxu2  ;;  %v749_v63 = vpop.f32.mrf.mxu1  ;;  %v4046_v30 = vor.u32 %v4368_v0, %v4045_v40  ;;  %v4381_v48 = vld [vmem:[%s6352_s1 + $0x7c4] sm:$0xf]  ;;  %v4093_v7 = vld [vmem:[%s6352_s1 + $0x7b0] sm:$0xf]  ;;  %v2316_v10 = vld [vmem:[%s4712_s6 + $0xc] sm:$0xe]  ;;  %v2322_v37 = vunpack.c.l.b16 %v2317_v22 }
  0xeb   : > { %2245 = vmatpush.bf16.msra.mxu0 %v3846_v44  ;;  %v1024_v25 = vpop.f32.mrf.mxu0  ;;  %v4042_v44 = vor.u32 %v4365_v36, %v4039_v42  ;;  %v4087_v63 = vld [vmem:[%s6352_s1 + $0x7a8] sm:$0xf0]  ;;  %v4085_v40 = vld [vmem:[%s6352_s1 + $0x7a0] sm:$0xf]  ;;  %v4378_v0 = vld [vmem:[%s6352_s1 + $0x7a4] sm:$0xf0] }
  0xec   : > { %2281 = vmatpush.bf16.msra.mxu2 %v3850_v49  ;;  %2263 = vmatpush.bf16.msra.mxu1 %v3910_v38  ;;  %v4103_v49 = vld [vmem:[%s6352_s1 + $0x7c8] sm:$0xf0] }
  0xed   : > { %2299 = vmatpush.bf16.msra.mxu3 %v3914_v52  ;;  %v4382_v52 = vld [vmem:[%s6352_s1 + $0x7c4] sm:$0xf0]  ;;  %v4106_v38 = vor.u32 %v4381_v48, %v4103_v49  ;;  %v4359_v48 = vld [vmem:[%s6352_s1 + $0x714] sm:$0xf]  ;;  %v4015_v49 = vld [vmem:[%s6352_s1 + $0x718] sm:$0xf0] }
  0xee   : > { %2246 = vmatmul.bf16.vlgmr.msra.gmra.mxu0 %v2014_v2  ;;  %v4102_v5 = vor.u32 %v4382_v52, %v4101_v43  ;;  %v4079_v43 = vld [vmem:[%s6352_s1 + $0x798] sm:$0xf0]  ;;  %v4013_v52 = vld [vmem:[%s6352_s1 + $0x710] sm:$0xf] }
  0xef   : > { %2542 = vmatpush.bf16.msrb.mxu0 %v4062_v62  ;;  %2282 = vmatmul.bf16.vlgmr.msra.gmra.mxu2 %v2014_v2  ;;  %v2319_v2 = vunpack.c.l.b16 %v2316_v10 }
  0xf0   : > { %2578 = vmatpush.bf16.msrb.mxu2 %v4066_v59  ;;  %2560 = vmatpush.bf16.msrb.mxu1 %v4126_v4  ;;  %v4031_v59 = vld [vmem:[%s6352_s1 + $0x738] sm:$0xf0]  ;;  %v4038_v4 = vor.u32 %v4366_v16, %v4037_v39  ;;  %v4375_v16 = vld [vmem:[%s6352_s1 + $0x794] sm:$0xf] }
  0xf1   : > { %2596 = vmatpush.bf16.msrb.mxu3 %v4130_v60  ;;  %v785_v50 = vpop.f32.mrf.mxu3  ;;  %v4379_v60 = vld [vmem:[%s6352_s1 + $0x7b4] sm:$0xf]  ;;  %v4034_v14 = vor.u32 %v4363_v56, %v4031_v59  ;;  %v6218_v39 = vpack.c.b16 %v4403_v19, %v2319_v2  ;;  %v4077_v19 = vld [vmem:[%s6352_s1 + $0x790] sm:$0xf]  ;;  %v4007_v56 = vld [vmem:[%s6352_s1 + $0x708] sm:$0xf0] }
  0xf2   : > { %v1060_v53 = vpop.f32.mrf.mxu2  ;;  %v1042_v54 = vpop.f32.mrf.mxu1  ;;  %v4098_v18 = vor.u32 %v4379_v60, %v4095_v6  ;;  %v4086_v50 = vor.u32 %v4378_v0, %v4085_v40 }
  0xf3   : > { %2543 = vmatpush.bf16.msrb.mxu0 %v4054_v26  ;;  %v1043_v57 = vadd.f32 %v1042_v54, %v1024_v25  ;;  %v1026_v62 = vpop.f32.mrf.mxu0  ;;  %v4376_v54 = vld [vmem:[%s6352_s1 + $0x794] sm:$0xf0]  ;;  %v2327_v59 = vshll.u32 %v6218_v39, 16 }
  0xf4   : > { %2579 = vmatpush.bf16.msrb.mxu2 %v4058_v3  ;;  %2561 = vmatpush.bf16.msrb.mxu1 %v4118_v28  ;;  %v4023_v3 = vld [vmem:[%s6352_s1 + $0x728] sm:$0xf0]  ;;  %v4362_v28 = vld [vmem:[%s6352_s1 + $0x724] sm:$0xf0]  ;;  %v4078_v15 = vor.u32 %v4376_v54, %v4077_v19 }
  0xf5   : > { %2597 = vmatpush.bf16.msrb.mxu3 %v4122_v21  ;;  %v6178_v8 = vadd.f32 %v1043_v57, %v5919_v31  ;;  %2264 = vmatmul.bf16.vlgmr.msra.gmra.mxu1 %v2039_v55  ;;  %v4030_v31 = vor.u32 %v4364_v9, %v4029_v11  ;;  %v4094_v21 = vor.u32 %v4380_v58, %v4093_v7  ;;  %v4358_v9 = vld [vmem:[%s6352_s1 + $0x704] sm:$0xf0]  ;;  %v4069_v7 = vld [vmem:[%s6352_s1 + $0x780] sm:$0xf] }
  0xf6   : > { %2300 = vmatmul.bf16.vlgmr.msra.gmra.mxu3 %v2039_v55  ;;  %v2323_v55 = vpack.c.b16 %v2322_v37, %v2024_v24  ;;  %v4014_v57 = vor.u32 %v4360_v61, %v4013_v52  ;;  %v4373_v24 = vld [vmem:[%s6352_s1 + $0x784] sm:$0xf]  ;;  %v4374_v58 = vld [vmem:[%s6352_s1 + $0x784] sm:$0xf0] }
  0xf7   : > { %2544 = vmatpush.bf16.msrb.mxu0 %v4046_v30 }
  0xf8   : > { %2580 = vmatpush.bf16.msrb.mxu2 %v4050_v33  ;;  %2562 = vmatpush.bf16.msrb.mxu1 %v4110_v45  ;;  %v4026_v33 = vor.u32 %v4361_v47, %v4023_v3  ;;  %v2040_v45 = vshrl.u32 %v6056_v20, 16 }
  0xf9   : > { %2598 = vmatpush.bf16.msrb.mxu3 %v4114_v34  ;;  %v1078_v23 = vpop.f32.mrf.mxu3  ;;  %v4090_v34 = vor.u32 %v4377_v12, %v4087_v63  ;;  %v4070_v63 = vor.u32 %v4374_v58, %v4069_v7 }
  0xfa   : > { %v1079_v25 = vadd.f32 %v1078_v23, %v1060_v53  ;;  %v1062_v26 = vpop.f32.mrf.mxu2  ;;  %v1044_v29 = vpop.f32.mrf.mxu1  ;;  %v2042_v6 = vor.u32 %v2040_v45, %v6124_v41  ;;  %v2336_v23 = vshrl.u32 %v2323_v55, 16 }
  0xfb   : > { %2545 = vmatpush.bf16.msrb.mxu0 %v4038_v4  ;;  %v1045_v42 = vadd.f32 %v1044_v29, %v1026_v62  ;;  %v1029_v30 = vpop.f32.mrf.mxu0  ;;  %v4071_v62 = vld [vmem:[%s6352_s1 + $0x788] sm:$0xf0]  ;;  %v4005_v4 = vld [vmem:[%s6352_s1 + $0x700] sm:$0xf] }
  0xfc   : > { %2581 = vmatpush.bf16.msrb.mxu2 %v4042_v44  ;;  %2563 = vmatpush.bf16.msrb.mxu1 %v4102_v5  ;;  %v6207_v36 = vadd.f32 %v1079_v25, %v5955_v51  ;;  %v4022_v51 = vor.u32 %v4362_v28, %v4021_v46  ;;  %v4082_v44 = vor.u32 %v4375_v16, %v4079_v43  ;;  %v2373_v46 = vrot.slane %v6056_v20, 1 }
  0xfd   : > { %2599 = vmatpush.bf16.msrb.mxu3 %v4106_v38  ;;  %v6230_v53 = vadd.f32 %v1045_v42, %v5974_v1  ;;  %v4018_v1 = vor.u32 %v4359_v48, %v4015_v49  ;;  %v4357_v38 = vld [vmem:[%s6352_s1 + $0x704] sm:$0xf]  ;;  %v4006_v12 = vor.u32 %v4358_v9, %v4005_v4 }
  0xfe   : > { %2251 = vmatmul.bf16.gmra.mxu0 %v2015_v32  ;;  %v4010_v13 = vor.u32 %v4357_v38, %v4007_v56 }
  0xff   : > { %2546 = vmatpush.bf16.msrb.mxu0 %v4030_v31  ;;  %2287 = vmatmul.bf16.gmra.mxu2 %v2015_v32  ;;  %v4074_v31 = vor.u32 %v4373_v24, %v4071_v62 }
 0x100   : > { %2582 = vmatpush.bf16.msrb.mxu2 %v4034_v14  ;;  %2564 = vmatpush.bf16.msrb.mxu1 %v4094_v21  ;;  %v2325_v14 = vshrl.u32 %v6218_v39, 16  ;;  %v2329_v21 = vrot.slane %v2327_v59, 1 }
 0x101   : > { %2600 = vmatpush.bf16.msrb.mxu3 %v4098_v18  ;;  %v1080_v60 = vpop.f32.mrf.mxu3  ;;  %v2332_v18 = vshll.u32 %v2323_v55, 16 }
 0x102   : > { %v1081_v5 = vadd.f32 %v1080_v60, %v1062_v26  ;;  %v1065_v11 = vpop.f32.mrf.mxu2  ;;  %v1047_v10 = vpop.f32.mrf.mxu1  ;;  %v2330_v25 = vor.u32 %v2329_v21, %v2325_v14 }
 0x103   : > { %2547 = vmatpush.bf16.msrb.mxu0 %v4022_v51  ;;  %v1048_v47 = vadd.f32 %v1047_v10, %v1029_v30  ;;  %v1031_v3 = vpop.f32.mrf.mxu0  ;;  %v2334_v22 = vrot.slane %v2332_v18, 1 }
 0x104   : > { %2583 = vmatpush.bf16.msrb.mxu2 %v4026_v33  ;;  %2565 = vmatpush.bf16.msrb.mxu1 %v4086_v50  ;;  %v1090_v41 = vadd.f32 %v1081_v5, %v6027_v27  ;;  %v2372_v27 = vrot.slane %v6218_v39, 1 }
 0x105   : > { %2601 = vmatpush.bf16.msrb.mxu3 %v4090_v34  ;;  %v1091_v2 = vadd.f32 %v1048_v47, %v6052_v35  ;;  %2269 = vmatmul.bf16.gmra.mxu1 %v2042_v6  ;;  %v2338_v29 = vor.u32 %v2336_v23, %v2334_v22  ;;  %v2335_v34 = vsel %vm206_vm1, %v2330_v25, %v2334_v22 }
 0x106   : > { %2305 = vmatmul.bf16.gmra.mxu3 %v2042_v6  ;;  %v2374_v33 = vsel %vm312_vm0, %v2372_v27, %v2373_v46  ;;  %v2375_v37 = vrot.slane %v2335_v34, 1 }
 0x107   : > { %2548 = vmatpush.bf16.msrb.mxu0 %v4014_v57  ;;  %v2376_v42 = vrot.slane %v2338_v29, 1 }
 0x108   : > { %2584 = vmatpush.bf16.msrb.mxu2 %v4018_v1  ;;  %2566 = vmatpush.bf16.msrb.mxu1 %v4078_v15 }
 0x109   : > { %2602 = vmatpush.bf16.msrb.mxu3 %v4082_v44  ;;  %v1083_v26 = vpop.f32.mrf.mxu3  ;;  %v2377_v48 = vsel %vm312_vm0, %v2375_v37, %v2376_v42 }
 0x10a   : > { %v1084_v28 = vadd.f32 %v1083_v26, %v1065_v11  ;;  %v1067_v40 = vpop.f32.mrf.mxu2  ;;  %v1049_v0 = vpop.f32.mrf.mxu1 }
 0x10b   : > { %2549 = vmatpush.bf16.msrb.mxu0 %v4006_v12  ;;  %v1328_v32 = vpop.f32.mrf.mxu0 }
 0x10c   : > { %2585 = vmatpush.bf16.msrb.mxu2 %v4010_v13  ;;  %2567 = vmatpush.bf16.msrb.mxu1 %v4070_v63  ;;  %v1092_v35 = vadd.f32 %v1084_v28, %v6096_v17 }
 0x10d   : > { %2603 = vmatpush.bf16.msrb.mxu3 %v4074_v31 }
 0x10e   : > { %2550 = vmatmul.bf16.vlgmr.msrb.gmra.mxu0 %v2374_v33 }
 0x10f   : > { %2586 = vmatmul.bf16.vlgmr.msrb.gmra.mxu2 %v2374_v33 }
 0x111   : > { %v1085_v20 = vpop.f32.mrf.mxu3 }
 0x112   : > { %v1364_v30 = vpop.f32.mrf.mxu2  ;;  %v1346_v45 = vpop.f32.mrf.mxu1 }
 0x113   : > { %v1347_v49 = vadd.f32 %v1346_v45, %v1328_v32  ;;  %v1330_v39 = vpop.f32.mrf.mxu0 }
 0x115   : > { %v1391_v51 = vadd.f32 %v1347_v49, %v6178_v8  ;;  %2568 = vmatmul.bf16.vlgmr.msrb.gmra.mxu1 %v2377_v48 }
 0x116   : > { %2604 = vmatmul.bf16.vlgmr.msrb.gmra.mxu3 %v2377_v48 }
 0x119   : > { %v1382_v17 = vpop.f32.mrf.mxu3 }
 0x11a   : > { %v1383_v50 = vadd.f32 %v1382_v17, %v1364_v30  ;;  %v1366_v16 = vpop.f32.mrf.mxu2  ;;  %v1348_v43 = vpop.f32.mrf.mxu1 }
 0x11b   : > { %v1349_v61 = vadd.f32 %v1348_v43, %v1330_v39  ;;  %v1333_v19 = vpop.f32.mrf.mxu0 }
 0x11c   : > { %v1392_v52 = vadd.f32 %v1383_v50, %v6207_v36 }
 0x11d   : > { %v1393_v54 = vadd.f32 %v1349_v61, %v6230_v53 }
 0x11e   : > { %2555 = vmatmul.bf16.gmra.mxu0 %v2373_v46 }
 0x11f   : > { %2591 = vmatmul.bf16.gmra.mxu2 %v2373_v46 }
 0x121   : > { %v1384_v55 = vpop.f32.mrf.mxu3 }
 0x122   : > { %v1385_v1 = vadd.f32 %v1384_v55, %v1366_v16  ;;  %v1369_v44 = vpop.f32.mrf.mxu2  ;;  %v1351_v38 = vpop.f32.mrf.mxu1 }
 0x123   : > { %v1352_v8 = vadd.f32 %v1351_v38, %v1333_v19  ;;  %v1335_v59 = vpop.f32.mrf.mxu0 }
 0x124   : > { %v1394_v56 = vadd.f32 %v1385_v1, %v1090_v41 }
 0x125   : > { %v1395_v60 = vadd.f32 %v1352_v8, %v1091_v2  ;;  %2573 = vmatmul.bf16.gmra.mxu1 %v2376_v42 }
 0x126   : > { %2609 = vmatmul.bf16.gmra.mxu3 %v2376_v42 }
 0x129   : > { %v1387_v57 = vpop.f32.mrf.mxu3 }
 0x12a   : > { %v1388_v15 = vadd.f32 %v1387_v57, %v1369_v44  ;;  %v1371_v24 = vpop.f32.mrf.mxu2  ;;  %v1353_v36 = vpop.f32.mrf.mxu1 }
 0x12b   : > { %v1634_v4 = vpop.f32.mrf.mxu0 }
 0x12c   : > { %v1396_v62 = vadd.f32 %v1388_v15, %v1092_v35 }
 0x131   : > { %v1389_v5 = vpop.f32.mrf.mxu3 }
 0x132   : > { %v1670_v53 = vpop.f32.mrf.mxu2  ;;  %v1652_v6 = vpop.f32.mrf.mxu1 }
 0x133   : > { %v1653_v11 = vadd.f32 %v1652_v6, %v1634_v4  ;;  %v1636_v9 = vpop.f32.mrf.mxu0 }
 0x135   : > { %v1697_v7 = vadd.f32 %v1653_v11, %v1391_v51 }
 0x139   : > { %v1688_v58 = vpop.f32.mrf.mxu3 }
 0x13a   : > { %v1689_v10 = vadd.f32 %v1688_v58, %v1670_v53  ;;  %v1672_v13 = vpop.f32.mrf.mxu2  ;;  %v1654_v14 = vpop.f32.mrf.mxu1 }
 0x13b   : > { %v1655_v41 = vadd.f32 %v1654_v14, %v1636_v9  ;;  %v1639_v47 = vpop.f32.mrf.mxu0 }
 0x13c   : > { %v1698_v18 = vadd.f32 %v1689_v10, %v1392_v52 }
 0x13d   : > { %v1699_v3 = vadd.f32 %v1655_v41, %v1393_v54 }
 0x141   : > { %v1690_v31 = vpop.f32.mrf.mxu3 }
 0x142   : > { %v1691_v21 = vadd.f32 %v1690_v31, %v1672_v13  ;;  %v1675_v12 = vpop.f32.mrf.mxu2  ;;  %v1657_v63 = vpop.f32.mrf.mxu1  ;;  %v2620_v13 = vlaneseq }
 0x143   : > { %v1658_v22 = vadd.f32 %v1657_v63, %v1639_v47  ;;  %v1641_v23 = vpop.f32.mrf.mxu0 }
 0x144   : > { %v1700_v2 = vadd.f32 %v1691_v21, %v1394_v56  ;;  %v2621_v47 = vshrl.u32 %v2620_v13, 7 }
 0x145   : > { %v1701_v27 = vadd.f32 %v1658_v22, %v1395_v60 }
 0x146   : > { %v2622_v21 = vadd.s32 8, %v2621_v47  ;;  %v2628_v63 = vand.u32 7, %v2621_v47 }
 0x148   : > { %vm6289_vm2 = vcmp.lt.s32.totalorder %v2628_v63, 3 }
 0x149   : > { %v1693_v46 = vpop.f32.mrf.mxu3 }
 0x14a   : > { %v1694_v25 = vadd.f32 %v1693_v46, %v1675_v12  ;;  %v1677_v26 = vpop.f32.mrf.mxu2  ;;  %v1659_v28 = vpop.f32.mrf.mxu1 }
 0x14b   : > { %v1938_v0 = vpop.f32.mrf.mxu0 }
 0x14c   : > { %v1702_v40 = vadd.f32 %v1694_v25, %v1396_v62 }
 0x151   : > { %v1695_v29 = vpop.f32.mrf.mxu3 }
 0x152   : > { %v1974_v35 = vpop.f32.mrf.mxu2  ;;  %v1956_v32 = vpop.f32.mrf.mxu1 }
 0x153   : > { %v1957_v33 = vadd.f32 %v1956_v32, %v1938_v0  ;;  %v1940_v34 = vpop.f32.mrf.mxu0 }
 0x155   : > { %v2001_v37 = vadd.f32 %v1957_v33, %v1697_v7 }
 0x159   : > { %v1992_v42 = vpop.f32.mrf.mxu3 }
 0x15a   : > { %v1993_v20 = vadd.f32 %v1992_v42, %v1974_v35  ;;  %v1976_v30 = vpop.f32.mrf.mxu2  ;;  %v1958_v45 = vpop.f32.mrf.mxu1 }
 0x15b   : > { %v1959_v49 = vadd.f32 %v1958_v45, %v1940_v34  ;;  %v1943_v39 = vpop.f32.mrf.mxu0  ;;  %v2623_v34 = vadd.s32 16, %v2621_v47 }
 0x15c   : > { %v2002_v48 = vadd.f32 %v1993_v20, %v1698_v18 }
 0x15d   : > { %v2003_v51 = vadd.f32 %v1959_v49, %v1699_v3 }
 0x161   : > { %v1994_v17 = vpop.f32.mrf.mxu3 }
 0x162   : > { %v1995_v50 = vadd.f32 %v1994_v17, %v1976_v30  ;;  %v1979_v16 = vpop.f32.mrf.mxu2  ;;  %v1961_v43 = vpop.f32.mrf.mxu1 }
 0x163   : > { %v1962_v61 = vadd.f32 %v1961_v43, %v1943_v39  ;;  %v1945_v19 = vpop.f32.mrf.mxu0  ;;  %v2642_v43 = vand.u32 7, %v2623_v34 }
 0x164   : > { %v6281_v52 = vadd.f32 %v1995_v50, %v1700_v2 }
 0x165   : > { %v6283_v54 = vadd.f32 %v1962_v61, %v1701_v27  ;;  %v2635_v27 = vand.u32 7, %v2622_v21  ;;  %vm6314_vm4 = vcmp.lt.s32.totalorder %v2642_v43, 3 }
 0x167   : > { %vm6293_vm3 = vcmp.lt.s32.totalorder %v2635_v27, 3 }
 0x169   : > { %v1997_v55 = vpop.f32.mrf.mxu3 }
 0x16a   : > { %v1998_v1 = vadd.f32 %v1997_v55, %v1979_v16  ;;  %v1981_v44 = vpop.f32.mrf.mxu2  ;;  %v1963_v38 = vpop.f32.mrf.mxu1 }
 0x16b   : > { %v2247_v8 = vpop.f32.mrf.mxu0 }
 0x16c   : > { %v6285_v56 = vadd.f32 %v1998_v1, %v1702_v40 }
 0x171   : > { %v1999_v59 = vpop.f32.mrf.mxu3 }
 0x172   : > { %v2283_v60 = vpop.f32.mrf.mxu2  ;;  %v2265_v57 = vpop.f32.mrf.mxu1 }
 0x173   : > { %v2249_v15 = vpop.f32.mrf.mxu0  ;;  %v2266_v3 = vadd.f32 %v2265_v57, %v2247_v8 }
 0x175   : > { %v2310_v2 = vadd.f32 %v2266_v3, %v2001_v37 }
 0x179   : > { %v2301_v24 = vpop.f32.mrf.mxu3 }
 0x17a   : > { %v2285_v36 = vpop.f32.mrf.mxu2  ;;  %v2267_v62 = vpop.f32.mrf.mxu1  ;;  %v2302_v46 = vadd.f32 %v2301_v24, %v2283_v60 }
 0x17b   : > { %v2252_v4 = vpop.f32.mrf.mxu0  ;;  %v2268_v22 = vadd.f32 %v2267_v62, %v2249_v15 }
 0x17c   : > { %v2311_v37 = vadd.f32 %v2302_v46, %v2002_v48 }
 0x17d   : > { %v2312_v0 = vadd.f32 %v2268_v22, %v2003_v51 }
 0x181   : > { %v2303_v5 = vpop.f32.mrf.mxu3 }
 0x182   : > { %v2288_v53 = vpop.f32.mrf.mxu2  ;;  %v2270_v6 = vpop.f32.mrf.mxu1  ;;  %v2304_v42 = vadd.f32 %v2303_v5, %v2285_v36 }
 0x183   : > { %v2254_v11 = vpop.f32.mrf.mxu0  ;;  %v2271_v45 = vadd.f32 %v2270_v6, %v2252_v4 }
 0x184   : > { %v2313_v48 = vadd.f32 %v2304_v42, %v6281_v52 }
 0x185   : > { %v2314_v44 = vadd.f32 %v2271_v45, %v6283_v54 }
 0x189   : > { %v2306_v9 = vpop.f32.mrf.mxu3 }
 0x18a   : > { %v2290_v7 = vpop.f32.mrf.mxu2  ;;  %v2272_v58 = vpop.f32.mrf.mxu1  ;;  %v2307_v15 = vadd.f32 %v2306_v9, %v2288_v53 }
 0x18b   : > { %v2551_v10 = vpop.f32.mrf.mxu0 }
 0x18c   : > { %v2315_v58 = vadd.f32 %v2307_v15, %v6285_v56 }
 0x191   : > { %v2308_v14 = vpop.f32.mrf.mxu3 }
 0x192   : > { %v2587_v18 = vpop.f32.mrf.mxu2  ;;  %v2569_v41 = vpop.f32.mrf.mxu1 }
 0x193   : > { %v2553_v31 = vpop.f32.mrf.mxu0  ;;  %v2570_v12 = vadd.f32 %v2569_v41, %v2551_v10 }
 0x195   : > { %v6287_v25 = vadd.f32 %v2570_v12, %v2310_v2 }
 0x197   : > { %v2669_v20 = vsel %vm6289_vm2, %v6287_v25, 0.0 }
 0x198   : > { %v2691_v51 = vmul.f32 %v2669_v20, %v2669_v20 }
 0x199   : > { %v2605_v23 = vpop.f32.mrf.mxu3 }
 0x19a   : > { %v2589_v26 = vpop.f32.mrf.mxu2  ;;  %v2571_v40 = vpop.f32.mrf.mxu1  ;;  %v2606_v29 = vadd.f32 %v2605_v23, %v2587_v18 }
 0x19b   : > { %v2572_v35 = vadd.f32 %v2571_v40, %v2553_v31  ;;  %v2556_v32 = vpop.f32.mrf.mxu0 }
 0x19c   : > { %v6302_v49 = vadd.f32 %v2606_v29, %v2311_v37 }
 0x19d   : > { %v6300_v30 = vadd.f32 %v2572_v35, %v2312_v0 }
 0x19e   : > { %v2670_v38 = vsel %vm6289_vm2, %v6302_v49, 0.0 }
 0x19f   : > { %v2671_v39 = vsel %vm6293_vm3, %v6300_v30, 0.0  ;;  %v2692_v54 = vmul.f32 %v2670_v38, %v2670_v38 }
 0x1a0   : > { %v2675_v17 = vadd.f32 %v2671_v39, %v2669_v20  ;;  %v2693_v50 = vmul.f32 %v2671_v39, %v2671_v39 }
 0x1a1   : > { %v2607_v16 = vpop.f32.mrf.mxu3 }
 0x1a2   : > { %v2608_v61 = vadd.f32 %v2607_v16, %v2589_v26  ;;  %v2592_v19 = vpop.f32.mrf.mxu2  ;;  %v2697_v55 = vadd.f32 %v2693_v50, %v2691_v51  ;;  %v2574_v1 = vpop.f32.mrf.mxu1 }
 0x1a3   : > { %v2575_v59 = vadd.f32 %v2574_v1, %v2556_v32  ;;  %v2558_v60 = vpop.f32.mrf.mxu0 }
 0x1a4   : > { %v6312_v8 = vadd.f32 %v2608_v61, %v2313_v48 }
 0x1a5   : > { %v6321_v24 = vadd.f32 %v2575_v59, %v2314_v44 }
 0x1a6   : > { %v2672_v52 = vsel %vm6293_vm3, %v6312_v8, 0.0 }
 0x1a7   : > { %v2683_v36 = vadd.f32 %v2672_v52, %v2670_v38  ;;  %v2694_v62 = vmul.f32 %v2672_v52, %v2672_v52  ;;  %v2673_v4 = vsel %vm6314_vm4, %v6321_v24, 0.0 }
 0x1a8   : > { %v2676_v6 = vadd.f32 %v2675_v17, %v2673_v4  ;;  %v2695_v11 = vmul.f32 %v2673_v4, %v2673_v4 }
 0x1a9   : > { %v2705_v5 = vadd.f32 %v2694_v62, %v2692_v54  ;;  %v2610_v7 = vpop.f32.mrf.mxu3 }
 0x1aa   : > { %v2611_v53 = vadd.f32 %v2610_v7, %v2592_v19  ;;  %v2594_v9 = vpop.f32.mrf.mxu2  ;;  %v2677_v10 = vrot.slane %v2676_v6, 4  ;;  %v2698_v13 = vadd.f32 %v2697_v55, %v2695_v11  ;;  %v2576_v14 = vpop.f32.mrf.mxu1 }
 0x1ac   : > { %v6327_v18 = vadd.f32 %v2611_v53, %v2315_v58  ;;  %v2678_v41 = vadd.f32 %v2677_v10, %v2676_v6  ;;  %v2699_v47 = vrot.slane %v2698_v13, 4 }
 0x1ae   : > { %v2674_v3 = vsel %vm6314_vm4, %v6327_v18, 0.0  ;;  %v2679_v31 = vrot.slane %v2678_v41, 2  ;;  %v2700_v21 = vadd.f32 %v2699_v47, %v2698_v13 }
 0x1af   : > { %v2684_v12 = vadd.f32 %v2683_v36, %v2674_v3  ;;  %v2696_v63 = vmul.f32 %v2674_v3, %v2674_v3 }
 0x1b0   : > { %v2680_v2 = vadd.f32 %v2679_v31, %v2678_v41  ;;  %v2701_v22 = vrot.slane %v2700_v21, 2 }
 0x1b1   : > { %v2685_v56 = vrot.slane %v2684_v12, 4  ;;  %v2706_v23 = vadd.f32 %v2705_v5, %v2696_v63  ;;  %v2612_v27 = vpop.f32.mrf.mxu3 }
 0x1b2   : > { %v2681_v46 = vrot.slane %v2680_v2, 1  ;;  %v2702_v26 = vadd.f32 %v2701_v22, %v2700_v21 }
 0x1b3   : > { %v2686_v28 = vadd.f32 %v2685_v56, %v2684_v12  ;;  %v2707_v40 = vrot.slane %v2706_v23, 4 }
 0x1b4   : > { %v2682_v0 = vadd.f32 %v2681_v46, %v2680_v2  ;;  %v2703_v29 = vrot.slane %v2702_v26, 1 }
 0x1b5   : > { %v2687_v35 = vrot.slane %v2686_v28, 2  ;;  %v2708_v32 = vadd.f32 %v2707_v40, %v2706_v23 }
 0x1b6   : > { %v2704_v33 = vadd.f32 %v2703_v29, %v2702_v26  ;;  %v2713_v34 = vmul.f32 0.11111111, %v2682_v0 }
 0x1b7   : > { %v2688_v37 = vadd.f32 %v2687_v35, %v2686_v28  ;;  %v2709_v42 = vrot.slane %v2708_v32, 2 }
 0x1b8   : > { %v2715_v20 = vmul.f32 0.11111111, %v2704_v33  ;;  %v2717_v45 = vmul.f32 %v2713_v34, %v2713_v34  ;;  %v2721_v39 = vsub.f32 %v6287_v25, %v2713_v34  ;;  %v2723_v51 = vsub.f32 %v6300_v30, %v2713_v34 }
 0x1b9   : > { %v2725_v17 = vsub.f32 %v6321_v24, %v2713_v34  ;;  %v2689_v50 = vrot.slane %v2688_v37, 1  ;;  %v2710_v16 = vadd.f32 %v2709_v42, %v2708_v32 }
 0x1ba   : > { %v2719_v43 = vsub.f32 %v2715_v20, %v2717_v45 }
 0x1bb   : > { %v2690_v48 = vadd.f32 %v2689_v50, %v2688_v37  ;;  %v2711_v61 = vrot.slane %v2710_v16, 1 }
 0x1bc   : > { %v2727_v19 = vadd.f32 1e-05, %v2719_v43 }
 0x1bd   : > { %v2712_v55 = vadd.f32 %v2711_v61, %v2710_v16  ;;  %v2714_v1 = vmul.f32 0.11111111, %v2690_v48 }
 0x1be   : > { %4434 = vrsqrt.f32 %v2727_v19  ;;  %vm2735_vm6 = vweird.f32 %v2727_v19 }
 0x1bf   : > { %v2716_v44 = vmul.f32 0.11111111, %v2712_v55  ;;  %v2718_v38 = vmul.f32 %v2714_v1, %v2714_v1  ;;  %v2722_v59 = vsub.f32 %v6302_v49, %v2714_v1  ;;  %v2724_v60 = vsub.f32 %v6312_v8, %v2714_v1 }
 0x1c0   : > { %v2726_v25 = vsub.f32 %v6327_v18, %v2714_v1 }
 0x1c1   : > { %v2720_v30 = vsub.f32 %v2716_v44, %v2718_v38 }
 0x1c3   : > { %v2728_v57 = vadd.f32 1e-05, %v2720_v30 }
 0x1c4   : > { %v4435_v15 = vpop.eup %4434 }
 0x1c5   : > { %v2730_v52 = vmul.f32 %v4435_v15, %v2727_v19  ;;  %4436 = vrsqrt.f32 %v2728_v57  ;;  %vm2736_vm5 = vweird.f32 %v4435_v15  ;;  %vm2745_vm9 = vweird.f32 %v2728_v57 }
 0x1c6   : > { %vm2737_vm7 = vmor %vm2735_vm6, %vm2736_vm5 }
 0x1c7   : > { %v2731_v24 = vmul.f32 %v4435_v15, %v2730_v52 }
 0x1c9   : > { %v2732_v54 = vmul.f32 0.5, %v2731_v24 }
 0x1cb   : > { %v4437_v36 = vpop.eup %4436  ;;  %v2733_v62 = vsub.f32 1.5, %v2732_v54 }
 0x1cc   : > { %v2740_v4 = vmul.f32 %v4437_v36, %v2728_v57  ;;  %vm2746_vm8 = vweird.f32 %v4437_v36 }
 0x1cd   : > { %v2734_v5 = vmul.f32 %v4435_v15, %v2733_v62  ;;  %vm2747_vm10 = vmor %vm2745_vm9, %vm2746_vm8 }
 0x1ce   : > { %v2741_v49 = vmul.f32 %v4437_v36, %v2740_v4 }
 0x1cf   : > { %v2738_v6 = vsel %vm2737_vm7, %v4435_v15, %v2734_v5 }
 0x1d0   : > { %v2749_v8 = vmul.f32 %v2738_v6, %v2721_v39  ;;  %v2751_v11 = vmul.f32 %v2738_v6, %v2723_v51  ;;  %v2753_v7 = vmul.f32 %v2738_v6, %v2725_v17  ;;  %v2742_v58 = vmul.f32 0.5, %v2741_v49 }
 0x1d2   : > { %v2743_v53 = vsub.f32 1.5, %v2742_v58  ;;  %v2761_v10 = vmul.f32 0.2, %v2749_v8  ;;  %v2763_v14 = vmul.f32 0.2, %v2751_v11  ;;  %vm2755_vm11 = vcmp.ge.f32.partialorder %v2749_v8, 0.0 }
 0x1d3   : > { %vm2757_vm12 = vcmp.ge.f32.partialorder %v2751_v11, 0.0  ;;  %vm2759_vm13 = vcmp.ge.f32.partialorder %v2753_v7, 0.0  ;;  %v2765_v3 = vmul.f32 0.2, %v2753_v7 }
 0x1d4   : > { %v2744_v9 = vmul.f32 %v4437_v36, %v2743_v53  ;;  %v2767_v63 = vsel %vm2755_vm11, %v2749_v8, %v2761_v10  ;;  %v2769_v2 = vsel %vm2757_vm12, %v2751_v11, %v2763_v14 }
 0x1d5   : > { %v2771_v56 = vsel %vm2759_vm13, %v2753_v7, %v2765_v3 }
 0x1d6   : > { %v2748_v13 = vsel %vm2747_vm10, %v4437_v36, %v2744_v9 }
 0x1d7   : > { %v2750_v18 = vmul.f32 %v2748_v13, %v2722_v59  ;;  %v2752_v41 = vmul.f32 %v2748_v13, %v2724_v60  ;;  %v2754_v47 = vmul.f32 %v2748_v13, %v2726_v25 }
 0x1d9   : > { %vm2756_vm14 = vcmp.ge.f32.partialorder %v2750_v18, 0.0  ;;  %vm2758_vm15 = vcmp.ge.f32.partialorder %v2752_v41, 0.0  ;;  %vm2760_vm0 = vcmp.ge.f32.partialorder %v2754_v47, 0.0  ;;  %v2762_v31 = vmul.f32 0.2, %v2750_v18 }
 0x1da   : > { %v2764_v21 = vmul.f32 0.2, %v2752_v41  ;;  %v2766_v12 = vmul.f32 0.2, %v2754_v47 }
 0x1db   : > { %v2768_v22 = vsel %vm2756_vm14, %v2750_v18, %v2762_v31 }
 0x1dc   : > { %v2770_v23 = vsel %vm2758_vm15, %v2752_v41, %v2764_v21  ;;  %v2772_v27 = vsel %vm2760_vm0, %v2754_v47, %v2766_v12  ;;  %v2773_v46 = vpack.c.bf16 %v2768_v22, %v2767_v63 }
 0x1dd   : > { %v2774_v26 = vpack.c.bf16 %v2770_v23, %v2769_v2  ;;  %v2775_v28 = vpack.c.bf16 %v2772_v27, %v2771_v56 }
 0x1de   : > { %2776 = vst [vmem:[%s187_s24] sm:$0xff] %v2773_v46 }
 0x1df   : > { %2777 = vst [vmem:[%s187_s24 + $0x8] sm:$0xff] %v2774_v26 }
 0x1e0   : > { %2778 = vst [vmem:[%s187_s24 + $0x10] sm:$0xff] %v2775_v28 }
 0x1e1 PF: > { %s12_s11 = sadd.s32 1, %s4460_s11   ;;  %s6360_s9 = smov %s4456_s10 }
 0x1e2   : > { %p9_p5 = scmp.ge.s32.totalorder %s12_s11, 4   ;;  %s6361_s10 = smov %s6363_s12 }
 0x1e4   :  { %11 = sbr.rel (!%p9_p5) target bundleno = 2 (0x2), region = 68 }

// kernel: local_discriminator_forward.7
= control target key start
LH: loop header
LB: loop body
LE: loop exit
PB: predicated region body
PF: predicated region fallthrough
CT: control target
= control target key end

     0   :  { %s5072_s9 = smov 0   ;;  %s5074_s10 = smov 0   ;;  %s6036_s0 = inlined_call_operand.vmem [shape: bf16[2,48,256], index: 0, kind: input, shape index: {}]   ;;  %s6037_s1 = inlined_call_operand.vmem [shape: bf16[16,256,128], index: 1, kind: input, shape index: {}]   ;;  %s6038_s2 = inlined_call_operand.vmem [shape: f32[2,16,128], index: 2, kind: output, shape index: {}]  }
   0x1   :  { %s5076_s11 = smov 0  }
   0x2 LB: > { %s24_s12 = sadd.s32 1, %s5051_s10  ;;  %p3241_p0 = scmp.ge.s32.totalorder %s5055_s11, 1  ;;  %s5055_s11 = sphi %s5076_s11, %s12_s11   ;;  %s5051_s10 = sphi %s5074_s10, %s6040_s10   ;;  %s5047_s9 = sphi %s5072_s9, %s6039_s9  }
   0x3   : > { %p26_p1 = scmp.ge.s32.totalorder %s24_s12, 2  ;;  %p135_p2 = scmp.lt.s32.totalorder %s5055_s11, 3 }
   0x5   : > { %s6042_s12 = smov (%p26_p1, %s24_s12), 0  ;;  %p136_p3 = pnand %p3241_p0, %p135_p2 }
   0x6   : > { %p164_p4 = scmp.lt.s32.totalorder (!%p136_p3), %s5047_s9, 1 }
   0x7   : > { %139 = sbr.rel (%p136_p3) target bundleno = 416 (0x1a0), region = 28 }
   0xc   : > { %v4775_v0 = vld [vmem:[%s6037_s1 + $0xb8] sm:$0xff]  ;;  %v4774_v4 = vld [vmem:[%s6037_s1 + $0xb0] sm:$0xff]  ;;  %s6044_s9 = smov (!%p164_p4, %s5047_s9), 1  ;;  %v4773_v8 = vld [vmem:[%s6037_s1 + $0xa8] sm:$0xff]  ;;  %vm262_vm0 = vsmask.f32 7424 }
   0xd   : > { %v4783_v1 = vld [vmem:[%s6037_s1 + $0xf8] sm:$0xff]  ;;  %385 = vmatpush.bf16.msra.mxu0 %v4775_v0  ;;  %v4782_v5 = vld [vmem:[%s6037_s1 + $0xf0] sm:$0xff]  ;;  %v4781_v9 = vld [vmem:[%s6037_s1 + $0xe8] sm:$0xff]  ;;  %s5008_s13 = smul.u32 48, %s6044_s9  ;;  %vm578_vm1 = vcmask 1046528   ;;  %s4751_s19 = sshll.u32 %s6044_s9, 4 }
   0xe   : > { %v4759_v2 = vld [vmem:[%s6037_s1 + $0x38] sm:$0xff]  ;;  %399 = vmatpush.bf16.msra.mxu1 %v4783_v1  ;;  %v4758_v6 = vld [vmem:[%s6037_s1 + $0x30] sm:$0xff]  ;;  %v4757_v10 = vld [vmem:[%s6037_s1 + $0x28] sm:$0xff]  ;;  %vm752_vm2 = vsmask.f32 6400  ;;  %s180_s22 = scalar_lea.vmem %s6038_s2, %s4751_s19 }
   0xf   : > { %v4767_v3 = vld [vmem:[%s6037_s1 + $0x78] sm:$0xff]  ;;  %511 = vmatpush.bf16.msra.mxu2 %v4759_v2  ;;  %v4766_v7 = vld [vmem:[%s6037_s1 + $0x70] sm:$0xff]  ;;  %v4765_v11 = vld [vmem:[%s6037_s1 + $0x68] sm:$0xff]  ;;  %s5144_s24 = scalar_lea.vmem %s6036_s0, %s5008_s13 }
  0x10   : > { %525 = vmatpush.bf16.msra.mxu3 %v4767_v3  ;;  %v4772_v12 = vld [vmem:[%s6037_s1 + $0xa0] sm:$0xff]  ;;  %v4771_v16 = vld [vmem:[%s6037_s1 + $0x98] sm:$0xff]  ;;  %v182_v21 = vld [vmem:[%s5144_s24 + $0x8] sm:$0xff] }
  0x11   : > { %386 = vmatpush.bf16.msra.mxu0 %v4774_v4  ;;  %v4780_v13 = vld [vmem:[%s6037_s1 + $0xe0] sm:$0xff]  ;;  %v4779_v17 = vld [vmem:[%s6037_s1 + $0xd8] sm:$0xff]  ;;  %v215_v22 = vld [vmem:[%s5144_s24 + $0x10] sm:$0x11]  ;;  %v5161_v24 = vunpack.c.l.b16 %v182_v21  ;;  %v5169_v29 = vunpack.c.h.b16 %v182_v21 }
  0x12   : > { %400 = vmatpush.bf16.msra.mxu1 %v4782_v5  ;;  %v4756_v14 = vld [vmem:[%s6037_s1 + $0x20] sm:$0xff]  ;;  %v4755_v18 = vld [vmem:[%s6037_s1 + $0x18] sm:$0xff]  ;;  %v256_v25 = vunpack.c.l.b16 %v215_v22  ;;  %v4770_v27 = vld [vmem:[%s6037_s1 + $0x90] sm:$0xff]  ;;  %v257_v30 = vunpack.c.h.b16 %v215_v22 }
  0x13   : > { %512 = vmatpush.bf16.msra.mxu2 %v4758_v6  ;;  %v4764_v15 = vld [vmem:[%s6037_s1 + $0x60] sm:$0xff]  ;;  %v4763_v19 = vld [vmem:[%s6037_s1 + $0x58] sm:$0xff]  ;;  %v4778_v28 = vld [vmem:[%s6037_s1 + $0xd0] sm:$0xff] }
  0x14   : > { %526 = vmatpush.bf16.msra.mxu3 %v4766_v7  ;;  %v181_v20 = vld [vmem:[%s5144_s24] sm:$0xff]  ;;  %v4754_v31 = vld [vmem:[%s6037_s1 + $0x10] sm:$0xff]  ;;  %v5178_v34 = vpack.c.b16 %v256_v25, %v256_v25  ;;  %v5181_v36 = vpack.c.b16 %v257_v30, %v257_v30  ;;  %v4769_v38 = vld [vmem:[%s6037_s1 + $0x88] sm:$0xff] }
  0x15   : > { %387 = vmatpush.bf16.msra.mxu0 %v4773_v8  ;;  %v252_v23 = vunpack.c.l.b16 %v181_v20  ;;  %v253_v26 = vunpack.c.h.b16 %v181_v20  ;;  %v4762_v32 = vld [vmem:[%s6037_s1 + $0x50] sm:$0xff]  ;;  %v4777_v39 = vld [vmem:[%s6037_s1 + $0xc8] sm:$0xff]  ;;  %v4768_v49 = vld [vmem:[%s6037_s1 + $0x80] sm:$0xff] }
  0x16   : > { %401 = vmatpush.bf16.msra.mxu1 %v4781_v9  ;;  %v4753_v42 = vld [vmem:[%s6037_s1 + $0x8] sm:$0xff]  ;;  %v271_v45 = vshll.u32 %v5178_v34, 16  ;;  %v283_v47 = vshll.u32 %v5181_v36, 16  ;;  %v4776_v50 = vld [vmem:[%s6037_s1 + $0xc0] sm:$0xff]  ;;  %v4791_v57 = vld [vmem:[%s6037_s1 + $0x138] sm:$0xff] }
  0x17   : > { %513 = vmatpush.bf16.msra.mxu2 %v4757_v10  ;;  %v258_v33 = vpack.c.b16 %v5161_v24, %v252_v23  ;;  %v259_v35 = vpack.c.b16 %v5169_v29, %v253_v26  ;;  %v4761_v43 = vld [vmem:[%s6037_s1 + $0x48] sm:$0xff]  ;;  %v4752_v51 = vld [vmem:[%s6037_s1] sm:$0xff]  ;;  %v4799_v58 = vld [vmem:[%s6037_s1 + $0x178] sm:$0xff] }
  0x18   : > { %527 = vmatpush.bf16.msra.mxu3 %v4765_v11  ;;  %v4760_v52 = vld [vmem:[%s6037_s1 + $0x40] sm:$0xff]  ;;  %v273_v54 = vrot.slane %v271_v45, 1  ;;  %v285_v56 = vrot.slane %v283_v47, 1  ;;  %v4807_v59 = vld [vmem:[%s6037_s1 + $0x1b8] sm:$0xff]  ;;  %v4790_v63 = vld [vmem:[%s6037_s1 + $0x130] sm:$0xff] }
  0x19   : > { %388 = vmatpush.bf16.msra.mxu0 %v4772_v12  ;;  %v266_v37 = vshll.u32 %v258_v33, 16  ;;  %v264_v40 = vshrl.u32 %v258_v33, 16  ;;  %v278_v41 = vshll.u32 %v259_v35, 16  ;;  %v276_v46 = vshrl.u32 %v259_v35, 16  ;;  %v4815_v60 = vld [vmem:[%s6037_s1 + $0x1f8] sm:$0xff]  ;;  %v4798_v0 = vld [vmem:[%s6037_s1 + $0x170] sm:$0xff] }
  0x1a   : > { %402 = vmatpush.bf16.msra.mxu1 %v4780_v13  ;;  %v4806_v1 = vld [vmem:[%s6037_s1 + $0x1b0] sm:$0xff]  ;;  %v4789_v3 = vld [vmem:[%s6037_s1 + $0x128] sm:$0xff]  ;;  %v539_v7 = vld [vmem:[%s5144_s24] sm:$0xee] }
  0x1b   : > { %514 = vmatpush.bf16.msra.mxu2 %v4756_v14  ;;  %v268_v44 = vrot.slane %v266_v37, 1  ;;  %v280_v48 = vrot.slane %v278_v41, 1  ;;  %v4814_v2 = vld [vmem:[%s6037_s1 + $0x1f0] sm:$0xff]  ;;  %v4797_v4 = vld [vmem:[%s6037_s1 + $0x168] sm:$0xff]  ;;  %v4788_v9 = vld [vmem:[%s6037_s1 + $0x120] sm:$0xff]  ;;  %v574_v13 = vunpack.c.l.b16 %v539_v7 }
  0x1c   : > { %528 = vmatpush.bf16.msra.mxu3 %v4764_v15  ;;  %v4805_v5 = vld [vmem:[%s6037_s1 + $0x1a8] sm:$0xff]  ;;  %v713_v8 = vld [vmem:[%s5144_s24 + $0x10] sm:$0x33]  ;;  %v4796_v10 = vld [vmem:[%s6037_s1 + $0x160] sm:$0xff]  ;;  %v575_v15 = vunpack.c.h.b16 %v539_v7 }
  0x1d   : > { %389 = vmatpush.bf16.msra.mxu0 %v4771_v16  ;;  %v269_v53 = vor.u32 %v268_v44, %v264_v40  ;;  %v281_v55 = vor.u32 %v280_v48, %v276_v46  ;;  %v4813_v6 = vld [vmem:[%s6037_s1 + $0x1e8] sm:$0xff]  ;;  %v4804_v11 = vld [vmem:[%s6037_s1 + $0x1a0] sm:$0xff]  ;;  %v748_v14 = vunpack.c.l.b16 %v713_v8  ;;  %v749_v16 = vunpack.c.h.b16 %v713_v8  ;;  %v4811_v20 = vld [vmem:[%s6037_s1 + $0x1d8] sm:$0xff] }
  0x1e   : > { %403 = vmatpush.bf16.msra.mxu1 %v4779_v17  ;;  %v4812_v12 = vld [vmem:[%s6037_s1 + $0x1e0] sm:$0xff]  ;;  %v4787_v17 = vld [vmem:[%s6037_s1 + $0x118] sm:$0xff]  ;;  %v5274_v21 = vpack.c.b16 %v5161_v24, %v574_v13  ;;  %v5277_v23 = vpack.c.b16 %v5169_v29, %v575_v15  ;;  %v4786_v26 = vld [vmem:[%s6037_s1 + $0x110] sm:$0xff] }
  0x1f   : > { %515 = vmatpush.bf16.msra.mxu2 %v4755_v18  ;;  %v274_v61 = vsel %vm262_vm0, %v269_v53, %v273_v54  ;;  %v286_v62 = vsel %vm262_vm0, %v281_v55, %v285_v56  ;;  %v4795_v18 = vld [vmem:[%s6037_s1 + $0x158] sm:$0xff]  ;;  %v750_v22 = vpack.c.b16 %v748_v14, %v748_v14  ;;  %v751_v25 = vpack.c.b16 %v749_v16, %v749_v16  ;;  %v4810_v30 = vld [vmem:[%s6037_s1 + $0x1d0] sm:$0xff]  ;;  %v4785_v41 = vld [vmem:[%s6037_s1 + $0x108] sm:$0xff] }
  0x20   : > { %529 = vmatpush.bf16.msra.mxu3 %v4763_v19  ;;  %v4803_v19 = vld [vmem:[%s6037_s1 + $0x198] sm:$0xff]  ;;  %v771_v37 = vshrl.u32 %v5277_v23, 16  ;;  %v4809_v44 = vld [vmem:[%s6037_s1 + $0x1c8] sm:$0xff]  ;;  %v4784_v53 = vld [vmem:[%s6037_s1 + $0x100] sm:$0xff]  ;;  %v579_v55 = vrot.slane %v5274_v21, 1 }
  0x21   : > { %390 = vmatpush.bf16.msra.mxu0 %v4770_v27  ;;  %v4794_v27 = vld [vmem:[%s6037_s1 + $0x150] sm:$0xff]  ;;  %v782_v40 = vshll.u32 %v751_v25, 16  ;;  %v4792_v54 = vld [vmem:[%s6037_s1 + $0x140] sm:$0xff]  ;;  %v4837_v13 = vld [vmem:[%s6037_s1 + $0x2a8] sm:$0xff] }
  0x22   : > { %404 = vmatpush.bf16.msra.mxu1 %v4778_v28  ;;  %v4802_v28 = vld [vmem:[%s6037_s1 + $0x190] sm:$0xff]  ;;  %v4800_v56 = vld [vmem:[%s6037_s1 + $0x180] sm:$0xff]  ;;  %v4845_v14 = vld [vmem:[%s6037_s1 + $0x2e8] sm:$0xff] }
  0x23   : > { %516 = vmatpush.bf16.msra.mxu2 %v4754_v31  ;;  %v754_v31 = vshrl.u32 %v5274_v21, 16  ;;  %v4822_v7 = vld [vmem:[%s6037_s1 + $0x230] sm:$0xff]  ;;  %v4820_v16 = vld [vmem:[%s6037_s1 + $0x220] sm:$0xff] }
  0x24   : > { %530 = vmatpush.bf16.msra.mxu3 %v4762_v32  ;;  %v757_v32 = vshll.u32 %v5274_v21, 16  ;;  %v4830_v8 = vld [vmem:[%s6037_s1 + $0x270] sm:$0xff] }
  0x25   : > { %391 = vmatpush.bf16.msra.mxu0 %v4769_v38  ;;  %v774_v38 = vshll.u32 %v5277_v23, 16  ;;  %v756_v45 = vrot.slane %v754_v31, 1  ;;  %v915_v15 = vld [vmem:[%s5144_s24 + $0x10] sm:$0xff] }
  0x26   : > { %405 = vmatpush.bf16.msra.mxu1 %v4777_v39  ;;  %v779_v39 = vshrl.u32 %v751_v25, 16  ;;  %v759_v46 = vrot.slane %v757_v32, 2  ;;  %v5378_v21 = vunpack.c.h.b16 %v915_v15  ;;  %v4827_v25 = vld [vmem:[%s6037_s1 + $0x258] sm:$0xff] }
  0x27   : > { %517 = vmatpush.bf16.msra.mxu2 %v4753_v42  ;;  %v4793_v42 = vld [vmem:[%s6037_s1 + $0x148] sm:$0xff] }
  0x28   : > { %531 = vmatpush.bf16.msra.mxu3 %v4761_v43  ;;  %v4801_v43 = vld [vmem:[%s6037_s1 + $0x188] sm:$0xff] }
  0x29   : > { %392 = vmatpush.bf16.msra.mxu0 %v4768_v49  ;;  %v773_v49 = vrot.slane %v771_v37, 1 }
  0x2a   : > { %406 = vmatpush.bf16.msra.mxu1 %v4776_v50  ;;  %v776_v50 = vrot.slane %v774_v38, 2 }
  0x2b   : > { %518 = vmatpush.bf16.msra.mxu2 %v4752_v51  ;;  %v781_v51 = vrot.slane %v779_v39, 1 }
  0x2c   : > { %532 = vmatpush.bf16.msra.mxu3 %v4760_v52  ;;  %393 = vmatmul.bf16.vlgmr.msra.gmra.mxu0 %v274_v61  ;;  %v784_v52 = vrot.slane %v782_v40, 2  ;;  %v4823_v61 = vld [vmem:[%s6037_s1 + $0x238] sm:$0xff] }
  0x2d   : > { %683 = vmatpush.bf16.msrb.mxu0 %v4791_v57  ;;  %407 = vmatmul.bf16.vlgmr.msra.gmra.mxu1 %v286_v62  ;;  %v4808_v57 = vld [vmem:[%s6037_s1 + $0x1c0] sm:$0xff]  ;;  %v4831_v62 = vld [vmem:[%s6037_s1 + $0x278] sm:$0xff] }
  0x2e   : > { %697 = vmatpush.bf16.msrb.mxu1 %v4799_v58  ;;  %519 = vmatmul.bf16.vlgmr.msra.gmra.mxu2 %v258_v33  ;;  %v762_v33 = vshrl.u32 %v750_v22, 16  ;;  %v580_v58 = vrot.slane %v5178_v34, 1  ;;  %v4839_v34 = vld [vmem:[%s6037_s1 + $0x2b8] sm:$0xff] }
  0x2f   : > { %885 = vmatpush.bf16.msrb.mxu2 %v4807_v59  ;;  %533 = vmatmul.bf16.vlgmr.msra.gmra.mxu3 %v259_v35  ;;  %v765_v35 = vshll.u32 %v750_v22, 16  ;;  %v582_v59 = vrot.slane %v5277_v23, 1  ;;  %v1084_v22 = vld [vmem:[%s5144_s24 + $0x18] sm:$0x11] }
  0x30   : > { %899 = vmatpush.bf16.msrb.mxu3 %v4815_v60  ;;  %v764_v47 = vrot.slane %v762_v33, 1  ;;  %v583_v60 = vrot.slane %v5181_v36, 1  ;;  %v4847_v36 = vld [vmem:[%s6037_s1 + $0x2f8] sm:$0xff]  ;;  %v1125_v31 = vunpack.c.l.b16 %v1084_v22  ;;  %v1126_v32 = vunpack.c.h.b16 %v1084_v22  ;;  %v4818_v33 = vld [vmem:[%s6037_s1 + $0x210] sm:$0xff] }
  0x31   : > { %684 = vmatpush.bf16.msrb.mxu0 %v4790_v63  ;;  %v767_v48 = vrot.slane %v765_v35, 2  ;;  %v760_v63 = vor.u32 %v759_v46, %v756_v45  ;;  %v4819_v23 = vld [vmem:[%s6037_s1 + $0x218] sm:$0xff]  ;;  %v4826_v35 = vld [vmem:[%s6037_s1 + $0x250] sm:$0xff] }
  0x32   : > { %698 = vmatpush.bf16.msrb.mxu1 %v4798_v0  ;;  %v5409_v38 = vpack.c.b16 %v1125_v31, %v1125_v31  ;;  %v5411_v39 = vpack.c.b16 %v1126_v32, %v1126_v32  ;;  %v4875_v22 = vld [vmem:[%s6037_s1 + $0x3d8] sm:$0xff]  ;;  %v4866_v31 = vld [vmem:[%s6037_s1 + $0x390] sm:$0xff] }
  0x33   : > { %886 = vmatpush.bf16.msrb.mxu2 %v4806_v1  ;;  %v768_v0 = vor.u32 %v767_v48, %v764_v47  ;;  %v777_v1 = vor.u32 %v776_v50, %v773_v49  ;;  %v4874_v32 = vld [vmem:[%s6037_s1 + $0x3d0] sm:$0xff] }
  0x34   : > { %900 = vmatpush.bf16.msrb.mxu3 %v4814_v2  ;;  %v785_v2 = vor.u32 %v784_v52, %v781_v51  ;;  %v1139_v47 = vshll.u32 %v5409_v38, 16  ;;  %v1151_v50 = vshll.u32 %v5411_v39, 16  ;;  %v4816_v51 = vld [vmem:[%s6037_s1 + $0x200] sm:$0xff] }
  0x35   : > { %685 = vmatpush.bf16.msrb.mxu0 %v4789_v3  ;;  %v581_v3 = vsel %vm578_vm1, %v579_v55, %v580_v58  ;;  %v4824_v52 = vld [vmem:[%s6037_s1 + $0x240] sm:$0xff]  ;;  %v4855_v55 = vld [vmem:[%s6037_s1 + $0x338] sm:$0xff] }
  0x36   : > { %699 = vmatpush.bf16.msrb.mxu1 %v4797_v4  ;;  %v584_v4 = vsel %vm578_vm1, %v582_v59, %v583_v60  ;;  %v1141_v58 = vrot.slane %v1139_v47, 1  ;;  %v1153_v60 = vrot.slane %v1151_v50, 1 }
  0x37   : > { %887 = vmatpush.bf16.msrb.mxu2 %v4805_v5  ;;  %v769_v5 = vsel %vm752_vm2, %v760_v63, %v768_v0 }
  0x38   : > { %901 = vmatpush.bf16.msrb.mxu3 %v4813_v6  ;;  %v786_v6 = vsel %vm752_vm2, %v777_v1, %v785_v2  ;;  %v4854_v1 = vld [vmem:[%s6037_s1 + $0x330] sm:$0xff] }
  0x39   : > { %686 = vmatpush.bf16.msrb.mxu0 %v4788_v9  ;;  %v4838_v9 = vld [vmem:[%s6037_s1 + $0x2b0] sm:$0xff] }
  0x3a   : > { %700 = vmatpush.bf16.msrb.mxu1 %v4796_v10  ;;  %v4846_v10 = vld [vmem:[%s6037_s1 + $0x2f0] sm:$0xff] }
  0x3b   : > { %888 = vmatpush.bf16.msrb.mxu2 %v4804_v11  ;;  %v4821_v11 = vld [vmem:[%s6037_s1 + $0x228] sm:$0xff]  ;;  %v4862_v2 = vld [vmem:[%s6037_s1 + $0x370] sm:$0xff] }
  0x3c   : > { %902 = vmatpush.bf16.msrb.mxu3 %v4812_v12  ;;  %v4829_v12 = vld [vmem:[%s6037_s1 + $0x268] sm:$0xff] }
  0x3d   : > { %687 = vmatpush.bf16.msrb.mxu0 %v4787_v17  ;;  %v4828_v17 = vld [vmem:[%s6037_s1 + $0x260] sm:$0xff] }
  0x3e   : > { %701 = vmatpush.bf16.msrb.mxu1 %v4795_v18  ;;  %v4836_v18 = vld [vmem:[%s6037_s1 + $0x2a0] sm:$0xff] }
  0x3f   : > { %889 = vmatpush.bf16.msrb.mxu2 %v4803_v19  ;;  %v4844_v19 = vld [vmem:[%s6037_s1 + $0x2e0] sm:$0xff] }
  0x40   : > { %903 = vmatpush.bf16.msrb.mxu3 %v4811_v20  ;;  %v5376_v20 = vunpack.c.l.b16 %v915_v15 }
  0x41   : > { %688 = vmatpush.bf16.msrb.mxu0 %v4786_v26  ;;  %v4835_v26 = vld [vmem:[%s6037_s1 + $0x298] sm:$0xff] }
  0x42   : > { %702 = vmatpush.bf16.msrb.mxu1 %v4794_v27  ;;  %v4843_v27 = vld [vmem:[%s6037_s1 + $0x2d8] sm:$0xff] }
  0x43   : > { %890 = vmatpush.bf16.msrb.mxu2 %v4802_v28  ;;  %v952_v28 = vpack.c.b16 %v5376_v20, %v5161_v24  ;;  %v4834_v24 = vld [vmem:[%s6037_s1 + $0x290] sm:$0xff] }
  0x44   : > { %904 = vmatpush.bf16.msrb.mxu3 %v4810_v30  ;;  %v953_v30 = vpack.c.b16 %v5378_v21, %v5169_v29  ;;  %v4842_v29 = vld [vmem:[%s6037_s1 + $0x2d0] sm:$0xff] }
  0x45   : > { %689 = vmatpush.bf16.msrb.mxu0 %v4785_v41  ;;  %v1134_v37 = vshll.u32 %v952_v28, 16  ;;  %v4817_v41 = vld [vmem:[%s6037_s1 + $0x208] sm:$0xff]  ;;  %v1132_v45 = vshrl.u32 %v952_v28, 16 }
  0x46   : > { %703 = vmatpush.bf16.msrb.mxu1 %v4793_v42  ;;  %v1146_v40 = vshll.u32 %v953_v30, 16  ;;  %v4825_v42 = vld [vmem:[%s6037_s1 + $0x248] sm:$0xff]  ;;  %v1144_v48 = vshrl.u32 %v953_v30, 16 }
  0x47   : > { %891 = vmatpush.bf16.msrb.mxu2 %v4801_v43  ;;  %v4833_v43 = vld [vmem:[%s6037_s1 + $0x288] sm:$0xff]  ;;  %v1136_v46 = vrot.slane %v1134_v37, 1 }
  0x48   : > { %905 = vmatpush.bf16.msrb.mxu3 %v4809_v44  ;;  %v4841_v44 = vld [vmem:[%s6037_s1 + $0x2c8] sm:$0xff]  ;;  %v1148_v49 = vrot.slane %v1146_v40, 1 }
  0x49   : > { %690 = vmatpush.bf16.msrb.mxu0 %v4784_v53  ;;  %v4832_v53 = vld [vmem:[%s6037_s1 + $0x280] sm:$0xff] }
  0x4a   : > { %704 = vmatpush.bf16.msrb.mxu1 %v4792_v54  ;;  %v4840_v54 = vld [vmem:[%s6037_s1 + $0x2c0] sm:$0xff]  ;;  %v1149_v59 = vor.u32 %v1148_v49, %v1144_v48 }
  0x4b   : > { %892 = vmatpush.bf16.msrb.mxu2 %v4800_v56  ;;  %v4863_v56 = vld [vmem:[%s6037_s1 + $0x378] sm:$0xff] }
  0x4c   : > { %906 = vmatpush.bf16.msrb.mxu3 %v4808_v57  ;;  %691 = vmatmul.bf16.vlgmr.msrb.gmra.mxu0 %v581_v3  ;;  %v1137_v57 = vor.u32 %v1136_v46, %v1132_v45  ;;  %v1154_v0 = vsel %vm262_vm0, %v1149_v59, %v1153_v60  ;;  %v4853_v3 = vld [vmem:[%s6037_s1 + $0x328] sm:$0xff]  ;;  %v1323_v60 = vrot.slane %v5409_v38, 1  ;;  %v4911_v38 = vld [vmem:[%s6037_s1 + $0x4f8] sm:$0xff] }
  0x4d   : > { %1052 = vmatpush.bf16.msra.mxu0 %v4823_v61  ;;  %705 = vmatmul.bf16.vlgmr.msrb.gmra.mxu1 %v584_v4  ;;  %v4871_v61 = vld [vmem:[%s6037_s1 + $0x3b8] sm:$0xff]  ;;  %v4861_v4 = vld [vmem:[%s6037_s1 + $0x368] sm:$0xff] }
  0x4e   : > { %1066 = vmatpush.bf16.msra.mxu1 %v4831_v62  ;;  %893 = vmatmul.bf16.vlgmr.msrb.gmra.mxu2 %v769_v5  ;;  %v4879_v62 = vld [vmem:[%s6037_s1 + $0x3f8] sm:$0xff]  ;;  %v1142_v63 = vsel %vm262_vm0, %v1137_v57, %v1141_v58  ;;  %v4869_v5 = vld [vmem:[%s6037_s1 + $0x3a8] sm:$0xff]  ;;  %v4864_v57 = vld [vmem:[%s6037_s1 + $0x380] sm:$0xff] }
  0x4f   : > { %1253 = vmatpush.bf16.msra.mxu2 %v4839_v34  ;;  %907 = vmatmul.bf16.vlgmr.msrb.gmra.mxu3 %v786_v6  ;;  %v4870_v34 = vld [vmem:[%s6037_s1 + $0x3b0] sm:$0xff]  ;;  %v4877_v6 = vld [vmem:[%s6037_s1 + $0x3e8] sm:$0xff]  ;;  %v4872_v58 = vld [vmem:[%s6037_s1 + $0x3c0] sm:$0xff] }
  0x50   : > { %1267 = vmatpush.bf16.msra.mxu3 %v4847_v36  ;;  %v4878_v36 = vld [vmem:[%s6037_s1 + $0x3f0] sm:$0xff]  ;;  %v4865_v45 = vld [vmem:[%s6037_s1 + $0x388] sm:$0xff] }
  0x51   : > { %1053 = vmatpush.bf16.msra.mxu0 %v4822_v7  ;;  %v1283_v7 = vld [vmem:[%s5144_s24 + $0x8] sm:$0xee] }
  0x52   : > { %1067 = vmatpush.bf16.msra.mxu1 %v4830_v8  ;;  %v1456_v8 = vld [vmem:[%s5144_s24 + $0x18] sm:$0x33]  ;;  %v1319_v15 = vunpack.c.h.b16 %v1283_v7  ;;  %v4873_v46 = vld [vmem:[%s6037_s1 + $0x3c8] sm:$0xff] }
  0x53   : > { %1254 = vmatpush.bf16.msra.mxu2 %v4838_v9  ;;  %v4852_v9 = vld [vmem:[%s6037_s1 + $0x320] sm:$0xff] }
  0x54   : > { %1268 = vmatpush.bf16.msra.mxu3 %v4846_v10  ;;  %v4860_v10 = vld [vmem:[%s6037_s1 + $0x360] sm:$0xff] }
  0x55   : > { %1054 = vmatpush.bf16.msra.mxu0 %v4821_v11  ;;  %v4868_v11 = vld [vmem:[%s6037_s1 + $0x3a0] sm:$0xff] }
  0x56   : > { %1068 = vmatpush.bf16.msra.mxu1 %v4829_v12  ;;  %v4876_v12 = vld [vmem:[%s6037_s1 + $0x3e0] sm:$0xff] }
  0x57   : > { %1255 = vmatpush.bf16.msra.mxu2 %v4837_v13  ;;  %v1318_v13 = vunpack.c.l.b16 %v1283_v7  ;;  %v4886_v7 = vld [vmem:[%s6037_s1 + $0x430] sm:$0xff] }
  0x58   : > { %1269 = vmatpush.bf16.msra.mxu3 %v4845_v14  ;;  %v1491_v14 = vunpack.c.l.b16 %v1456_v8 }
  0x59   : > { %1055 = vmatpush.bf16.msra.mxu0 %v4820_v16  ;;  %v1492_v16 = vunpack.c.h.b16 %v1456_v8  ;;  %v4894_v8 = vld [vmem:[%s6037_s1 + $0x470] sm:$0xff] }
  0x5a   : > { %1069 = vmatpush.bf16.msra.mxu1 %v4828_v17  ;;  %v4851_v17 = vld [vmem:[%s6037_s1 + $0x318] sm:$0xff] }
  0x5b   : > { %1256 = vmatpush.bf16.msra.mxu2 %v4836_v18  ;;  %v4859_v18 = vld [vmem:[%s6037_s1 + $0x358] sm:$0xff] }
  0x5c   : > { %1270 = vmatpush.bf16.msra.mxu3 %v4844_v19  ;;  %v4867_v19 = vld [vmem:[%s6037_s1 + $0x398] sm:$0xff] }
  0x5d   : > { %1056 = vmatpush.bf16.msra.mxu0 %v4819_v23  ;;  %v1320_v23 = vpack.c.b16 %v5376_v20, %v1318_v13  ;;  %v4901_v13 = vld [vmem:[%s6037_s1 + $0x4a8] sm:$0xff] }
  0x5e   : > { %1070 = vmatpush.bf16.msra.mxu1 %v4827_v25  ;;  %v1493_v25 = vpack.c.b16 %v1491_v14, %v1491_v14  ;;  %v4909_v14 = vld [vmem:[%s6037_s1 + $0x4e8] sm:$0xff] }
  0x5f   : > { %1257 = vmatpush.bf16.msra.mxu2 %v4835_v26  ;;  %v1321_v26 = vpack.c.b16 %v5378_v21, %v1319_v15  ;;  %v1322_v59 = vrot.slane %v1320_v23, 1  ;;  %v1657_v15 = vld [vmem:[%s5144_s24 + $0x18] sm:$0xff] }
  0x60   : > { %1271 = vmatpush.bf16.msra.mxu3 %v4843_v27  ;;  %v1494_v27 = vpack.c.b16 %v1492_v16, %v1492_v16  ;;  %v4884_v16 = vld [vmem:[%s6037_s1 + $0x420] sm:$0xff] }
  0x61   : > { %1057 = vmatpush.bf16.msra.mxu0 %v4818_v33  ;;  %v1496_v33 = vshrl.u32 %v1320_v23, 16  ;;  %v1513_v37 = vshrl.u32 %v1321_v26, 16  ;;  %v1516_v40 = vshll.u32 %v1321_v26, 16 }
  0x62   : > { %1071 = vmatpush.bf16.msra.mxu1 %v4826_v35  ;;  %v1499_v35 = vshll.u32 %v1320_v23, 16  ;;  %v5598_v23 = vunpack.c.h.b16 %v1657_v15 }
  0x63   : > { %1258 = vmatpush.bf16.msra.mxu2 %v4834_v24  ;;  %v1504_v24 = vshrl.u32 %v1493_v25, 16  ;;  %v1498_v47 = vrot.slane %v1496_v33, 1 }
  0x64   : > { %1272 = vmatpush.bf16.msra.mxu3 %v4842_v29  ;;  %v1507_v29 = vshll.u32 %v1493_v25, 16  ;;  %v1501_v48 = vrot.slane %v1499_v35, 2  ;;  %v1826_v25 = vld [vmem:[%s5144_s24 + $0x20] sm:$0x11] }
  0x65   : > { %1058 = vmatpush.bf16.msra.mxu0 %v4817_v41  ;;  %v1521_v41 = vshrl.u32 %v1494_v27, 16  ;;  %v1506_v49 = vrot.slane %v1504_v24, 1  ;;  %v1867_v33 = vunpack.c.l.b16 %v1826_v25  ;;  %v1868_v35 = vunpack.c.h.b16 %v1826_v25  ;;  %v4882_v24 = vld [vmem:[%s6037_s1 + $0x410] sm:$0xff]  ;;  %v4915_v25 = vld [vmem:[%s6037_s1 + $0x518] sm:$0xff] }
  0x66   : > { %1072 = vmatpush.bf16.msra.mxu1 %v4825_v42  ;;  %v1524_v42 = vshll.u32 %v1494_v27, 16  ;;  %v1509_v50 = vrot.slane %v1507_v29, 2  ;;  %v4891_v27 = vld [vmem:[%s6037_s1 + $0x458] sm:$0xff]  ;;  %v4890_v29 = vld [vmem:[%s6037_s1 + $0x450] sm:$0xff] }
  0x67   : > { %1259 = vmatpush.bf16.msra.mxu2 %v4833_v43  ;;  %v4849_v43 = vld [vmem:[%s6037_s1 + $0x308] sm:$0xff] }
  0x68   : > { %1273 = vmatpush.bf16.msra.mxu3 %v4841_v44  ;;  %v4857_v44 = vld [vmem:[%s6037_s1 + $0x348] sm:$0xff] }
  0x69   : > { %1059 = vmatpush.bf16.msra.mxu0 %v4816_v51  ;;  %v1515_v51 = vrot.slane %v1513_v37, 1 }
  0x6a   : > { %1073 = vmatpush.bf16.msra.mxu1 %v4824_v52  ;;  %v1518_v52 = vrot.slane %v1516_v40, 2  ;;  %v5629_v40 = vpack.c.b16 %v1867_v33, %v1867_v33 }
  0x6b   : > { %1260 = vmatpush.bf16.msra.mxu2 %v4832_v53  ;;  %v1523_v53 = vrot.slane %v1521_v41, 1  ;;  %v5631_v41 = vpack.c.b16 %v1868_v35, %v1868_v35 }
  0x6c   : > { %1274 = vmatpush.bf16.msra.mxu3 %v4840_v54  ;;  %1060 = vmatmul.bf16.vlgmr.msra.gmra.mxu0 %v952_v28  ;;  %v4850_v28 = vld [vmem:[%s6037_s1 + $0x310] sm:$0xff]  ;;  %v1526_v54 = vrot.slane %v1524_v42, 2 }
  0x6d   : > { %1426 = vmatpush.bf16.msrb.mxu0 %v4855_v55  ;;  %1074 = vmatmul.bf16.vlgmr.msra.gmra.mxu1 %v953_v30  ;;  %v4858_v30 = vld [vmem:[%s6037_s1 + $0x350] sm:$0xff]  ;;  %v4848_v55 = vld [vmem:[%s6037_s1 + $0x300] sm:$0xff] }
  0x6e   : > { %1440 = vmatpush.bf16.msrb.mxu1 %v4863_v56  ;;  %1261 = vmatmul.bf16.vlgmr.msra.gmra.mxu2 %v1142_v63  ;;  %v4856_v56 = vld [vmem:[%s6037_s1 + $0x340] sm:$0xff]  ;;  %v4887_v63 = vld [vmem:[%s6037_s1 + $0x438] sm:$0xff] }
  0x6f   : > { %1627 = vmatpush.bf16.msrb.mxu2 %v4871_v61  ;;  %1275 = vmatmul.bf16.vlgmr.msra.gmra.mxu3 %v1154_v0  ;;  %v1325_v61 = vrot.slane %v1321_v26, 1  ;;  %v4895_v0 = vld [vmem:[%s6037_s1 + $0x478] sm:$0xff] }
  0x70   : > { %1641 = vmatpush.bf16.msrb.mxu3 %v4879_v62  ;;  %v1326_v62 = vrot.slane %v5411_v39, 1  ;;  %v1324_v39 = vsel %vm578_vm1, %v1322_v59, %v1323_v60  ;;  %v4883_v26 = vld [vmem:[%s6037_s1 + $0x418] sm:$0xff] }
  0x71   : > { %1427 = vmatpush.bf16.msrb.mxu0 %v4854_v1  ;;  %v1502_v1 = vor.u32 %v1501_v48, %v1498_v47 }
  0x72   : > { %1441 = vmatpush.bf16.msrb.mxu1 %v4862_v2  ;;  %v1510_v2 = vor.u32 %v1509_v50, %v1506_v49  ;;  %v1881_v49 = vshll.u32 %v5629_v40, 16 }
  0x73   : > { %1628 = vmatpush.bf16.msrb.mxu2 %v4870_v34  ;;  %v1519_v34 = vor.u32 %v1518_v52, %v1515_v51  ;;  %v1893_v52 = vshll.u32 %v5631_v41, 16 }
  0x74   : > { %1642 = vmatpush.bf16.msrb.mxu3 %v4878_v36  ;;  %v1527_v36 = vor.u32 %v1526_v54, %v1523_v53  ;;  %v4880_v53 = vld [vmem:[%s6037_s1 + $0x400] sm:$0xff]  ;;  %v1883_v60 = vrot.slane %v1881_v49, 1 }
  0x75   : > { %1428 = vmatpush.bf16.msrb.mxu0 %v4853_v3  ;;  %v4903_v3 = vld [vmem:[%s6037_s1 + $0x4b8] sm:$0xff]  ;;  %v4888_v54 = vld [vmem:[%s6037_s1 + $0x440] sm:$0xff] }
  0x76   : > { %1442 = vmatpush.bf16.msrb.mxu1 %v4861_v4  ;;  %v1327_v4 = vsel %vm578_vm1, %v1325_v61, %v1326_v62  ;;  %v1895_v62 = vrot.slane %v1893_v52, 1 }
  0x77   : > { %1629 = vmatpush.bf16.msrb.mxu2 %v4869_v5  ;;  %v1511_v5 = vsel %vm752_vm2, %v1502_v1, %v1510_v2 }
  0x78   : > { %1643 = vmatpush.bf16.msrb.mxu3 %v4877_v6  ;;  %v1528_v6 = vsel %vm752_vm2, %v1519_v34, %v1527_v36  ;;  %v4918_v34 = vld [vmem:[%s6037_s1 + $0x530] sm:$0xff] }
  0x79   : > { %1429 = vmatpush.bf16.msrb.mxu0 %v4852_v9  ;;  %v4902_v9 = vld [vmem:[%s6037_s1 + $0x4b0] sm:$0xff] }
  0x7a   : > { %1443 = vmatpush.bf16.msrb.mxu1 %v4860_v10  ;;  %v4910_v10 = vld [vmem:[%s6037_s1 + $0x4f0] sm:$0xff] }
  0x7b   : > { %1630 = vmatpush.bf16.msrb.mxu2 %v4868_v11  ;;  %v4885_v11 = vld [vmem:[%s6037_s1 + $0x428] sm:$0xff]  ;;  %v4926_v36 = vld [vmem:[%s6037_s1 + $0x570] sm:$0xff] }
  0x7c   : > { %1644 = vmatpush.bf16.msrb.mxu3 %v4876_v12  ;;  %v4893_v12 = vld [vmem:[%s6037_s1 + $0x468] sm:$0xff] }
  0x7d   : > { %1430 = vmatpush.bf16.msrb.mxu0 %v4851_v17  ;;  %v4892_v17 = vld [vmem:[%s6037_s1 + $0x460] sm:$0xff] }
  0x7e   : > { %1444 = vmatpush.bf16.msrb.mxu1 %v4859_v18  ;;  %v4900_v18 = vld [vmem:[%s6037_s1 + $0x4a0] sm:$0xff] }
  0x7f   : > { %1631 = vmatpush.bf16.msrb.mxu2 %v4867_v19  ;;  %v4908_v19 = vld [vmem:[%s6037_s1 + $0x4e0] sm:$0xff] }
  0x80   : > { %1645 = vmatpush.bf16.msrb.mxu3 %v4875_v22  ;;  %v5596_v22 = vunpack.c.l.b16 %v1657_v15  ;;  %v4932_v15 = vld [vmem:[%s6037_s1 + $0x5a0] sm:$0xff] }
  0x81   : > { %1431 = vmatpush.bf16.msrb.mxu0 %v4850_v28  ;;  %v4899_v28 = vld [vmem:[%s6037_s1 + $0x498] sm:$0xff] }
  0x82   : > { %1445 = vmatpush.bf16.msrb.mxu1 %v4858_v30  ;;  %v4907_v30 = vld [vmem:[%s6037_s1 + $0x4d8] sm:$0xff] }
  0x83   : > { %1632 = vmatpush.bf16.msrb.mxu2 %v4866_v31  ;;  %v1694_v31 = vpack.c.b16 %v5596_v22, %v5376_v20  ;;  %v4898_v20 = vld [vmem:[%s6037_s1 + $0x490] sm:$0xff] }
  0x84   : > { %1646 = vmatpush.bf16.msrb.mxu3 %v4874_v32  ;;  %v1695_v32 = vpack.c.b16 %v5598_v23, %v5378_v21  ;;  %v4906_v21 = vld [vmem:[%s6037_s1 + $0x4d0] sm:$0xff] }
  0x85   : > { %1432 = vmatpush.bf16.msrb.mxu0 %v4849_v43  ;;  %v1876_v37 = vshll.u32 %v1694_v31, 16  ;;  %v4881_v43 = vld [vmem:[%s6037_s1 + $0x408] sm:$0xff]  ;;  %v1874_v47 = vshrl.u32 %v1694_v31, 16 }
  0x86   : > { %1446 = vmatpush.bf16.msrb.mxu1 %v4857_v44  ;;  %v1888_v42 = vshll.u32 %v1695_v32, 16  ;;  %v4889_v44 = vld [vmem:[%s6037_s1 + $0x448] sm:$0xff]  ;;  %v1886_v50 = vshrl.u32 %v1695_v32, 16 }
  0x87   : > { %1633 = vmatpush.bf16.msrb.mxu2 %v4865_v45  ;;  %v4897_v45 = vld [vmem:[%s6037_s1 + $0x488] sm:$0xff]  ;;  %v1878_v48 = vrot.slane %v1876_v37, 1  ;;  %v4914_v37 = vld [vmem:[%s6037_s1 + $0x510] sm:$0xff] }
  0x88   : > { %1647 = vmatpush.bf16.msrb.mxu3 %v4873_v46  ;;  %v4905_v46 = vld [vmem:[%s6037_s1 + $0x4c8] sm:$0xff]  ;;  %v1890_v51 = vrot.slane %v1888_v42, 1  ;;  %v4922_v42 = vld [vmem:[%s6037_s1 + $0x550] sm:$0xff] }
  0x89   : > { %1433 = vmatpush.bf16.msrb.mxu0 %v4848_v55  ;;  %v4896_v55 = vld [vmem:[%s6037_s1 + $0x480] sm:$0xff]  ;;  %v1879_v59 = vor.u32 %v1878_v48, %v1874_v47 }
  0x8a   : > { %1447 = vmatpush.bf16.msrb.mxu1 %v4856_v56  ;;  %v4904_v56 = vld [vmem:[%s6037_s1 + $0x4c0] sm:$0xff]  ;;  %v1891_v61 = vor.u32 %v1890_v51, %v1886_v50 }
  0x8b   : > { %1634 = vmatpush.bf16.msrb.mxu2 %v4864_v57  ;;  %v4919_v57 = vld [vmem:[%s6037_s1 + $0x538] sm:$0xff]  ;;  %v1884_v1 = vsel %vm262_vm0, %v1879_v59, %v1883_v60 }
  0x8c   : > { %1648 = vmatpush.bf16.msrb.mxu3 %v4872_v58  ;;  %1434 = vmatmul.bf16.vlgmr.msrb.gmra.mxu0 %v1324_v39  ;;  %v4927_v58 = vld [vmem:[%s6037_s1 + $0x578] sm:$0xff]  ;;  %v1896_v2 = vsel %vm262_vm0, %v1891_v61, %v1895_v62  ;;  %v4917_v39 = vld [vmem:[%s6037_s1 + $0x528] sm:$0xff] }
  0x8d   : > { %1794 = vmatpush.bf16.msra.mxu0 %v4887_v63  ;;  %1448 = vmatmul.bf16.vlgmr.msrb.gmra.mxu1 %v1327_v4  ;;  %v4935_v63 = vld [vmem:[%s6037_s1 + $0x5b8] sm:$0xff]  ;;  %v4925_v4 = vld [vmem:[%s6037_s1 + $0x568] sm:$0xff] }
  0x8e   : > { %1808 = vmatpush.bf16.msra.mxu1 %v4895_v0  ;;  %1635 = vmatmul.bf16.vlgmr.msrb.gmra.mxu2 %v1511_v5  ;;  %v4943_v0 = vld [vmem:[%s6037_s1 + $0x5f8] sm:$0xff]  ;;  %v4933_v5 = vld [vmem:[%s6037_s1 + $0x5a8] sm:$0xff] }
  0x8f   : > { %1995 = vmatpush.bf16.msra.mxu2 %v4903_v3  ;;  %1649 = vmatmul.bf16.vlgmr.msrb.gmra.mxu3 %v1528_v6  ;;  %v4934_v3 = vld [vmem:[%s6037_s1 + $0x5b0] sm:$0xff]  ;;  %v4941_v6 = vld [vmem:[%s6037_s1 + $0x5e8] sm:$0xff] }
  0x90   : > { %2009 = vmatpush.bf16.msra.mxu3 %v4911_v38  ;;  %v4942_v38 = vld [vmem:[%s6037_s1 + $0x5f0] sm:$0xff] }
  0x91   : > { %1795 = vmatpush.bf16.msra.mxu0 %v4886_v7  ;;  %v2025_v7 = vld [vmem:[%s5144_s24 + $0x10] sm:$0xee] }
  0x92   : > { %1809 = vmatpush.bf16.msra.mxu1 %v4894_v8  ;;  %v2198_v8 = vld [vmem:[%s5144_s24 + $0x20] sm:$0x33] }
  0x93   : > { %1996 = vmatpush.bf16.msra.mxu2 %v4902_v9 }
  0x94   : > { %2010 = vmatpush.bf16.msra.mxu3 %v4910_v10 }
  0x95   : > { %1796 = vmatpush.bf16.msra.mxu0 %v4885_v11  ;;  %v4916_v11 = vld [vmem:[%s6037_s1 + $0x520] sm:$0xff] }
  0x96   : > { %1810 = vmatpush.bf16.msra.mxu1 %v4893_v12  ;;  %v4924_v12 = vld [vmem:[%s6037_s1 + $0x560] sm:$0xff] }
  0x97   : > { %1997 = vmatpush.bf16.msra.mxu2 %v4901_v13 }
  0x98   : > { %2011 = vmatpush.bf16.msra.mxu3 %v4909_v14  ;;  %v2060_v14 = vunpack.c.l.b16 %v2025_v7 }
  0x99   : > { %1797 = vmatpush.bf16.msra.mxu0 %v4884_v16  ;;  %v4940_v16 = vld [vmem:[%s6037_s1 + $0x5e0] sm:$0xff] }
  0x9a   : > { %1811 = vmatpush.bf16.msra.mxu1 %v4892_v17  ;;  %v2233_v17 = vunpack.c.l.b16 %v2198_v8 }
  0x9b   : > { %1998 = vmatpush.bf16.msra.mxu2 %v4900_v18  ;;  %v2061_v18 = vunpack.c.h.b16 %v2025_v7  ;;  %v2065_v7 = vrot.slane %v5629_v40, 1  ;;  %v4967_v40 = vld [vmem:[%s6037_s1 + $0x6b8] sm:$0xff] }
  0x9c   : > { %2012 = vmatpush.bf16.msra.mxu3 %v4908_v19  ;;  %v2234_v19 = vunpack.c.h.b16 %v2198_v8 }
  0x9d   : > { %1798 = vmatpush.bf16.msra.mxu0 %v4883_v26  ;;  %v4923_v26 = vld [vmem:[%s6037_s1 + $0x558] sm:$0xff]  ;;  %v5727_v35 = vpack.c.b16 %v5598_v23, %v2061_v18 }
  0x9e   : > { %1812 = vmatpush.bf16.msra.mxu1 %v4891_v27  ;;  %v5718_v27 = vpack.c.b16 %v5596_v22, %v2060_v14 }
  0x9f   : > { %1999 = vmatpush.bf16.msra.mxu2 %v4899_v28  ;;  %v4931_v28 = vld [vmem:[%s6037_s1 + $0x598] sm:$0xff]  ;;  %v2255_v51 = vshrl.u32 %v5727_v35, 16  ;;  %v2258_v52 = vshll.u32 %v5727_v35, 16  ;;  %v2067_v8 = vrot.slane %v5727_v35, 1  ;;  %v4973_v35 = vld [vmem:[%s6037_s1 + $0x6e8] sm:$0xff] }
  0xa0   : > { %2013 = vmatpush.bf16.msra.mxu3 %v4907_v30  ;;  %v4939_v30 = vld [vmem:[%s6037_s1 + $0x5d8] sm:$0xff]  ;;  %v2241_v48 = vshll.u32 %v5718_v27, 16 }
  0xa1   : > { %1799 = vmatpush.bf16.msra.mxu0 %v4882_v24  ;;  %v2236_v24 = vpack.c.b16 %v2234_v19, %v2234_v19 }
  0xa2   : > { %1813 = vmatpush.bf16.msra.mxu1 %v4890_v29  ;;  %v2243_v60 = vrot.slane %v2241_v48, 2 }
  0xa3   : > { %2000 = vmatpush.bf16.msra.mxu2 %v4898_v20 }
  0xa4   : > { %2014 = vmatpush.bf16.msra.mxu3 %v4906_v21 }
  0xa5   : > { %1800 = vmatpush.bf16.msra.mxu0 %v4881_v43  ;;  %v2238_v43 = vshrl.u32 %v5718_v27, 16 }
  0xa6   : > { %1814 = vmatpush.bf16.msra.mxu1 %v4889_v44 }
  0xa7   : > { %2001 = vmatpush.bf16.msra.mxu2 %v4897_v45  ;;  %v4930_v45 = vld [vmem:[%s6037_s1 + $0x590] sm:$0xff]  ;;  %v2240_v59 = vrot.slane %v2238_v43, 1  ;;  %v4964_v43 = vld [vmem:[%s6037_s1 + $0x6a0] sm:$0xff] }
  0xa8   : > { %2015 = vmatpush.bf16.msra.mxu3 %v4905_v46  ;;  %v4938_v46 = vld [vmem:[%s6037_s1 + $0x5d0] sm:$0xff] }
  0xa9   : > { %1801 = vmatpush.bf16.msra.mxu0 %v4880_v53  ;;  %v394_v9 = vpop.f32.mrf.mxu0  ;;  %v2263_v53 = vshrl.u32 %v2236_v24, 16 }
  0xaa   : > { %1815 = vmatpush.bf16.msra.mxu1 %v4888_v54  ;;  %v408_v10 = vpop.f32.mrf.mxu1  ;;  %v2266_v54 = vshll.u32 %v2236_v24, 16  ;;  %v5818_v24 = vld [vmem:[%s5144_s24 + $0x20] sm:$0xff] }
  0xab   : > { %2002 = vmatpush.bf16.msra.mxu2 %v4896_v55  ;;  %v409_v13 = vadd.f32 %v408_v10, %v394_v9  ;;  %v4913_v55 = vld [vmem:[%s6037_s1 + $0x508] sm:$0xff]  ;;  %v2068_v9 = vrot.slane %v5631_v41, 1  ;;  %v4975_v41 = vld [vmem:[%s6037_s1 + $0x6f8] sm:$0xff]  ;;  %v2435_v48 = vunpack.c.h.b16 %v5818_v24 }
  0xac   : > { %2016 = vmatpush.bf16.msra.mxu3 %v4904_v56  ;;  %1802 = vmatmul.bf16.vlgmr.msra.gmra.mxu0 %v1694_v31  ;;  %v2235_v31 = vpack.c.b16 %v2233_v17, %v2233_v17  ;;  %v4921_v56 = vld [vmem:[%s6037_s1 + $0x548] sm:$0xff] }
  0xad   : > { %2168 = vmatpush.bf16.msrb.mxu0 %v4919_v57  ;;  %1816 = vmatmul.bf16.vlgmr.msra.gmra.mxu1 %v1695_v32  ;;  %v4929_v57 = vld [vmem:[%s6037_s1 + $0x588] sm:$0xff]  ;;  %v2069_v18 = vsel %vm578_vm1, %v2067_v8, %v2068_v9 }
  0xae   : > { %2182 = vmatpush.bf16.msrb.mxu1 %v4927_v58  ;;  %2003 = vmatmul.bf16.vlgmr.msra.gmra.mxu2 %v1884_v1  ;;  %v2246_v49 = vshrl.u32 %v2235_v31, 16  ;;  %v2249_v50 = vshll.u32 %v2235_v31, 16  ;;  %v4937_v58 = vld [vmem:[%s6037_s1 + $0x5c8] sm:$0xff]  ;;  %v2265_v1 = vrot.slane %v2263_v53, 1 }
  0xaf   : > { %2369 = vmatpush.bf16.msrb.mxu2 %v4935_v63  ;;  %2017 = vmatmul.bf16.vlgmr.msra.gmra.mxu3 %v1896_v2  ;;  %v2257_v63 = vrot.slane %v2255_v51, 1  ;;  %v2268_v2 = vrot.slane %v2266_v54, 2  ;;  %v4949_v31 = vld [vmem:[%s6037_s1 + $0x628] sm:$0xff]  ;;  %v4955_v51 = vld [vmem:[%s6037_s1 + $0x658] sm:$0xff] }
  0xb0   : > { %2383 = vmatpush.bf16.msrb.mxu3 %v4943_v0  ;;  %v2248_v61 = vrot.slane %v2246_v49, 1  ;;  %v2251_v62 = vrot.slane %v2249_v50, 2  ;;  %v2260_v0 = vrot.slane %v2258_v52, 2  ;;  %v2568_v49 = vld [vmem:[%s5144_s24 + $0x28] sm:$0x11]  ;;  %v4947_v50 = vld [vmem:[%s6037_s1 + $0x618] sm:$0xff] }
  0xb1   : > { %2169 = vmatpush.bf16.msrb.mxu0 %v4918_v34  ;;  %v520_v32 = vpop.f32.mrf.mxu2  ;;  %v396_v20 = vpop.f32.mrf.mxu0  ;;  %v4963_v52 = vld [vmem:[%s6037_s1 + $0x698] sm:$0xff] }
  0xb2   : > { %2183 = vmatpush.bf16.msrb.mxu1 %v4926_v36  ;;  %v534_v33 = vpop.f32.mrf.mxu3  ;;  %v521_v29 = vadd.f32 %v520_v32, %v409_v13  ;;  %v410_v21 = vpop.f32.mrf.mxu1  ;;  %v2244_v13 = vor.u32 %v2243_v60, %v2240_v59  ;;  %v2252_v14 = vor.u32 %v2251_v62, %v2248_v61  ;;  %v4957_v32 = vld [vmem:[%s6037_s1 + $0x668] sm:$0xff] }
  0xb3   : > { %2370 = vmatpush.bf16.msrb.mxu2 %v4934_v3  ;;  %v411_v44 = vadd.f32 %v410_v21, %v396_v20  ;;  %v4912_v3 = vld [vmem:[%s6037_s1 + $0x500] sm:$0xff] }
  0xb4   : > { %2384 = vmatpush.bf16.msrb.mxu3 %v4942_v38  ;;  %v5742_v47 = vadd.f32 %v534_v33, %v521_v29  ;;  %v4920_v38 = vld [vmem:[%s6037_s1 + $0x540] sm:$0xff]  ;;  %v2253_v19 = vsel %vm752_vm2, %v2244_v13, %v2252_v14  ;;  %v4965_v33 = vld [vmem:[%s6037_s1 + $0x6a8] sm:$0xff] }
  0xb5   : > { %2170 = vmatpush.bf16.msrb.mxu0 %v4917_v39  ;;  %v2064_v39 = vrot.slane %v5718_v27, 1  ;;  %v4958_v27 = vld [vmem:[%s6037_s1 + $0x670] sm:$0xff] }
  0xb6   : > { %2184 = vmatpush.bf16.msrb.mxu1 %v4925_v4 }
  0xb7   : > { %2371 = vmatpush.bf16.msrb.mxu2 %v4933_v5  ;;  %v4928_v5 = vld [vmem:[%s6037_s1 + $0x580] sm:$0xff]  ;;  %v2066_v17 = vsel %vm578_vm1, %v2064_v39, %v2065_v7  ;;  %v4945_v39 = vld [vmem:[%s6037_s1 + $0x608] sm:$0xff] }
  0xb8   : > { %2385 = vmatpush.bf16.msrb.mxu3 %v4941_v6  ;;  %v4936_v6 = vld [vmem:[%s6037_s1 + $0x5c0] sm:$0xff] }
  0xb9   : > { %2171 = vmatpush.bf16.msrb.mxu0 %v4916_v11  ;;  %v522_v34 = vpop.f32.mrf.mxu2  ;;  %v4951_v11 = vld [vmem:[%s6037_s1 + $0x638] sm:$0xff] }
  0xba   : > { %2185 = vmatpush.bf16.msrb.mxu1 %v4924_v12  ;;  %v523_v36 = vadd.f32 %v522_v34, %v411_v44  ;;  %v536_v4 = vpop.f32.mrf.mxu3  ;;  %v4959_v12 = vld [vmem:[%s6037_s1 + $0x678] sm:$0xff]  ;;  %v4972_v44 = vld [vmem:[%s6037_s1 + $0x6e0] sm:$0xff] }
  0xbb   : > { %2372 = vmatpush.bf16.msrb.mxu2 %v4932_v15  ;;  %v2261_v15 = vor.u32 %v2260_v0, %v2257_v63  ;;  %v4954_v63 = vld [vmem:[%s6037_s1 + $0x650] sm:$0xff] }
  0xbc   : > { %2386 = vmatpush.bf16.msrb.mxu3 %v4940_v16  ;;  %v5775_v10 = vadd.f32 %v536_v4, %v523_v36  ;;  %v2269_v16 = vor.u32 %v2268_v2, %v2265_v1  ;;  %v4962_v0 = vld [vmem:[%s6037_s1 + $0x690] sm:$0xff]  ;;  %v4953_v4 = vld [vmem:[%s6037_s1 + $0x648] sm:$0xff] }
  0xbd   : > { %2172 = vmatpush.bf16.msrb.mxu0 %v4915_v25  ;;  %v4970_v1 = vld [vmem:[%s6037_s1 + $0x6d0] sm:$0xff] }
  0xbe   : > { %2186 = vmatpush.bf16.msrb.mxu1 %v4923_v26  ;;  %v2270_v25 = vsel %vm752_vm2, %v2261_v15, %v2269_v16  ;;  %v4950_v26 = vld [vmem:[%s6037_s1 + $0x630] sm:$0xff]  ;;  %v4944_v16 = vld [vmem:[%s6037_s1 + $0x600] sm:$0xff] }
  0xbf   : > { %2373 = vmatpush.bf16.msrb.mxu2 %v4931_v28  ;;  %v4966_v28 = vld [vmem:[%s6037_s1 + $0x6b0] sm:$0xff] }
  0xc0   : > { %2387 = vmatpush.bf16.msrb.mxu3 %v4939_v30  ;;  %v4974_v30 = vld [vmem:[%s6037_s1 + $0x6f0] sm:$0xff] }
  0xc1   : > { %2173 = vmatpush.bf16.msrb.mxu0 %v4914_v37  ;;  %v4948_v37 = vld [vmem:[%s6037_s1 + $0x620] sm:$0xff] }
  0xc2   : > { %2187 = vmatpush.bf16.msrb.mxu1 %v4922_v42  ;;  %v4956_v42 = vld [vmem:[%s6037_s1 + $0x660] sm:$0xff] }
  0xc3   : > { %2374 = vmatpush.bf16.msrb.mxu2 %v4930_v45  ;;  %v2434_v45 = vunpack.c.l.b16 %v5818_v24  ;;  %v4994_v24 = vld [vmem:[%s6037_s1 + $0x790] sm:$0xff] }
  0xc4   : > { %2388 = vmatpush.bf16.msrb.mxu3 %v4938_v46 }
  0xc5   : > { %2174 = vmatpush.bf16.msrb.mxu0 %v4913_v55  ;;  %v5851_v53 = vpack.c.b16 %v2434_v45, %v5596_v22  ;;  %v4946_v22 = vld [vmem:[%s6037_s1 + $0x610] sm:$0xff] }
  0xc6   : > { %2188 = vmatpush.bf16.msrb.mxu1 %v4921_v56  ;;  %v5856_v56 = vpack.c.b16 %v2435_v48, %v5598_v23 }
  0xc7   : > { %2375 = vmatpush.bf16.msrb.mxu2 %v4929_v57  ;;  %v2609_v57 = vunpack.c.l.b16 %v2568_v49  ;;  %v2618_v2 = vshll.u32 %v5851_v53, 16  ;;  %v2616_v7 = vshrl.u32 %v5851_v53, 16 }
  0xc8   : > { %2389 = vmatpush.bf16.msrb.mxu3 %v4937_v58  ;;  %v2610_v58 = vunpack.c.h.b16 %v2568_v49  ;;  %v2767_v49 = vld [vmem:[%s5144_s24 + $0x18] sm:$0xee] }
  0xc9   : > { %2175 = vmatpush.bf16.msrb.mxu0 %v4912_v3  ;;  %v692_v29 = vpop.f32.mrf.mxu0  ;;  %v5874_v36 = vpack.c.b16 %v2609_v57, %v2609_v57  ;;  %v2620_v8 = vrot.slane %v2618_v2, 1 }
  0xca   : > { %2189 = vmatpush.bf16.msrb.mxu1 %v4920_v38  ;;  %v706_v20 = vpop.f32.mrf.mxu1  ;;  %v5876_v3 = vpack.c.b16 %v2610_v58, %v2610_v58  ;;  %v2630_v38 = vshll.u32 %v5856_v56, 16  ;;  %v4979_v58 = vld [vmem:[%s6037_s1 + $0x718] sm:$0xff] }
  0xcb   : > { %2376 = vmatpush.bf16.msrb.mxu2 %v4928_v5  ;;  %v707_v21 = vadd.f32 %v706_v20, %v692_v29  ;;  %v4961_v5 = vld [vmem:[%s6037_s1 + $0x688] sm:$0xff]  ;;  %v4982_v29 = vld [vmem:[%s6037_s1 + $0x730] sm:$0xff] }
  0xcc   : > { %2390 = vmatpush.bf16.msrb.mxu3 %v4936_v6  ;;  %2176 = vmatmul.bf16.vlgmr.msrb.gmra.mxu0 %v2066_v17  ;;  %v4969_v6 = vld [vmem:[%s6037_s1 + $0x6c8] sm:$0xff]  ;;  %v2632_v13 = vrot.slane %v2630_v38, 1  ;;  %v2635_v14 = vshll.u32 %v5876_v3, 16  ;;  %v4960_v17 = vld [vmem:[%s6037_s1 + $0x680] sm:$0xff]  ;;  %v4990_v20 = vld [vmem:[%s6037_s1 + $0x770] sm:$0xff] }
  0xcd   : > { %2536 = vmatpush.bf16.msra.mxu0 %v4951_v11  ;;  %2190 = vmatmul.bf16.vlgmr.msrb.gmra.mxu1 %v2069_v18  ;;  %v711_v46 = vadd.f32 %v707_v21, %v5742_v47  ;;  %v4971_v47 = vld [vmem:[%s6037_s1 + $0x6d8] sm:$0xff]  ;;  %v2623_v11 = vshll.u32 %v5874_v36, 16  ;;  %v4968_v18 = vld [vmem:[%s6037_s1 + $0x6c0] sm:$0xff]  ;;  %v4998_v21 = vld [vmem:[%s6037_s1 + $0x7b0] sm:$0xff] }
  0xce   : > { %2550 = vmatpush.bf16.msra.mxu1 %v4959_v12  ;;  %2377 = vmatmul.bf16.vlgmr.msrb.gmra.mxu2 %v2253_v19  ;;  %v2628_v12 = vshrl.u32 %v5856_v56, 16  ;;  %v4983_v19 = vld [vmem:[%s6037_s1 + $0x738] sm:$0xff] }
  0xcf   : > { %2737 = vmatpush.bf16.msra.mxu2 %v4967_v40  ;;  %2391 = vmatmul.bf16.vlgmr.msrb.gmra.mxu3 %v2270_v25  ;;  %v4952_v40 = vld [vmem:[%s6037_s1 + $0x640] sm:$0xff]  ;;  %v4991_v25 = vld [vmem:[%s6037_s1 + $0x778] sm:$0xff] }
  0xd0   : > { %2751 = vmatpush.bf16.msra.mxu3 %v4975_v41 }
  0xd1   : > { %2537 = vmatpush.bf16.msra.mxu0 %v4950_v26  ;;  %v894_v54 = vpop.f32.mrf.mxu2  ;;  %v694_v60 = vpop.f32.mrf.mxu0  ;;  %v2621_v26 = vor.u32 %v2620_v8, %v2616_v7  ;;  %v4977_v8 = vld [vmem:[%s6037_s1 + $0x708] sm:$0xff] }
  0xd2   : > { %2551 = vmatpush.bf16.msra.mxu1 %v4958_v27  ;;  %v908_v55 = vpop.f32.mrf.mxu3  ;;  %v708_v61 = vpop.f32.mrf.mxu1  ;;  %v2625_v27 = vrot.slane %v2623_v11, 1 }
  0xd3   : > { %2738 = vmatpush.bf16.msra.mxu2 %v4966_v28  ;;  %v909_v59 = vadd.f32 %v908_v55, %v894_v54  ;;  %v709_v62 = vadd.f32 %v708_v61, %v694_v60  ;;  %v2633_v28 = vor.u32 %v2632_v13, %v2628_v12  ;;  %v4996_v54 = vld [vmem:[%s6037_s1 + $0x7a0] sm:$0xff] }
  0xd4   : > { %2752 = vmatpush.bf16.msra.mxu3 %v4974_v30  ;;  %v2637_v30 = vrot.slane %v2635_v14, 1  ;;  %v5004_v55 = vld [vmem:[%s6037_s1 + $0x7e0] sm:$0xff]  ;;  %v4993_v14 = vld [vmem:[%s6037_s1 + $0x788] sm:$0xff] }
  0xd5   : > { %2538 = vmatpush.bf16.msra.mxu0 %v4949_v31  ;;  %v5864_v23 = vadd.f32 %v909_v59, %v711_v46  ;;  %v712_v34 = vadd.f32 %v709_v62, %v5775_v10  ;;  %v4999_v31 = vld [vmem:[%s6037_s1 + $0x7b8] sm:$0xff]  ;;  %v5005_v46 = vld [vmem:[%s6037_s1 + $0x7e8] sm:$0xff] }
  0xd6   : > { %2552 = vmatpush.bf16.msra.mxu1 %v4957_v32  ;;  %v5007_v32 = vld [vmem:[%s6037_s1 + $0x7f8] sm:$0xff] }
  0xd7   : > { %2739 = vmatpush.bf16.msra.mxu2 %v4965_v33  ;;  %v2626_v33 = vsel %vm262_vm0, %v2621_v26, %v2625_v27  ;;  %v4987_v59 = vld [vmem:[%s6037_s1 + $0x758] sm:$0xff]  ;;  %v4984_v26 = vld [vmem:[%s6037_s1 + $0x740] sm:$0xff]  ;;  %v2807_v27 = vrot.slane %v5874_v36, 1 }
  0xd8   : > { %2753 = vmatpush.bf16.msra.mxu3 %v4973_v35  ;;  %v2638_v35 = vsel %vm262_vm0, %v2633_v28, %v2637_v30  ;;  %v4995_v62 = vld [vmem:[%s6037_s1 + $0x798] sm:$0xff]  ;;  %v2810_v30 = vrot.slane %v5876_v3, 1 }
  0xd9   : > { %2539 = vmatpush.bf16.msra.mxu0 %v4948_v37  ;;  %v896_v9 = vpop.f32.mrf.mxu2  ;;  %v5006_v37 = vld [vmem:[%s6037_s1 + $0x7f0] sm:$0xff] }
  0xda   : > { %2553 = vmatpush.bf16.msra.mxu1 %v4956_v42  ;;  %v910_v10 = vpop.f32.mrf.mxu3  ;;  %v4981_v42 = vld [vmem:[%s6037_s1 + $0x728] sm:$0xff] }
  0xdb   : > { %2740 = vmatpush.bf16.msra.mxu2 %v4964_v43  ;;  %v911_v15 = vadd.f32 %v910_v10, %v896_v9  ;;  %v4989_v43 = vld [vmem:[%s6037_s1 + $0x768] sm:$0xff] }
  0xdc   : > { %2754 = vmatpush.bf16.msra.mxu3 %v4972_v44  ;;  %v4997_v44 = vld [vmem:[%s6037_s1 + $0x7a8] sm:$0xff] }
  0xdd   : > { %2540 = vmatpush.bf16.msra.mxu0 %v4947_v50  ;;  %v5901_v41 = vadd.f32 %v911_v15, %v712_v34  ;;  %v2940_v50 = vld [vmem:[%s5144_s24 + $0x28] sm:$0x33] }
  0xde   : > { %2554 = vmatpush.bf16.msra.mxu1 %v4955_v51  ;;  %v4980_v51 = vld [vmem:[%s6037_s1 + $0x720] sm:$0xff]  ;;  %v2976_v57 = vunpack.c.h.b16 %v2940_v50  ;;  %v4985_v9 = vld [vmem:[%s6037_s1 + $0x748] sm:$0xff] }
  0xdf   : > { %2741 = vmatpush.bf16.msra.mxu2 %v4963_v52  ;;  %v4988_v52 = vld [vmem:[%s6037_s1 + $0x760] sm:$0xff]  ;;  %v5001_v15 = vld [vmem:[%s6037_s1 + $0x7c8] sm:$0xff] }
  0xe0   : > { %2755 = vmatpush.bf16.msra.mxu3 %v4971_v47  ;;  %v2802_v47 = vunpack.c.l.b16 %v2767_v49 }
  0xe1   : > { %2541 = vmatpush.bf16.msra.mxu0 %v4946_v22  ;;  %v5003_v22 = vld [vmem:[%s6037_s1 + $0x7d8] sm:$0xff] }
  0xe2   : > { %2555 = vmatpush.bf16.msra.mxu1 %v4954_v63  ;;  %v2804_v60 = vpack.c.b16 %v2434_v45, %v2802_v47  ;;  %v4978_v45 = vld [vmem:[%s6037_s1 + $0x710] sm:$0xff] }
  0xe3   : > { %2742 = vmatpush.bf16.msra.mxu2 %v4962_v0  ;;  %v2978_v0 = vpack.c.b16 %v2976_v57, %v2976_v57 }
  0xe4   : > { %2756 = vmatpush.bf16.msra.mxu3 %v4970_v1  ;;  %v4986_v1 = vld [vmem:[%s6037_s1 + $0x750] sm:$0xff]  ;;  %v2980_v2 = vshrl.u32 %v2804_v60, 16  ;;  %v2983_v34 = vshll.u32 %v2804_v60, 16 }
  0xe5   : > { %2542 = vmatpush.bf16.msra.mxu0 %v4945_v39  ;;  %v3008_v7 = vshll.u32 %v2978_v0, 16 }
  0xe6   : > { %2556 = vmatpush.bf16.msra.mxu1 %v4953_v4  ;;  %v2982_v10 = vrot.slane %v2980_v2, 1  ;;  %v2985_v11 = vrot.slane %v2983_v34, 2 }
  0xe7   : > { %2743 = vmatpush.bf16.msra.mxu2 %v4961_v5 }
  0xe8   : > { %2757 = vmatpush.bf16.msra.mxu3 %v4969_v6  ;;  %v3005_v6 = vshrl.u32 %v2978_v0, 16 }
  0xe9   : > { %2543 = vmatpush.bf16.msra.mxu0 %v4944_v16 }
  0xea   : > { %2557 = vmatpush.bf16.msra.mxu1 %v4952_v40 }
  0xeb   : > { %2744 = vmatpush.bf16.msra.mxu2 %v4960_v17  ;;  %v3007_v17 = vrot.slane %v3005_v6, 1 }
  0xec   : > { %2758 = vmatpush.bf16.msra.mxu3 %v4968_v18  ;;  %2544 = vmatmul.bf16.vlgmr.msra.gmra.mxu0 %v5851_v53  ;;  %v2975_v53 = vunpack.c.l.b16 %v2940_v50  ;;  %v3010_v18 = vrot.slane %v3008_v7, 2 }
  0xed   : > { %2910 = vmatpush.bf16.msrb.mxu0 %v4983_v19  ;;  %2558 = vmatmul.bf16.vlgmr.msra.gmra.mxu1 %v5856_v56  ;;  %v2803_v56 = vunpack.c.h.b16 %v2767_v49  ;;  %v2806_v19 = vrot.slane %v2804_v60, 1 }
  0xee   : > { %2924 = vmatpush.bf16.msrb.mxu1 %v4991_v25  ;;  %2745 = vmatmul.bf16.vlgmr.msra.gmra.mxu2 %v2626_v33  ;;  %v2977_v61 = vpack.c.b16 %v2975_v53, %v2975_v53  ;;  %v4976_v25 = vld [vmem:[%s6037_s1 + $0x700] sm:$0xff] }
  0xef   : > { %3111 = vmatpush.bf16.msrb.mxu2 %v4999_v31  ;;  %2759 = vmatmul.bf16.vlgmr.msra.gmra.mxu3 %v2638_v35  ;;  %v2805_v63 = vpack.c.b16 %v2435_v48, %v2803_v56  ;;  %v5002_v48 = vld [vmem:[%s6037_s1 + $0x7d0] sm:$0xff]  ;;  %v2986_v31 = vor.u32 %v2985_v11, %v2982_v10  ;;  %v5000_v33 = vld [vmem:[%s6037_s1 + $0x7c0] sm:$0xff]  ;;  %v2808_v36 = vsel %vm578_vm1, %v2806_v19, %v2807_v27 }
  0xf0   : > { %3125 = vmatpush.bf16.msrb.mxu3 %v5007_v32  ;;  %v2988_v38 = vshrl.u32 %v2977_v61, 16  ;;  %v2991_v39 = vshll.u32 %v2977_v61, 16  ;;  %v4992_v32 = vld [vmem:[%s6037_s1 + $0x780] sm:$0xff] }
  0xf1   : > { %2911 = vmatpush.bf16.msrb.mxu0 %v4982_v29  ;;  %v2997_v4 = vshrl.u32 %v2805_v63, 16  ;;  %v3000_v5 = vshll.u32 %v2805_v63, 16  ;;  %v2809_v28 = vrot.slane %v2805_v63, 1 }
  0xf2   : > { %2925 = vmatpush.bf16.msrb.mxu1 %v4990_v20  ;;  %v2990_v12 = vrot.slane %v2988_v38, 1  ;;  %v2993_v13 = vrot.slane %v2991_v39, 2  ;;  %v3011_v20 = vor.u32 %v3010_v18, %v3007_v17 }
  0xf3   : > { %3112 = vmatpush.bf16.msrb.mxu2 %v4998_v21  ;;  %v2999_v16 = vrot.slane %v2997_v4, 1  ;;  %v3002_v40 = vrot.slane %v3000_v5, 2  ;;  %v2811_v3 = vsel %vm578_vm1, %v2809_v28, %v2810_v30 }
  0xf4   : > { %3126 = vmatpush.bf16.msrb.mxu3 %v5006_v37  ;;  %v2994_v35 = vor.u32 %v2993_v13, %v2990_v12 }
  0xf5   : > { %2912 = vmatpush.bf16.msrb.mxu0 %v4981_v42  ;;  %v3003_v29 = vor.u32 %v3002_v40, %v2999_v16  ;;  %v1061_v42 = vpop.f32.mrf.mxu0 }
  0xf6   : > { %2926 = vmatpush.bf16.msrb.mxu1 %v4989_v43  ;;  %v2995_v21 = vsel %vm752_vm2, %v2986_v31, %v2994_v35  ;;  %v1075_v43 = vpop.f32.mrf.mxu1 }
  0xf7   : > { %3113 = vmatpush.bf16.msrb.mxu2 %v4997_v44  ;;  %v3012_v37 = vsel %vm752_vm2, %v3003_v29, %v3011_v20  ;;  %v1262_v44 = vpop.f32.mrf.mxu2 }
  0xf8   : > { %3127 = vmatpush.bf16.msrb.mxu3 %v5005_v46  ;;  %v1276_v46 = vpop.f32.mrf.mxu3 }
  0xf9   : > { %2913 = vmatpush.bf16.msrb.mxu0 %v4980_v51 }
  0xfa   : > { %2927 = vmatpush.bf16.msrb.mxu1 %v4988_v52 }
  0xfb   : > { %3114 = vmatpush.bf16.msrb.mxu2 %v4996_v54 }
  0xfc   : > { %3128 = vmatpush.bf16.msrb.mxu3 %v5004_v55 }
  0xfd   : > { %2914 = vmatpush.bf16.msrb.mxu0 %v4979_v58  ;;  %v1063_v49 = vpop.f32.mrf.mxu0 }
  0xfe   : > { %2928 = vmatpush.bf16.msrb.mxu1 %v4987_v59  ;;  %v1077_v50 = vpop.f32.mrf.mxu1 }
  0xff   : > { %3115 = vmatpush.bf16.msrb.mxu2 %v4995_v62  ;;  %v1264_v51 = vpop.f32.mrf.mxu2  ;;  %v1078_v16 = vadd.f32 %v1077_v50, %v1063_v49 }
 0x100   : > { %3129 = vmatpush.bf16.msrb.mxu3 %v5003_v22  ;;  %v1278_v52 = vpop.f32.mrf.mxu3 }
 0x101   : > { %2915 = vmatpush.bf16.msrb.mxu0 %v4978_v45  ;;  %v1081_v28 = vadd.f32 %v1078_v16, %v5901_v41 }
 0x102   : > { %2929 = vmatpush.bf16.msrb.mxu1 %v4986_v1 }
 0x103   : > { %3116 = vmatpush.bf16.msrb.mxu2 %v4994_v24 }
 0x104   : > { %3130 = vmatpush.bf16.msrb.mxu3 %v5002_v48 }
 0x105   : > { %2916 = vmatpush.bf16.msrb.mxu0 %v4977_v8  ;;  %v1076_v8 = vadd.f32 %v1075_v43, %v1061_v42 }
 0x106   : > { %2930 = vmatpush.bf16.msrb.mxu1 %v4985_v9  ;;  %v1277_v9 = vadd.f32 %v1276_v46, %v1262_v44 }
 0x107   : > { %3117 = vmatpush.bf16.msrb.mxu2 %v4993_v14  ;;  %v1080_v10 = vadd.f32 %v1076_v8, %v5864_v23 }
 0x108   : > { %3131 = vmatpush.bf16.msrb.mxu3 %v5001_v15 }
 0x109   : > { %2917 = vmatpush.bf16.msrb.mxu0 %v4976_v25  ;;  %v1435_v47 = vpop.f32.mrf.mxu0  ;;  %v1281_v14 = vadd.f32 %v1277_v9, %v1080_v10  ;;  %v1279_v25 = vadd.f32 %v1278_v52, %v1264_v51 }
 0x10a   : > { %2931 = vmatpush.bf16.msrb.mxu1 %v4984_v26  ;;  %v1449_v53 = vpop.f32.mrf.mxu1 }
 0x10b   : > { %3118 = vmatpush.bf16.msrb.mxu2 %v4992_v32  ;;  %v1450_v11 = vadd.f32 %v1449_v53, %v1435_v47 }
 0x10c   : > { %3132 = vmatpush.bf16.msrb.mxu3 %v5000_v33  ;;  %2918 = vmatmul.bf16.vlgmr.msrb.gmra.mxu0 %v2808_v36  ;;  %v1282_v33 = vadd.f32 %v1279_v25, %v1081_v28 }
 0x10d   : > { %2932 = vmatmul.bf16.vlgmr.msrb.gmra.mxu1 %v2811_v3  ;;  %v1454_v40 = vadd.f32 %v1450_v11, %v1281_v14 }
 0x10e   : > { %3119 = vmatmul.bf16.vlgmr.msrb.gmra.mxu2 %v2995_v21 }
 0x10f   : > { %3133 = vmatmul.bf16.vlgmr.msrb.gmra.mxu3 %v3012_v37 }
 0x111   : > { %v1636_v54 = vpop.f32.mrf.mxu2  ;;  %v1437_v56 = vpop.f32.mrf.mxu0 }
 0x112   : > { %v1650_v55 = vpop.f32.mrf.mxu3  ;;  %v1451_v57 = vpop.f32.mrf.mxu1 }
 0x113   : > { %v1651_v15 = vadd.f32 %v1650_v55, %v1636_v54  ;;  %v1452_v30 = vadd.f32 %v1451_v57, %v1437_v56 }
 0x115   : > { %v1655_v26 = vadd.f32 %v1651_v15, %v1454_v40  ;;  %v1455_v3 = vadd.f32 %v1452_v30, %v1282_v33 }
 0x119   : > { %v1638_v58 = vpop.f32.mrf.mxu2 }
 0x11a   : > { %v1652_v59 = vpop.f32.mrf.mxu3 }
 0x11b   : > { %v1653_v23 = vadd.f32 %v1652_v59, %v1638_v58 }
 0x11d   : > { %v1656_v46 = vadd.f32 %v1653_v23, %v1455_v3 }
 0x129   : > { %v1803_v60 = vpop.f32.mrf.mxu0 }
 0x12a   : > { %v1817_v61 = vpop.f32.mrf.mxu1 }
 0x12b   : > { %v1818_v17 = vadd.f32 %v1817_v61, %v1803_v60 }
 0x12d   : > { %v1822_v31 = vadd.f32 %v1818_v17, %v1655_v26 }
 0x131   : > { %v2004_v62 = vpop.f32.mrf.mxu2  ;;  %v1805_v63 = vpop.f32.mrf.mxu0 }
 0x132   : > { %v2018_v22 = vpop.f32.mrf.mxu3  ;;  %v1819_v0 = vpop.f32.mrf.mxu1 }
 0x133   : > { %v2019_v27 = vadd.f32 %v2018_v22, %v2004_v62  ;;  %v1820_v21 = vadd.f32 %v1819_v0, %v1805_v63 }
 0x135   : > { %v2023_v35 = vadd.f32 %v2019_v27, %v1822_v31  ;;  %v1823_v51 = vadd.f32 %v1820_v21, %v1656_v46 }
 0x139   : > { %v2006_v45 = vpop.f32.mrf.mxu2 }
 0x13a   : > { %v2020_v1 = vpop.f32.mrf.mxu3 }
 0x13b   : > { %v2021_v49 = vadd.f32 %v2020_v1, %v2006_v45 }
 0x13d   : > { %v2024_v54 = vadd.f32 %v2021_v49, %v1823_v51 }
 0x149   : > { %v2177_v2 = vpop.f32.mrf.mxu0 }
 0x14a   : > { %v2191_v34 = vpop.f32.mrf.mxu1 }
 0x14b   : > { %v2192_v32 = vadd.f32 %v2191_v34, %v2177_v2 }
 0x14d   : > { %v2196_v37 = vadd.f32 %v2192_v32, %v2023_v35 }
 0x151   : > { %v2378_v38 = vpop.f32.mrf.mxu2  ;;  %v2179_v24 = vpop.f32.mrf.mxu0 }
 0x152   : > { %v2392_v39 = vpop.f32.mrf.mxu3  ;;  %v2193_v48 = vpop.f32.mrf.mxu1 }
 0x153   : > { %v2393_v29 = vadd.f32 %v2392_v39, %v2378_v38  ;;  %v2194_v52 = vadd.f32 %v2193_v48, %v2179_v24 }
 0x155   : > { %v2397_v50 = vadd.f32 %v2393_v29, %v2196_v37  ;;  %v2197_v59 = vadd.f32 %v2194_v52, %v2024_v54 }
 0x159   : > { %v2380_v4 = vpop.f32.mrf.mxu2 }
 0x15a   : > { %v2394_v5 = vpop.f32.mrf.mxu3 }
 0x15b   : > { %v2395_v55 = vadd.f32 %v2394_v5, %v2380_v4 }
 0x15d   : > { %v2398_v0 = vadd.f32 %v2395_v55, %v2197_v59 }
 0x169   : > { %v2545_v6 = vpop.f32.mrf.mxu0 }
 0x16a   : > { %v2559_v7 = vpop.f32.mrf.mxu1 }
 0x16b   : > { %v2560_v42 = vadd.f32 %v2559_v7, %v2545_v6 }
 0x16d   : > { %v2564_v47 = vadd.f32 %v2560_v42, %v2397_v50 }
 0x171   : > { %v2746_v12 = vpop.f32.mrf.mxu2  ;;  %v2547_v18 = vpop.f32.mrf.mxu0 }
 0x172   : > { %v2760_v13 = vpop.f32.mrf.mxu3  ;;  %v2561_v19 = vpop.f32.mrf.mxu1 }
 0x173   : > { %v2761_v41 = vadd.f32 %v2760_v13, %v2746_v12  ;;  %v2562_v60 = vadd.f32 %v2561_v19, %v2547_v18 }
 0x175   : > { %v2765_v56 = vadd.f32 %v2761_v41, %v2564_v47  ;;  %v2565_v2 = vadd.f32 %v2562_v60, %v2398_v0 }
 0x179   : > { %v2748_v20 = vpop.f32.mrf.mxu2 }
 0x17a   : > { %v2762_v36 = vpop.f32.mrf.mxu3 }
 0x17b   : > { %v2763_v45 = vadd.f32 %v2762_v36, %v2748_v20 }
 0x17d   : > { %v2766_v38 = vadd.f32 %v2763_v45, %v2565_v2 }
 0x189   : > { %v2919_v43 = vpop.f32.mrf.mxu0 }
 0x18a   : > { %v2933_v44 = vpop.f32.mrf.mxu1 }
 0x18b   : > { %v2934_v53 = vadd.f32 %v2933_v44, %v2919_v43 }
 0x18d   : > { %v2938_v61 = vadd.f32 %v2934_v53, %v2765_v56 }
 0x191   : > { %v3120_v57 = vpop.f32.mrf.mxu2  ;;  %v2921_v22 = vpop.f32.mrf.mxu0 }
 0x192   : > { %v3134_v58 = vpop.f32.mrf.mxu3  ;;  %v2935_v63 = vpop.f32.mrf.mxu1 }
 0x193   : > { %v3135_v62 = vadd.f32 %v3134_v58, %v3120_v57  ;;  %v2936_v34 = vadd.f32 %v2935_v63, %v2921_v22 }
 0x195   : > { %v3139_v1 = vadd.f32 %v3135_v62, %v2938_v61  ;;  %v2939_v48 = vadd.f32 %v2936_v34, %v2766_v38 }
 0x197   : > { %3141 = vst [vmem:[%s180_s22] sm:$0xff] %v3139_v1 }
 0x199   : > { %v3122_v39 = vpop.f32.mrf.mxu2 }
 0x19a   : > { %v3136_v24 = vpop.f32.mrf.mxu3 }
 0x19b   : > { %v3137_v4 = vadd.f32 %v3136_v24, %v3122_v39 }
 0x19d   : > { %v3140_v5 = vadd.f32 %v3137_v4, %v2939_v48 }
 0x19f   : > { %3142 = vst [vmem:[%s180_s22 + $0x8] sm:$0xff] %v3140_v5 }
 0x1a0 PF: > { %s12_s11 = sadd.s32 1, %s5055_s11   ;;  %s6039_s9 = smov %s5051_s10 }
 0x1a1   : > { %p9_p5 = scmp.ge.s32.totalorder %s12_s11, 4   ;;  %s6040_s10 = smov %s6042_s12 }
 0x1a3   :  { %11 = sbr.rel (!%p9_p5) target bundleno = 2 (0x2), region = 76 }

</bundles_post_ra>
